<compile_context>
chip_gen: v5e
topology: v5e:2x2
jax: 0.10.0
libtpu: 0.0.40
codegen_flags: <defaults>
</compile_context>

<pallas_src>
import numpy as np
import jax
import jax.numpy as jnp
from jax import lax
from jax.experimental import pallas as pl
from jax.experimental.pallas import tpu as pltpu

B, H, W = 2, 16, 16            # batch of one forward pass (module was shown at 26x26)
C_IN, C_MID = 3, 64
HP, WP = H // 2, W // 2        # spatial size after 2x2 max-pool
K1 = 32                        # conv1 im2col K (9*3=27, padded to 32)
EPS = 1e-5


# ----------------------------- in-kernel helpers -----------------------------
def _batchnorm_train(z, gamma, beta):
    """Training-mode BatchNorm over (N, C): batch stats, biased variance, eps=1e-5.
    Two-pass (mean, then centered second moment) for numerical robustness."""
    inv_n = 1.0 / z.shape[0]
    mean = jnp.sum(z, axis=0, keepdims=True) * inv_n
    zc = z - mean
    var = jnp.sum(zc * zc, axis=0, keepdims=True) * inv_n
    s = gamma * lax.rsqrt(var + EPS)
    return zc * s + beta


def _conv3x3_taps(pad_ref, w_ref, bias, b_, ho, wo, cin, cout):
    """3x3 'same' conv from a zero-padded VMEM ref as 9 lane-aligned tap matmuls.
    pad_ref: (b_, ho+2, wo+2, cin) f32; w_ref: (9, cin, cout) bf16; bias: (1, cout).
    Returns (b_*ho*wo, cout) float32."""
    m = b_ * ho * wo
    acc = jnp.zeros((m, cout), jnp.float32)
    for k in range(9):
        ky, kx = divmod(k, 3)
        tap = pad_ref[:, ky:ky + ho, kx:kx + wo, :].reshape(m, cin)
        acc = acc + jnp.dot(tap.astype(jnp.bfloat16), w_ref[k],
                            preferred_element_type=jnp.float32)
    return acc + bias


# --------------------------------- the kernel --------------------------------
def autoencoder_kernel(p1_ref, w1_ref, b1_ref, g1_ref, be1_ref,
                       wd1_ref, bd1_ref, g2_ref, be2_ref,
                       wd2_ref, bd2_ref, uhw_ref,
                       out_ref,
                       hbuf, pool_pad, up_pad):
    # ---------------- Encoder: conv1 (3->64) + ReLU + BN ----------------
    # im2col patches were built in the wrapper: one (B*H*W, 32) @ (32, 64) matmul.
    z = jnp.dot(p1_ref[0], w1_ref[...],
                preferred_element_type=jnp.float32) + b1_ref[...]       # (512, 64)
    z = jnp.maximum(z, 0.0)
    z = _batchnorm_train(z, g1_ref[...], be1_ref[...])

    # -------- 2x2 max-pool, stride 2 (no full-size scratch round trip) --------
    # H-pooling on the value: rows h and h+1 of the same (b, w) are whole-tile
    # neighbours after regrouping the leading dim -> pure VPU max, no shuffles.
    z4 = z.reshape(B * HP, 2, W, C_MID)
    hbuf[...] = jnp.maximum(z4[:, 0], z4[:, 1])                         # (B*HP, W, 64)
    # W-pooling via sublane-strided reads on the (already halved) staging buffer.
    pooled = jnp.maximum(hbuf[:, pl.ds(0, WP, stride=2), :],
                         hbuf[:, pl.ds(1, WP, stride=2), :])            # (B*HP, WP, 64)

    # one streaming memset for the halo; interior overwritten right after
    pool_pad[...] = jnp.zeros_like(pool_pad)
    pool_pad[:, 1:HP + 1, 1:WP + 1, :] = pooled.reshape(B, HP, WP, C_MID)

    # ---------------- Decoder: deconv1 (64->64) + ReLU + BN ----------------
    z = _conv3x3_taps(pool_pad, wd1_ref, bd1_ref[...], B, HP, WP, C_MID, C_MID)
    z = jnp.maximum(z, 0.0)
    z = _batchnorm_train(z, g2_ref[...], be2_ref[...])                  # (128, 64)

    # ------ bilinear x2 upsample (align_corners=True): one matmul per sample ------
    # uhw_ref = kron(LH, LW) of shape (H*W, HP*WP) in bf16; channels stay on lanes.
    up_pad[...] = jnp.zeros_like(up_pad)
    zb = z.astype(jnp.bfloat16)
    for b in range(B):
        ub = jnp.dot(uhw_ref[...], zb[b * HP * WP:(b + 1) * HP * WP, :],
                     preferred_element_type=jnp.float32)                # (256, 64)
        up_pad[b, 1:H + 1, 1:W + 1, :] = ub.reshape(H, W, C_MID)

    # ---------------- deconv2 (64->3) + sigmoid ----------------
    zo = _conv3x3_taps(up_pad, wd2_ref, bd2_ref[...], B, H, W, C_MID, C_IN)  # (512, 3)
    # numerically-stable sigmoid: no overflow, reciprocal on the EUP, result in [0,1].
    e = jnp.exp(-jnp.abs(zo))                        # in (0, 1]
    r = pl.reciprocal(1.0 + e, approx=True)          # ~1/(1+e), EUP slot
    er = e * r                                       # sigmoid(-|zo|) in [0, 0.5]
    sig = jnp.where(zo >= 0.0, 1.0 - er, er)
    out_ref[0] = sig.reshape(B, H, W, C_IN)


# --------------------------------- wrapper -----------------------------------
def _interp_matrix(out_size, in_size):
    """align_corners=True linear-interpolation matrix of shape (out, in)."""
    L = np.zeros((out_size, in_size), np.float32)
    for i in range(out_size):
        c = i * (in_size - 1) / (out_size - 1) if out_size > 1 else 0.0
        lo = min(int(np.floor(c)), in_size - 1)
        hi = min(lo + 1, in_size - 1)
        f = float(c - lo)
        L[i, lo] += 1.0 - f
        L[i, hi] += f
    return L


def _upsample_matrix():
    """Per-sample kron(LH, LW): (H*W, HP*WP) in bf16 (separable 2-D interpolation)."""
    U = np.kron(_interp_matrix(H, HP), _interp_matrix(W, WP))
    return jnp.asarray(U, dtype=jnp.bfloat16)


def _conv1_patches(x_nhwc):
    """XLA-side im2col for the 3-channel first conv: (N,H,W,3) -> (N*H*W, 32) bf16."""
    xp = jnp.pad(x_nhwc, ((0, 0), (1, 1), (1, 1), (0, 0)))
    cols = [xp[:, ky:ky + H, kx:kx + W, :] for ky in range(3) for kx in range(3)]
    p = jnp.concatenate(cols, axis=-1).reshape(-1, 9 * C_IN)
    p = jnp.pad(p, ((0, 0), (0, K1 - 9 * C_IN)))
    return p.astype(jnp.bfloat16)


def _row(v):
    return v.reshape(1, -1).astype(jnp.float32)


def _prep_weights(params):
    # conv1: PyTorch (out, in, kh, kw) -> im2col matrix (27, 64), zero-padded to (32, 64)
    w1 = jnp.transpose(params["conv1_w"], (2, 3, 1, 0)).reshape(9 * C_IN, C_MID)
    w1 = jnp.pad(w1, ((0, K1 - 9 * C_IN), (0, 0))).astype(jnp.bfloat16)
    # deconvN: PyTorch (in, out, kh, kw); equivalent conv = spatial flip + in/out swap
    wd1 = jnp.transpose(params["deconv1_w"][:, :, ::-1, ::-1],
                        (2, 3, 0, 1)).reshape(9, C_MID, C_MID).astype(jnp.bfloat16)
    wd2 = jnp.transpose(params["deconv2_w"][:, :, ::-1, ::-1],
                        (2, 3, 0, 1)).reshape(9, C_MID, C_IN).astype(jnp.bfloat16)
    return (w1, _row(params["conv1_b"]),
            _row(params["bn1_gamma"]), _row(params["bn1_beta"]),
            wd1, _row(params["deconv1_b"]),
            _row(params["bn2_gamma"]), _row(params["bn2_beta"]),
            wd2, _row(params["deconv2_b"]),
            _upsample_matrix())


def autoencoder_forward_groups(xs_nchw, params):
    """G independent forward passes in ONE pallas_call.
    xs_nchw: (G, B, 3, H, W); each group is BatchNorm'd over its own batch of B."""
    G = xs_nchw.shape[0]
    x = jnp.transpose(xs_nchw, (0, 1, 3, 4, 2)).astype(jnp.float32)     # (G,B,H,W,3)
    patches = _conv1_patches(x.reshape(G * B, H, W, C_IN)).reshape(G, B * H * W, K1)
    weights = _prep_weights(params)

    def bcast_spec(a):       # weights: same block every grid step -> stay resident
        nd = a.ndim
        return pl.BlockSpec(a.shape, lambda g, _nd=nd: (0,) * _nd)

    in_specs = ([pl.BlockSpec((1, B * H * W, K1), lambda g: (g, 0, 0))]
                + [bcast_spec(a) for a in weights])

    out = pl.pallas_call(
        autoencoder_kernel,
        out_shape=jax.ShapeDtypeStruct((G, B, H, W, C_IN), jnp.float32),
        grid=(G,),
        in_specs=in_specs,
        out_specs=pl.BlockSpec((1, B, H, W, C_IN), lambda g: (g, 0, 0, 0, 0)),
        scratch_shapes=[
            pltpu.VMEM((B * HP, W, C_MID), jnp.float32),            # H-pooled staging
            pltpu.VMEM((B, HP + 2, WP + 2, C_MID), jnp.float32),    # padded pooled
            pltpu.VMEM((B, H + 2, W + 2, C_MID), jnp.float32),      # padded upsampled
        ],
        compiler_params=pltpu.CompilerParams(
            dimension_semantics=("parallel",)),                     # megacore on v7x
    )(patches, *weights)
    return jnp.transpose(out, (0, 1, 4, 2, 3))                      # (G,B,3,H,W)


def autoencoder_forward(x_nchw, params):
    """Single forward pass, matching Autoencoder.forward(x) with x: (B, 3, H, W)."""
    return autoencoder_forward_groups(x_nchw[None], params)[0]


# ----------------------------------- main -------------------------------------
if __name__ == "__main__":
    key = jax.random.PRNGKey(0)
    ks = jax.random.split(key, 12)
    params = {
        "conv1_w":   jax.random.normal(ks[0], (C_MID, C_IN, 3, 3), jnp.float32) * 0.10,
        "conv1_b":   jax.random.normal(ks[1], (C_MID,), jnp.float32) * 0.10,
        "bn1_gamma": 1.0 + 0.1 * jax.random.normal(ks[2], (C_MID,), jnp.float32),
        "bn1_beta":  0.1 * jax.random.normal(ks[3], (C_MID,), jnp.float32),
        "deconv1_w": jax.random.normal(ks[4], (C_MID, C_MID, 3, 3), jnp.float32) * 0.05,
        "deconv1_b": jax.random.normal(ks[5], (C_MID,), jnp.float32) * 0.10,
        "bn2_gamma": 1.0 + 0.1 * jax.random.normal(ks[6], (C_MID,), jnp.float32),
        "bn2_beta":  0.1 * jax.random.normal(ks[7], (C_MID,), jnp.float32),
        "deconv2_w": jax.random.normal(ks[8], (C_MID, C_IN, 3, 3), jnp.float32) * 0.05,
        "deconv2_b": jax.random.normal(ks[9], (C_IN,), jnp.float32) * 0.10,
    }
    x = jax.random.normal(ks[10], (B, C_IN, H, W), jnp.float32)

    # single forward pass (the module's semantics)
    y = jax.block_until_ready(jax.jit(autoencoder_forward)(x, params))
    assert y.shape == (B, C_IN, H, W), y.shape
    assert bool(jnp.all(jnp.isfinite(y)))
    assert bool(jnp.all((y >= 0.0) & (y <= 1.0)))       # sigmoid output range

    # G=4 independent forward passes in one pallas_call (parallel grid, amortized DMA)
    x_more = jax.random.normal(ks[11], (3, B, C_IN, H, W), jnp.float32)
    xs = jnp.concatenate([x[None], x_more], axis=0)     # (4, B, 3, H, W)
    ys = jax.block_until_ready(jax.jit(autoencoder_forward_groups)(xs, params))
    assert ys.shape == (4, B, C_IN, H, W), ys.shape
    assert bool(jnp.all(jnp.isfinite(ys)))
    assert bool(jnp.all((ys >= 0.0) & (ys <= 1.0)))
    assert bool(jnp.allclose(ys[0], y, atol=1e-4))      # group 0 == standalone forward

    print("KERNEL_OK")
</pallas_src>

<mosaic_0001>
module attributes {stable_mosaic.version = 11 : i64} {
  func.func @autoencoder_kernel(%arg0: i32, %arg1: memref<1x512x32xbf16, #tpu.memory_space<vmem>>, %arg2: memref<32x64xbf16, #tpu.memory_space<vmem>>, %arg3: memref<1x64xf32, #tpu.memory_space<vmem>>, %arg4: memref<1x64xf32, #tpu.memory_space<vmem>>, %arg5: memref<1x64xf32, #tpu.memory_space<vmem>>, %arg6: memref<9x64x64xbf16, #tpu.memory_space<vmem>>, %arg7: memref<1x64xf32, #tpu.memory_space<vmem>>, %arg8: memref<1x64xf32, #tpu.memory_space<vmem>>, %arg9: memref<1x64xf32, #tpu.memory_space<vmem>>, %arg10: memref<9x64x3xbf16, #tpu.memory_space<vmem>>, %arg11: memref<1x3xf32, #tpu.memory_space<vmem>>, %arg12: memref<256x64xbf16, #tpu.memory_space<vmem>>, %arg13: memref<1x2x16x16x3xf32, #tpu.memory_space<vmem>>, %arg14: memref<16x16x64xf32, #tpu.memory_space<vmem>>, %arg15: memref<2x10x10x64xf32, #tpu.memory_space<vmem>>, %arg16: memref<2x18x18x64xf32, #tpu.memory_space<vmem>>) attributes {dimension_semantics = [#tpu.dimension_semantics<parallel>], iteration_bounds = array<i64: 1>, scalar_prefetch = 0 : i64, scratch_operands = 3 : i64, tpu.core_type = #tpu.core_type<tc>, window_params = [{transform_indices = @transform_0, window_bounds = array<i64: 1, 512, 32>}, {pipeline_mode = #tpu.pipeline_mode<synchronous>, transform_indices = @transform_1, window_bounds = array<i64: 32, 64>}, {pipeline_mode = #tpu.pipeline_mode<synchronous>, transform_indices = @transform_2, window_bounds = array<i64: 1, 64>}, {pipeline_mode = #tpu.pipeline_mode<synchronous>, transform_indices = @transform_3, window_bounds = array<i64: 1, 64>}, {pipeline_mode = #tpu.pipeline_mode<synchronous>, transform_indices = @transform_4, window_bounds = array<i64: 1, 64>}, {pipeline_mode = #tpu.pipeline_mode<synchronous>, transform_indices = @transform_5, window_bounds = array<i64: 9, 64, 64>}, {pipeline_mode = #tpu.pipeline_mode<synchronous>, transform_indices = @transform_6, window_bounds = array<i64: 1, 64>}, {pipeline_mode = #tpu.pipeline_mode<synchronous>, transform_indices = @transform_7, window_bounds = array<i64: 1, 64>}, {pipeline_mode = #tpu.pipeline_mode<synchronous>, transform_indices = @transform_8, window_bounds = array<i64: 1, 64>}, {pipeline_mode = #tpu.pipeline_mode<synchronous>, transform_indices = @transform_9, window_bounds = array<i64: 9, 64, 3>}, {pipeline_mode = #tpu.pipeline_mode<synchronous>, transform_indices = @transform_10, window_bounds = array<i64: 1, 3>}, {pipeline_mode = #tpu.pipeline_mode<synchronous>, transform_indices = @transform_11, window_bounds = array<i64: 256, 64>}, {transform_indices = @transform_12, window_bounds = array<i64: 1, 2, 16, 16, 3>}]} {
    %c0 = arith.constant 0 : index
    %c0_0 = arith.constant 0 : index
    %c0_1 = arith.constant 0 : index
    %0 = vector.load %arg1[%c0, %c0_0, %c0_1] : memref<1x512x32xbf16, #tpu.memory_space<vmem>>, vector<1x512x32xbf16>
    %1 = vector.shape_cast %0 : vector<1x512x32xbf16> to vector<512x32xbf16>
    %c0_2 = arith.constant 0 : index
    %c0_3 = arith.constant 0 : index
    %2 = vector.load %arg2[%c0_2, %c0_3] : memref<32x64xbf16, #tpu.memory_space<vmem>>, vector<32x64xbf16>
    %cst = arith.constant dense<0.000000e+00> : vector<512x64xf32>
    %3 = tpu.matmul %1, %2, %cst {dimension_numbers = #tpu.dot_dimension_numbers<[1], [0], [0], [1], [0, 0, 1, 1], [], []>} : vector<512x32xbf16>, vector<32x64xbf16>, vector<512x64xf32> -> vector<512x64xf32>
    %c0_4 = arith.constant 0 : index
    %c0_5 = arith.constant 0 : index
    %4 = vector.load %arg3[%c0_4, %c0_5] : memref<1x64xf32, #tpu.memory_space<vmem>>, vector<1x64xf32>
    %5 = vector.broadcast %4 : vector<1x64xf32> to vector<512x64xf32>
    %6 = arith.addf %3, %5 : vector<512x64xf32>
    %cst_6 = arith.constant 0.000000e+00 : f32
    %7 = vector.broadcast %cst_6 : f32 to vector<512x64xf32>
    %8 = arith.maximumf %6, %7 : vector<512x64xf32>
    %c0_7 = arith.constant 0 : index
    %c0_8 = arith.constant 0 : index
    %9 = vector.load %arg4[%c0_7, %c0_8] : memref<1x64xf32, #tpu.memory_space<vmem>>, vector<1x64xf32>
    %c0_9 = arith.constant 0 : index
    %c0_10 = arith.constant 0 : index
    %10 = vector.load %arg5[%c0_9, %c0_10] : memref<1x64xf32, #tpu.memory_space<vmem>>, vector<1x64xf32>
    %cst_11 = arith.constant dense<0.000000e+00> : vector<64xf32>
    %11 = vector.multi_reduction <add>, %8, %cst_11 [0] : vector<512x64xf32> to vector<64xf32>
    %12 = vector.shape_cast %11 : vector<64xf32> to vector<1x64xf32>
    %cst_12 = arith.constant 0.001953125 : f32
    %13 = vector.broadcast %cst_12 : f32 to vector<1x64xf32>
    %14 = arith.mulf %12, %13 : vector<1x64xf32>
    %15 = vector.broadcast %14 : vector<1x64xf32> to vector<512x64xf32>
    %16 = arith.subf %8, %15 : vector<512x64xf32>
    %17 = arith.mulf %16, %16 : vector<512x64xf32>
    %cst_13 = arith.constant dense<0.000000e+00> : vector<64xf32>
    %18 = vector.multi_reduction <add>, %17, %cst_13 [0] : vector<512x64xf32> to vector<64xf32>
    %19 = vector.shape_cast %18 : vector<64xf32> to vector<1x64xf32>
    %cst_14 = arith.constant 0.001953125 : f32
    %20 = vector.broadcast %cst_14 : f32 to vector<1x64xf32>
    %21 = arith.mulf %19, %20 : vector<1x64xf32>
    %cst_15 = arith.constant 9.99999974E-6 : f32
    %22 = vector.broadcast %cst_15 : f32 to vector<1x64xf32>
    %23 = arith.addf %21, %22 : vector<1x64xf32>
    %24 = math.rsqrt %23 : vector<1x64xf32>
    %25 = arith.mulf %9, %24 : vector<1x64xf32>
    %26 = vector.broadcast %25 : vector<1x64xf32> to vector<512x64xf32>
    %27 = arith.mulf %16, %26 : vector<512x64xf32>
    %28 = vector.broadcast %10 : vector<1x64xf32> to vector<512x64xf32>
    %29 = arith.addf %27, %28 : vector<512x64xf32>
    %30 = vector.shape_cast %29 : vector<512x64xf32> to vector<16x2x16x64xf32>
    %31 = vector.extract_strided_slice %30 {offsets = [0, 0, 0, 0], sizes = [16, 1, 16, 64], strides = [1, 1, 1, 1]} : vector<16x2x16x64xf32> to vector<16x1x16x64xf32>
    %32 = vector.shape_cast %31 : vector<16x1x16x64xf32> to vector<16x16x64xf32>
    %33 = vector.extract_strided_slice %30 {offsets = [0, 1, 0, 0], sizes = [16, 1, 16, 64], strides = [1, 1, 1, 1]} : vector<16x2x16x64xf32> to vector<16x1x16x64xf32>
    %34 = vector.shape_cast %33 : vector<16x1x16x64xf32> to vector<16x16x64xf32>
    %35 = arith.maximumf %32, %34 : vector<16x16x64xf32>
    %c0_16 = arith.constant 0 : index
    %c0_17 = arith.constant 0 : index
    %c0_18 = arith.constant 0 : index
    %36 = vector.load %arg14[%c0_16, %c0_17, %c0_18] : memref<16x16x64xf32, #tpu.memory_space<vmem>>, vector<16x16x64xf32>
    tpu.vector_store %arg14[%c0_16, %c0_17, %c0_18], %35 {strides = array<i32>} : memref<16x16x64xf32, #tpu.memory_space<vmem>>, vector<16x16x64xf32>,
    %c0_19 = arith.constant 0 : index
    %c0_20 = arith.constant 0 : index
    %c0_21 = arith.constant 0 : index
    %37 = tpu.strided_load %arg14[%c0_19, %c0_20, %c0_21] {strides = array<i32: 1, 2, 1>} : memref<16x16x64xf32, #tpu.memory_space<vmem>>, vector<16x8x64xf32>
    %c0_22 = arith.constant 0 : index
    %c1 = arith.constant 1 : index
    %c0_23 = arith.constant 0 : index
    %38 = tpu.strided_load %arg14[%c0_22, %c1, %c0_23] {strides = array<i32: 1, 2, 1>} : memref<16x16x64xf32, #tpu.memory_space<vmem>>, vector<16x8x64xf32>
    %39 = arith.maximumf %37, %38 : vector<16x8x64xf32>
    %cst_24 = arith.constant 0.000000e+00 : f32
    %40 = vector.broadcast %cst_24 : f32 to vector<2x10x10x64xf32>
    %c0_25 = arith.constant 0 : index
    %c0_26 = arith.constant 0 : index
    %c0_27 = arith.constant 0 : index
    %c0_28 = arith.constant 0 : index
    %41 = vector.load %arg15[%c0_25, %c0_26, %c0_27, %c0_28] : memref<2x10x10x64xf32, #tpu.memory_space<vmem>>, vector<2x10x10x64xf32>
    tpu.vector_store %arg15[%c0_25, %c0_26, %c0_27, %c0_28], %40 {strides = array<i32>} : memref<2x10x10x64xf32, #tpu.memory_space<vmem>>, vector<2x10x10x64xf32>,
    %42 = vector.shape_cast %39 : vector<16x8x64xf32> to vector<2x8x8x64xf32>
    %c0_29 = arith.constant 0 : index
    %c1_30 = arith.constant 1 : index
    %c1_31 = arith.constant 1 : index
    %c0_32 = arith.constant 0 : index
    %43 = vector.load %arg15[%c0_29, %c1_30, %c1_31, %c0_32] : memref<2x10x10x64xf32, #tpu.memory_space<vmem>>, vector<2x8x8x64xf32>
    tpu.vector_store %arg15[%c0_29, %c1_30, %c1_31, %c0_32], %42 {strides = array<i32>} : memref<2x10x10x64xf32, #tpu.memory_space<vmem>>, vector<2x8x8x64xf32>,
    %c0_33 = arith.constant 0 : index
    %c0_34 = arith.constant 0 : index
    %44 = vector.load %arg7[%c0_33, %c0_34] : memref<1x64xf32, #tpu.memory_space<vmem>>, vector<1x64xf32>
    %cst_35 = arith.constant 0.000000e+00 : f32
    %45 = vector.broadcast %cst_35 : f32 to vector<128x64xf32>
    %c0_36 = arith.constant 0 : index
    %c0_37 = arith.constant 0 : index
    %c0_38 = arith.constant 0 : index
    %c0_39 = arith.constant 0 : index
    %46 = vector.load %arg15[%c0_36, %c0_37, %c0_38, %c0_39] : memref<2x10x10x64xf32, #tpu.memory_space<vmem>>, vector<2x8x8x64xf32>
    %47 = vector.shape_cast %46 : vector<2x8x8x64xf32> to vector<128x64xf32>
    %48 = arith.truncf %47 : vector<128x64xf32> to vector<128x64xbf16>
    %c0_40 = arith.constant 0 : index
    %c0_41 = arith.constant 0 : index
    %c0_42 = arith.constant 0 : index
    %49 = vector.load %arg6[%c0_40, %c0_41, %c0_42] : memref<9x64x64xbf16, #tpu.memory_space<vmem>>, vector<1x64x64xbf16>
    %50 = vector.shape_cast %49 : vector<1x64x64xbf16> to vector<64x64xbf16>
    %cst_43 = arith.constant dense<0.000000e+00> : vector<128x64xf32>
    %51 = tpu.matmul %48, %50, %cst_43 {dimension_numbers = #tpu.dot_dimension_numbers<[1], [0], [0], [1], [0, 0, 1, 1], [], []>} : vector<128x64xbf16>, vector<64x64xbf16>, vector<128x64xf32> -> vector<128x64xf32>
    %52 = arith.addf %45, %51 : vector<128x64xf32>
    %c0_44 = arith.constant 0 : index
    %c0_45 = arith.constant 0 : index
    %c1_46 = arith.constant 1 : index
    %c0_47 = arith.constant 0 : index
    %53 = vector.load %arg15[%c0_44, %c0_45, %c1_46, %c0_47] : memref<2x10x10x64xf32, #tpu.memory_space<vmem>>, vector<2x8x8x64xf32>
    %54 = vector.shape_cast %53 : vector<2x8x8x64xf32> to vector<128x64xf32>
    %55 = arith.truncf %54 : vector<128x64xf32> to vector<128x64xbf16>
    %c1_48 = arith.constant 1 : index
    %c0_49 = arith.constant 0 : index
    %c0_50 = arith.constant 0 : index
    %56 = vector.load %arg6[%c1_48, %c0_49, %c0_50] : memref<9x64x64xbf16, #tpu.memory_space<vmem>>, vector<1x64x64xbf16>
    %57 = vector.shape_cast %56 : vector<1x64x64xbf16> to vector<64x64xbf16>
    %cst_51 = arith.constant dense<0.000000e+00> : vector<128x64xf32>
    %58 = tpu.matmul %55, %57, %cst_51 {dimension_numbers = #tpu.dot_dimension_numbers<[1], [0], [0], [1], [0, 0, 1, 1], [], []>} : vector<128x64xbf16>, vector<64x64xbf16>, vector<128x64xf32> -> vector<128x64xf32>
    %59 = arith.addf %52, %58 : vector<128x64xf32>
    %c0_52 = arith.constant 0 : index
    %c0_53 = arith.constant 0 : index
    %c2 = arith.constant 2 : index
    %c0_54 = arith.constant 0 : index
    %60 = vector.load %arg15[%c0_52, %c0_53, %c2, %c0_54] : memref<2x10x10x64xf32, #tpu.memory_space<vmem>>, vector<2x8x8x64xf32>
    %61 = vector.shape_cast %60 : vector<2x8x8x64xf32> to vector<128x64xf32>
    %62 = arith.truncf %61 : vector<128x64xf32> to vector<128x64xbf16>
    %c2_55 = arith.constant 2 : index
    %c0_56 = arith.constant 0 : index
    %c0_57 = arith.constant 0 : index
    %63 = vector.load %arg6[%c2_55, %c0_56, %c0_57] : memref<9x64x64xbf16, #tpu.memory_space<vmem>>, vector<1x64x64xbf16>
    %64 = vector.shape_cast %63 : vector<1x64x64xbf16> to vector<64x64xbf16>
    %cst_58 = arith.constant dense<0.000000e+00> : vector<128x64xf32>
    %65 = tpu.matmul %62, %64, %cst_58 {dimension_numbers = #tpu.dot_dimension_numbers<[1], [0], [0], [1], [0, 0, 1, 1], [], []>} : vector<128x64xbf16>, vector<64x64xbf16>, vector<128x64xf32> -> vector<128x64xf32>
    %66 = arith.addf %59, %65 : vector<128x64xf32>
    %c0_59 = arith.constant 0 : index
    %c1_60 = arith.constant 1 : index
    %c0_61 = arith.constant 0 : index
    %c0_62 = arith.constant 0 : index
    %67 = vector.load %arg15[%c0_59, %c1_60, %c0_61, %c0_62] : memref<2x10x10x64xf32, #tpu.memory_space<vmem>>, vector<2x8x8x64xf32>
    %68 = vector.shape_cast %67 : vector<2x8x8x64xf32> to vector<128x64xf32>
    %69 = arith.truncf %68 : vector<128x64xf32> to vector<128x64xbf16>
    %c3 = arith.constant 3 : index
    %c0_63 = arith.constant 0 : index
    %c0_64 = arith.constant 0 : index
    %70 = vector.load %arg6[%c3, %c0_63, %c0_64] : memref<9x64x64xbf16, #tpu.memory_space<vmem>>, vector<1x64x64xbf16>
    %71 = vector.shape_cast %70 : vector<1x64x64xbf16> to vector<64x64xbf16>
    %cst_65 = arith.constant dense<0.000000e+00> : vector<128x64xf32>
    %72 = tpu.matmul %69, %71, %cst_65 {dimension_numbers = #tpu.dot_dimension_numbers<[1], [0], [0], [1], [0, 0, 1, 1], [], []>} : vector<128x64xbf16>, vector<64x64xbf16>, vector<128x64xf32> -> vector<128x64xf32>
    %73 = arith.addf %66, %72 : vector<128x64xf32>
    %c0_66 = arith.constant 0 : index
    %c1_67 = arith.constant 1 : index
    %c1_68 = arith.constant 1 : index
    %c0_69 = arith.constant 0 : index
    %74 = vector.load %arg15[%c0_66, %c1_67, %c1_68, %c0_69] : memref<2x10x10x64xf32, #tpu.memory_space<vmem>>, vector<2x8x8x64xf32>
    %75 = vector.shape_cast %74 : vector<2x8x8x64xf32> to vector<128x64xf32>
    %76 = arith.truncf %75 : vector<128x64xf32> to vector<128x64xbf16>
    %c4 = arith.constant 4 : index
    %c0_70 = arith.constant 0 : index
    %c0_71 = arith.constant 0 : index
    %77 = vector.load %arg6[%c4, %c0_70, %c0_71] : memref<9x64x64xbf16, #tpu.memory_space<vmem>>, vector<1x64x64xbf16>
    %78 = vector.shape_cast %77 : vector<1x64x64xbf16> to vector<64x64xbf16>
    %cst_72 = arith.constant dense<0.000000e+00> : vector<128x64xf32>
    %79 = tpu.matmul %76, %78, %cst_72 {dimension_numbers = #tpu.dot_dimension_numbers<[1], [0], [0], [1], [0, 0, 1, 1], [], []>} : vector<128x64xbf16>, vector<64x64xbf16>, vector<128x64xf32> -> vector<128x64xf32>
    %80 = arith.addf %73, %79 : vector<128x64xf32>
    %c0_73 = arith.constant 0 : index
    %c1_74 = arith.constant 1 : index
    %c2_75 = arith.constant 2 : index
    %c0_76 = arith.constant 0 : index
    %81 = vector.load %arg15[%c0_73, %c1_74, %c2_75, %c0_76] : memref<2x10x10x64xf32, #tpu.memory_space<vmem>>, vector<2x8x8x64xf32>
    %82 = vector.shape_cast %81 : vector<2x8x8x64xf32> to vector<128x64xf32>
    %83 = arith.truncf %82 : vector<128x64xf32> to vector<128x64xbf16>
    %c5 = arith.constant 5 : index
    %c0_77 = arith.constant 0 : index
    %c0_78 = arith.constant 0 : index
    %84 = vector.load %arg6[%c5, %c0_77, %c0_78] : memref<9x64x64xbf16, #tpu.memory_space<vmem>>, vector<1x64x64xbf16>
    %85 = vector.shape_cast %84 : vector<1x64x64xbf16> to vector<64x64xbf16>
    %cst_79 = arith.constant dense<0.000000e+00> : vector<128x64xf32>
    %86 = tpu.matmul %83, %85, %cst_79 {dimension_numbers = #tpu.dot_dimension_numbers<[1], [0], [0], [1], [0, 0, 1, 1], [], []>} : vector<128x64xbf16>, vector<64x64xbf16>, vector<128x64xf32> -> vector<128x64xf32>
    %87 = arith.addf %80, %86 : vector<128x64xf32>
    %c0_80 = arith.constant 0 : index
    %c2_81 = arith.constant 2 : index
    %c0_82 = arith.constant 0 : index
    %c0_83 = arith.constant 0 : index
    %88 = vector.load %arg15[%c0_80, %c2_81, %c0_82, %c0_83] : memref<2x10x10x64xf32, #tpu.memory_space<vmem>>, vector<2x8x8x64xf32>
    %89 = vector.shape_cast %88 : vector<2x8x8x64xf32> to vector<128x64xf32>
    %90 = arith.truncf %89 : vector<128x64xf32> to vector<128x64xbf16>
    %c6 = arith.constant 6 : index
    %c0_84 = arith.constant 0 : index
    %c0_85 = arith.constant 0 : index
    %91 = vector.load %arg6[%c6, %c0_84, %c0_85] : memref<9x64x64xbf16, #tpu.memory_space<vmem>>, vector<1x64x64xbf16>
    %92 = vector.shape_cast %91 : vector<1x64x64xbf16> to vector<64x64xbf16>
    %cst_86 = arith.constant dense<0.000000e+00> : vector<128x64xf32>
    %93 = tpu.matmul %90, %92, %cst_86 {dimension_numbers = #tpu.dot_dimension_numbers<[1], [0], [0], [1], [0, 0, 1, 1], [], []>} : vector<128x64xbf16>, vector<64x64xbf16>, vector<128x64xf32> -> vector<128x64xf32>
    %94 = arith.addf %87, %93 : vector<128x64xf32>
    %c0_87 = arith.constant 0 : index
    %c2_88 = arith.constant 2 : index
    %c1_89 = arith.constant 1 : index
    %c0_90 = arith.constant 0 : index
    %95 = vector.load %arg15[%c0_87, %c2_88, %c1_89, %c0_90] : memref<2x10x10x64xf32, #tpu.memory_space<vmem>>, vector<2x8x8x64xf32>
    %96 = vector.shape_cast %95 : vector<2x8x8x64xf32> to vector<128x64xf32>
    %97 = arith.truncf %96 : vector<128x64xf32> to vector<128x64xbf16>
    %c7 = arith.constant 7 : index
    %c0_91 = arith.constant 0 : index
    %c0_92 = arith.constant 0 : index
    %98 = vector.load %arg6[%c7, %c0_91, %c0_92] : memref<9x64x64xbf16, #tpu.memory_space<vmem>>, vector<1x64x64xbf16>
    %99 = vector.shape_cast %98 : vector<1x64x64xbf16> to vector<64x64xbf16>
    %cst_93 = arith.constant dense<0.000000e+00> : vector<128x64xf32>
    %100 = tpu.matmul %97, %99, %cst_93 {dimension_numbers = #tpu.dot_dimension_numbers<[1], [0], [0], [1], [0, 0, 1, 1], [], []>} : vector<128x64xbf16>, vector<64x64xbf16>, vector<128x64xf32> -> vector<128x64xf32>
    %101 = arith.addf %94, %100 : vector<128x64xf32>
    %c0_94 = arith.constant 0 : index
    %c2_95 = arith.constant 2 : index
    %c2_96 = arith.constant 2 : index
    %c0_97 = arith.constant 0 : index
    %102 = vector.load %arg15[%c0_94, %c2_95, %c2_96, %c0_97] : memref<2x10x10x64xf32, #tpu.memory_space<vmem>>, vector<2x8x8x64xf32>
    %103 = vector.shape_cast %102 : vector<2x8x8x64xf32> to vector<128x64xf32>
    %104 = arith.truncf %103 : vector<128x64xf32> to vector<128x64xbf16>
    %c8 = arith.constant 8 : index
    %c0_98 = arith.constant 0 : index
    %c0_99 = arith.constant 0 : index
    %105 = vector.load %arg6[%c8, %c0_98, %c0_99] : memref<9x64x64xbf16, #tpu.memory_space<vmem>>, vector<1x64x64xbf16>
    %106 = vector.shape_cast %105 : vector<1x64x64xbf16> to vector<64x64xbf16>
    %cst_100 = arith.constant dense<0.000000e+00> : vector<128x64xf32>
    %107 = tpu.matmul %104, %106, %cst_100 {dimension_numbers = #tpu.dot_dimension_numbers<[1], [0], [0], [1], [0, 0, 1, 1], [], []>} : vector<128x64xbf16>, vector<64x64xbf16>, vector<128x64xf32> -> vector<128x64xf32>
    %108 = arith.addf %101, %107 : vector<128x64xf32>
    %109 = vector.broadcast %44 : vector<1x64xf32> to vector<128x64xf32>
    %110 = arith.addf %108, %109 : vector<128x64xf32>
    %cst_101 = arith.constant 0.000000e+00 : f32
    %111 = vector.broadcast %cst_101 : f32 to vector<128x64xf32>
    %112 = arith.maximumf %110, %111 : vector<128x64xf32>
    %c0_102 = arith.constant 0 : index
    %c0_103 = arith.constant 0 : index
    %113 = vector.load %arg8[%c0_102, %c0_103] : memref<1x64xf32, #tpu.memory_space<vmem>>, vector<1x64xf32>
    %c0_104 = arith.constant 0 : index
    %c0_105 = arith.constant 0 : index
    %114 = vector.load %arg9[%c0_104, %c0_105] : memref<1x64xf32, #tpu.memory_space<vmem>>, vector<1x64xf32>
    %cst_106 = arith.constant dense<0.000000e+00> : vector<64xf32>
    %115 = vector.multi_reduction <add>, %112, %cst_106 [0] : vector<128x64xf32> to vector<64xf32>
    %116 = vector.shape_cast %115 : vector<64xf32> to vector<1x64xf32>
    %cst_107 = arith.constant 7.812500e-03 : f32
    %117 = vector.broadcast %cst_107 : f32 to vector<1x64xf32>
    %118 = arith.mulf %116, %117 : vector<1x64xf32>
    %119 = vector.broadcast %118 : vector<1x64xf32> to vector<128x64xf32>
    %120 = arith.subf %112, %119 : vector<128x64xf32>
    %121 = arith.mulf %120, %120 : vector<128x64xf32>
    %cst_108 = arith.constant dense<0.000000e+00> : vector<64xf32>
    %122 = vector.multi_reduction <add>, %121, %cst_108 [0] : vector<128x64xf32> to vector<64xf32>
    %123 = vector.shape_cast %122 : vector<64xf32> to vector<1x64xf32>
    %cst_109 = arith.constant 7.812500e-03 : f32
    %124 = vector.broadcast %cst_109 : f32 to vector<1x64xf32>
    %125 = arith.mulf %123, %124 : vector<1x64xf32>
    %cst_110 = arith.constant 9.99999974E-6 : f32
    %126 = vector.broadcast %cst_110 : f32 to vector<1x64xf32>
    %127 = arith.addf %125, %126 : vector<1x64xf32>
    %128 = math.rsqrt %127 : vector<1x64xf32>
    %129 = arith.mulf %113, %128 : vector<1x64xf32>
    %130 = vector.broadcast %129 : vector<1x64xf32> to vector<128x64xf32>
    %131 = arith.mulf %120, %130 : vector<128x64xf32>
    %132 = vector.broadcast %114 : vector<1x64xf32> to vector<128x64xf32>
    %133 = arith.addf %131, %132 : vector<128x64xf32>
    %cst_111 = arith.constant 0.000000e+00 : f32
    %134 = vector.broadcast %cst_111 : f32 to vector<2x18x18x64xf32>
    %c0_112 = arith.constant 0 : index
    %c0_113 = arith.constant 0 : index
    %c0_114 = arith.constant 0 : index
    %c0_115 = arith.constant 0 : index
    %135 = vector.load %arg16[%c0_112, %c0_113, %c0_114, %c0_115] : memref<2x18x18x64xf32, #tpu.memory_space<vmem>>, vector<2x18x18x64xf32>
    tpu.vector_store %arg16[%c0_112, %c0_113, %c0_114, %c0_115], %134 {strides = array<i32>} : memref<2x18x18x64xf32, #tpu.memory_space<vmem>>, vector<2x18x18x64xf32>,
    %136 = arith.truncf %133 : vector<128x64xf32> to vector<128x64xbf16>
    %c0_116 = arith.constant 0 : index
    %c0_117 = arith.constant 0 : index
    %137 = vector.load %arg12[%c0_116, %c0_117] : memref<256x64xbf16, #tpu.memory_space<vmem>>, vector<256x64xbf16>
    %138 = vector.extract_strided_slice %136 {offsets = [0, 0], sizes = [64, 64], strides = [1, 1]} : vector<128x64xbf16> to vector<64x64xbf16>
    %cst_118 = arith.constant dense<0.000000e+00> : vector<256x64xf32>
    %139 = tpu.matmul %137, %138, %cst_118 {dimension_numbers = #tpu.dot_dimension_numbers<[1], [0], [0], [1], [0, 0, 1, 1], [], []>} : vector<256x64xbf16>, vector<64x64xbf16>, vector<256x64xf32> -> vector<256x64xf32>
    %140 = vector.shape_cast %139 : vector<256x64xf32> to vector<16x16x64xf32>
    %c0_119 = arith.constant 0 : index
    %c1_120 = arith.constant 1 : index
    %c1_121 = arith.constant 1 : index
    %c0_122 = arith.constant 0 : index
    %141 = vector.load %arg16[%c0_119, %c1_120, %c1_121, %c0_122] : memref<2x18x18x64xf32, #tpu.memory_space<vmem>>, vector<1x16x16x64xf32>
    %142 = vector.shape_cast %141 : vector<1x16x16x64xf32> to vector<16x16x64xf32>
    %143 = vector.shape_cast %140 : vector<16x16x64xf32> to vector<1x16x16x64xf32>
    tpu.vector_store %arg16[%c0_119, %c1_120, %c1_121, %c0_122], %143 {strides = array<i32>} : memref<2x18x18x64xf32, #tpu.memory_space<vmem>>, vector<1x16x16x64xf32>,
    %c0_123 = arith.constant 0 : index
    %c0_124 = arith.constant 0 : index
    %144 = vector.load %arg12[%c0_123, %c0_124] : memref<256x64xbf16, #tpu.memory_space<vmem>>, vector<256x64xbf16>
    %145 = vector.extract_strided_slice %136 {offsets = [64, 0], sizes = [64, 64], strides = [1, 1]} : vector<128x64xbf16> to vector<64x64xbf16>
    %cst_125 = arith.constant dense<0.000000e+00> : vector<256x64xf32>
    %146 = tpu.matmul %144, %145, %cst_125 {dimension_numbers = #tpu.dot_dimension_numbers<[1], [0], [0], [1], [0, 0, 1, 1], [], []>} : vector<256x64xbf16>, vector<64x64xbf16>, vector<256x64xf32> -> vector<256x64xf32>
    %147 = vector.shape_cast %146 : vector<256x64xf32> to vector<16x16x64xf32>
    %c1_126 = arith.constant 1 : index
    %c1_127 = arith.constant 1 : index
    %c1_128 = arith.constant 1 : index
    %c0_129 = arith.constant 0 : index
    %148 = vector.load %arg16[%c1_126, %c1_127, %c1_128, %c0_129] : memref<2x18x18x64xf32, #tpu.memory_space<vmem>>, vector<1x16x16x64xf32>
    %149 = vector.shape_cast %148 : vector<1x16x16x64xf32> to vector<16x16x64xf32>
    %150 = vector.shape_cast %147 : vector<16x16x64xf32> to vector<1x16x16x64xf32>
    tpu.vector_store %arg16[%c1_126, %c1_127, %c1_128, %c0_129], %150 {strides = array<i32>} : memref<2x18x18x64xf32, #tpu.memory_space<vmem>>, vector<1x16x16x64xf32>,
    %c0_130 = arith.constant 0 : index
    %c0_131 = arith.constant 0 : index
    %151 = vector.load %arg11[%c0_130, %c0_131] : memref<1x3xf32, #tpu.memory_space<vmem>>, vector<1x3xf32>
    %cst_132 = arith.constant 0.000000e+00 : f32
    %152 = vector.broadcast %cst_132 : f32 to vector<512x3xf32>
    %c0_133 = arith.constant 0 : index
    %c0_134 = arith.constant 0 : index
    %c0_135 = arith.constant 0 : index
    %c0_136 = arith.constant 0 : index
    %153 = vector.load %arg16[%c0_133, %c0_134, %c0_135, %c0_136] : memref<2x18x18x64xf32, #tpu.memory_space<vmem>>, vector<2x16x16x64xf32>
    %154 = vector.shape_cast %153 : vector<2x16x16x64xf32> to vector<512x64xf32>
    %155 = arith.truncf %154 : vector<512x64xf32> to vector<512x64xbf16>
    %c0_137 = arith.constant 0 : index
    %c0_138 = arith.constant 0 : index
    %c0_139 = arith.constant 0 : index
    %156 = vector.load %arg10[%c0_137, %c0_138, %c0_139] : memref<9x64x3xbf16, #tpu.memory_space<vmem>>, vector<1x64x3xbf16>
    %157 = vector.shape_cast %156 : vector<1x64x3xbf16> to vector<64x3xbf16>
    %cst_140 = arith.constant dense<0.000000e+00> : vector<512x3xf32>
    %158 = tpu.matmul %155, %157, %cst_140 {dimension_numbers = #tpu.dot_dimension_numbers<[1], [0], [0], [1], [0, 0, 1, 1], [], []>} : vector<512x64xbf16>, vector<64x3xbf16>, vector<512x3xf32> -> vector<512x3xf32>
    %159 = arith.addf %152, %158 : vector<512x3xf32>
    %c0_141 = arith.constant 0 : index
    %c0_142 = arith.constant 0 : index
    %c1_143 = arith.constant 1 : index
    %c0_144 = arith.constant 0 : index
    %160 = vector.load %arg16[%c0_141, %c0_142, %c1_143, %c0_144] : memref<2x18x18x64xf32, #tpu.memory_space<vmem>>, vector<2x16x16x64xf32>
    %161 = vector.shape_cast %160 : vector<2x16x16x64xf32> to vector<512x64xf32>
    %162 = arith.truncf %161 : vector<512x64xf32> to vector<512x64xbf16>
    %c1_145 = arith.constant 1 : index
    %c0_146 = arith.constant 0 : index
    %c0_147 = arith.constant 0 : index
    %163 = vector.load %arg10[%c1_145, %c0_146, %c0_147] : memref<9x64x3xbf16, #tpu.memory_space<vmem>>, vector<1x64x3xbf16>
    %164 = vector.shape_cast %163 : vector<1x64x3xbf16> to vector<64x3xbf16>
    %cst_148 = arith.constant dense<0.000000e+00> : vector<512x3xf32>
    %165 = tpu.matmul %162, %164, %cst_148 {dimension_numbers = #tpu.dot_dimension_numbers<[1], [0], [0], [1], [0, 0, 1, 1], [], []>} : vector<512x64xbf16>, vector<64x3xbf16>, vector<512x3xf32> -> vector<512x3xf32>
    %166 = arith.addf %159, %165 : vector<512x3xf32>
    %c0_149 = arith.constant 0 : index
    %c0_150 = arith.constant 0 : index
    %c2_151 = arith.constant 2 : index
    %c0_152 = arith.constant 0 : index
    %167 = vector.load %arg16[%c0_149, %c0_150, %c2_151, %c0_152] : memref<2x18x18x64xf32, #tpu.memory_space<vmem>>, vector<2x16x16x64xf32>
    %168 = vector.shape_cast %167 : vector<2x16x16x64xf32> to vector<512x64xf32>
    %169 = arith.truncf %168 : vector<512x64xf32> to vector<512x64xbf16>
    %c2_153 = arith.constant 2 : index
    %c0_154 = arith.constant 0 : index
    %c0_155 = arith.constant 0 : index
    %170 = vector.load %arg10[%c2_153, %c0_154, %c0_155] : memref<9x64x3xbf16, #tpu.memory_space<vmem>>, vector<1x64x3xbf16>
    %171 = vector.shape_cast %170 : vector<1x64x3xbf16> to vector<64x3xbf16>
    %cst_156 = arith.constant dense<0.000000e+00> : vector<512x3xf32>
    %172 = tpu.matmul %169, %171, %cst_156 {dimension_numbers = #tpu.dot_dimension_numbers<[1], [0], [0], [1], [0, 0, 1, 1], [], []>} : vector<512x64xbf16>, vector<64x3xbf16>, vector<512x3xf32> -> vector<512x3xf32>
    %173 = arith.addf %166, %172 : vector<512x3xf32>
    %c0_157 = arith.constant 0 : index
    %c1_158 = arith.constant 1 : index
    %c0_159 = arith.constant 0 : index
    %c0_160 = arith.constant 0 : index
    %174 = vector.load %arg16[%c0_157, %c1_158, %c0_159, %c0_160] : memref<2x18x18x64xf32, #tpu.memory_space<vmem>>, vector<2x16x16x64xf32>
    %175 = vector.shape_cast %174 : vector<2x16x16x64xf32> to vector<512x64xf32>
    %176 = arith.truncf %175 : vector<512x64xf32> to vector<512x64xbf16>
    %c3_161 = arith.constant 3 : index
    %c0_162 = arith.constant 0 : index
    %c0_163 = arith.constant 0 : index
    %177 = vector.load %arg10[%c3_161, %c0_162, %c0_163] : memref<9x64x3xbf16, #tpu.memory_space<vmem>>, vector<1x64x3xbf16>
    %178 = vector.shape_cast %177 : vector<1x64x3xbf16> to vector<64x3xbf16>
    %cst_164 = arith.constant dense<0.000000e+00> : vector<512x3xf32>
    %179 = tpu.matmul %176, %178, %cst_164 {dimension_numbers = #tpu.dot_dimension_numbers<[1], [0], [0], [1], [0, 0, 1, 1], [], []>} : vector<512x64xbf16>, vector<64x3xbf16>, vector<512x3xf32> -> vector<512x3xf32>
    %180 = arith.addf %173, %179 : vector<512x3xf32>
    %c0_165 = arith.constant 0 : index
    %c1_166 = arith.constant 1 : index
    %c1_167 = arith.constant 1 : index
    %c0_168 = arith.constant 0 : index
    %181 = vector.load %arg16[%c0_165, %c1_166, %c1_167, %c0_168] : memref<2x18x18x64xf32, #tpu.memory_space<vmem>>, vector<2x16x16x64xf32>
    %182 = vector.shape_cast %181 : vector<2x16x16x64xf32> to vector<512x64xf32>
    %183 = arith.truncf %182 : vector<512x64xf32> to vector<512x64xbf16>
    %c4_169 = arith.constant 4 : index
    %c0_170 = arith.constant 0 : index
    %c0_171 = arith.constant 0 : index
    %184 = vector.load %arg10[%c4_169, %c0_170, %c0_171] : memref<9x64x3xbf16, #tpu.memory_space<vmem>>, vector<1x64x3xbf16>
    %185 = vector.shape_cast %184 : vector<1x64x3xbf16> to vector<64x3xbf16>
    %cst_172 = arith.constant dense<0.000000e+00> : vector<512x3xf32>
    %186 = tpu.matmul %183, %185, %cst_172 {dimension_numbers = #tpu.dot_dimension_numbers<[1], [0], [0], [1], [0, 0, 1, 1], [], []>} : vector<512x64xbf16>, vector<64x3xbf16>, vector<512x3xf32> -> vector<512x3xf32>
    %187 = arith.addf %180, %186 : vector<512x3xf32>
    %c0_173 = arith.constant 0 : index
    %c1_174 = arith.constant 1 : index
    %c2_175 = arith.constant 2 : index
    %c0_176 = arith.constant 0 : index
    %188 = vector.load %arg16[%c0_173, %c1_174, %c2_175, %c0_176] : memref<2x18x18x64xf32, #tpu.memory_space<vmem>>, vector<2x16x16x64xf32>
    %189 = vector.shape_cast %188 : vector<2x16x16x64xf32> to vector<512x64xf32>
    %190 = arith.truncf %189 : vector<512x64xf32> to vector<512x64xbf16>
    %c5_177 = arith.constant 5 : index
    %c0_178 = arith.constant 0 : index
    %c0_179 = arith.constant 0 : index
    %191 = vector.load %arg10[%c5_177, %c0_178, %c0_179] : memref<9x64x3xbf16, #tpu.memory_space<vmem>>, vector<1x64x3xbf16>
    %192 = vector.shape_cast %191 : vector<1x64x3xbf16> to vector<64x3xbf16>
    %cst_180 = arith.constant dense<0.000000e+00> : vector<512x3xf32>
    %193 = tpu.matmul %190, %192, %cst_180 {dimension_numbers = #tpu.dot_dimension_numbers<[1], [0], [0], [1], [0, 0, 1, 1], [], []>} : vector<512x64xbf16>, vector<64x3xbf16>, vector<512x3xf32> -> vector<512x3xf32>
    %194 = arith.addf %187, %193 : vector<512x3xf32>
    %c0_181 = arith.constant 0 : index
    %c2_182 = arith.constant 2 : index
    %c0_183 = arith.constant 0 : index
    %c0_184 = arith.constant 0 : index
    %195 = vector.load %arg16[%c0_181, %c2_182, %c0_183, %c0_184] : memref<2x18x18x64xf32, #tpu.memory_space<vmem>>, vector<2x16x16x64xf32>
    %196 = vector.shape_cast %195 : vector<2x16x16x64xf32> to vector<512x64xf32>
    %197 = arith.truncf %196 : vector<512x64xf32> to vector<512x64xbf16>
    %c6_185 = arith.constant 6 : index
    %c0_186 = arith.constant 0 : index
    %c0_187 = arith.constant 0 : index
    %198 = vector.load %arg10[%c6_185, %c0_186, %c0_187] : memref<9x64x3xbf16, #tpu.memory_space<vmem>>, vector<1x64x3xbf16>
    %199 = vector.shape_cast %198 : vector<1x64x3xbf16> to vector<64x3xbf16>
    %cst_188 = arith.constant dense<0.000000e+00> : vector<512x3xf32>
    %200 = tpu.matmul %197, %199, %cst_188 {dimension_numbers = #tpu.dot_dimension_numbers<[1], [0], [0], [1], [0, 0, 1, 1], [], []>} : vector<512x64xbf16>, vector<64x3xbf16>, vector<512x3xf32> -> vector<512x3xf32>
    %201 = arith.addf %194, %200 : vector<512x3xf32>
    %c0_189 = arith.constant 0 : index
    %c2_190 = arith.constant 2 : index
    %c1_191 = arith.constant 1 : index
    %c0_192 = arith.constant 0 : index
    %202 = vector.load %arg16[%c0_189, %c2_190, %c1_191, %c0_192] : memref<2x18x18x64xf32, #tpu.memory_space<vmem>>, vector<2x16x16x64xf32>
    %203 = vector.shape_cast %202 : vector<2x16x16x64xf32> to vector<512x64xf32>
    %204 = arith.truncf %203 : vector<512x64xf32> to vector<512x64xbf16>
    %c7_193 = arith.constant 7 : index
    %c0_194 = arith.constant 0 : index
    %c0_195 = arith.constant 0 : index
    %205 = vector.load %arg10[%c7_193, %c0_194, %c0_195] : memref<9x64x3xbf16, #tpu.memory_space<vmem>>, vector<1x64x3xbf16>
    %206 = vector.shape_cast %205 : vector<1x64x3xbf16> to vector<64x3xbf16>
    %cst_196 = arith.constant dense<0.000000e+00> : vector<512x3xf32>
    %207 = tpu.matmul %204, %206, %cst_196 {dimension_numbers = #tpu.dot_dimension_numbers<[1], [0], [0], [1], [0, 0, 1, 1], [], []>} : vector<512x64xbf16>, vector<64x3xbf16>, vector<512x3xf32> -> vector<512x3xf32>
    %208 = arith.addf %201, %207 : vector<512x3xf32>
    %c0_197 = arith.constant 0 : index
    %c2_198 = arith.constant 2 : index
    %c2_199 = arith.constant 2 : index
    %c0_200 = arith.constant 0 : index
    %209 = vector.load %arg16[%c0_197, %c2_198, %c2_199, %c0_200] : memref<2x18x18x64xf32, #tpu.memory_space<vmem>>, vector<2x16x16x64xf32>
    %210 = vector.shape_cast %209 : vector<2x16x16x64xf32> to vector<512x64xf32>
    %211 = arith.truncf %210 : vector<512x64xf32> to vector<512x64xbf16>
    %c8_201 = arith.constant 8 : index
    %c0_202 = arith.constant 0 : index
    %c0_203 = arith.constant 0 : index
    %212 = vector.load %arg10[%c8_201, %c0_202, %c0_203] : memref<9x64x3xbf16, #tpu.memory_space<vmem>>, vector<1x64x3xbf16>
    %213 = vector.shape_cast %212 : vector<1x64x3xbf16> to vector<64x3xbf16>
    %cst_204 = arith.constant dense<0.000000e+00> : vector<512x3xf32>
    %214 = tpu.matmul %211, %213, %cst_204 {dimension_numbers = #tpu.dot_dimension_numbers<[1], [0], [0], [1], [0, 0, 1, 1], [], []>} : vector<512x64xbf16>, vector<64x3xbf16>, vector<512x3xf32> -> vector<512x3xf32>
    %215 = arith.addf %208, %214 : vector<512x3xf32>
    %216 = vector.broadcast %151 : vector<1x3xf32> to vector<512x3xf32>
    %217 = arith.addf %215, %216 : vector<512x3xf32>
    %218 = math.absf %217 : vector<512x3xf32>
    %cst_205 = arith.constant 0.000000e+00 : f32
    %219 = vector.broadcast %cst_205 : f32 to vector<512x3xf32>
    %220 = arith.subf %219, %218 : vector<512x3xf32>
    %221 = math.exp %220 : vector<512x3xf32>
    %cst_206 = arith.constant 1.000000e+00 : f32
    %222 = vector.broadcast %cst_206 : f32 to vector<512x3xf32>
    %223 = arith.addf %222, %221 : vector<512x3xf32>
    %224 = tpu.reciprocal %223 {approx = true} : vector<512x3xf32> -> vector<512x3xf32>
    %225 = arith.mulf %221, %224 : vector<512x3xf32>
    %cst_207 = arith.constant 0.000000e+00 : f32
    %226 = vector.broadcast %cst_207 : f32 to vector<512x3xf32>
    %227 = arith.cmpf oge, %217, %226 : vector<512x3xf32>
    %cst_208 = arith.constant 1.000000e+00 : f32
    %228 = vector.broadcast %cst_208 : f32 to vector<512x3xf32>
    %229 = arith.subf %228, %225 : vector<512x3xf32>
    %230 = arith.select %227, %229, %225 : vector<512x3xi1>, vector<512x3xf32>
    %231 = vector.shape_cast %230 : vector<512x3xf32> to vector<2x16x16x3xf32>
    %c0_209 = arith.constant 0 : index
    %c0_210 = arith.constant 0 : index
    %c0_211 = arith.constant 0 : index
    %c0_212 = arith.constant 0 : index
    %c0_213 = arith.constant 0 : index
    %232 = vector.load %arg13[%c0_209, %c0_210, %c0_211, %c0_212, %c0_213] : memref<1x2x16x16x3xf32, #tpu.memory_space<vmem>>, vector<1x2x16x16x3xf32>
    %233 = vector.shape_cast %232 : vector<1x2x16x16x3xf32> to vector<2x16x16x3xf32>
    %234 = vector.shape_cast %231 : vector<2x16x16x3xf32> to vector<1x2x16x16x3xf32>
    tpu.vector_store %arg13[%c0_209, %c0_210, %c0_211, %c0_212, %c0_213], %234 {strides = array<i32>} : memref<1x2x16x16x3xf32, #tpu.memory_space<vmem>>, vector<1x2x16x16x3xf32>,
    return
  }
  func.func @transform_0(%arg0: i32) -> (i32, i32, i32) {
    %c0_i32 = arith.constant 0 : i32
    %c0_i32_0 = arith.constant 0 : i32
    %c0_i32_1 = arith.constant 0 : i32
    return %arg0, %c0_i32, %c0_i32_0 : i32, i32, i32
  }
  func.func @transform_1(%arg0: i32) -> (i32, i32) {
    %c0_i32 = arith.constant 0 : i32
    %c0_i32_0 = arith.constant 0 : i32
    %c0_i32_1 = arith.constant 0 : i32
    return %c0_i32, %c0_i32_0 : i32, i32
  }
  func.func @transform_2(%arg0: i32) -> (i32, i32) {
    %c0_i32 = arith.constant 0 : i32
    %c0_i32_0 = arith.constant 0 : i32
    %c0_i32_1 = arith.constant 0 : i32
    return %c0_i32, %c0_i32_0 : i32, i32
  }
  func.func @transform_3(%arg0: i32) -> (i32, i32) {
    %c0_i32 = arith.constant 0 : i32
    %c0_i32_0 = arith.constant 0 : i32
    %c0_i32_1 = arith.constant 0 : i32
    return %c0_i32, %c0_i32_0 : i32, i32
  }
  func.func @transform_4(%arg0: i32) -> (i32, i32) {
    %c0_i32 = arith.constant 0 : i32
    %c0_i32_0 = arith.constant 0 : i32
    %c0_i32_1 = arith.constant 0 : i32
    return %c0_i32, %c0_i32_0 : i32, i32
  }
  func.func @transform_5(%arg0: i32) -> (i32, i32, i32) {
    %c0_i32 = arith.constant 0 : i32
    %c0_i32_0 = arith.constant 0 : i32
    %c0_i32_1 = arith.constant 0 : i32
    %c0_i32_2 = arith.constant 0 : i32
    return %c0_i32, %c0_i32_0, %c0_i32_1 : i32, i32, i32
  }
  func.func @transform_6(%arg0: i32) -> (i32, i32) {
    %c0_i32 = arith.constant 0 : i32
    %c0_i32_0 = arith.constant 0 : i32
    %c0_i32_1 = arith.constant 0 : i32
    return %c0_i32, %c0_i32_0 : i32, i32
  }
  func.func @transform_7(%arg0: i32) -> (i32, i32) {
    %c0_i32 = arith.constant 0 : i32
    %c0_i32_0 = arith.constant 0 : i32
    %c0_i32_1 = arith.constant 0 : i32
    return %c0_i32, %c0_i32_0 : i32, i32
  }
  func.func @transform_8(%arg0: i32) -> (i32, i32) {
    %c0_i32 = arith.constant 0 : i32
    %c0_i32_0 = arith.constant 0 : i32
    %c0_i32_1 = arith.constant 0 : i32
    return %c0_i32, %c0_i32_0 : i32, i32
  }
  func.func @transform_9(%arg0: i32) -> (i32, i32, i32) {
    %c0_i32 = arith.constant 0 : i32
    %c0_i32_0 = arith.constant 0 : i32
    %c0_i32_1 = arith.constant 0 : i32
    %c0_i32_2 = arith.constant 0 : i32
    return %c0_i32, %c0_i32_0, %c0_i32_1 : i32, i32, i32
  }
  func.func @transform_10(%arg0: i32) -> (i32, i32) {
    %c0_i32 = arith.constant 0 : i32
    %c0_i32_0 = arith.constant 0 : i32
    %c0_i32_1 = arith.constant 0 : i32
    return %c0_i32, %c0_i32_0 : i32, i32
  }
  func.func @transform_11(%arg0: i32) -> (i32, i32) {
    %c0_i32 = arith.constant 0 : i32
    %c0_i32_0 = arith.constant 0 : i32
    %c0_i32_1 = arith.constant 0 : i32
    return %c0_i32, %c0_i32_0 : i32, i32
  }
  func.func @transform_12(%arg0: i32) -> (i32, i32, i32, i32, i32) {
    %c0_i32 = arith.constant 0 : i32
    %c0_i32_0 = arith.constant 0 : i32
    %c0_i32_1 = arith.constant 0 : i32
    %c0_i32_2 = arith.constant 0 : i32
    %c0_i32_3 = arith.constant 0 : i32
    return %arg0, %c0_i32, %c0_i32_0, %c0_i32_1, %c0_i32_2 : i32, i32, i32, i32, i32
  }
}

</mosaic_0001>

<bundles_post_ra>
// kernel: autoencoder_forward.1
= control target key start
LH: loop header
LB: loop body
LE: loop exit
PB: predicated region body
PF: predicated region fallthrough
CT: control target
= control target key end

     0   :  { %vm286_vm0 = vcmask 261120   ;;  %vm618_vm1 = vcmask 523264   ;;  %vm1305_vm5 = vcmask 517120   ;;  %vm8278_vm9 = vcmask 23552   ;;  %s15493_s1 = inlined_call_operand.vmem [shape: bf16[32,64], index: 1, kind: input, shape index: {}]   ;;  %s15494_s2 = inlined_call_operand.vmem [shape: f32[1,64], index: 2, kind: input, shape index: {}]   ;;  %s15495_s4 = inlined_call_operand.vmem [shape: f32[1,64], index: 4, kind: input, shape index: {}]   ;;  %s15496_s0 = inlined_call_operand.vmem [shape: bf16[1,512,32], index: 0, kind: input, shape index: {}]   ;;  %s15497_s3 = inlined_call_operand.vmem [shape: f32[1,64], index: 3, kind: input, shape index: {}]   ;;  %s15498_s5 = inlined_call_operand.vmem [shape: bf16[9,64,64], index: 5, kind: input, shape index: {}]   ;;  %s15499_s6 = inlined_call_operand.vmem [shape: f32[1,64], index: 6, kind: input, shape index: {}]   ;;  %s15500_s8 = inlined_call_operand.vmem [shape: f32[1,64], index: 8, kind: input, shape index: {}]   ;;  %s15501_s7 = inlined_call_operand.vmem [shape: f32[1,64], index: 7, kind: input, shape index: {}]   ;;  %s15502_s11 = inlined_call_operand.vmem [shape: bf16[256,64], index: 11, kind: input, shape index: {}]   ;;  %s15503_s9 = inlined_call_operand.vmem [shape: bf16[9,64,3], index: 9, kind: input, shape index: {}]   ;;  %s15504_s10 = inlined_call_operand.vmem [shape: f32[1,3], index: 10, kind: input, shape index: {}]   ;;  %s15505_s12 = inlined_call_operand.vmem [shape: f32[1,2,16,16,3], index: 12, kind: output, shape index: {}]  }
   0x1   :  { %v9484_v0 = vld [vmem:[%s15493_s1 + $0x8] sm:$0xff]  ;;  %v9483_v1 = vld [vmem:[%s15493_s1] sm:$0xff]  ;;  %v9453_v4 = vld [vmem:[%s15496_s0 + $0x10] sm:$0xff] }
   0x2   :  { %389 = vmatpush.bf16.msra.mxu0 %v9484_v0  ;;  %9589 = vmatpush.bf16.msra.mxu1 %v9484_v0  ;;  %v9451_v2 = vld [vmem:[%s15496_s0] sm:$0xff]  ;;  %v9452_v3 = vld [vmem:[%s15496_s0 + $0x8] sm:$0xff]  ;;  %v9454_v5 = vld [vmem:[%s15496_s0 + $0x18] sm:$0xff] }
   0x3   :  { %v9455_v6 = vld [vmem:[%s15496_s0 + $0x20] sm:$0xff]  ;;  %v9456_v7 = vld [vmem:[%s15496_s0 + $0x28] sm:$0xff]  ;;  %v9457_v8 = vld [vmem:[%s15496_s0 + $0x30] sm:$0xff] }
   0x4   :  { %v9458_v9 = vld [vmem:[%s15496_s0 + $0x38] sm:$0xff]  ;;  %v9459_v10 = vld [vmem:[%s15496_s0 + $0x40] sm:$0xff]  ;;  %v9460_v13 = vld [vmem:[%s15496_s0 + $0x48] sm:$0xff] }
   0x5   :  { %v9461_v16 = vld [vmem:[%s15496_s0 + $0x50] sm:$0xff]  ;;  %v9462_v19 = vld [vmem:[%s15496_s0 + $0x58] sm:$0xff]  ;;  %v9463_v22 = vld [vmem:[%s15496_s0 + $0x60] sm:$0xff] }
   0x6   :  { %390 = vmatpush.bf16.msra.mxu0 %v9483_v1  ;;  %9590 = vmatpush.bf16.msra.mxu1 %v9483_v1  ;;  %v9464_v25 = vld [vmem:[%s15496_s0 + $0x68] sm:$0xff]  ;;  %v9465_v28 = vld [vmem:[%s15496_s0 + $0x70] sm:$0xff]  ;;  %v9466_v31 = vld [vmem:[%s15496_s0 + $0x78] sm:$0xff] }
   0x7   :  { %v9467_v34 = vld [vmem:[%s15496_s0 + $0x80] sm:$0xff]  ;;  %v9468_v37 = vld [vmem:[%s15496_s0 + $0x88] sm:$0xff]  ;;  %v9469_v40 = vld [vmem:[%s15496_s0 + $0x90] sm:$0xff] }
   0x8   :  { %v9470_v43 = vld [vmem:[%s15496_s0 + $0x98] sm:$0xff]  ;;  %v9471_v46 = vld [vmem:[%s15496_s0 + $0xa0] sm:$0xff]  ;;  %v9472_v49 = vld [vmem:[%s15496_s0 + $0xa8] sm:$0xff] }
   0x9   :  { %8483 = vmatmul.msk.bf16.vlgmr.msra.gmra.mxu0 %vm286_vm0, %v9451_v2  ;;  %v9473_v52 = vld [vmem:[%s15496_s0 + $0xb0] sm:$0xff]  ;;  %v9474_v55 = vld [vmem:[%s15496_s0 + $0xb8] sm:$0xff]  ;;  %v9475_v58 = vld [vmem:[%s15496_s0 + $0xc0] sm:$0xff] }
   0xa   :  { %v9480_v60 = vld [vmem:[%s15496_s0 + $0xe8] sm:$0xff]  ;;  %v9481_v0 = vld [vmem:[%s15496_s0 + $0xf0] sm:$0xff] }
   0xb   :  { %8512 = vmatmul.msk.bf16.vlgmr.msra.gmra.mxu1 %vm286_vm0, %v9480_v60  ;;  %v9476_v62 = vld [vmem:[%s15496_s0 + $0xc8] sm:$0xff]  ;;  %v9477_v2 = vld [vmem:[%s15496_s0 + $0xd0] sm:$0xff] }
  0x19   :  { %8484 = vmatmul.msk.bf16.gmra.mxu0 %vm286_vm0, %v9452_v3 }
  0x1b   :  { %8513 = vmatmul.msk.bf16.gmra.mxu1 %vm286_vm0, %v9481_v0 }
  0x29   :  { %8485 = vmatmul.msk.bf16.gmra.mxu0 %vm286_vm0, %v9453_v4  ;;  %v9482_v4 = vld [vmem:[%s15496_s0 + $0xf8] sm:$0xff] }
  0x2b   :  { %8514 = vmatmul.msk.bf16.gmra.mxu1 %vm286_vm0, %v9482_v4 }
  0x39   :  { %8486 = vmatmul.msk.bf16.gmra.mxu0 %vm286_vm0, %v9454_v5 }
  0x49   :  { %8487 = vmatmul.msk.bf16.gmra.mxu0 %vm286_vm0, %v9455_v6  ;;  %v9478_v6 = vld [vmem:[%s15496_s0 + $0xd8] sm:$0xff] }
  0x59   :  { %8488 = vmatmul.msk.bf16.gmra.mxu0 %vm286_vm0, %v9456_v7 }
  0x69   :  { %8489 = vmatmul.msk.bf16.gmra.mxu0 %vm286_vm0, %v9457_v8 }
  0x79   :  { %8490 = vmatmul.msk.bf16.gmra.mxu0 %vm286_vm0, %v9458_v9  ;;  %v9479_v9 = vld [vmem:[%s15496_s0 + $0xe0] sm:$0xff] }
  0x86   :  { %v9970_v11 = vpop.f32.mrf.mxu0 }
  0x89   :  { %8491 = vmatmul.msk.bf16.gmra.mxu0 %vm286_vm0, %v9459_v10 }
  0x8e   :  { %v9973_v12 = vpop.f32.mrf.mxu0 }
  0x96   :  { %v9978_v14 = vpop.f32.mrf.mxu0 }
  0x99   :  { %8492 = vmatmul.msk.bf16.gmra.mxu0 %vm286_vm0, %v9460_v13 }
  0x9e   :  { %v9981_v15 = vpop.f32.mrf.mxu0 }
  0xa6   :  { %v9986_v17 = vpop.f32.mrf.mxu0 }
  0xa9   :  { %8493 = vmatmul.msk.bf16.gmra.mxu0 %vm286_vm0, %v9461_v16 }
  0xae   :  { %v9989_v18 = vpop.f32.mrf.mxu0 }
  0xb6   :  { %v9994_v20 = vpop.f32.mrf.mxu0 }
  0xb9   :  { %8494 = vmatmul.msk.bf16.gmra.mxu0 %vm286_vm0, %v9462_v19  ;;  %v10152_v19 = vld [vmem:[%s15494_s2] ss:$0 sm:$0xff] }
  0xbe   :  { %v9997_v21 = vpop.f32.mrf.mxu0 }
  0xbf   :  { %v10204_v60 = vadd.f32 %v10152_v19, %v9997_v21 }
  0xc1   :  { %v15508_v21 = vmax.f32 %v10204_v60, 0.0 }
  0xc6   :  { %v10002_v23 = vpop.f32.mrf.mxu0 }
  0xc7   :  { %v10214_v4 = vadd.f32 %v10152_v19, %v10002_v23 }
  0xc9   :  { %8495 = vmatmul.msk.bf16.gmra.mxu0 %vm286_vm0, %v9463_v22  ;;  %v10156_v22 = vadd.f32 %v10152_v19, %v9973_v12 }
  0xce   :  { %v10005_v24 = vpop.f32.mrf.mxu0 }
  0xd6   :  { %v10010_v26 = vpop.f32.mrf.mxu0 }
  0xd7   :  { %v10230_v23 = vadd.f32 %v10152_v19, %v10010_v26 }
  0xd9   :  { %8496 = vmatmul.msk.bf16.gmra.mxu0 %vm286_vm0, %v9464_v25  ;;  %v10160_v25 = vadd.f32 %v10152_v19, %v9970_v11  ;;  %v10177_v11 = vadd.f32 %v10152_v19, %v9986_v17  ;;  %v15512_v26 = vmax.f32 %v10230_v23, 0.0 }
  0xde   :  { %v10013_v27 = vpop.f32.mrf.mxu0 }
  0xe6   :  { %v10018_v29 = vpop.f32.mrf.mxu0 }
  0xe9   :  { %8497 = vmatmul.msk.bf16.gmra.mxu0 %vm286_vm0, %v9465_v28  ;;  %v10164_v28 = vadd.f32 %v10152_v19, %v9978_v14 }
  0xeb   :  { %v15520_v12 = vmax.f32 %v10164_v28, 0.0 }
  0xed   :  { %v622_v17 = vsel %vm618_vm1, %v15520_v12, 0.0 }
  0xee   :  { %v10021_v30 = vpop.f32.mrf.mxu0 }
  0xf6   :  { %v10026_v32 = vpop.f32.mrf.mxu0 }
  0xf9   :  { %8498 = vmatmul.msk.bf16.gmra.mxu0 %vm286_vm0, %v9466_v31  ;;  %v15525_v31 = vmax.f32 %v10156_v22, 0.0 }
  0xfb   :  { %v620_v14 = vsel %vm618_vm1, %v15525_v31, 0.0 }
  0xfe   :  { %v10029_v33 = vpop.f32.mrf.mxu0 }
 0x106   :  { %v10034_v35 = vpop.f32.mrf.mxu0 }
 0x109   :  { %8499 = vmatmul.msk.bf16.gmra.mxu0 %vm286_vm0, %v9467_v34  ;;  %v10169_v34 = vadd.f32 %v10152_v19, %v9981_v15  ;;  %v10185_v15 = vadd.f32 %v10152_v19, %v9989_v18 }
 0x10e   :  { %v10037_v36 = vpop.f32.mrf.mxu0 }
 0x116   :  { %v10042_v38 = vpop.f32.mrf.mxu0 }
 0x119   :  { %8500 = vmatmul.msk.bf16.gmra.mxu0 %vm286_vm0, %v9468_v37 }
 0x11e   :  { %v10045_v39 = vpop.f32.mrf.mxu0 }
 0x126   :  { %v10050_v41 = vpop.f32.mrf.mxu0 }
 0x129   :  { %8501 = vmatmul.msk.bf16.gmra.mxu0 %vm286_vm0, %v9469_v40  ;;  %v15530_v40 = vmax.f32 %v10160_v25, 0.0 }
 0x12e   :  { %v10053_v42 = vpop.f32.mrf.mxu0 }
 0x136   :  { %v10058_v44 = vpop.f32.mrf.mxu0 }
 0x139   :  { %8502 = vmatmul.msk.bf16.gmra.mxu0 %vm286_vm0, %v9470_v43  ;;  %v15515_v43 = vmax.f32 %v10169_v34, 0.0 }
 0x13b   :  { %v624_v18 = vsel %vm618_vm1, %v15515_v43, 0.0 }
 0x13e   :  { %v10061_v45 = vpop.f32.mrf.mxu0 }
 0x146   :  { %v10066_v47 = vpop.f32.mrf.mxu0 }
 0x149   :  { %8503 = vmatmul.msk.bf16.gmra.mxu0 %vm286_vm0, %v9471_v46  ;;  %v619_v46 = vsel %vm618_vm1, %v15530_v40, 0.0 }
 0x14e   :  { %v10069_v48 = vpop.f32.mrf.mxu0 }
 0x156   :  { %v10074_v50 = vpop.f32.mrf.mxu0 }
 0x159   :  { %8504 = vmatmul.msk.bf16.gmra.mxu0 %vm286_vm0, %v9472_v49  ;;  %v15510_v49 = vmax.f32 %v10177_v11, 0.0 }
 0x15e   :  { %v10077_v51 = vpop.f32.mrf.mxu0 }
 0x166   :  { %v10082_v53 = vpop.f32.mrf.mxu0 }
 0x169   :  { %8505 = vmatmul.msk.bf16.gmra.mxu0 %vm286_vm0, %v9473_v52  ;;  %v10196_v52 = vadd.f32 %v10152_v19, %v9994_v20 }
 0x16b   :  { %v15507_v20 = vmax.f32 %v10196_v52, 0.0 }
 0x16e   :  { %v10085_v54 = vpop.f32.mrf.mxu0 }
 0x176   :  { %v10090_v56 = vpop.f32.mrf.mxu0 }
 0x179   :  { %8506 = vmatmul.msk.bf16.gmra.mxu0 %vm286_vm0, %v9474_v55  ;;  %v621_v55 = vadd.f32 %v620_v14, %v619_v46  ;;  %v10222_v14 = vadd.f32 %v10152_v19, %v10005_v24  ;;  %v10238_v24 = vadd.f32 %v10152_v19, %v10013_v27 }
 0x17b   :  { %v15513_v27 = vmax.f32 %v10238_v24, 0.0 }
 0x17e   :  { %v10093_v57 = vpop.f32.mrf.mxu0 }
 0x186   :  { %v10098_v59 = vpop.f32.mrf.mxu0 }
 0x189   :  { %8507 = vmatmul.msk.bf16.gmra.mxu0 %vm286_vm0, %v9475_v58  ;;  %v15506_v58 = vmax.f32 %v10185_v15, 0.0 }
 0x18e   :  { %v10105_v61 = vpop.f32.mrf.mxu0 }
 0x196   :  { %v10110_v63 = vpop.f32.mrf.mxu0 }
 0x199   :  { %8508 = vmatmul.msk.bf16.gmra.mxu0 %vm286_vm0, %v9476_v62  ;;  %v623_v62 = vadd.f32 %v622_v17, %v621_v55  ;;  %v630_v17 = vsel %vm618_vm1, %v15507_v20, 0.0  ;;  %v15509_v55 = vmax.f32 %v10214_v4, 0.0 }
 0x19b   :  { %v634_v20 = vsel %vm618_vm1, %v15509_v55, 0.0  ;;  %v638_v55 = vsel %vm618_vm1, %v15512_v26, 0.0 }
 0x19e   :  { %v10117_v1 = vpop.f32.mrf.mxu0 }
 0x1a6   :  { %v10122_v3 = vpop.f32.mrf.mxu0 }
 0x1a9   :  { %8509 = vmatmul.msk.bf16.gmra.mxu0 %vm286_vm0, %v9477_v2  ;;  %v626_v2 = vsel %vm618_vm1, %v15510_v49, 0.0 }
 0x1ae   :  { %v10129_v5 = vpop.f32.mrf.mxu0 }
 0x1b6   :  { %v10134_v7 = vpop.f32.mrf.mxu0 }
 0x1b9   :  { %8510 = vmatmul.msk.bf16.gmra.mxu0 %vm286_vm0, %v9478_v6  ;;  %v625_v6 = vadd.f32 %v624_v18, %v623_v62  ;;  %v632_v62 = vsel %vm618_vm1, %v15508_v21, 0.0 }
 0x1bb   :  { %v627_v46 = vadd.f32 %v626_v2, %v625_v6 }
 0x1be   :  { %v10137_v8 = vpop.f32.mrf.mxu0 }
 0x1c6   :  { %v10142_v10 = vpop.f32.mrf.mxu0 }
 0x1c9   :  { %8511 = vmatmul.msk.bf16.gmra.mxu0 %vm286_vm0, %v9479_v9  ;;  %v628_v9 = vsel %vm618_vm1, %v15506_v58, 0.0  ;;  %v15511_v58 = vmax.f32 %v10222_v14, 0.0 }
 0x1ca   :  { %v629_v18 = vadd.f32 %v628_v9, %v627_v46  ;;  %v10248_v9 = vadd.f32 %v10152_v19, %v10018_v29  ;;  %v10264_v29 = vadd.f32 %v10152_v19, %v10026_v32 }
 0x1cb   :  { %v636_v21 = vsel %vm618_vm1, %v15511_v58, 0.0 }
 0x1cc   :  { %v631_v2 = vadd.f32 %v630_v17, %v629_v18  ;;  %v10256_v17 = vadd.f32 %v10152_v19, %v10021_v30  ;;  %v15514_v49 = vmax.f32 %v10248_v9, 0.0  ;;  %v10272_v30 = vadd.f32 %v10152_v19, %v10029_v33 }
 0x1cd   :  { %v15517_v32 = vmax.f32 %v10264_v29, 0.0 }
 0x1ce   :  { %v10145_v13 = vpop.f32.mrf.mxu0  ;;  %v633_v46 = vadd.f32 %v632_v62, %v631_v2  ;;  %v640_v2 = vsel %vm618_vm1, %v15513_v27, 0.0  ;;  %v15516_v58 = vmax.f32 %v10256_v17, 0.0  ;;  %v642_v26 = vsel %vm618_vm1, %v15514_v49, 0.0 }
 0x1cf   :  { %v15518_v33 = vmax.f32 %v10272_v30, 0.0  ;;  %v646_v49 = vsel %vm618_vm1, %v15517_v32, 0.0 }
 0x1d0   :  { %v635_v18 = vadd.f32 %v634_v20, %v633_v46  ;;  %v644_v27 = vsel %vm618_vm1, %v15516_v58, 0.0 }
 0x1d2   :  { %v637_v62 = vadd.f32 %v636_v21, %v635_v18  ;;  %v10282_v21 = vadd.f32 %v10152_v19, %v10034_v35  ;;  %v10298_v35 = vadd.f32 %v10152_v19, %v10042_v38 }
 0x1d4   :  { %v639_v20 = vadd.f32 %v638_v55, %v637_v62  ;;  %v10290_v55 = vadd.f32 %v10152_v19, %v10037_v36  ;;  %v15519_v43 = vmax.f32 %v10282_v21, 0.0  ;;  %v10306_v36 = vadd.f32 %v10152_v19, %v10045_v39 }
 0x1d5   :  { %v15522_v38 = vmax.f32 %v10298_v35, 0.0 }
 0x1d6   :  { %v10147_v16 = vpop.f32.mrf.mxu0  ;;  %v641_v18 = vadd.f32 %v640_v2, %v639_v20  ;;  %v648_v20 = vsel %vm618_vm1, %v15518_v33, 0.0  ;;  %v15521_v58 = vmax.f32 %v10290_v55, 0.0  ;;  %v650_v32 = vsel %vm618_vm1, %v15519_v43, 0.0 }
 0x1d7   :  { %v15523_v39 = vmax.f32 %v10306_v36, 0.0  ;;  %v654_v43 = vsel %vm618_vm1, %v15522_v38, 0.0 }
 0x1d8   :  { %v643_v62 = vadd.f32 %v642_v26, %v641_v18  ;;  %v652_v33 = vsel %vm618_vm1, %v15521_v58, 0.0 }
 0x1da   :  { %v645_v2 = vadd.f32 %v644_v27, %v643_v62  ;;  %v10316_v27 = vadd.f32 %v10152_v19, %v10050_v41  ;;  %v10332_v41 = vadd.f32 %v10152_v19, %v10058_v44 }
 0x1dc   :  { %v647_v26 = vadd.f32 %v646_v49, %v645_v2  ;;  %v10324_v49 = vadd.f32 %v10152_v19, %v10053_v42  ;;  %v15524_v12 = vmax.f32 %v10316_v27, 0.0  ;;  %v10340_v42 = vadd.f32 %v10152_v19, %v10061_v45 }
 0x1dd   :  { %v15527_v44 = vmax.f32 %v10332_v41, 0.0 }
 0x1de   :  { %v10171_v37 = vpop.f32.mrf.mxu0  ;;  %v649_v62 = vadd.f32 %v648_v20, %v647_v26  ;;  %v656_v26 = vsel %vm618_vm1, %v15523_v39, 0.0  ;;  %v15526_v58 = vmax.f32 %v10324_v49, 0.0  ;;  %v658_v38 = vsel %vm618_vm1, %v15524_v12, 0.0 }
 0x1df   :  { %v15528_v45 = vmax.f32 %v10340_v42, 0.0  ;;  %v662_v12 = vsel %vm618_vm1, %v15527_v44, 0.0 }
 0x1e0   :  { %v651_v2 = vadd.f32 %v650_v32, %v649_v62  ;;  %v660_v39 = vsel %vm618_vm1, %v15526_v58, 0.0 }
 0x1e2   :  { %v653_v20 = vadd.f32 %v652_v33, %v651_v2  ;;  %v10350_v33 = vadd.f32 %v10152_v19, %v10066_v47  ;;  %v10366_v47 = vadd.f32 %v10152_v19, %v10074_v50 }
 0x1e4   :  { %v655_v32 = vadd.f32 %v654_v43, %v653_v20  ;;  %v10358_v43 = vadd.f32 %v10152_v19, %v10069_v48  ;;  %v15529_v31 = vmax.f32 %v10350_v33, 0.0  ;;  %v10374_v48 = vadd.f32 %v10152_v19, %v10077_v51 }
 0x1e5   :  { %v15532_v50 = vmax.f32 %v10366_v47, 0.0 }
 0x1e6   :  { %v10206_v0 = vpop.f32.mrf.mxu0  ;;  %v657_v2 = vadd.f32 %v656_v26, %v655_v32  ;;  %v664_v32 = vsel %vm618_vm1, %v15528_v45, 0.0  ;;  %v15531_v58 = vmax.f32 %v10358_v43, 0.0  ;;  %v666_v44 = vsel %vm618_vm1, %v15529_v31, 0.0 }
 0x1e7   :  { %v15533_v51 = vmax.f32 %v10374_v48, 0.0  ;;  %v670_v31 = vsel %vm618_vm1, %v15532_v50, 0.0 }
 0x1e8   :  { %v659_v20 = vadd.f32 %v658_v38, %v657_v2  ;;  %v668_v45 = vsel %vm618_vm1, %v15531_v58, 0.0 }
 0x1ea   :  { %v661_v26 = vadd.f32 %v660_v39, %v659_v20  ;;  %v10384_v39 = vadd.f32 %v10152_v19, %v10082_v53  ;;  %v10400_v53 = vadd.f32 %v10152_v19, %v10090_v56 }
 0x1ec   :  { %v663_v38 = vadd.f32 %v662_v12, %v661_v26  ;;  %15609 = vst [vmem:[#allocation5_spill] sm:$0xff] %v10384_v39  ;;  %v10392_v12 = vadd.f32 %v10152_v19, %v10085_v54  ;;  %v15534_v40 = vmax.f32 %v10384_v39, 0.0  ;;  %v10408_v54 = vadd.f32 %v10152_v19, %v10093_v57 }
 0x1ed   :  { %v15537_v56 = vmax.f32 %v10400_v53, 0.0 }
 0x1ee   :  { %v10240_v6 = vpop.f32.mrf.mxu0  ;;  %v665_v20 = vadd.f32 %v664_v32, %v663_v38  ;;  %v672_v38 = vsel %vm618_vm1, %v15533_v51, 0.0  ;;  %v15536_v58 = vmax.f32 %v10392_v12, 0.0  ;;  %v674_v50 = vsel %vm618_vm1, %v15534_v40, 0.0 }
 0x1ef   :  { %v15538_v57 = vmax.f32 %v10408_v54, 0.0  ;;  %v678_v40 = vsel %vm618_vm1, %v15537_v56, 0.0 }
 0x1f0   :  { %v667_v26 = vadd.f32 %v666_v44, %v665_v20  ;;  %v676_v51 = vsel %vm618_vm1, %v15536_v58, 0.0 }
 0x1f2   :  { %v669_v32 = vadd.f32 %v668_v45, %v667_v26  ;;  %v10418_v45 = vadd.f32 %v10152_v19, %v10098_v59  ;;  %v10434_v59 = vadd.f32 %v10152_v19, %v10110_v63 }
 0x1f4   :  { %v671_v44 = vadd.f32 %v670_v31, %v669_v32  ;;  %15610 = vst [vmem:[#allocation6_spill] sm:$0xff] %v10418_v45  ;;  %v10426_v31 = vadd.f32 %v10152_v19, %v10105_v61  ;;  %v15540_v39 = vmax.f32 %v10418_v45, 0.0  ;;  %v10442_v61 = vadd.f32 %v10152_v19, %v10117_v1  ;;  %v10462_v45 = vpop.f32.mrf.mxu1 }
 0x1f5   :  { %15611 = vst [vmem:[#allocation7_spill] sm:$0xff] %v10434_v59  ;;  %v15543_v63 = vmax.f32 %v10434_v59, 0.0 }
 0x1f6   :  { %v10274_v46 = vpop.f32.mrf.mxu0  ;;  %v673_v26 = vadd.f32 %v672_v38, %v671_v44  ;;  %v680_v44 = vsel %vm618_vm1, %v15538_v57, 0.0  ;;  %v15541_v58 = vmax.f32 %v10426_v31, 0.0  ;;  %v682_v56 = vsel %vm618_vm1, %v15540_v39, 0.0 }
 0x1f7   :  { %v15544_v1 = vmax.f32 %v10442_v61, 0.0  ;;  %v686_v39 = vsel %vm618_vm1, %v15543_v63, 0.0 }
 0x1f8   :  { %v675_v32 = vadd.f32 %v674_v50, %v673_v26  ;;  %v684_v57 = vsel %vm618_vm1, %v15541_v58, 0.0 }
 0x1f9   :  { %v688_v58 = vsel %vm618_vm1, %v15544_v1, 0.0 }
 0x1fa   :  { %v677_v38 = vadd.f32 %v676_v51, %v675_v32  ;;  %v10452_v51 = vadd.f32 %v10152_v19, %v10122_v3 }
 0x1fc   :  { %v679_v50 = vadd.f32 %v678_v40, %v677_v38  ;;  %15612 = vst [vmem:[#allocation8_spill] sm:$0xff] %v10452_v51  ;;  %v10460_v40 = vadd.f32 %v10152_v19, %v10129_v5  ;;  %v15545_v3 = vmax.f32 %v10452_v51, 0.0 }
 0x1fe   :  { %v10308_v18 = vpop.f32.mrf.mxu0  ;;  %v681_v32 = vadd.f32 %v680_v44, %v679_v50  ;;  %v10470_v44 = vadd.f32 %v10152_v19, %v10134_v7  ;;  %v15547_v5 = vmax.f32 %v10460_v40, 0.0  ;;  %v690_v63 = vsel %vm618_vm1, %v15545_v3, 0.0 }
 0x200   :  { %v683_v38 = vadd.f32 %v682_v56, %v681_v32  ;;  %v10478_v56 = vadd.f32 %v10152_v19, %v10137_v8  ;;  %v15548_v7 = vmax.f32 %v10470_v44, 0.0  ;;  %v692_v1 = vsel %vm618_vm1, %v15547_v5, 0.0 }
 0x202   :  { %v685_v50 = vadd.f32 %v684_v57, %v683_v38  ;;  %15613 = vst [vmem:[#allocation9_spill] sm:$0xff] %v10478_v56  ;;  %v10486_v57 = vadd.f32 %v10152_v19, %v10142_v10  ;;  %v15550_v8 = vmax.f32 %v10478_v56, 0.0  ;;  %v694_v3 = vsel %vm618_vm1, %v15548_v7, 0.0 }
 0x203   :  { %v10502_v10 = vadd.f32 %v10152_v19, %v10147_v16 }
 0x204   :  { %v687_v32 = vadd.f32 %v686_v39, %v685_v50  ;;  %15614 = vst [vmem:[#allocation10_spill] sm:$0xff] %v10486_v57  ;;  %v10494_v39 = vadd.f32 %v10152_v19, %v10145_v13  ;;  %v15551_v51 = vmax.f32 %v10486_v57, 0.0  ;;  %v696_v5 = vsel %vm618_vm1, %v15550_v8, 0.0 }
 0x205   :  { %15615 = vst [vmem:[#allocation11_spill] sm:$0xff] %v10502_v10 }
 0x206   :  { %v10342_v62 = vpop.f32.mrf.mxu0  ;;  %v689_v38 = vadd.f32 %v688_v58, %v687_v32  ;;  %v10504_v32 = vpop.f32.mrf.mxu1  ;;  %v15553_v13 = vmax.f32 %v10494_v39, 0.0  ;;  %v698_v16 = vsel %vm618_vm1, %v15551_v51, 0.0 }
 0x208   :  { %v691_v50 = vadd.f32 %v690_v63, %v689_v38  ;;  %v10512_v63 = vadd.f32 %v10152_v19, %v10171_v37  ;;  %v700_v8 = vsel %vm618_vm1, %v15553_v13, 0.0 }
 0x20a   :  { %v693_v58 = vadd.f32 %v692_v1, %v691_v50  ;;  %v15554_v1 = vmax.f32 %v10502_v10, 0.0  ;;  %v10520_v50 = vadd.f32 %v10152_v19, %v10206_v0  ;;  %v15556_v37 = vmax.f32 %v10512_v63, 0.0 }
 0x20b   :  { %v10536_v0 = vadd.f32 %v10152_v19, %v10274_v46 }
 0x20c   :  { %v695_v38 = vadd.f32 %v694_v3, %v693_v58  ;;  %15616 = vst [vmem:[#allocation12_spill] sm:$0xff] %v10520_v50  ;;  %v10528_v3 = vadd.f32 %v10152_v19, %v10240_v6  ;;  %v702_v51 = vsel %vm618_vm1, %v15554_v1, 0.0  ;;  %v15557_v57 = vmax.f32 %v10520_v50, 0.0 }
 0x20d   :  { %v10544_v6 = vadd.f32 %v10152_v19, %v10308_v18  ;;  %v15560_v46 = vmax.f32 %v10536_v0, 0.0 }
 0x20e   :  { %v10376_v2 = vpop.f32.mrf.mxu0  ;;  %v697_v56 = vadd.f32 %v696_v5, %v695_v38  ;;  %v704_v38 = vsel %vm618_vm1, %v15556_v37, 0.0  ;;  %v15559_v13 = vmax.f32 %v10528_v3, 0.0  ;;  %v542_v1 = vpop.f32.mrf.mxu1  ;;  %v706_v10 = vsel %vm618_vm1, %v15557_v57, 0.0 }
 0x20f   :  { %15617 = vst [vmem:[#allocation13_spill] sm:$0xff] %v10544_v6  ;;  %v15562_v18 = vmax.f32 %v10544_v6, 0.0  ;;  %v710_v57 = vsel %vm618_vm1, %v15560_v46, 0.0 }
 0x210   :  { %v699_v58 = vadd.f32 %v698_v16, %v697_v56  ;;  %v708_v37 = vsel %vm618_vm1, %v15559_v13, 0.0 }
 0x212   :  { %v701_v5 = vadd.f32 %v700_v8, %v699_v58  ;;  %v10552_v8 = vadd.f32 %v10152_v19, %v10342_v62 }
 0x214   :  { %v703_v56 = vadd.f32 %v702_v51, %v701_v5  ;;  %15618 = vst [vmem:[#allocation14_spill] sm:$0xff] %v10552_v8  ;;  %v10560_v51 = vadd.f32 %v10152_v19, %v10376_v2  ;;  %v15563_v50 = vmax.f32 %v10552_v8, 0.0 }
 0x216   :  { %v10410_v20 = vpop.f32.mrf.mxu0  ;;  %v705_v58 = vadd.f32 %v704_v38, %v703_v56  ;;  %15619 = vst [vmem:[#allocation15_spill] sm:$0xff] %v10560_v51  ;;  %v712_v56 = vsel %vm618_vm1, %v15562_v18, 0.0  ;;  %v15565_v13 = vmax.f32 %v10560_v51, 0.0  ;;  %v714_v46 = vsel %vm618_vm1, %v15563_v50, 0.0  ;;  %v544_v6 = vpop.f32.mrf.mxu1 }
 0x217   :  { %v10568_v62 = vadd.f32 %v10152_v19, %v10410_v20 }
 0x218   :  { %v707_v5 = vadd.f32 %v706_v10, %v705_v58  ;;  %v716_v18 = vsel %vm618_vm1, %v15565_v13, 0.0 }
 0x219   :  { %15620 = vst [vmem:[#allocation16_spill] sm:$0xff] %v10568_v62  ;;  %v15567_v20 = vmax.f32 %v10568_v62, 0.0 }
 0x21a   :  { %v709_v38 = vadd.f32 %v708_v37, %v707_v5 }
 0x21b   :  { %v718_v50 = vsel %vm618_vm1, %v15567_v20, 0.0 }
 0x21c   :  { %v711_v10 = vadd.f32 %v710_v57, %v709_v38 }
 0x21e   :  { %v10444_v26 = vpop.f32.mrf.mxu0  ;;  %v713_v5 = vadd.f32 %v712_v56, %v711_v10 }
 0x21f   :  { %v10576_v2 = vadd.f32 %v10152_v19, %v10444_v26 }
 0x220   :  { %v715_v38 = vadd.f32 %v714_v46, %v713_v5 }
 0x221   :  { %15621 = vst [vmem:[#allocation17_spill] sm:$0xff] %v10576_v2  ;;  %v15569_v26 = vmax.f32 %v10576_v2, 0.0  ;;  %v547_v2 = vpop.f32.mrf.mxu1 }
 0x222   :  { %v717_v56 = vadd.f32 %v716_v18, %v715_v38 }
 0x223   :  { %v720_v10 = vsel %vm618_vm1, %v15569_v26, 0.0 }
 0x224   :  { %v719_v51 = vadd.f32 %v718_v50, %v717_v56 }
 0x226   :  { %v522_v59 = vpop.f32.mrf.mxu0  ;;  %v721_v62 = vadd.f32 %v720_v10, %v719_v51 }
 0x227   :  { %v10583_v37 = vadd.f32 %v10152_v19, %v522_v59 }
 0x229   :  { %v15571_v8 = vmax.f32 %v10583_v37, 0.0 }
 0x22b   :  { %v722_v5 = vsel %vm618_vm1, %v15571_v8, 0.0  ;;  %v10617_v8 = vadd.f32 %v10152_v19, %v10462_v45 }
 0x22c   :  { %v723_v26 = vadd.f32 %v722_v5, %v721_v62 }
 0x22e   :  { %v524_v7 = vpop.f32.mrf.mxu0 }
 0x22f   :  { %v10590_v57 = vadd.f32 %v10152_v19, %v524_v7 }
 0x231   :  { %v15572_v13 = vmax.f32 %v10590_v57, 0.0 }
 0x233   :  { %v724_v18 = vsel %vm618_vm1, %v15572_v13, 0.0  ;;  %v10622_v13 = vadd.f32 %v10152_v19, %v10504_v32 }
 0x234   :  { %v725_v56 = vadd.f32 %v724_v18, %v723_v26  ;;  %v10628_v26 = vadd.f32 %v10152_v19, %v542_v1  ;;  %v10640_v1 = vadd.f32 %v10152_v19, %v547_v2 }
 0x236   :  { %v527_v16 = vpop.f32.mrf.mxu0  ;;  %15623 = vst [vmem:[#allocation19_spill] sm:$0xff] %v10628_v26 }
 0x237   :  { %v10597_v59 = vadd.f32 %v10152_v19, %v527_v16 }
 0x239   :  { %15622 = vst [vmem:[#allocation18_spill] sm:$0xff] %v10597_v59  ;;  %v15573_v20 = vmax.f32 %v10597_v59, 0.0  ;;  %v549_v59 = vpop.f32.mrf.mxu1 }
 0x23b   :  { %v726_v50 = vsel %vm618_vm1, %v15573_v20, 0.0  ;;  %v15577_v20 = vmax.f32 %v10622_v13, 0.0 }
 0x23c   :  { %v727_v51 = vadd.f32 %v726_v50, %v725_v56  ;;  %v10632_v50 = vadd.f32 %v10152_v19, %v544_v6 }
 0x23e   :  { %v529_v58 = vpop.f32.mrf.mxu0  ;;  %15624 = vst [vmem:[#allocation20_spill] sm:$0xff] %v10632_v50  ;;  %v15580_v6 = vmax.f32 %v10632_v50, 0.0 }
 0x23f   :  { %v530_v7 = vadd.f32 %v10152_v19, %v529_v58 }
 0x240   :  { %v740_v2 = vsel %vm618_vm1, %v15580_v6, 0.0 }
 0x241   :  { %v607_v38 = vmax.f32 %v530_v7, 0.0 }
 0x246   :  { %v532_v46 = vpop.f32.mrf.mxu0 }
 0x247   :  { %v533_v16 = vadd.f32 %v10152_v19, %v532_v46  ;;  %v728_v46 = vsel %vm618_vm1, %v607_v38, 0.0 }
 0x248   :  { %v729_v5 = vadd.f32 %v728_v46, %v727_v51  ;;  %v15576_v51 = vmax.f32 %v10628_v26, 0.0 }
 0x249   :  { %v608_v58 = vmax.f32 %v533_v16, 0.0  ;;  %v15575_v16 = vmax.f32 %v10617_v8, 0.0 }
 0x24b   :  { %v730_v62 = vsel %vm618_vm1, %v608_v58, 0.0  ;;  %v734_v46 = vsel %vm618_vm1, %v15575_v16, 0.0 }
 0x24c   :  { %v731_v18 = vadd.f32 %v730_v62, %v729_v5  ;;  %v736_v62 = vsel %vm618_vm1, %v15577_v20, 0.0 }
 0x24e   :  { %v534_v10 = vpop.f32.mrf.mxu0 }
 0x24f   :  { %v535_v7 = vadd.f32 %v10152_v19, %v534_v10 }
 0x251   :  { %v609_v45 = vmax.f32 %v535_v7, 0.0  ;;  %v10647_v7 = vadd.f32 %v10152_v19, %v549_v59 }
 0x253   :  { %v732_v32 = vsel %vm618_vm1, %v609_v45, 0.0 }
 0x254   :  { %v733_v56 = vadd.f32 %v732_v32, %v731_v18  ;;  %v738_v18 = vsel %vm618_vm1, %v15576_v51, 0.0  ;;  %v15582_v32 = vmax.f32 %v10640_v1, 0.0 }
 0x256   :  { %v735_v10 = vadd.f32 %v734_v46, %v733_v56  ;;  %v15581_v56 = vmax.f32 %v10647_v7, 0.0  ;;  %v742_v19 = vsel %vm618_vm1, %v15582_v32, 0.0 }
 0x258   :  { %v737_v5 = vadd.f32 %v736_v62, %v735_v10  ;;  %v744_v10 = vsel %vm618_vm1, %v15581_v56, 0.0 }
 0x25a   :  { %v739_v16 = vadd.f32 %v738_v18, %v737_v5 }
 0x25c   :  { %v741_v46 = vadd.f32 %v740_v2, %v739_v16 }
 0x25e   :  { %v743_v59 = vadd.f32 %v742_v19, %v741_v46  ;;  %v15628_v19 = vmax.f32 %v10160_v25, 0.0 }
 0x260   :  { %v745_v62 = vadd.f32 %v744_v10, %v743_v59 }
 0x262   :  { %v746_v51 = vrot.slane %v745_v62, 4 }
 0x264   :  { %v747_v20 = vadd.f32 %v746_v51, %v745_v62  ;;  %v15633_v62 = vmax.f32 %v10185_v15, 0.0 }
 0x266   :  { %v748_v5 = vrot.slane %v747_v20, 2 }
 0x268   :  { %v749_v18 = vadd.f32 %v748_v5, %v747_v20  ;;  %v15629_v20 = vmax.f32 %v10156_v22, 0.0  ;;  %v15632_v22 = vmax.f32 %v10177_v11, 0.0  ;;  %v15634_v11 = vmax.f32 %v10196_v52, 0.0 }
 0x269   :  { %v15636_v52 = vmax.f32 %v10214_v4, 0.0  ;;  %v15638_v4 = vmax.f32 %v10230_v23, 0.0  ;;  %v15640_v23 = vmax.f32 %v10248_v9, 0.0  ;;  %v15642_v9 = vmax.f32 %v10264_v29, 0.0 }
 0x26a   :  { %v750_v50 = vrot.slane %v749_v18, 1  ;;  %v15644_v29 = vmax.f32 %v10282_v21, 0.0  ;;  %v15646_v21 = vmax.f32 %v10298_v35, 0.0  ;;  %v15648_v35 = vmax.f32 %v10316_v27, 0.0 }
 0x26b   :  { %v15650_v27 = vmax.f32 %v10332_v41, 0.0  ;;  %v15652_v41 = vmax.f32 %v10350_v33, 0.0  ;;  %v15654_v33 = vmax.f32 %v10366_v47, 0.0  ;;  %v15656_v47 = vld [vmem:[#allocation5_spill] sm:$0xff] }
 0x26c   :  { %v751_v26 = vadd.f32 %v750_v50, %v749_v18 }
 0x26e   :  { %v10663_v6 = vmul.f32 0.001953125, %v751_v26 }
 0x270   :  { %v10666_v16 = vsub.f32 %v607_v38, %v10663_v6  ;;  %v10669_v2 = vsub.f32 %v608_v58, %v10663_v6  ;;  %v10672_v46 = vsub.f32 %v609_v45, %v10663_v6  ;;  %v10677_v59 = vsub.f32 %v15628_v19, %v10663_v6 }
 0x271   :  { %v10682_v50 = vsub.f32 %v15629_v20, %v10663_v6  ;;  %v15630_v38 = vmax.f32 %v10164_v28, 0.0  ;;  %v15631_v58 = vmax.f32 %v10169_v34, 0.0  ;;  %v10701_v10 = vsub.f32 %v15632_v22, %v10663_v6 }
 0x272   :  { %15625 = vst [vmem:[#allocation21_spill] sm:$0xff] %v10666_v16  ;;  %v817_v25 = vmul.f32 %v10677_v59, %v10677_v59  ;;  %v10708_v34 = vsub.f32 %v15633_v62, %v10663_v6  ;;  %v15635_v62 = vmax.f32 %v10204_v60, 0.0  ;;  %v15637_v60 = vmax.f32 %v10222_v14, 0.0 }
 0x273   :  { %15626 = vst [vmem:[#allocation22_spill] sm:$0xff] %v10669_v2  ;;  %v10687_v26 = vsub.f32 %v15630_v38, %v10663_v6  ;;  %v10692_v45 = vsub.f32 %v15631_v58, %v10663_v6  ;;  %v818_v51 = vmul.f32 %v10682_v50, %v10682_v50  ;;  %v10717_v38 = vsub.f32 %v15634_v11, %v10663_v6 }
 0x274   :  { %15627 = vst [vmem:[#allocation23_spill] sm:$0xff] %v10672_v46  ;;  %v881_v18 = vsel %vm618_vm1, %v817_v25, 0.0  ;;  %v821_v58 = vmul.f32 %v10701_v10, %v10701_v10  ;;  %v10725_v56 = vsub.f32 %v15635_v62, %v10663_v6  ;;  %v822_v25 = vmul.f32 %v10708_v34, %v10708_v34 }
 0x275   :  { %v819_v28 = vmul.f32 %v10687_v26, %v10687_v26  ;;  %v820_v5 = vmul.f32 %v10692_v45, %v10692_v45  ;;  %v882_v19 = vsel %vm618_vm1, %v818_v51, 0.0  ;;  %v15639_v14 = vmax.f32 %v10238_v24, 0.0 }
 0x276   :  { %v883_v20 = vadd.f32 %v882_v19, %v881_v18  ;;  %v10733_v19 = vsub.f32 %v15636_v52, %v10663_v6  ;;  %v15641_v24 = vmax.f32 %v10256_v17, 0.0  ;;  %v15643_v17 = vmax.f32 %v10272_v30, 0.0 }
 0x277   :  { %v884_v15 = vsel %vm618_vm1, %v819_v28, 0.0  ;;  %v886_v51 = vsel %vm618_vm1, %v820_v5, 0.0  ;;  %v823_v28 = vmul.f32 %v10717_v38, %v10717_v38  ;;  %v824_v5 = vmul.f32 %v10725_v56, %v10725_v56 }
 0x278   :  { %v885_v22 = vadd.f32 %v884_v15, %v883_v20  ;;  %v888_v20 = vsel %vm618_vm1, %v821_v58, 0.0  ;;  %v10741_v15 = vsub.f32 %v15637_v60, %v10663_v6  ;;  %v825_v58 = vmul.f32 %v10733_v19, %v10733_v19 }
 0x279   :  { %v15645_v30 = vmax.f32 %v10290_v55, 0.0  ;;  %v15647_v55 = vmax.f32 %v10306_v36, 0.0  ;;  %v15649_v36 = vmax.f32 %v10324_v49, 0.0  ;;  %v15651_v49 = vmax.f32 %v10340_v42, 0.0 }
 0x27a   :  { %v887_v18 = vadd.f32 %v886_v51, %v885_v22  ;;  %v890_v22 = vsel %vm618_vm1, %v822_v25, 0.0  ;;  %v10749_v51 = vsub.f32 %v15638_v4, %v10663_v6  ;;  %v826_v25 = vmul.f32 %v10741_v15, %v10741_v15 }
 0x27b   :  { %v15653_v42 = vmax.f32 %v10358_v43, 0.0  ;;  %v15655_v43 = vmax.f32 %v10374_v48, 0.0  ;;  %v15658_v48 = vmax.f32 %v10392_v12, 0.0  ;;  %v15661_v12 = vmax.f32 %v10408_v54, 0.0 }
 0x27c   :  { %v889_v11 = vadd.f32 %v888_v20, %v887_v18  ;;  %v892_v18 = vsel %vm618_vm1, %v823_v28, 0.0  ;;  %v10757_v20 = vsub.f32 %v15639_v14, %v10663_v6  ;;  %v827_v28 = vmul.f32 %v10749_v51, %v10749_v51 }
 0x27d   :  { %v15665_v54 = vmax.f32 %v10426_v31, 0.0  ;;  %v15669_v31 = vmax.f32 %v10442_v61, 0.0  ;;  %v15673_v61 = vmax.f32 %v10460_v40, 0.0  ;;  %v15676_v40 = vld [vmem:[#allocation9_spill] sm:$0xff] }
 0x27e   :  { %v891_v62 = vadd.f32 %v890_v22, %v889_v11  ;;  %v894_v11 = vsel %vm618_vm1, %v824_v5, 0.0  ;;  %v10765_v22 = vsub.f32 %v15640_v23, %v10663_v6  ;;  %v828_v5 = vmul.f32 %v10757_v20, %v10757_v20 }
 0x280   :  { %v893_v52 = vadd.f32 %v892_v18, %v891_v62  ;;  %v896_v62 = vsel %vm618_vm1, %v825_v58, 0.0  ;;  %v10773_v18 = vsub.f32 %v15641_v24, %v10663_v6  ;;  %v829_v58 = vmul.f32 %v10765_v22, %v10765_v22 }
 0x282   :  { %v895_v60 = vadd.f32 %v894_v11, %v893_v52  ;;  %v898_v52 = vsel %vm618_vm1, %v826_v25, 0.0  ;;  %v10781_v11 = vsub.f32 %v15642_v9, %v10663_v6  ;;  %v830_v25 = vmul.f32 %v10773_v18, %v10773_v18 }
 0x284   :  { %v897_v4 = vadd.f32 %v896_v62, %v895_v60  ;;  %v900_v60 = vsel %vm618_vm1, %v827_v28, 0.0  ;;  %v10789_v62 = vsub.f32 %v15643_v17, %v10663_v6  ;;  %v831_v28 = vmul.f32 %v10781_v11, %v10781_v11 }
 0x286   :  { %v899_v14 = vadd.f32 %v898_v52, %v897_v4  ;;  %v902_v4 = vsel %vm618_vm1, %v828_v5, 0.0  ;;  %v10797_v52 = vsub.f32 %v15644_v29, %v10663_v6  ;;  %v832_v5 = vmul.f32 %v10789_v62, %v10789_v62 }
 0x288   :  { %v901_v23 = vadd.f32 %v900_v60, %v899_v14  ;;  %v904_v14 = vsel %vm618_vm1, %v829_v58, 0.0  ;;  %v10805_v60 = vsub.f32 %v15645_v30, %v10663_v6  ;;  %v833_v58 = vmul.f32 %v10797_v52, %v10797_v52 }
 0x28a   :  { %v903_v24 = vadd.f32 %v902_v4, %v901_v23  ;;  %v906_v23 = vsel %vm618_vm1, %v830_v25, 0.0  ;;  %v10813_v4 = vsub.f32 %v15646_v21, %v10663_v6  ;;  %v834_v25 = vmul.f32 %v10805_v60, %v10805_v60 }
 0x28c   :  { %v905_v9 = vadd.f32 %v904_v14, %v903_v24  ;;  %v908_v24 = vsel %vm618_vm1, %v831_v28, 0.0  ;;  %v10821_v14 = vsub.f32 %v15647_v55, %v10663_v6  ;;  %v835_v28 = vmul.f32 %v10813_v4, %v10813_v4 }
 0x28e   :  { %v907_v17 = vadd.f32 %v906_v23, %v905_v9  ;;  %v910_v9 = vsel %vm618_vm1, %v832_v5, 0.0  ;;  %v10829_v23 = vsub.f32 %v15648_v35, %v10663_v6  ;;  %v836_v5 = vmul.f32 %v10821_v14, %v10821_v14 }
 0x290   :  { %v909_v29 = vadd.f32 %v908_v24, %v907_v17  ;;  %v912_v17 = vsel %vm618_vm1, %v833_v58, 0.0  ;;  %v10837_v24 = vsub.f32 %v15649_v36, %v10663_v6  ;;  %v837_v58 = vmul.f32 %v10829_v23, %v10829_v23 }
 0x292   :  { %v911_v30 = vadd.f32 %v910_v9, %v909_v29  ;;  %v914_v29 = vsel %vm618_vm1, %v834_v25, 0.0  ;;  %v10845_v9 = vsub.f32 %v15650_v27, %v10663_v6  ;;  %v838_v25 = vmul.f32 %v10837_v24, %v10837_v24 }
 0x294   :  { %v913_v21 = vadd.f32 %v912_v17, %v911_v30  ;;  %v916_v30 = vsel %vm618_vm1, %v835_v28, 0.0  ;;  %v10853_v17 = vsub.f32 %v15651_v49, %v10663_v6  ;;  %v839_v28 = vmul.f32 %v10845_v9, %v10845_v9 }
 0x296   :  { %v915_v55 = vadd.f32 %v914_v29, %v913_v21  ;;  %v918_v21 = vsel %vm618_vm1, %v836_v5, 0.0  ;;  %v10861_v29 = vsub.f32 %v15652_v41, %v10663_v6  ;;  %v840_v5 = vmul.f32 %v10853_v17, %v10853_v17 }
 0x298   :  { %v917_v35 = vadd.f32 %v916_v30, %v915_v55  ;;  %v920_v55 = vsel %vm618_vm1, %v837_v58, 0.0  ;;  %v10869_v30 = vsub.f32 %v15653_v42, %v10663_v6  ;;  %v841_v58 = vmul.f32 %v10861_v29, %v10861_v29 }
 0x29a   :  { %v919_v36 = vadd.f32 %v918_v21, %v917_v35  ;;  %v922_v35 = vsel %vm618_vm1, %v838_v25, 0.0  ;;  %v10877_v21 = vsub.f32 %v15654_v33, %v10663_v6  ;;  %v842_v25 = vmul.f32 %v10869_v30, %v10869_v30 }
 0x29c   :  { %v921_v27 = vadd.f32 %v920_v55, %v919_v36  ;;  %v924_v36 = vsel %vm618_vm1, %v839_v28, 0.0  ;;  %v10885_v55 = vsub.f32 %v15655_v43, %v10663_v6  ;;  %v843_v28 = vmul.f32 %v10877_v21, %v10877_v21 }
 0x29d   :  { %v10901_v43 = vsub.f32 %v15658_v48, %v10663_v6  ;;  %v10917_v48 = vsub.f32 %v15661_v12, %v10663_v6  ;;  %v10933_v12 = vsub.f32 %v15665_v54, %v10663_v6  ;;  %v10949_v54 = vsub.f32 %v15669_v31, %v10663_v6 }
 0x29e   :  { %v923_v49 = vadd.f32 %v922_v35, %v921_v27  ;;  %v926_v27 = vsel %vm618_vm1, %v840_v5, 0.0  ;;  %v15657_v35 = vmax.f32 %v15656_v47, 0.0  ;;  %v844_v5 = vmul.f32 %v10885_v55, %v10885_v55 }
 0x29f   :  { %15659 = vst [vmem:[#allocation5_spill] sm:$0xff] %v10901_v43  ;;  %v15660_v47 = vmax.f32 %v10400_v53, 0.0  ;;  %v15663_v53 = vld [vmem:[#allocation6_spill] sm:$0xff]  ;;  %v10965_v31 = vsub.f32 %v15673_v61, %v10663_v6  ;;  %v15677_v61 = vmax.f32 %v15676_v40, 0.0  ;;  %v15681_v40 = vmax.f32 %v10494_v39, 0.0 }
 0x2a0   :  { %v925_v41 = vadd.f32 %v924_v36, %v923_v49  ;;  %v10893_v33 = vsub.f32 %v15657_v35, %v10663_v6  ;;  %v928_v49 = vsel %vm618_vm1, %v841_v58, 0.0  ;;  %15662 = vst [vmem:[#allocation24_spill] sm:$0xff] %v10917_v48  ;;  %v15685_v39 = vmax.f32 %v10512_v63, 0.0 }
 0x2a1   :  { %v10909_v35 = vsub.f32 %v15660_v47, %v10663_v6  ;;  %v15664_v47 = vmax.f32 %v15663_v53, 0.0  ;;  %v15666_v53 = vld [vmem:[#allocation7_spill] sm:$0xff]  ;;  %v15690_v63 = vmax.f32 %v10528_v3, 0.0  ;;  %v15694_v3 = vld [vmem:[#allocation13_spill] sm:$0xff] }
 0x2a2   :  { %v927_v42 = vadd.f32 %v926_v27, %v925_v41  ;;  %v930_v41 = vsel %vm618_vm1, %v842_v25, 0.0  ;;  %v845_v58 = vmul.f32 %v10893_v33, %v10893_v33  ;;  %v846_v25 = vmul.f32 %v10901_v43, %v10901_v43  ;;  %15670 = vst [vmem:[#allocation7_spill] sm:$0xff] %v10949_v54 }
 0x2a3   :  { %v10925_v32 = vsub.f32 %v15664_v47, %v10663_v6  ;;  %v15667_v47 = vmax.f32 %v15666_v53, 0.0  ;;  %v15671_v53 = vld [vmem:[#allocation8_spill] sm:$0xff] }
 0x2a4   :  { %v929_v36 = vadd.f32 %v928_v49, %v927_v42  ;;  %v932_v42 = vsel %vm618_vm1, %v843_v28, 0.0  ;;  %v847_v28 = vmul.f32 %v10909_v35, %v10909_v35  ;;  %15674 = vst [vmem:[#allocation8_spill] sm:$0xff] %v10965_v31 }
 0x2a5   :  { %v10941_v43 = vsub.f32 %v15667_v47, %v10663_v6  ;;  %v15672_v47 = vmax.f32 %v15671_v53, 0.0  ;;  %v15675_v53 = vmax.f32 %v10470_v44, 0.0  ;;  %v15679_v44 = vld [vmem:[#allocation10_spill] sm:$0xff] }
 0x2a6   :  { %v931_v27 = vadd.f32 %v930_v41, %v929_v36  ;;  %v934_v36 = vsel %vm618_vm1, %v844_v5, 0.0  ;;  %v848_v5 = vmul.f32 %v10917_v48, %v10917_v48 }
 0x2a7   :  { %15668 = vst [vmem:[#allocation6_spill] sm:$0xff] %v10941_v43  ;;  %v10957_v48 = vsub.f32 %v15672_v47, %v10663_v6  ;;  %v10973_v47 = vsub.f32 %v15675_v53, %v10663_v6  ;;  %v15680_v53 = vmax.f32 %v15679_v44, 0.0  ;;  %v15682_v44 = vld [vmem:[#allocation11_spill] sm:$0xff] }
 0x2a8   :  { %v933_v49 = vadd.f32 %v932_v42, %v931_v27  ;;  %v936_v27 = vsel %vm618_vm1, %v845_v58, 0.0  ;;  %v849_v58 = vmul.f32 %v10925_v32, %v10925_v32 }
 0x2aa   :  { %v935_v41 = vadd.f32 %v934_v36, %v933_v49  ;;  %v938_v49 = vsel %vm618_vm1, %v846_v25, 0.0  ;;  %v850_v25 = vmul.f32 %v10933_v12, %v10933_v12 }
 0x2ac   :  { %v937_v42 = vadd.f32 %v936_v27, %v935_v41  ;;  %v940_v41 = vsel %vm618_vm1, %v847_v28, 0.0  ;;  %v851_v28 = vmul.f32 %v10941_v43, %v10941_v43  ;;  %v10981_v43 = vsub.f32 %v15677_v61, %v10663_v6 }
 0x2ad   :  { %v10997_v61 = vsub.f32 %v15681_v40, %v10663_v6  ;;  %v11013_v40 = vsub.f32 %v15685_v39, %v10663_v6  ;;  %v11029_v39 = vsub.f32 %v15690_v63, %v10663_v6  ;;  %v15695_v63 = vmax.f32 %v15694_v3, 0.0  ;;  %v15698_v3 = vld [vmem:[#allocation15_spill] sm:$0xff] }
 0x2ae   :  { %v939_v36 = vadd.f32 %v938_v49, %v937_v42  ;;  %v942_v42 = vsel %vm618_vm1, %v848_v5, 0.0  ;;  %v852_v5 = vmul.f32 %v10949_v54, %v10949_v54  ;;  %15678 = vst [vmem:[#allocation9_spill] sm:$0xff] %v10981_v43  ;;  %v10989_v54 = vsub.f32 %v15680_v53, %v10663_v6 }
 0x2af   :  { %v15683_v53 = vmax.f32 %v15682_v44, 0.0  ;;  %15686 = vst [vmem:[#allocation11_spill] sm:$0xff] %v11013_v40  ;;  %v15687_v44 = vld [vmem:[#allocation12_spill] sm:$0xff] }
 0x2b0   :  { %v941_v27 = vadd.f32 %v940_v41, %v939_v36  ;;  %v944_v36 = vsel %vm618_vm1, %v849_v58, 0.0  ;;  %v853_v58 = vmul.f32 %v10957_v48, %v10957_v48  ;;  %15691 = vst [vmem:[#allocation25_spill] sm:$0xff] %v11029_v39 }
 0x2b2   :  { %v943_v49 = vadd.f32 %v942_v42, %v941_v27  ;;  %v946_v27 = vsel %vm618_vm1, %v850_v25, 0.0  ;;  %v854_v25 = vmul.f32 %v10965_v31, %v10965_v31  ;;  %v11005_v31 = vsub.f32 %v15683_v53, %v10663_v6 }
 0x2b3   :  { %v15688_v53 = vmax.f32 %v15687_v44, 0.0  ;;  %v15692_v44 = vmax.f32 %v10536_v0, 0.0  ;;  %v15696_v0 = vld [vmem:[#allocation14_spill] sm:$0xff] }
 0x2b4   :  { %v945_v41 = vadd.f32 %v944_v36, %v943_v49  ;;  %v948_v49 = vsel %vm618_vm1, %v851_v28, 0.0  ;;  %v855_v28 = vmul.f32 %v10973_v47, %v10973_v47  ;;  %15684 = vst [vmem:[#allocation10_spill] sm:$0xff] %v11005_v31 }
 0x2b6   :  { %v947_v42 = vadd.f32 %v946_v27, %v945_v41  ;;  %v950_v41 = vsel %vm618_vm1, %v852_v5, 0.0  ;;  %v856_v5 = vmul.f32 %v10981_v43, %v10981_v43  ;;  %v11021_v43 = vsub.f32 %v15688_v53, %v10663_v6 }
 0x2b7   :  { %v11037_v53 = vsub.f32 %v15692_v44, %v10663_v6  ;;  %v15697_v44 = vmax.f32 %v15696_v0, 0.0  ;;  %v15701_v0 = vld [vmem:[#allocation16_spill] sm:$0xff] }
 0x2b8   :  { %v949_v36 = vadd.f32 %v948_v49, %v947_v42  ;;  %v952_v42 = vsel %vm618_vm1, %v853_v58, 0.0  ;;  %v857_v58 = vmul.f32 %v10989_v54, %v10989_v54  ;;  %15689 = vst [vmem:[#allocation12_spill] sm:$0xff] %v11021_v43 }
 0x2b9   :  { %15693 = vst [vmem:[#allocation26_spill] sm:$0xff] %v11037_v53 }
 0x2ba   :  { %v951_v27 = vadd.f32 %v950_v41, %v949_v36  ;;  %v954_v36 = vsel %vm618_vm1, %v854_v25, 0.0  ;;  %v858_v25 = vmul.f32 %v10997_v61, %v10997_v61 }
 0x2bc   :  { %v953_v49 = vadd.f32 %v952_v42, %v951_v27  ;;  %v956_v27 = vsel %vm618_vm1, %v855_v28, 0.0  ;;  %v859_v28 = vmul.f32 %v11005_v31, %v11005_v31  ;;  %v11045_v31 = vsub.f32 %v15695_v63, %v10663_v6 }
 0x2bd   :  { %v15699_v63 = vmax.f32 %v15698_v3, 0.0  ;;  %v15703_v3 = vld [vmem:[#allocation17_spill] sm:$0xff] }
 0x2be   :  { %v955_v41 = vadd.f32 %v954_v36, %v953_v49  ;;  %v958_v49 = vsel %vm618_vm1, %v856_v5, 0.0  ;;  %v860_v5 = vmul.f32 %v11013_v40, %v11013_v40  ;;  %v11053_v40 = vsub.f32 %v15697_v44, %v10663_v6 }
 0x2bf   :  { %v15702_v44 = vmax.f32 %v15701_v0, 0.0  ;;  %v15706_v0 = vmax.f32 %v10583_v37, 0.0  ;;  %v15710_v37 = vld [vmem:[#allocation18_spill] sm:$0xff] }
 0x2c0   :  { %v957_v42 = vadd.f32 %v956_v27, %v955_v41  ;;  %v960_v41 = vsel %vm618_vm1, %v857_v58, 0.0  ;;  %v861_v58 = vmul.f32 %v11021_v43, %v11021_v43  ;;  %v11061_v43 = vsub.f32 %v15699_v63, %v10663_v6 }
 0x2c1   :  { %v15704_v63 = vmax.f32 %v15703_v3, 0.0  ;;  %v15708_v3 = vmax.f32 %v10590_v57, 0.0 }
 0x2c2   :  { %v959_v36 = vadd.f32 %v958_v49, %v957_v42  ;;  %v962_v42 = vsel %vm618_vm1, %v858_v25, 0.0  ;;  %v862_v25 = vmul.f32 %v11029_v39, %v11029_v39  ;;  %15700 = vst [vmem:[#allocation13_spill] sm:$0xff] %v11061_v43  ;;  %v11069_v39 = vsub.f32 %v15702_v44, %v10663_v6 }
 0x2c3   :  { %v11085_v44 = vsub.f32 %v15706_v0, %v10663_v6  ;;  %v15711_v0 = vmax.f32 %v15710_v37, 0.0  ;;  %v872_v37 = vmul.f32 %v10666_v16, %v10666_v16 }
 0x2c4   :  { %v961_v27 = vadd.f32 %v960_v41, %v959_v36  ;;  %v964_v36 = vsel %vm618_vm1, %v859_v28, 0.0  ;;  %v863_v28 = vmul.f32 %v11037_v53, %v11037_v53  ;;  %v11077_v53 = vsub.f32 %v15704_v63, %v10663_v6 }
 0x2c5   :  { %15707 = vst [vmem:[#allocation15_spill] sm:$0xff] %v11085_v44  ;;  %v11093_v63 = vsub.f32 %v15708_v3, %v10663_v6 }
 0x2c6   :  { %v963_v49 = vadd.f32 %v962_v42, %v961_v27  ;;  %v966_v27 = vsel %vm618_vm1, %v860_v5, 0.0  ;;  %v864_v5 = vmul.f32 %v11045_v31, %v11045_v31  ;;  %15705 = vst [vmem:[#allocation14_spill] sm:$0xff] %v11077_v53 }
 0x2c7   :  { %15709 = vst [vmem:[#allocation16_spill] sm:$0xff] %v11093_v63  ;;  %v870_v57 = vmul.f32 %v11093_v63, %v11093_v63 }
 0x2c8   :  { %v965_v41 = vadd.f32 %v964_v36, %v963_v49  ;;  %v968_v49 = vsel %vm618_vm1, %v861_v58, 0.0  ;;  %v865_v58 = vmul.f32 %v11053_v40, %v11053_v40 }
 0x2ca   :  { %v967_v42 = vadd.f32 %v966_v27, %v965_v41  ;;  %v970_v41 = vsel %vm618_vm1, %v862_v25, 0.0  ;;  %v866_v25 = vmul.f32 %v11061_v43, %v11061_v43  ;;  %v11101_v43 = vsub.f32 %v15711_v0, %v10663_v6 }
 0x2cb   :  { %v986_v0 = vsel %vm618_vm1, %v870_v57, 0.0  ;;  %v874_v57 = vmul.f32 %v10672_v46, %v10672_v46 }
 0x2cc   :  { %v969_v36 = vadd.f32 %v968_v49, %v967_v42  ;;  %v972_v42 = vsel %vm618_vm1, %v863_v28, 0.0  ;;  %v867_v28 = vmul.f32 %v11069_v39, %v11069_v39  ;;  %15712 = vst [vmem:[#allocation17_spill] sm:$0xff] %v11101_v43 }
 0x2ce   :  { %v971_v27 = vadd.f32 %v970_v41, %v969_v36  ;;  %v974_v36 = vsel %vm618_vm1, %v864_v5, 0.0  ;;  %v868_v5 = vmul.f32 %v11077_v53, %v11077_v53 }
 0x2d0   :  { %v973_v49 = vadd.f32 %v972_v42, %v971_v27  ;;  %v976_v27 = vsel %vm618_vm1, %v865_v58, 0.0  ;;  %v869_v58 = vmul.f32 %v11085_v44, %v11085_v44  ;;  %v982_v3 = vsel %vm618_vm1, %v868_v5, 0.0 }
 0x2d1   :  { %v873_v5 = vmul.f32 %v10669_v2, %v10669_v2 }
 0x2d2   :  { %v975_v41 = vadd.f32 %v974_v36, %v973_v49  ;;  %v978_v49 = vsel %vm618_vm1, %v866_v25, 0.0  ;;  %v871_v25 = vmul.f32 %v11101_v43, %v11101_v43 }
 0x2d4   :  { %v977_v42 = vadd.f32 %v976_v27, %v975_v41  ;;  %v980_v41 = vsel %vm618_vm1, %v867_v28, 0.0  ;;  %v15713_v28 = vmax.f32 %v10617_v8, 0.0  ;;  %v15717_v8 = vld [vmem:[#allocation19_spill] sm:$0xff] }
 0x2d6   :  { %v979_v36 = vadd.f32 %v978_v49, %v977_v42  ;;  %v984_v42 = vsel %vm618_vm1, %v869_v58, 0.0 }
 0x2d8   :  { %v981_v27 = vadd.f32 %v980_v41, %v979_v36  ;;  %v11118_v36 = vsub.f32 %v15713_v28, %v10663_v6  ;;  %v988_v41 = vsel %vm618_vm1, %v871_v25, 0.0 }
 0x2da   :  { %v983_v53 = vadd.f32 %v982_v3, %v981_v27  ;;  %15714 = vst [vmem:[#allocation18_spill] sm:$0xff] %v11118_v36  ;;  %v990_v3 = vsel %vm618_vm1, %v872_v37, 0.0  ;;  %v875_v28 = vmul.f32 %v11118_v36, %v11118_v36  ;;  %v994_v37 = vsel %vm618_vm1, %v874_v57, 0.0 }
 0x2dc   :  { %v985_v49 = vadd.f32 %v984_v42, %v983_v53  ;;  %v15715_v53 = vmax.f32 %v10622_v13, 0.0  ;;  %v15719_v13 = vld [vmem:[#allocation20_spill] sm:$0xff]  ;;  %v996_v36 = vsel %vm618_vm1, %v875_v28, 0.0 }
 0x2de   :  { %v987_v44 = vadd.f32 %v986_v0, %v985_v49  ;;  %v11126_v58 = vsub.f32 %v15715_v53, %v10663_v6  ;;  %v15718_v49 = vmax.f32 %v15717_v8, 0.0 }
 0x2e0   :  { %v989_v27 = vadd.f32 %v988_v41, %v987_v44  ;;  %15716 = vst [vmem:[#allocation27_spill] sm:$0xff] %v11126_v58  ;;  %v813_v0 = vsub.f32 %v15718_v49, %v10663_v6  ;;  %v992_v44 = vsel %vm618_vm1, %v873_v5, 0.0  ;;  %v15720_v41 = vmax.f32 %v15719_v13, 0.0 }
 0x2e1   :  { %v876_v46 = vmul.f32 %v11126_v58, %v11126_v58  ;;  %v15722_v5 = vmax.f32 %v10647_v7, 0.0 }
 0x2e2   :  { %v991_v42 = vadd.f32 %v990_v3, %v989_v27  ;;  %v814_v53 = vsub.f32 %v15720_v41, %v10663_v6  ;;  %v15721_v3 = vmax.f32 %v10640_v1, 0.0  ;;  %v877_v49 = vmul.f32 %v813_v0, %v813_v0 }
 0x2e3   :  { %v998_v13 = vsel %vm618_vm1, %v876_v46, 0.0 }
 0x2e4   :  { %v993_v25 = vadd.f32 %v992_v44, %v991_v42  ;;  %v815_v8 = vsub.f32 %v15721_v3, %v10663_v6  ;;  %v816_v42 = vsub.f32 %v15722_v5, %v10663_v6  ;;  %v878_v44 = vmul.f32 %v814_v53, %v814_v53 }
 0x2e5   :  { %v1000_v57 = vsel %vm618_vm1, %v877_v49, 0.0 }
 0x2e6   :  { %v995_v27 = vadd.f32 %v994_v37, %v993_v25  ;;  %v879_v58 = vmul.f32 %v815_v8, %v815_v8  ;;  %v880_v37 = vmul.f32 %v816_v42, %v816_v42  ;;  %v1002_v1 = vsel %vm618_vm1, %v878_v44, 0.0 }
 0x2e8   :  { %v997_v2 = vadd.f32 %v996_v36, %v995_v27  ;;  %v1004_v16 = vsel %vm618_vm1, %v879_v58, 0.0  ;;  %v1006_v36 = vsel %vm618_vm1, %v880_v37, 0.0 }
 0x2ea   :  { %v999_v41 = vadd.f32 %v998_v13, %v997_v2 }
 0x2ec   :  { %v1001_v25 = vadd.f32 %v1000_v57, %v999_v41 }
 0x2ee   :  { %v1003_v3 = vadd.f32 %v1002_v1, %v1001_v25 }
 0x2f0   :  { %v1005_v28 = vadd.f32 %v1004_v16, %v1003_v3  ;;  %v616_v16 = vld [vmem:[%s15497_s3] sm:$0x1] }
 0x2f2   :  { %v1007_v27 = vadd.f32 %v1006_v36, %v1005_v28 }
 0x2f4   :  { %v1008_v7 = vrot.slane %v1007_v27, 4 }
 0x2f6   :  { %v1009_v6 = vadd.f32 %v1008_v7, %v1007_v27 }
 0x2f8   :  { %v1010_v5 = vrot.slane %v1009_v6, 2 }
 0x2fa   :  { %v1011_v43 = vadd.f32 %v1010_v5, %v1009_v6 }
 0x2fc   :  { %v1012_v46 = vrot.slane %v1011_v43, 1 }
 0x2fe   :  { %v1013_v2 = vadd.f32 %v1012_v46, %v1011_v43  ;;  %v11161_v43 = vld [vmem:[%s15495_s4] ss:$0 sm:$0xff] }
 0x300   :  { %v1014_v13 = vmul.f32 0.001953125, %v1013_v2 }
 0x302   :  { %v1015_v63 = vadd.f32 1e-05, %v1014_v13 }
 0x304   :  { %9601 = vrsqrt.f32 %v1015_v63  ;;  %vm1022_vm3 = vweird.f32 %v1015_v63 }
 0x30a   :  { %v9602_v49 = vpop.eup %9601 }
 0x30b   :  { %v1017_v41 = vmul.f32 %v9602_v49, %v1015_v63  ;;  %vm1023_vm2 = vweird.f32 %v9602_v49 }
 0x30c   :  { %vm1024_vm4 = vmor %vm1022_vm3, %vm1023_vm2 }
 0x30d   :  { %v1018_v57 = vmul.f32 %v9602_v49, %v1017_v41 }
 0x30f   :  { %v1019_v44 = vmul.f32 0.5, %v1018_v57 }
 0x311   :  { %v1020_v25 = vsub.f32 1.5, %v1019_v44  ;;  %v15725_v44 = vld [vmem:[#allocation6_spill] sm:$0xff] }
 0x313   :  { %v1021_v58 = vmul.f32 %v9602_v49, %v1020_v25 }
 0x315   :  { %v1025_v37 = vsel %vm1024_vm4, %v9602_v49, %v1021_v58 }
 0x316   :  { %v1026_v1 = vmul.f32 %v1025_v37, %v616_v16  ;;  %v15726_v16 = vld [vmem:[#allocation7_spill] sm:$0xff]  ;;  %v15727_v37 = vld [vmem:[#allocation8_spill] sm:$0xff] }
 0x318   :  { %v11163_v3 = vperm.slane %v1026_v1, 0  ;;  %v15728_v1 = vld [vmem:[#allocation9_spill] sm:$0xff] }
 0x31a   :  { %v1090_v28 = vmul.f32 %v11163_v3, %v813_v0  ;;  %v1091_v36 = vmul.f32 %v11163_v3, %v814_v53  ;;  %v1092_v27 = vmul.f32 %v11163_v3, %v815_v8  ;;  %v1093_v7 = vmul.f32 %v11163_v3, %v816_v42 }
 0x31b   :  { %v1030_v0 = vmul.f32 %v11163_v3, %v10677_v59  ;;  %v1031_v53 = vmul.f32 %v11163_v3, %v10682_v50  ;;  %v1032_v8 = vmul.f32 %v11163_v3, %v10687_v26  ;;  %v1033_v42 = vmul.f32 %v11163_v3, %v10692_v45 }
 0x31c   :  { %v1157_v63 = vadd.f32 %v11161_v43, %v1090_v28  ;;  %v1158_v6 = vadd.f32 %v11161_v43, %v1091_v36  ;;  %v1159_v5 = vadd.f32 %v11161_v43, %v1092_v27  ;;  %v1160_v46 = vadd.f32 %v11161_v43, %v1093_v7  ;;  %v15729_v27 = vld [vmem:[#allocation10_spill] sm:$0xff] }
 0x31d   :  { %v1034_v49 = vmul.f32 %v11163_v3, %v10701_v10  ;;  %v1035_v41 = vmul.f32 %v11163_v3, %v10708_v34  ;;  %v1036_v57 = vmul.f32 %v11163_v3, %v10717_v38  ;;  %v1037_v59 = vmul.f32 %v11163_v3, %v10725_v56 }
 0x31e   :  { %v1191_v2 = vmax.f32 %v1157_v63, %v1159_v5  ;;  %v1192_v13 = vmax.f32 %v1158_v6, %v1160_v46  ;;  %v1038_v50 = vmul.f32 %v11163_v3, %v10733_v19  ;;  %v1039_v26 = vmul.f32 %v11163_v3, %v10741_v15  ;;  %v15730_v63 = vld [vmem:[#allocation11_spill] sm:$0xff] }
 0x31f   :  { %v1040_v45 = vmul.f32 %v11163_v3, %v10749_v51  ;;  %v1041_v10 = vmul.f32 %v11163_v3, %v10757_v20  ;;  %v1042_v34 = vmul.f32 %v11163_v3, %v10765_v22  ;;  %v1043_v38 = vmul.f32 %v11163_v3, %v10773_v18 }
 0x320   :  { %1223 = vst.msk [vmem:[#allocation2 + $0xf0] sm:$0xff] %vm618_vm1, %v1191_v2  ;;  %v1044_v56 = vmul.f32 %v11163_v3, %v10781_v11  ;;  %v1045_v19 = vmul.f32 %v11163_v3, %v10789_v62  ;;  %v1046_v15 = vmul.f32 %v11163_v3, %v10797_v52  ;;  %v1047_v51 = vmul.f32 %v11163_v3, %v10805_v60 }
 0x321   :  { %1224 = vst.msk [vmem:[#allocation2 + $0xf8] sm:$0xff] %vm618_vm1, %v1192_v13  ;;  %v1048_v20 = vmul.f32 %v11163_v3, %v10813_v4  ;;  %v1049_v22 = vmul.f32 %v11163_v3, %v10821_v14  ;;  %v1050_v18 = vmul.f32 %v11163_v3, %v10829_v23  ;;  %v11219_v11 = vmul.f32 %v11163_v3, %v10837_v24 }
 0x322   :  { %v1052_v62 = vmul.f32 %v11163_v3, %v10845_v9  ;;  %v11225_v52 = vmul.f32 %v11163_v3, %v10853_v17  ;;  %v11229_v60 = vmul.f32 %v11163_v3, %v10861_v29  ;;  %v11233_v4 = vmul.f32 %v11163_v3, %v10869_v30  ;;  %v15723_v9 = vld [vmem:[#allocation5_spill] sm:$0xff]  ;;  %v15724_v30 = vld [vmem:[#allocation24_spill] sm:$0xff] }
 0x323   :  { %v11237_v14 = vmul.f32 %v11163_v3, %v10877_v21  ;;  %v11241_v23 = vmul.f32 %v11163_v3, %v10885_v55  ;;  %v11245_v24 = vmul.f32 %v11163_v3, %v10893_v33  ;;  %v11249_v17 = vmul.f32 %v11163_v3, %v15723_v9 }
 0x324   :  { %v11253_v29 = vmul.f32 %v11163_v3, %v10909_v35  ;;  %v11257_v21 = vmul.f32 %v11163_v3, %v15724_v30  ;;  %v11261_v55 = vmul.f32 %v11163_v3, %v10925_v32  ;;  %v11265_v33 = vmul.f32 %v11163_v3, %v10933_v12  ;;  %v15731_v30 = vld [vmem:[#allocation12_spill] sm:$0xff] }
 0x325   :  { %v11269_v25 = vmul.f32 %v11163_v3, %v15725_v44  ;;  %v11273_v35 = vmul.f32 %v11163_v3, %v15726_v16  ;;  %v11277_v58 = vmul.f32 %v11163_v3, %v10957_v48  ;;  %v11281_v32 = vmul.f32 %v11163_v3, %v15727_v37  ;;  %v15732_v16 = vld [vmem:[#allocation25_spill] sm:$0xff] }
 0x326   :  { %v11285_v12 = vmul.f32 %v11163_v3, %v10973_v47  ;;  %v11289_v28 = vmul.f32 %v11163_v3, %v15728_v1  ;;  %v11293_v36 = vmul.f32 %v11163_v3, %v10989_v54  ;;  %v11297_v48 = vmul.f32 %v11163_v3, %v10997_v61 }
 0x327   :  { %v11301_v7 = vmul.f32 %v11163_v3, %v15729_v27  ;;  %v11305_v47 = vmul.f32 %v11163_v3, %v15730_v63  ;;  %v1097_v6 = vadd.f32 %v11161_v43, %v1030_v0  ;;  %v1098_v5 = vadd.f32 %v11161_v43, %v1031_v53 }
 0x328   :  { %v1099_v46 = vadd.f32 %v11161_v43, %v1032_v8  ;;  %v1100_v54 = vadd.f32 %v11161_v43, %v1033_v42  ;;  %v1101_v2 = vadd.f32 %v11161_v43, %v1034_v49  ;;  %v1102_v61 = vadd.f32 %v11161_v43, %v1035_v41  ;;  %v15733_v42 = vld [vmem:[#allocation26_spill] sm:$0xff] }
 0x329   :  { %v1103_v13 = vadd.f32 %v11161_v43, %v1036_v57  ;;  %v1104_v9 = vadd.f32 %v11161_v43, %v1037_v59  ;;  %v11317_v44 = vmul.f32 %v11163_v3, %v15731_v30  ;;  %v11321_v0 = vmul.f32 %v11163_v3, %v15732_v16 }
 0x32a   :  { %v1105_v53 = vadd.f32 %v11161_v43, %v1038_v50  ;;  %v1107_v8 = vadd.f32 %v11161_v43, %v1040_v45  ;;  %v11327_v49 = vmul.f32 %v11163_v3, %v15733_v42  ;;  %v11331_v41 = vmul.f32 %v11163_v3, %v11045_v31 }
 0x32b   :  { %v1106_v57 = vadd.f32 %v11161_v43, %v1039_v26  ;;  %v1108_v59 = vadd.f32 %v11161_v43, %v1041_v10  ;;  %v1109_v37 = vadd.f32 %v11161_v43, %v1042_v34  ;;  %v1110_v1 = vadd.f32 %v11161_v43, %v1043_v38  ;;  %v15734_v34 = vld [vmem:[#allocation13_spill] sm:$0xff] }
 0x32c   :  { %v1111_v50 = vadd.f32 %v11161_v43, %v1044_v56  ;;  %v1161_v27 = vmax.f32 %v1097_v6, %v1099_v46  ;;  %v1112_v45 = vadd.f32 %v11161_v43, %v1045_v19  ;;  %v1162_v63 = vmax.f32 %v1098_v5, %v1100_v54  ;;  %v15735_v46 = vld [vmem:[#allocation14_spill] sm:$0xff] }
 0x32d   :  { %v1163_v30 = vmax.f32 %v1101_v2, %v1103_v13  ;;  %v1164_v16 = vmax.f32 %v1102_v61, %v1104_v9  ;;  %v11341_v31 = vmul.f32 %v11163_v3, %v11053_v40  ;;  %v1113_v26 = vadd.f32 %v11161_v43, %v1046_v15  ;;  %v9496_v2 = vld [vmem:[%s15498_s5 + $0x58] sm:$0xff]  ;;  %v15736_v61 = vld [vmem:[#allocation15_spill] sm:$0xff] }
 0x32e   :  { %v1115_v10 = vadd.f32 %v11161_v43, %v1048_v20  ;;  %v1165_v42 = vmax.f32 %v1105_v53, %v1107_v8  ;;  %1193 = vst.msk [vmem:[#allocation2] sm:$0xff] %vm618_vm1, %v1161_v27  ;;  %v11348_v38 = vmul.f32 %v11163_v3, %v15734_v34  ;;  %v1114_v56 = vadd.f32 %v11161_v43, %v1047_v51  ;;  %v9492_v51 = vld [vmem:[%s15498_s5 + $0x38] sm:$0xff]  ;;  %v9495_v27 = vld [vmem:[%s15498_s5 + $0x50] sm:$0xff] }
 0x32f   :  { %v1116_v19 = vadd.f32 %v11161_v43, %v1049_v22  ;;  %v1166_v6 = vmax.f32 %v1106_v57, %v1108_v59  ;;  %1194 = vst.msk [vmem:[#allocation2 + $0x8] sm:$0xff] %vm618_vm1, %v1162_v63  ;;  %v11355_v40 = vmul.f32 %v11163_v3, %v11069_v39  ;;  %v1117_v15 = vadd.f32 %v11161_v43, %v1050_v18  ;;  %v9488_v22 = vld [vmem:[%s15498_s5 + $0x18] sm:$0xff] }
 0x330   :  { %v1119_v20 = vadd.f32 %v11161_v43, %v1052_v62  ;;  %v1167_v5 = vmax.f32 %v1109_v37, %v1111_v50  ;;  %1195 = vst.msk [vmem:[#allocation2 + $0x10] sm:$0xff] %vm618_vm1, %v1163_v30  ;;  %v11368_v54 = vmul.f32 %v11163_v3, %v15735_v46  ;;  %v1118_v39 = vadd.f32 %v11161_v43, %v11219_v11 }
 0x331   :  { %v1120_v18 = vadd.f32 %v11161_v43, %v11225_v52  ;;  %v1168_v62 = vmax.f32 %v1110_v1, %v1112_v45  ;;  %1196 = vst.msk [vmem:[#allocation2 + $0x18] sm:$0xff] %vm618_vm1, %v1164_v16  ;;  %v11380_v13 = vmul.f32 %v11163_v3, %v15736_v61  ;;  %v1121_v9 = vadd.f32 %v11161_v43, %v11229_v60  ;;  %v15737_v52 = vld [vmem:[#allocation16_spill] sm:$0xff]  ;;  %v15738_v45 = vld [vmem:[#allocation17_spill] sm:$0xff] }
 0x332   :  { %v1123_v11 = vadd.f32 %v11161_v43, %v11237_v14  ;;  %v1169_v53 = vmax.f32 %v1113_v26, %v1115_v10  ;;  %1197 = vst.msk [vmem:[#allocation2 + $0x20] sm:$0xff] %vm618_vm1, %v1165_v42  ;;  %v11389_v8 = vmul.f32 %v11163_v3, %v15737_v52  ;;  %v1122_v57 = vadd.f32 %v11161_v43, %v11233_v4  ;;  %v9491_v4 = vld [vmem:[%s15498_s5 + $0x30] sm:$0xff]  ;;  %v9493_v61 = vld [vmem:[%s15498_s5 + $0x40] sm:$0xff] }
 0x333   :  { %v1124_v59 = vadd.f32 %v11161_v43, %v11241_v23  ;;  %v1170_v37 = vmax.f32 %v1114_v56, %v1116_v19  ;;  %1198 = vst.msk [vmem:[#allocation2 + $0x28] sm:$0xff] %vm618_vm1, %v1166_v6  ;;  %v1125_v60 = vadd.f32 %v11161_v43, %v11245_v24  ;;  %v1127_v14 = vadd.f32 %v11161_v43, %v11253_v29  ;;  %v9487_v23 = vld [vmem:[%s15498_s5 + $0x10] sm:$0xff]  ;;  %v9494_v6 = vld [vmem:[%s15498_s5 + $0x48] sm:$0xff] }
 0x334   :  { %v1171_v1 = vmax.f32 %v1117_v15, %v1119_v20  ;;  %1199 = vst.msk [vmem:[#allocation2 + $0x30] sm:$0xff] %vm618_vm1, %v1167_v5  ;;  %1480 = vmatpush.bf16.msrb.mxu1 %v9492_v51  ;;  %1577 = vmatpush.bf16.msra.mxu2 %v9488_v22  ;;  %v1126_v50 = vadd.f32 %v11161_v43, %v11249_v17  ;;  %v15740_v15 = vld [vmem:[#allocation22_spill] sm:$0xff] }
 0x335   :  { %v1128_v24 = vadd.f32 %v11161_v43, %v11257_v21  ;;  %v1172_v29 = vmax.f32 %v1118_v39, %v1120_v18  ;;  %1200 = vst.msk [vmem:[#allocation2 + $0x38] sm:$0xff] %vm618_vm1, %v1168_v62  ;;  %1707 = vmatpush.bf16.msra.mxu3 %v9496_v2  ;;  %v1084_v63 = vmul.f32 %v11163_v3, %v15738_v45  ;;  %v15739_v21 = vld [vmem:[#allocation21_spill] sm:$0xff] }
 0x336   :  { %v1129_v30 = vadd.f32 %v11161_v43, %v11261_v55  ;;  %v1131_v17 = vadd.f32 %v11161_v43, %v11269_v25  ;;  %v1173_v16 = vmax.f32 %v1121_v9, %v1123_v11  ;;  %1201 = vst.msk [vmem:[#allocation2 + $0x40] sm:$0xff] %vm618_vm1, %v1169_v53  ;;  %v1085_v26 = vmul.f32 %v11163_v3, %v15739_v21  ;;  %v15742_v9 = vld [vmem:[#allocation18_spill] sm:$0xff] }
 0x337   :  { %v1130_v10 = vadd.f32 %v11161_v43, %v11265_v33  ;;  %v1132_v42 = vadd.f32 %v11161_v43, %v11273_v35  ;;  %v1174_v34 = vmax.f32 %v1122_v57, %v1124_v59  ;;  %1202 = vst.msk [vmem:[#allocation2 + $0x48] sm:$0xff] %vm618_vm1, %v1170_v37  ;;  %v1133_v55 = vadd.f32 %v11161_v43, %v11277_v58  ;;  %v9490_v33 = vld [vmem:[%s15498_s5 + $0x28] sm:$0xff] }
 0x338   :  { %v1135_v25 = vadd.f32 %v11161_v43, %v11285_v12  ;;  %v1175_v56 = vmax.f32 %v1125_v60, %v1127_v14  ;;  %1203 = vst.msk [vmem:[#allocation2 + $0x50] sm:$0xff] %vm618_vm1, %v1171_v1  ;;  %1481 = vmatpush.bf16.msrb.mxu1 %v9491_v4  ;;  %1578 = vmatpush.bf16.msra.mxu2 %v9487_v23  ;;  %v9486_v35 = vld [vmem:[%s15498_s5 + $0x8] sm:$0xff] }
 0x339   :  { %v1134_v19 = vadd.f32 %v11161_v43, %v11281_v32  ;;  %v1136_v58 = vadd.f32 %v11161_v43, %v11289_v28  ;;  %v1176_v12 = vmax.f32 %v1126_v50, %v1128_v24  ;;  %1204 = vst.msk [vmem:[#allocation2 + $0x58] sm:$0xff] %vm618_vm1, %v1172_v29  ;;  %1708 = vmatpush.bf16.msra.mxu3 %v9495_v27  ;;  %v15741_v28 = vld [vmem:[#allocation23_spill] sm:$0xff] }
 0x33a   :  { %v1086_v20 = vmul.f32 %v11163_v3, %v15740_v15  ;;  %v1137_v5 = vadd.f32 %v11161_v43, %v11293_v36  ;;  %v1139_v32 = vadd.f32 %v11161_v43, %v11301_v7  ;;  %v1177_v51 = vmax.f32 %v1129_v30, %v1131_v17  ;;  %1205 = vst.msk [vmem:[#allocation2 + $0x60] sm:$0xff] %vm618_vm1, %v1173_v16  ;;  %v1229_v15 = vld [vmem:[#allocation2 + $0x20] ss:$2 sm:$0xff] }
 0x33b   :  { %v1087_v22 = vmul.f32 %v11163_v3, %v15741_v28  ;;  %v1138_v46 = vadd.f32 %v11161_v43, %v11297_v48  ;;  %v1140_v39 = vadd.f32 %v11161_v43, %v11305_v47  ;;  %v1178_v18 = vmax.f32 %v1130_v10, %v1132_v42  ;;  %1206 = vst.msk [vmem:[#allocation2 + $0x68] sm:$0xff] %vm618_vm1, %v1174_v34  ;;  %v9489_v48 = vld [vmem:[%s15498_s5 + $0x20] sm:$0xff] }
 0x33c   :  { %v1141_v36 = vadd.f32 %v11161_v43, %v11317_v44  ;;  %v1143_v7 = vadd.f32 %v11161_v43, %v11327_v49  ;;  %v1179_v62 = vmax.f32 %v1133_v55, %v1135_v25  ;;  %1207 = vst.msk [vmem:[#allocation2 + $0x70] sm:$0xff] %vm618_vm1, %v1175_v56  ;;  %1482 = vmatpush.bf16.msrb.mxu1 %v9490_v33  ;;  %v9485_v47 = vld [vmem:[%s15498_s5] sm:$0xff]  ;;  %v9863_v17 = vmov 0.0   ;;  %v1263_v28 = vld [vmem:[#allocation2 + $0x31] ss:$2 sm:$0xff] }
 0x33d   :  { %1579 = vmatpush.bf16.msra.mxu2 %v9486_v35  ;;  %v1142_v2 = vadd.f32 %v11161_v43, %v11321_v0  ;;  %v1144_v44 = vadd.f32 %v11161_v43, %v11331_v41  ;;  %v1180_v49 = vmax.f32 %v1134_v19, %v1136_v58  ;;  %1208 = vst.msk [vmem:[#allocation2 + $0x78] sm:$0xff] %vm618_vm1, %v1176_v12  ;;  %v15743_v41 = vld [vmem:[#allocation27_spill] sm:$0xff] }
 0x33e   :  { %1709 = vmatpush.bf16.msra.mxu3 %v9494_v6  ;;  %v1088_v11 = vmul.f32 %v11163_v3, %v15742_v9  ;;  %v1145_v53 = vadd.f32 %v11161_v43, %v11341_v31  ;;  %v1147_v0 = vadd.f32 %v11161_v43, %v11355_v40  ;;  %v1181_v52 = vmax.f32 %v1137_v5, %v1139_v32  ;;  %v1255_v19 = vld [vmem:[#allocation2 + $0xf0] ss:$2 sm:$0xff]  ;;  %v1287_v58 = vld [vmem:[#allocation2 + $0xf1] ss:$2 sm:$0xff] }
 0x33f   :  { %1209 = vst.msk [vmem:[#allocation2 + $0x80] sm:$0xff] %vm618_vm1, %v1177_v51  ;;  %v1089_v57 = vmul.f32 %v11163_v3, %v15743_v41  ;;  %v1146_v59 = vadd.f32 %v11161_v43, %v11348_v38  ;;  %v1148_v37 = vadd.f32 %v11161_v43, %v11368_v54  ;;  %v1182_v60 = vmax.f32 %v1138_v46, %v1140_v39  ;;  %v1227_v12 = vld [vmem:[#allocation2 + $0x10] ss:$2 sm:$0xff]  ;;  %v1259_v6 = vld [vmem:[#allocation2 + $0x11] ss:$2 sm:$0xff] }
 0x340   :  { %1210 = vst.msk [vmem:[#allocation2 + $0x88] sm:$0xff] %vm618_vm1, %v1178_v18  ;;  %v1149_v31 = vadd.f32 %v11161_v43, %v11380_v13  ;;  %v1151_v40 = vadd.f32 %v11161_v43, %v1084_v63  ;;  %v1183_v14 = vmax.f32 %v1141_v36, %v1143_v7  ;;  %1483 = vmatpush.bf16.msrb.mxu1 %v9489_v48  ;;  %v1257_v63 = vld [vmem:[#allocation2 + $0x1] ss:$2 sm:$0xff]  ;;  %v1231_v51 = vld [vmem:[#allocation2 + $0x30] ss:$2 sm:$0xff] }
 0x341   :  { %1211 = vst.msk [vmem:[#allocation2 + $0x90] sm:$0xff] %vm618_vm1, %v1179_v62  ;;  %1580 = vmatpush.bf16.msra.mxu2 %v9485_v47  ;;  %v1150_v3 = vadd.f32 %v11161_v43, %v11389_v8  ;;  %v1152_v38 = vadd.f32 %v11161_v43, %v1085_v26  ;;  %v1184_v1 = vmax.f32 %v1142_v2, %v1144_v44  ;;  %v1265_v46 = vld [vmem:[#allocation2 + $0x41] ss:$2 sm:$0xff]  ;;  %v1235_v18 = vld [vmem:[#allocation2 + $0x50] ss:$2 sm:$0xff] }
 0x342   :  { %1212 = vst.msk [vmem:[#allocation2 + $0x98] sm:$0xff] %vm618_vm1, %v1180_v49  ;;  %1710 = vmatpush.bf16.msra.mxu3 %v9493_v61  ;;  %v1153_v54 = vadd.f32 %v11161_v43, %v1086_v20  ;;  %v1155_v13 = vadd.f32 %v11161_v43, %v1088_v11  ;;  %v1185_v4 = vmax.f32 %v1145_v53, %v1147_v0  ;;  %v1261_v20 = vld [vmem:[#allocation2 + $0x21] ss:$2 sm:$0xff]  ;;  %v1267_v36 = vld [vmem:[#allocation2 + $0x51] ss:$2 sm:$0xff] }
 0x343   :  { %1213 = vst.msk [vmem:[#allocation2 + $0xa0] sm:$0xff] %vm618_vm1, %v1181_v52  ;;  %v1154_v23 = vadd.f32 %v11161_v43, %v1087_v22  ;;  %v1156_v50 = vadd.f32 %v11161_v43, %v1089_v57  ;;  %v1186_v24 = vmax.f32 %v1146_v59, %v1148_v37  ;;  %v1187_v8 = vmax.f32 %v1149_v31, %v1151_v40  ;;  %v1225_v43 = vld [vmem:[#allocation2] ss:$2 sm:$0xff]  ;;  %v1269_v48 = vld [vmem:[#allocation2 + $0x61] ss:$2 sm:$0xff] }
 0x344   :  { %1214 = vst.msk [vmem:[#allocation2 + $0xa8] sm:$0xff] %vm618_vm1, %v1182_v60  ;;  %v1188_v29 = vmax.f32 %v1150_v3, %v1152_v38  ;;  %v1189_v27 = vmax.f32 %v1153_v54, %v1155_v13  ;;  %v1288_v30 = vmax.f32 %v1225_v43, %v1257_v63  ;;  %v1239_v33 = vld [vmem:[#allocation2 + $0x70] ss:$2 sm:$0xff]  ;;  %v1271_v35 = vld [vmem:[#allocation2 + $0x71] ss:$2 sm:$0xff]  ;;  %v1303_v32 = vmax.f32 %v1255_v19, %v1287_v58 }
 0x345   :  { %1215 = vst.msk [vmem:[#allocation2 + $0xb0] sm:$0xff] %vm618_vm1, %v1183_v14  ;;  %v1190_v45 = vmax.f32 %v1154_v23, %v1156_v50  ;;  %v1295_v5 = vmax.f32 %v1239_v33, %v1271_v35  ;;  %v1233_v22 = vld [vmem:[#allocation2 + $0x40] ss:$2 sm:$0xff]  ;;  %v1289_v39 = vmax.f32 %v1227_v12, %v1259_v6  ;;  %v1290_v7 = vmax.f32 %v1229_v15, %v1261_v20 }
 0x346   :  { %1216 = vst.msk [vmem:[#allocation2 + $0xb8] sm:$0xff] %vm618_vm1, %v1184_v1  ;;  %v1237_v62 = vld [vmem:[#allocation2 + $0x60] ss:$2 sm:$0xff]  ;;  %v1291_v47 = vmax.f32 %v1231_v51, %v1263_v28  ;;  %v1292_v49 = vmax.f32 %v1233_v22, %v1265_v46  ;;  %v1293_v11 = vmax.f32 %v1235_v18, %v1267_v36 }
 0x347   :  { %1217 = vst.msk [vmem:[#allocation2 + $0xc0] sm:$0xff] %vm618_vm1, %v1185_v4  ;;  %v1241_v2 = vld [vmem:[#allocation2 + $0x80] ss:$2 sm:$0xff]  ;;  %v1273_v44 = vld [vmem:[#allocation2 + $0x81] ss:$2 sm:$0xff]  ;;  %v1294_v52 = vmax.f32 %v1237_v62, %v1269_v48  ;;  %v9507_v62 = vld [vmem:[%s15498_s5 + $0xb0] sm:$0xff] }
 0x348   :  { %1218 = vst.msk [vmem:[#allocation2 + $0xc8] sm:$0xff] %vm618_vm1, %v1186_v24  ;;  %v1296_v59 = vmax.f32 %v1241_v2, %v1273_v44 }
 0x349   :  { %1219 = vst.msk [vmem:[#allocation2 + $0xd0] sm:$0xff] %vm618_vm1, %v1187_v8  ;;  %v1243_v61 = vld [vmem:[#allocation2 + $0x90] ss:$2 sm:$0xff]  ;;  %v1275_v9 = vld [vmem:[#allocation2 + $0x91] ss:$2 sm:$0xff] }
 0x34a   :  { %1220 = vst.msk [vmem:[#allocation2 + $0xd8] sm:$0xff] %vm618_vm1, %v1188_v29  ;;  %v1297_v31 = vmax.f32 %v1243_v61, %v1275_v9 }
 0x34b   :  { %1221 = vst.msk [vmem:[#allocation2 + $0xe0] sm:$0xff] %vm618_vm1, %v1189_v27  ;;  %v1245_v53 = vld [vmem:[#allocation2 + $0xa0] ss:$2 sm:$0xff]  ;;  %v1277_v0 = vld [vmem:[#allocation2 + $0xa1] ss:$2 sm:$0xff] }
 0x34c   :  { %1222 = vst.msk [vmem:[#allocation2 + $0xe8] sm:$0xff] %vm618_vm1, %v1190_v45  ;;  %v1298_v3 = vmax.f32 %v1245_v53, %v1277_v0 }
 0x34d   :  { %1304 = vst.msk [vmem:[#allocation3] sm:$0xff] %vm618_vm1, %v9863_v17  ;;  %v1247_v41 = vld [vmem:[#allocation2 + $0xb0] ss:$2 sm:$0xff]  ;;  %v1279_v57 = vld [vmem:[#allocation2 + $0xb1] ss:$2 sm:$0xff] }
 0x34e   :  { %1306 = vst.msk [vmem:[#allocation3 + $0x8] sm:$0x3] %vm1305_vm5, %v9863_v17  ;;  %v1299_v54 = vmax.f32 %v1247_v41, %v1279_v57 }
 0x34f   :  { %1307 = vst.msk [vmem:[#allocation3 + $0x10] sm:$0xff] %vm618_vm1, %v9863_v17  ;;  %v1249_v37 = vld [vmem:[#allocation2 + $0xc0] ss:$2 sm:$0xff]  ;;  %v1281_v60 = vld [vmem:[#allocation2 + $0xc1] ss:$2 sm:$0xff] }
 0x350   :  { %1308 = vst.msk [vmem:[#allocation3 + $0x18] sm:$0x3] %vm1305_vm5, %v9863_v17  ;;  %v1300_v13 = vmax.f32 %v1249_v37, %v1281_v60 }
 0x351   :  { %1346 = vst.msk [vmem:[#allocation3 + $0x11] sm:$0xff] %vm618_vm1, %v1288_v30  ;;  %v1251_v40 = vld [vmem:[#allocation2 + $0xd0] ss:$2 sm:$0xff]  ;;  %v1283_v14 = vld [vmem:[#allocation2 + $0xd1] ss:$2 sm:$0xff] }
 0x352   :  { %1309 = vst.msk [vmem:[#allocation3 + $0x20] sm:$0xff] %vm618_vm1, %v9863_v17  ;;  %v1301_v24 = vmax.f32 %v1251_v40, %v1283_v14 }
 0x353   :  { %1310 = vst.msk [vmem:[#allocation3 + $0x28] sm:$0x3] %vm1305_vm5, %v9863_v17  ;;  %v1253_v38 = vld [vmem:[#allocation2 + $0xe0] ss:$2 sm:$0xff]  ;;  %v1285_v1 = vld [vmem:[#allocation2 + $0xe1] ss:$2 sm:$0xff] }
 0x354   :  { %1311 = vst.msk [vmem:[#allocation3 + $0x30] sm:$0xff] %vm618_vm1, %v9863_v17  ;;  %v1363_v10 = vld [vmem:[#allocation3] sm:$0xff]  ;;  %v1302_v45 = vmax.f32 %v1253_v38, %v1285_v1 }
 0x355   :  { %1312 = vst.msk [vmem:[#allocation3 + $0x38] sm:$0x3] %vm1305_vm5, %v9863_v17  ;;  %v1395_v16 = vld [vmem:[#allocation3 + $0x1] sm:$0xff] }
 0x356   :  { %1313 = vst.msk [vmem:[#allocation3 + $0x40] sm:$0xff] %vm618_vm1, %v9863_v17  ;;  %v1622_v55 = vld [vmem:[#allocation3 + $0x2] sm:$0xff] }
 0x357   :  { %1314 = vst.msk [vmem:[#allocation3 + $0x48] sm:$0x3] %vm1305_vm5, %v9863_v17 }
 0x358   :  { %v11538_v21 = vld [vmem:[#allocation3 + $0x11] sm:$0xff]  ;;  %1315 = vst.msk [vmem:[#allocation3 + $0x50] sm:$0xff] %vm618_vm1, %v9863_v17 }
 0x359   :  { %v1411_v26 = vpack.c.bf16 %v11538_v21, %v1395_v16  ;;  %1316 = vst.msk [vmem:[#allocation3 + $0x58] sm:$0x3] %vm1305_vm5, %v9863_v17  ;;  %v11552_v42 = vld [vmem:[#allocation3 + $0x10] sm:$0xff] }
 0x35a   :  { %1317 = vst.msk [vmem:[#allocation3 + $0x60] sm:$0xff] %vm618_vm1, %v9863_v17  ;;  %v1379_v34 = vpack.c.bf16 %v11552_v42, %v1363_v10  ;;  %v11762_v25 = vld [vmem:[#allocation3 + $0x12] sm:$0xff] }
 0x35b   :  { %8539 = vmatmul.msk.bf16.vlgmr.msrb.gmra.mxu1 %vm618_vm1, %v1411_v26  ;;  %1318 = vst.msk [vmem:[#allocation3 + $0x68] sm:$0x3] %vm1305_vm5, %v9863_v17  ;;  %v1638_v56 = vpack.c.bf16 %v11762_v25, %v1622_v55 }
 0x35c   :  { %1319 = vst.msk [vmem:[#allocation3 + $0x70] sm:$0xff] %vm618_vm1, %v9863_v17  ;;  %8563 = vmatmul.msk.bf16.vlgmr.msra.gmra.mxu2 %vm618_vm1, %v1379_v34 }
 0x35d   :  { %1320 = vst.msk [vmem:[#allocation3 + $0x78] sm:$0x3] %vm1305_vm5, %v9863_v17  ;;  %8595 = vmatmul.msk.bf16.vlgmr.msra.gmra.mxu3 %vm618_vm1, %v1638_v56 }
 0x35e   :  { %1321 = vst.msk [vmem:[#allocation3 + $0x80] sm:$0xff] %vm618_vm1, %v9863_v17 }
 0x35f   :  { %1322 = vst.msk [vmem:[#allocation3 + $0x88] sm:$0x3] %vm1305_vm5, %v9863_v17 }
 0x360   :  { %1323 = vst.msk [vmem:[#allocation3 + $0x90] sm:$0xff] %vm618_vm1, %v9863_v17 }
 0x361   :  { %1324 = vst.msk [vmem:[#allocation3 + $0x98] sm:$0x3] %vm1305_vm5, %v9863_v17 }
 0x362   :  { %1325 = vst.msk [vmem:[#allocation3 + $0xa0] sm:$0xff] %vm618_vm1, %v9863_v17 }
 0x363   :  { %1326 = vst.msk [vmem:[#allocation3 + $0xa8] sm:$0x3] %vm1305_vm5, %v9863_v17 }
 0x364   :  { %1327 = vst.msk [vmem:[#allocation3 + $0xb0] sm:$0xff] %vm618_vm1, %v9863_v17 }
 0x365   :  { %1328 = vst.msk [vmem:[#allocation3 + $0xb8] sm:$0x3] %vm1305_vm5, %v9863_v17 }
 0x366   :  { %1329 = vst.msk [vmem:[#allocation3 + $0xc0] sm:$0xff] %vm618_vm1, %v9863_v17 }
 0x367   :  { %1330 = vst.msk [vmem:[#allocation3 + $0xc8] sm:$0x3] %vm1305_vm5, %v9863_v17 }
 0x368   :  { %1331 = vst.msk [vmem:[#allocation3 + $0xd0] sm:$0xff] %vm618_vm1, %v9863_v17 }
 0x369   :  { %1332 = vst.msk [vmem:[#allocation3 + $0xd8] sm:$0x3] %vm1305_vm5, %v9863_v17  ;;  %v1371_v60 = vld [vmem:[#allocation3 + $0xa0] sm:$0xff] }
 0x36a   :  { %1333 = vst.msk [vmem:[#allocation3 + $0xe0] sm:$0xff] %vm618_vm1, %v9863_v17  ;;  %v1630_v37 = vld [vmem:[#allocation3 + $0xa2] sm:$0xff] }
 0x36b   :  { %1334 = vst.msk [vmem:[#allocation3 + $0xe8] sm:$0x3] %vm1305_vm5, %v9863_v17 }
 0x36c   :  { %1335 = vst.msk [vmem:[#allocation3 + $0xf0] sm:$0xff] %vm618_vm1, %v9863_v17 }
 0x36d   :  { %1336 = vst.msk [vmem:[#allocation3 + $0xf8] sm:$0x3] %vm1305_vm5, %v9863_v17 }
 0x36e   :  { %1337 = vst.msk [vmem:[#allocation3 + $0x100] sm:$0xff] %vm618_vm1, %v9863_v17 }
 0x36f   :  { %1338 = vst.msk [vmem:[#allocation3 + $0x108] sm:$0x3] %vm1305_vm5, %v9863_v17 }
 0x370   :  { %1339 = vst.msk [vmem:[#allocation3 + $0x110] sm:$0xff] %vm618_vm1, %v9863_v17 }
 0x371   :  { %1340 = vst.msk [vmem:[#allocation3 + $0x118] sm:$0x3] %vm1305_vm5, %v9863_v17 }
 0x372   :  { %1341 = vst.msk [vmem:[#allocation3 + $0x120] sm:$0xff] %vm618_vm1, %v9863_v17 }
 0x373   :  { %1342 = vst.msk [vmem:[#allocation3 + $0x128] sm:$0x3] %vm1305_vm5, %v9863_v17 }
 0x374   :  { %1343 = vst.msk [vmem:[#allocation3 + $0x130] sm:$0xff] %vm618_vm1, %v9863_v17 }
 0x375   :  { %1344 = vst.msk [vmem:[#allocation3 + $0x138] sm:$0x3] %vm1305_vm5, %v9863_v17 }
 0x376   :  { %2840 = vst.msk [vmem:[#allocation4] sm:$0xff] %vm618_vm1, %v9863_v17 }
 0x377   :  { %2841 = vst.msk [vmem:[#allocation4 + $0x8] sm:$0xff] %vm618_vm1, %v9863_v17 }
 0x378   :  { %2842 = vst.msk [vmem:[#allocation4 + $0x10] sm:$0x3] %vm1305_vm5, %v9863_v17 }
 0x379   :  { %2843 = vst.msk [vmem:[#allocation4 + $0x18] sm:$0xff] %vm618_vm1, %v9863_v17 }
 0x37a   :  { %2844 = vst.msk [vmem:[#allocation4 + $0x20] sm:$0xff] %vm618_vm1, %v9863_v17 }
 0x37b   :  { %2845 = vst.msk [vmem:[#allocation4 + $0x28] sm:$0x3] %vm1305_vm5, %v9863_v17 }
 0x37c   :  { %2846 = vst.msk [vmem:[#allocation4 + $0x30] sm:$0xff] %vm618_vm1, %v9863_v17 }
 0x37d   :  { %2847 = vst.msk [vmem:[#allocation4 + $0x38] sm:$0xff] %vm618_vm1, %v9863_v17 }
 0x37e   :  { %2848 = vst.msk [vmem:[#allocation4 + $0x40] sm:$0x3] %vm1305_vm5, %v9863_v17 }
 0x37f   :  { %2849 = vst.msk [vmem:[#allocation4 + $0x48] sm:$0xff] %vm618_vm1, %v9863_v17 }
 0x380   :  { %2850 = vst.msk [vmem:[#allocation4 + $0x50] sm:$0xff] %vm618_vm1, %v9863_v17 }
 0x381   :  { %2851 = vst.msk [vmem:[#allocation4 + $0x58] sm:$0x3] %vm1305_vm5, %v9863_v17 }
 0x382   :  { %2852 = vst.msk [vmem:[#allocation4 + $0x60] sm:$0xff] %vm618_vm1, %v9863_v17 }
 0x383   :  { %2853 = vst.msk [vmem:[#allocation4 + $0x68] sm:$0xff] %vm618_vm1, %v9863_v17 }
 0x384   :  { %2854 = vst.msk [vmem:[#allocation4 + $0x70] sm:$0x3] %vm1305_vm5, %v9863_v17 }
 0x385   :  { %2855 = vst.msk [vmem:[#allocation4 + $0x78] sm:$0xff] %vm618_vm1, %v9863_v17 }
 0x386   :  { %2856 = vst.msk [vmem:[#allocation4 + $0x80] sm:$0xff] %vm618_vm1, %v9863_v17 }
 0x387   :  { %2857 = vst.msk [vmem:[#allocation4 + $0x88] sm:$0x3] %vm1305_vm5, %v9863_v17 }
 0x388   :  { %2858 = vst.msk [vmem:[#allocation4 + $0x90] sm:$0xff] %vm618_vm1, %v9863_v17 }
 0x389   :  { %2859 = vst.msk [vmem:[#allocation4 + $0x98] sm:$0xff] %vm618_vm1, %v9863_v17 }
 0x38a   :  { %2860 = vst.msk [vmem:[#allocation4 + $0xa0] sm:$0x3] %vm1305_vm5, %v9863_v17 }
 0x38b   :  { %2861 = vst.msk [vmem:[#allocation4 + $0xa8] sm:$0xff] %vm618_vm1, %v9863_v17 }
 0x38c   :  { %2862 = vst.msk [vmem:[#allocation4 + $0xb0] sm:$0xff] %vm618_vm1, %v9863_v17 }
 0x38d   :  { %2863 = vst.msk [vmem:[#allocation4 + $0xb8] sm:$0x3] %vm1305_vm5, %v9863_v17 }
 0x38e   :  { %2864 = vst.msk [vmem:[#allocation4 + $0xc0] sm:$0xff] %vm618_vm1, %v9863_v17 }
 0x38f   :  { %2865 = vst.msk [vmem:[#allocation4 + $0xc8] sm:$0xff] %vm618_vm1, %v9863_v17 }
 0x390   :  { %2866 = vst.msk [vmem:[#allocation4 + $0xd0] sm:$0x3] %vm1305_vm5, %v9863_v17 }
 0x391   :  { %2867 = vst.msk [vmem:[#allocation4 + $0xd8] sm:$0xff] %vm618_vm1, %v9863_v17 }
 0x392   :  { %2868 = vst.msk [vmem:[#allocation4 + $0xe0] sm:$0xff] %vm618_vm1, %v9863_v17 }
 0x393   :  { %2869 = vst.msk [vmem:[#allocation4 + $0xe8] sm:$0x3] %vm1305_vm5, %v9863_v17 }
 0x394   :  { %2870 = vst.msk [vmem:[#allocation4 + $0xf0] sm:$0xff] %vm618_vm1, %v9863_v17 }
 0x395   :  { %2871 = vst.msk [vmem:[#allocation4 + $0xf8] sm:$0xff] %vm618_vm1, %v9863_v17 }
 0x396   :  { %2872 = vst.msk [vmem:[#allocation4 + $0x100] sm:$0x3] %vm1305_vm5, %v9863_v17 }
 0x397   :  { %2873 = vst.msk [vmem:[#allocation4 + $0x108] sm:$0xff] %vm618_vm1, %v9863_v17 }
 0x398   :  { %2874 = vst.msk [vmem:[#allocation4 + $0x110] sm:$0xff] %vm618_vm1, %v9863_v17 }
 0x399   :  { %2875 = vst.msk [vmem:[#allocation4 + $0x118] sm:$0x3] %vm1305_vm5, %v9863_v17 }
 0x39a   :  { %2876 = vst.msk [vmem:[#allocation4 + $0x120] sm:$0xff] %vm618_vm1, %v9863_v17 }
 0x39b   :  { %2877 = vst.msk [vmem:[#allocation4 + $0x128] sm:$0xff] %vm618_vm1, %v9863_v17 }
 0x39c   :  { %2878 = vst.msk [vmem:[#allocation4 + $0x130] sm:$0x3] %vm1305_vm5, %v9863_v17 }
 0x39d   :  { %2879 = vst.msk [vmem:[#allocation4 + $0x138] sm:$0xff] %vm618_vm1, %v9863_v17 }
 0x39e   :  { %2880 = vst.msk [vmem:[#allocation4 + $0x140] sm:$0xff] %vm618_vm1, %v9863_v17 }
 0x39f   :  { %2881 = vst.msk [vmem:[#allocation4 + $0x148] sm:$0x3] %vm1305_vm5, %v9863_v17 }
 0x3a0   :  { %2882 = vst.msk [vmem:[#allocation4 + $0x150] sm:$0xff] %vm618_vm1, %v9863_v17 }
 0x3a1   :  { %2883 = vst.msk [vmem:[#allocation4 + $0x158] sm:$0xff] %vm618_vm1, %v9863_v17 }
 0x3a2   :  { %2884 = vst.msk [vmem:[#allocation4 + $0x160] sm:$0x3] %vm1305_vm5, %v9863_v17 }
 0x3a3   :  { %2885 = vst.msk [vmem:[#allocation4 + $0x168] sm:$0xff] %vm618_vm1, %v9863_v17 }
 0x3a4   :  { %2886 = vst.msk [vmem:[#allocation4 + $0x170] sm:$0xff] %vm618_vm1, %v9863_v17 }
 0x3a5   :  { %2887 = vst.msk [vmem:[#allocation4 + $0x178] sm:$0x3] %vm1305_vm5, %v9863_v17 }
 0x3a6   :  { %2888 = vst.msk [vmem:[#allocation4 + $0x180] sm:$0xff] %vm618_vm1, %v9863_v17 }
 0x3a7   :  { %2889 = vst.msk [vmem:[#allocation4 + $0x188] sm:$0xff] %vm618_vm1, %v9863_v17 }
 0x3a8   :  { %2890 = vst.msk [vmem:[#allocation4 + $0x190] sm:$0x3] %vm1305_vm5, %v9863_v17 }
 0x3a9   :  { %2891 = vst.msk [vmem:[#allocation4 + $0x198] sm:$0xff] %vm618_vm1, %v9863_v17 }
 0x3aa   :  { %2892 = vst.msk [vmem:[#allocation4 + $0x1a0] sm:$0xff] %vm618_vm1, %v9863_v17 }
 0x3ab   :  { %2893 = vst.msk [vmem:[#allocation4 + $0x1a8] sm:$0x3] %vm1305_vm5, %v9863_v17 }
 0x3ac   :  { %2894 = vst.msk [vmem:[#allocation4 + $0x1b0] sm:$0xff] %vm618_vm1, %v9863_v17 }
 0x3ad   :  { %2895 = vst.msk [vmem:[#allocation4 + $0x1b8] sm:$0xff] %vm618_vm1, %v9863_v17 }
 0x3ae   :  { %2896 = vst.msk [vmem:[#allocation4 + $0x1c0] sm:$0x3] %vm1305_vm5, %v9863_v17 }
 0x3af   :  { %2897 = vst.msk [vmem:[#allocation4 + $0x1c8] sm:$0xff] %vm618_vm1, %v9863_v17 }
 0x3b0   :  { %2898 = vst.msk [vmem:[#allocation4 + $0x1d0] sm:$0xff] %vm618_vm1, %v9863_v17 }
 0x3b1   :  { %2899 = vst.msk [vmem:[#allocation4 + $0x1d8] sm:$0x3] %vm1305_vm5, %v9863_v17 }
 0x3b2   :  { %2900 = vst.msk [vmem:[#allocation4 + $0x1e0] sm:$0xff] %vm618_vm1, %v9863_v17 }
 0x3b3   :  { %2901 = vst.msk [vmem:[#allocation4 + $0x1e8] sm:$0xff] %vm618_vm1, %v9863_v17 }
 0x3b4   :  { %2902 = vst.msk [vmem:[#allocation4 + $0x1f0] sm:$0x3] %vm1305_vm5, %v9863_v17 }
 0x3b5   :  { %2903 = vst.msk [vmem:[#allocation4 + $0x1f8] sm:$0xff] %vm618_vm1, %v9863_v17 }
 0x3b6   :  { %2904 = vst.msk [vmem:[#allocation4 + $0x200] sm:$0xff] %vm618_vm1, %v9863_v17 }
 0x3b7   :  { %2905 = vst.msk [vmem:[#allocation4 + $0x208] sm:$0x3] %vm1305_vm5, %v9863_v17 }
 0x3b8   :  { %2906 = vst.msk [vmem:[#allocation4 + $0x210] sm:$0xff] %vm618_vm1, %v9863_v17 }
 0x3b9   :  { %2907 = vst.msk [vmem:[#allocation4 + $0x218] sm:$0xff] %vm618_vm1, %v9863_v17 }
 0x3ba   :  { %2908 = vst.msk [vmem:[#allocation4 + $0x220] sm:$0x3] %vm1305_vm5, %v9863_v17 }
 0x3bb   :  { %2909 = vst.msk [vmem:[#allocation4 + $0x228] sm:$0xff] %vm618_vm1, %v9863_v17 }
 0x3bc   :  { %2910 = vst.msk [vmem:[#allocation4 + $0x230] sm:$0xff] %vm618_vm1, %v9863_v17 }
 0x3bd   :  { %2911 = vst.msk [vmem:[#allocation4 + $0x238] sm:$0x3] %vm1305_vm5, %v9863_v17 }
 0x3be   :  { %2912 = vst.msk [vmem:[#allocation4 + $0x240] sm:$0xff] %vm618_vm1, %v9863_v17 }
 0x3bf   :  { %2913 = vst.msk [vmem:[#allocation4 + $0x248] sm:$0xff] %vm618_vm1, %v9863_v17 }
 0x3c0   :  { %2914 = vst.msk [vmem:[#allocation4 + $0x250] sm:$0x3] %vm1305_vm5, %v9863_v17 }
 0x3c1   :  { %2915 = vst.msk [vmem:[#allocation4 + $0x258] sm:$0xff] %vm618_vm1, %v9863_v17 }
 0x3c2   :  { %2916 = vst.msk [vmem:[#allocation4 + $0x260] sm:$0xff] %vm618_vm1, %v9863_v17 }
 0x3c3   :  { %2917 = vst.msk [vmem:[#allocation4 + $0x268] sm:$0x3] %vm1305_vm5, %v9863_v17 }
 0x3c4   :  { %2918 = vst.msk [vmem:[#allocation4 + $0x270] sm:$0xff] %vm618_vm1, %v9863_v17 }
 0x3c5   :  { %2919 = vst.msk [vmem:[#allocation4 + $0x278] sm:$0xff] %vm618_vm1, %v9863_v17 }
 0x3c6   :  { %2920 = vst.msk [vmem:[#allocation4 + $0x280] sm:$0x3] %vm1305_vm5, %v9863_v17 }
 0x3c7   :  { %2921 = vst.msk [vmem:[#allocation4 + $0x288] sm:$0xff] %vm618_vm1, %v9863_v17 }
 0x3c8   :  { %2922 = vst.msk [vmem:[#allocation4 + $0x290] sm:$0xff] %vm618_vm1, %v9863_v17 }
 0x3c9   :  { %2923 = vst.msk [vmem:[#allocation4 + $0x298] sm:$0x3] %vm1305_vm5, %v9863_v17 }
 0x3ca   :  { %2924 = vst.msk [vmem:[#allocation4 + $0x2a0] sm:$0xff] %vm618_vm1, %v9863_v17 }
 0x3cb   :  { %2925 = vst.msk [vmem:[#allocation4 + $0x2a8] sm:$0xff] %vm618_vm1, %v9863_v17 }
 0x3cc   :  { %2926 = vst.msk [vmem:[#allocation4 + $0x2b0] sm:$0x3] %vm1305_vm5, %v9863_v17 }
 0x3cd   :  { %2927 = vst.msk [vmem:[#allocation4 + $0x2b8] sm:$0xff] %vm618_vm1, %v9863_v17 }
 0x3ce   :  { %2928 = vst.msk [vmem:[#allocation4 + $0x2c0] sm:$0xff] %vm618_vm1, %v9863_v17 }
 0x3cf   :  { %2929 = vst.msk [vmem:[#allocation4 + $0x2c8] sm:$0x3] %vm1305_vm5, %v9863_v17 }
 0x3d0   :  { %2930 = vst.msk [vmem:[#allocation4 + $0x2d0] sm:$0xff] %vm618_vm1, %v9863_v17 }
 0x3d1   :  { %2931 = vst.msk [vmem:[#allocation4 + $0x2d8] sm:$0xff] %vm618_vm1, %v9863_v17 }
 0x3d2   :  { %2932 = vst.msk [vmem:[#allocation4 + $0x2e0] sm:$0x3] %vm1305_vm5, %v9863_v17 }
 0x3d3   :  { %2933 = vst.msk [vmem:[#allocation4 + $0x2e8] sm:$0xff] %vm618_vm1, %v9863_v17 }
 0x3d4   :  { %2934 = vst.msk [vmem:[#allocation4 + $0x2f0] sm:$0xff] %vm618_vm1, %v9863_v17 }
 0x3d5   :  { %2935 = vst.msk [vmem:[#allocation4 + $0x2f8] sm:$0x3] %vm1305_vm5, %v9863_v17 }
 0x3d6   :  { %2936 = vst.msk [vmem:[#allocation4 + $0x300] sm:$0xff] %vm618_vm1, %v9863_v17 }
 0x3d7   :  { %2937 = vst.msk [vmem:[#allocation4 + $0x308] sm:$0xff] %vm618_vm1, %v9863_v17 }
 0x3d8   :  { %2938 = vst.msk [vmem:[#allocation4 + $0x310] sm:$0x3] %vm1305_vm5, %v9863_v17 }
 0x3d9   :  { %2939 = vst.msk [vmem:[#allocation4 + $0x318] sm:$0xff] %vm618_vm1, %v9863_v17 }
 0x3da   :  { %2940 = vst.msk [vmem:[#allocation4 + $0x320] sm:$0xff] %vm618_vm1, %v9863_v17 }
 0x3db   :  { %2941 = vst.msk [vmem:[#allocation4 + $0x328] sm:$0x3] %vm1305_vm5, %v9863_v17 }
 0x3dc   :  { %2942 = vst.msk [vmem:[#allocation4 + $0x330] sm:$0xff] %vm618_vm1, %v9863_v17 }
 0x3dd   :  { %2943 = vst.msk [vmem:[#allocation4 + $0x338] sm:$0xff] %vm618_vm1, %v9863_v17 }
 0x3de   :  { %2944 = vst.msk [vmem:[#allocation4 + $0x340] sm:$0x3] %vm1305_vm5, %v9863_v17 }
 0x3df   :  { %2945 = vst.msk [vmem:[#allocation4 + $0x348] sm:$0xff] %vm618_vm1, %v9863_v17  ;;  %v1582_v20 = vpop.f32.mrf.mxu2 }
 0x3e0   :  { %2946 = vst.msk [vmem:[#allocation4 + $0x350] sm:$0xff] %vm618_vm1, %v9863_v17  ;;  %v1712_v19 = vpop.f32.mrf.mxu3 }
 0x3e1   :  { %2947 = vst.msk [vmem:[#allocation4 + $0x358] sm:$0x3] %vm1305_vm5, %v9863_v17 }
 0x3e2   :  { %1353 = vst.msk [vmem:[#allocation3 + $0x81] sm:$0xff] %vm618_vm1, %v1295_v5  ;;  %v9506_v5 = vld [vmem:[%s15498_s5 + $0xa8] sm:$0xff] }
 0x3e3   :  { %1361 = vst.msk [vmem:[#allocation3 + $0x121] sm:$0xff] %vm618_vm1, %v1303_v32 }
 0x3e4   :  { %1347 = vst.msk [vmem:[#allocation3 + $0x21] sm:$0xff] %vm618_vm1, %v1289_v39 }
 0x3e5   :  { %1348 = vst.msk [vmem:[#allocation3 + $0x31] sm:$0xff] %vm618_vm1, %v1290_v7 }
 0x3e6   :  { %1349 = vst.msk [vmem:[#allocation3 + $0x41] sm:$0xff] %vm618_vm1, %v1291_v47 }
 0x3e7   :  { %1350 = vst.msk [vmem:[#allocation3 + $0x51] sm:$0xff] %vm618_vm1, %v1292_v49 }
 0x3e8   :  { %1351 = vst.msk [vmem:[#allocation3 + $0x61] sm:$0xff] %vm618_vm1, %v1293_v11 }
 0x3e9   :  { %1352 = vst.msk [vmem:[#allocation3 + $0x71] sm:$0xff] %vm618_vm1, %v1294_v52 }
 0x3ea   :  { %1354 = vst.msk [vmem:[#allocation3 + $0xb1] sm:$0xff] %vm618_vm1, %v1296_v59 }
 0x3eb   :  { %v11835_v4 = vld [vmem:[#allocation3 + $0x21] sm:$0xff]  ;;  %1355 = vst.msk [vmem:[#allocation3 + $0xc1] sm:$0xff] %vm618_vm1, %v1297_v31 }
 0x3ec   :  { %v11837_v23 = vld [vmem:[#allocation3 + $0x20] sm:$0xff]  ;;  %v11842_v8 = vld [vmem:[#allocation3 + $0x31] sm:$0xff]  ;;  %1356 = vst.msk [vmem:[#allocation3 + $0xd1] sm:$0xff] %vm618_vm1, %v1298_v3 }
 0x3ed   :  { %v11839_v50 = vld [vmem:[#allocation3 + $0x22] sm:$0xff]  ;;  %v11844_v29 = vld [vmem:[#allocation3 + $0x30] sm:$0xff]  ;;  %v11853_v63 = vpack.c.bf16 %v11842_v8, %v11835_v4  ;;  %1357 = vst.msk [vmem:[#allocation3 + $0xe1] sm:$0xff] %vm618_vm1, %v1299_v54 }
 0x3ee   :  { %v11846_v27 = vld [vmem:[#allocation3 + $0x32] sm:$0xff]  ;;  %v11857_v30 = vpack.c.bf16 %v11844_v29, %v11837_v23  ;;  %v11859_v17 = vld [vmem:[#allocation3 + $0x41] sm:$0xff]  ;;  %1358 = vst.msk [vmem:[#allocation3 + $0xf1] sm:$0xff] %vm618_vm1, %v1300_v13 }
 0x3ef   :  { %v11861_v16 = vld [vmem:[#allocation3 + $0x40] sm:$0xff]  ;;  %v11868_v10 = vpack.c.bf16 %v11846_v27, %v11839_v50  ;;  %v11870_v34 = vld [vmem:[#allocation3 + $0x51] sm:$0xff]  ;;  %8540 = vmatmul.msk.bf16.gmra.mxu1 %vm618_vm1, %v11853_v63  ;;  %1359 = vst.msk [vmem:[#allocation3 + $0x101] sm:$0xff] %vm618_vm1, %v1301_v24 }
 0x3f0   :  { %v11863_v26 = vld [vmem:[#allocation3 + $0x42] sm:$0xff]  ;;  %v11872_v55 = vld [vmem:[#allocation3 + $0x50] sm:$0xff]  ;;  %8564 = vmatmul.msk.bf16.gmra.mxu2 %vm618_vm1, %v11857_v30  ;;  %1360 = vst.msk [vmem:[#allocation3 + $0x111] sm:$0xff] %vm618_vm1, %v1302_v45  ;;  %v11959_v40 = vpack.c.bf16 %v11870_v34, %v11859_v17 }
 0x3f1   :  { %v11874_v56 = vld [vmem:[#allocation3 + $0x52] sm:$0xff]  ;;  %v11887_v58 = vld [vmem:[#allocation3 + $0x61] sm:$0xff]  ;;  %8596 = vmatmul.msk.bf16.gmra.mxu3 %vm618_vm1, %v11868_v10  ;;  %v11963_v14 = vpack.c.bf16 %v11872_v55, %v11861_v16 }
 0x3f2   :  { %v11889_v12 = vld [vmem:[#allocation3 + $0x60] sm:$0xff]  ;;  %v11903_v32 = vld [vmem:[#allocation3 + $0xb1] sm:$0xff]  ;;  %v11967_v3 = vpack.c.bf16 %v11874_v56, %v11863_v26 }
 0x3f3   :  { %v11891_v6 = vld [vmem:[#allocation3 + $0x62] sm:$0xff]  ;;  %v11905_v51 = vld [vmem:[#allocation3 + $0xb0] sm:$0xff] }
 0x3f4   :  { %v11907_v28 = vld [vmem:[#allocation3 + $0xb2] sm:$0xff]  ;;  %v11909_v22 = vld [vmem:[#allocation3 + $0xc1] sm:$0xff]  ;;  %v1383_v0 = vpack.c.bf16 %v11905_v51, %v1371_v60 }
 0x3f5   :  { %v11911_v46 = vld [vmem:[#allocation3 + $0xc0] sm:$0xff]  ;;  %v11915_v18 = vld [vmem:[#allocation3 + $0xd1] sm:$0xff]  ;;  %v1642_v53 = vpack.c.bf16 %v11907_v28, %v1630_v37 }
 0x3f6   :  { %v11913_v39 = vld [vmem:[#allocation3 + $0xc2] sm:$0xff]  ;;  %v11917_v36 = vld [vmem:[#allocation3 + $0xd0] sm:$0xff]  ;;  %v12007_v47 = vpack.c.bf16 %v11915_v18, %v11909_v22 }
 0x3f7   :  { %v11919_v7 = vld [vmem:[#allocation3 + $0xd2] sm:$0xff]  ;;  %v11927_v2 = vld [vmem:[#allocation3 + $0xe1] sm:$0xff]  ;;  %v12011_v48 = vpack.c.bf16 %v11917_v36, %v11911_v46 }
 0x3f8   :  { %v11929_v44 = vld [vmem:[#allocation3 + $0xe0] sm:$0xff]  ;;  %v11933_v61 = vld [vmem:[#allocation3 + $0xf1] sm:$0xff] }
 0x3f9   :  { %v11931_v49 = vld [vmem:[#allocation3 + $0xe2] sm:$0xff]  ;;  %v11935_v9 = vld [vmem:[#allocation3 + $0xf0] sm:$0xff] }
 0x3fa   :  { %v11937_v11 = vld [vmem:[#allocation3 + $0xf2] sm:$0xff]  ;;  %v11945_v41 = vld [vmem:[#allocation3 + $0x101] sm:$0xff] }
 0x3fb   :  { %v11947_v57 = vld [vmem:[#allocation3 + $0x100] sm:$0xff]  ;;  %v11975_v38 = vld [vmem:[#allocation3 + $0x71] sm:$0xff] }
 0x3fc   :  { %v11949_v59 = vld [vmem:[#allocation3 + $0x102] sm:$0xff]  ;;  %v11977_v1 = vld [vmem:[#allocation3 + $0x70] sm:$0xff]  ;;  %v11983_v13 = vpack.c.bf16 %v11975_v38, %v11887_v58 }
 0x3fd   :  { %v11979_v54 = vld [vmem:[#allocation3 + $0x72] sm:$0xff]  ;;  %v11987_v24 = vpack.c.bf16 %v11977_v1, %v11889_v12  ;;  %v1403_v31 = vld [vmem:[#allocation3 + $0xa1] sm:$0xff] }
 0x3fe   :  { %v11991_v45 = vpack.c.bf16 %v11979_v54, %v11891_v6  ;;  %v1415_v52 = vpack.c.bf16 %v11903_v32, %v1403_v31  ;;  %v12015_v31 = vpack.c.bf16 %v11919_v7, %v11913_v39  ;;  %v9499_v37 = vld [vmem:[%s15498_s5 + $0x70] sm:$0xff] }
 0x3ff   :  { %8541 = vmatmul.msk.bf16.gmra.mxu1 %vm618_vm1, %v11959_v40  ;;  %v9503_v60 = vld [vmem:[%s15498_s5 + $0x90] sm:$0xff] }
 0x400   :  { %8565 = vmatmul.msk.bf16.gmra.mxu2 %vm618_vm1, %v11963_v14  ;;  %v12077_v35 = vld [vmem:[#allocation3 + $0x111] sm:$0xff] }
 0x401   :  { %8597 = vmatmul.msk.bf16.gmra.mxu3 %vm618_vm1, %v11967_v3  ;;  %v12079_v33 = vld [vmem:[#allocation3 + $0x110] sm:$0xff]  ;;  %v12087_v43 = vpack.c.bf16 %v12077_v35, %v11945_v41 }
 0x403   :  { %15746 = vst [vmem:[#allocation5_spill] sm:$0xff] %v12087_v43 }
 0x40f   :  { %8542 = vmatmul.msk.bf16.gmra.mxu1 %vm618_vm1, %v11983_v13 }
 0x410   :  { %8566 = vmatmul.msk.bf16.gmra.mxu2 %vm618_vm1, %v11987_v24 }
 0x411   :  { %8598 = vmatmul.msk.bf16.gmra.mxu3 %vm618_vm1, %v11991_v45 }
 0x41f   :  { %8543 = vmatmul.msk.bf16.gmra.mxu1 %vm618_vm1, %v1415_v52  ;;  %v9508_v52 = vld [vmem:[%s15498_s5 + $0xb8] sm:$0xff] }
 0x420   :  { %8567 = vmatmul.msk.bf16.gmra.mxu2 %vm618_vm1, %v1383_v0  ;;  %v9504_v0 = vld [vmem:[%s15498_s5 + $0x98] sm:$0xff]  ;;  %2145 = vmatpush.bf16.msrb.mxu3 %v9508_v52  ;;  %v9497_v52 = vld [vmem:[%s15498_s5 + $0x60] sm:$0xff] }
 0x421   :  { %8599 = vmatmul.msk.bf16.gmra.mxu3 %vm618_vm1, %v1642_v53  ;;  %v9500_v53 = vld [vmem:[%s15498_s5 + $0x78] sm:$0xff]  ;;  %1999 = vmatpush.bf16.msrb.mxu2 %v9504_v0  ;;  %v9502_v0 = vld [vmem:[%s15498_s5 + $0x88] sm:$0xff] }
 0x422   :  { %1853 = vmatpush.bf16.msra.mxu1 %v9500_v53  ;;  %v9498_v53 = vld [vmem:[%s15498_s5 + $0x68] sm:$0xff] }
 0x424   :  { %2146 = vmatpush.bf16.msrb.mxu3 %v9507_v62  ;;  %v12062_v62 = vpack.c.bf16 %v11935_v9, %v11929_v44 }
 0x425   :  { %2000 = vmatpush.bf16.msrb.mxu2 %v9503_v60  ;;  %v12058_v60 = vpack.c.bf16 %v11933_v61, %v11927_v2 }
 0x426   :  { %1854 = vmatpush.bf16.msra.mxu1 %v9499_v37  ;;  %v9501_v37 = vld [vmem:[%s15498_s5 + $0x80] sm:$0xff] }
 0x427   :  { %15744 = vst [vmem:[#allocation19_spill] sm:$0xff] %v12058_v60 }
 0x428   :  { %2147 = vmatpush.bf16.msrb.mxu3 %v9506_v5  ;;  %v1485_v5 = vpop.f32.mrf.mxu1 }
 0x429   :  { %2001 = vmatpush.bf16.msrb.mxu2 %v9502_v0  ;;  %v12069_v0 = vpack.c.bf16 %v11937_v11, %v11931_v49  ;;  %v1583_v15 = vadd.f32 %v1582_v20, %v1485_v5 }
 0x42a   :  { %1855 = vmatpush.bf16.msra.mxu1 %v9498_v53  ;;  %v9505_v53 = vld [vmem:[%s15498_s5 + $0xa0] sm:$0xff] }
 0x42b   :  { %15745 = vst [vmem:[#allocation20_spill] sm:$0xff] %v12069_v0 }
 0x42c   :  { %2148 = vmatpush.bf16.msrb.mxu3 %v9505_v53  ;;  %v15749_v53 = vpack.c.bf16 %v11839_v50, %v11762_v25  ;;  %v15752_v25 = vpack.c.bf16 %v11863_v26, %v11846_v27  ;;  %v15754_v27 = vpack.c.bf16 %v11887_v58, %v11870_v34  ;;  %v12153_v58 = vld [vmem:[#allocation3 + $0x82] sm:$0xff] }
 0x42d   :  { %2002 = vmatpush.bf16.msrb.mxu2 %v9501_v37  ;;  %v12083_v37 = vld [vmem:[#allocation3 + $0x112] sm:$0xff] }
 0x42e   :  { %1856 = vmatpush.bf16.msra.mxu1 %v9497_v52  ;;  %v12081_v52 = vadd.f32 %v1712_v19, %v1583_v15  ;;  %v12095_v20 = vpack.c.bf16 %v12083_v37, %v11949_v59  ;;  %v1784_v19 = vpack.c.bf16 %v11837_v23, %v11552_v42  ;;  %v1930_v15 = vpack.c.bf16 %v11835_v4, %v11538_v21 }
 0x42f   :  { %8544 = vmatmul.msk.bf16.gmra.mxu1 %vm618_vm1, %v12007_v47  ;;  %v15750_v42 = vpack.c.bf16 %v11861_v16, %v11844_v29  ;;  %v15751_v21 = vpack.c.bf16 %v11859_v17, %v11842_v8  ;;  %v15753_v8 = vpack.c.bf16 %v11889_v12, %v11872_v55  ;;  %v15755_v17 = vpack.c.bf16 %v11891_v6, %v11874_v56  ;;  %v12149_v55 = vld [vmem:[#allocation3 + $0x80] sm:$0xff] }
 0x430   :  { %8568 = vmatmul.msk.bf16.gmra.mxu2 %vm618_vm1, %v12011_v48  ;;  %15748 = vst [vmem:[#allocation6_spill] sm:$0xff] %v12095_v20  ;;  %v12113_v5 = vpop.f32.mrf.mxu1  ;;  %v12151_v12 = vld [vmem:[#allocation3 + $0x81] sm:$0xff]  ;;  %v1787_v56 = vpack.c.bf16 %v12149_v55, %v11977_v1 }
 0x431   :  { %8600 = vmatmul.msk.bf16.gmra.mxu3 %vm618_vm1, %v12015_v31  ;;  %v1933_v6 = vpack.c.bf16 %v12151_v12, %v11975_v38 }
 0x43f   :  { %8545 = vmatmul.msk.bf16.gmra.mxu1 %vm618_vm1, %v12058_v60 }
 0x440   :  { %8569 = vmatmul.msk.bf16.gmra.mxu2 %vm618_vm1, %v12062_v62 }
 0x441   :  { %8601 = vmatmul.msk.bf16.gmra.mxu3 %vm618_vm1, %v12069_v0  ;;  %v12091_v0 = vpack.c.bf16 %v12079_v33, %v11947_v57 }
 0x443   :  { %15747 = vst [vmem:[#allocation24_spill] sm:$0xff] %v12091_v0 }
 0x44f   :  { %8546 = vmatmul.msk.bf16.gmra.mxu1 %vm618_vm1, %v12087_v43  ;;  %v12115_v43 = vpop.f32.mrf.mxu2 }
 0x450   :  { %8570 = vmatmul.msk.bf16.gmra.mxu2 %vm618_vm1, %v12091_v0 }
 0x451   :  { %8602 = vmatmul.msk.bf16.gmra.mxu3 %vm618_vm1, %v12095_v20  ;;  %v12117_v20 = vpop.f32.mrf.mxu3 }
 0x45f   :  { %8627 = vmatmul.msk.bf16.vlgmr.msra.gmra.mxu1 %vm618_vm1, %v1784_v19 }
 0x460   :  { %8659 = vmatmul.msk.bf16.vlgmr.msrb.gmra.mxu2 %vm618_vm1, %v1930_v15 }
 0x461   :  { %8691 = vmatmul.msk.bf16.vlgmr.msrb.gmra.mxu3 %vm618_vm1, %v15749_v53 }
 0x46c   :  { %v1490_v0 = vpop.f32.mrf.mxu1 }
 0x46f   :  { %8628 = vmatmul.msk.bf16.gmra.mxu1 %vm618_vm1, %v15750_v42 }
 0x470   :  { %8660 = vmatmul.msk.bf16.gmra.mxu2 %vm618_vm1, %v15751_v21 }
 0x471   :  { %8692 = vmatmul.msk.bf16.gmra.mxu3 %vm618_vm1, %v15752_v25 }
 0x473   :  { %v1587_v4 = vpop.f32.mrf.mxu2 }
 0x474   :  { %v1588_v23 = vadd.f32 %v1587_v4, %v1490_v0  ;;  %v1717_v50 = vpop.f32.mrf.mxu3  ;;  %v1492_v19 = vpop.f32.mrf.mxu1 }
 0x476   :  { %v12131_v15 = vadd.f32 %v1717_v50, %v1588_v23 }
 0x47b   :  { %v1589_v53 = vpop.f32.mrf.mxu2 }
 0x47c   :  { %v1590_v29 = vadd.f32 %v1589_v53, %v1492_v19  ;;  %v1719_v16 = vpop.f32.mrf.mxu3  ;;  %v1495_v42 = vpop.f32.mrf.mxu1 }
 0x47e   :  { %v12133_v60 = vadd.f32 %v1719_v16, %v1590_v29  ;;  %v2079_v29 = vpack.c.bf16 %v12153_v58, %v11979_v54  ;;  %v15756_v54 = vpack.c.bf16 %v11911_v46, %v11905_v51 }
 0x47f   :  { %8629 = vmatmul.msk.bf16.gmra.mxu1 %vm618_vm1, %v15753_v8 }
 0x480   :  { %8661 = vmatmul.msk.bf16.gmra.mxu2 %vm618_vm1, %v15754_v27 }
 0x481   :  { %8693 = vmatmul.msk.bf16.gmra.mxu3 %vm618_vm1, %v15755_v17 }
 0x483   :  { %v1592_v26 = vpop.f32.mrf.mxu2 }
 0x484   :  { %v1593_v0 = vadd.f32 %v1592_v26, %v1495_v42  ;;  %v1722_v21 = vpop.f32.mrf.mxu3  ;;  %v1497_v25 = vpop.f32.mrf.mxu1 }
 0x486   :  { %v12147_v4 = vadd.f32 %v1722_v21, %v1593_v0 }
 0x48b   :  { %v1594_v23 = vpop.f32.mrf.mxu2 }
 0x48c   :  { %v1595_v50 = vadd.f32 %v1594_v23, %v1497_v25  ;;  %v1724_v34 = vpop.f32.mrf.mxu3  ;;  %v1500_v19 = vpop.f32.mrf.mxu1  ;;  %v15757_v25 = vpack.c.bf16 %v11909_v22, %v11903_v32  ;;  %v15758_v23 = vpack.c.bf16 %v11913_v39, %v11907_v28  ;;  %v15759_v32 = vpack.c.bf16 %v11929_v44, %v11917_v36  ;;  %v9512_v39 = vld [vmem:[%s15498_s5 + $0xd8] sm:$0xff] }
 0x48d   :  { %v15760_v28 = vpack.c.bf16 %v11927_v2, %v11915_v18  ;;  %v15761_v22 = vpack.c.bf16 %v11931_v49, %v11919_v7  ;;  %v9516_v36 = vld [vmem:[%s15498_s5 + $0xf8] sm:$0xff]  ;;  %2292 = vmatpush.bf16.msrb.mxu1 %v9512_v39 }
 0x48e   :  { %v12155_v53 = vadd.f32 %v1724_v34, %v1595_v50  ;;  %v9520_v44 = vld [vmem:[%s15498_s5 + $0x118] sm:$0xff]  ;;  %2438 = vmatpush.bf16.msra.mxu2 %v9516_v36 }
 0x48f   :  { %8630 = vmatmul.msk.bf16.gmra.mxu1 %vm618_vm1, %v1787_v56  ;;  %2584 = vmatpush.bf16.msra.mxu3 %v9520_v44  ;;  %v12252_v44 = vld [vmem:[#allocation3 + $0x120] sm:$0xff] }
 0x490   :  { %8662 = vmatmul.msk.bf16.gmra.mxu2 %vm618_vm1, %v1933_v6 }
 0x491   :  { %8694 = vmatmul.msk.bf16.gmra.mxu3 %vm618_vm1, %v2079_v29 }
 0x493   :  { %v1597_v16 = vpop.f32.mrf.mxu2 }
 0x494   :  { %v1598_v42 = vadd.f32 %v1597_v16, %v1500_v19  ;;  %v1727_v8 = vpop.f32.mrf.mxu3  ;;  %v1502_v27 = vpop.f32.mrf.mxu1 }
 0x496   :  { %v12166_v17 = vadd.f32 %v1727_v8, %v1598_v42 }
 0x49b   :  { %v1599_v26 = vpop.f32.mrf.mxu2 }
 0x49c   :  { %v1600_v1 = vadd.f32 %v1599_v26, %v1502_v27  ;;  %v1729_v0 = vpop.f32.mrf.mxu3  ;;  %v1505_v21 = vpop.f32.mrf.mxu1  ;;  %v9511_v27 = vld [vmem:[%s15498_s5 + $0xd0] sm:$0xff] }
 0x49d   :  { %v9515_v26 = vld [vmem:[%s15498_s5 + $0xf0] sm:$0xff]  ;;  %2293 = vmatpush.bf16.msrb.mxu1 %v9511_v27 }
 0x49e   :  { %v12168_v38 = vadd.f32 %v1729_v0, %v1600_v1  ;;  %v9519_v1 = vld [vmem:[%s15498_s5 + $0x110] sm:$0xff]  ;;  %2439 = vmatpush.bf16.msra.mxu2 %v9515_v26  ;;  %v9510_v0 = vld [vmem:[%s15498_s5 + $0xc8] sm:$0xff] }
 0x49f   :  { %8631 = vmatmul.msk.bf16.gmra.mxu1 %vm618_vm1, %v15756_v54  ;;  %2585 = vmatpush.bf16.msra.mxu3 %v9519_v1  ;;  %v9518_v54 = vld [vmem:[%s15498_s5 + $0x108] sm:$0xff] }
 0x4a0   :  { %8663 = vmatmul.msk.bf16.gmra.mxu2 %vm618_vm1, %v15757_v25 }
 0x4a1   :  { %8695 = vmatmul.msk.bf16.gmra.mxu3 %vm618_vm1, %v15758_v23  ;;  %2294 = vmatpush.bf16.msrb.mxu1 %v9510_v0 }
 0x4a3   :  { %v1602_v50 = vpop.f32.mrf.mxu2  ;;  %2586 = vmatpush.bf16.msra.mxu3 %v9518_v54 }
 0x4a4   :  { %v1603_v34 = vadd.f32 %v1602_v50, %v1505_v21  ;;  %v1732_v19 = vpop.f32.mrf.mxu3  ;;  %v1507_v56 = vpop.f32.mrf.mxu1  ;;  %v9514_v21 = vld [vmem:[%s15498_s5 + $0xe8] sm:$0xff] }
 0x4a5   :  { %2440 = vmatpush.bf16.msra.mxu2 %v9514_v21 }
 0x4a6   :  { %v12182_v6 = vadd.f32 %v1732_v19, %v1603_v34 }
 0x4ab   :  { %v1604_v29 = vpop.f32.mrf.mxu2 }
 0x4ac   :  { %v1605_v51 = vadd.f32 %v1604_v29, %v1507_v56  ;;  %v1734_v46 = vpop.f32.mrf.mxu3  ;;  %v1510_v16 = vpop.f32.mrf.mxu1  ;;  %v9509_v56 = vld [vmem:[%s15498_s5 + $0xc0] sm:$0xff] }
 0x4ad   :  { %v9513_v29 = vld [vmem:[%s15498_s5 + $0xe0] sm:$0xff]  ;;  %2295 = vmatpush.bf16.msrb.mxu1 %v9509_v56  ;;  %v1585_v56 = vadd.f32 %v12115_v43, %v12113_v5 }
 0x4ae   :  { %v12184_v42 = vadd.f32 %v1734_v46, %v1605_v51  ;;  %v9517_v51 = vld [vmem:[%s15498_s5 + $0x100] sm:$0xff]  ;;  %v15762_v46 = vpack.c.bf16 %v11947_v57, %v11935_v9  ;;  %2441 = vmatpush.bf16.msra.mxu2 %v9513_v29 }
 0x4af   :  { %8632 = vmatmul.msk.bf16.gmra.mxu1 %vm618_vm1, %v15759_v32  ;;  %v15764_v32 = vpack.c.bf16 %v11949_v59, %v11937_v11  ;;  %2587 = vmatpush.bf16.msra.mxu3 %v9517_v51 }
 0x4b0   :  { %8664 = vmatmul.msk.bf16.gmra.mxu2 %vm618_vm1, %v15760_v28 }
 0x4b1   :  { %8696 = vmatmul.msk.bf16.gmra.mxu3 %vm618_vm1, %v15761_v22 }
 0x4b3   :  { %v1607_v18 = vpop.f32.mrf.mxu2 }
 0x4b4   :  { %v1608_v2 = vadd.f32 %v1607_v18, %v1510_v16  ;;  %v1737_v8 = vpop.f32.mrf.mxu3  ;;  %v1512_v7 = vpop.f32.mrf.mxu1  ;;  %v15763_v16 = vpack.c.bf16 %v11945_v41, %v11933_v61  ;;  %v12254_v61 = vld [vmem:[#allocation3 + $0x121] sm:$0xff] }
 0x4b6   :  { %v12207_v49 = vadd.f32 %v1737_v8, %v1608_v2  ;;  %v12256_v2 = vld [vmem:[#allocation3 + $0x122] sm:$0xff]  ;;  %v1791_v8 = vpack.c.bf16 %v12252_v44, %v12079_v33 }
 0x4b7   :  { %v2083_v27 = vpack.c.bf16 %v12256_v2, %v12083_v37 }
 0x4bb   :  { %v1609_v25 = vpop.f32.mrf.mxu2 }
 0x4bc   :  { %v1610_v23 = vadd.f32 %v1609_v25, %v1512_v7  ;;  %v1739_v50 = vpop.f32.mrf.mxu3  ;;  %v1515_v34 = vpop.f32.mrf.mxu1  ;;  %v1937_v7 = vpack.c.bf16 %v12254_v61, %v12077_v35 }
 0x4be   :  { %v12227_v19 = vadd.f32 %v1739_v50, %v1610_v23 }
 0x4bf   :  { %8633 = vmatmul.msk.bf16.gmra.mxu1 %vm618_vm1, %v15762_v46 }
 0x4c0   :  { %8665 = vmatmul.msk.bf16.gmra.mxu2 %vm618_vm1, %v15763_v16 }
 0x4c1   :  { %8697 = vmatmul.msk.bf16.gmra.mxu3 %vm618_vm1, %v15764_v32 }
 0x4c3   :  { %v1612_v28 = vpop.f32.mrf.mxu2 }
 0x4c4   :  { %v1613_v22 = vadd.f32 %v1612_v28, %v1515_v34  ;;  %v1742_v39 = vpop.f32.mrf.mxu3  ;;  %v1517_v36 = vpop.f32.mrf.mxu1 }
 0x4c6   :  { %v12250_v9 = vadd.f32 %v1742_v39, %v1613_v22 }
 0x4cb   :  { %v1614_v57 = vpop.f32.mrf.mxu2 }
 0x4cc   :  { %v1615_v41 = vadd.f32 %v1614_v57, %v1517_v36  ;;  %v1744_v18 = vpop.f32.mrf.mxu3  ;;  %v1520_v11 = vpop.f32.mrf.mxu1 }
 0x4ce   :  { %v12258_v59 = vadd.f32 %v1744_v18, %v1615_v41 }
 0x4cf   :  { %8634 = vmatmul.msk.bf16.gmra.mxu1 %vm618_vm1, %v1791_v8 }
 0x4d0   :  { %8666 = vmatmul.msk.bf16.gmra.mxu2 %vm618_vm1, %v1937_v7 }
 0x4d1   :  { %8698 = vmatmul.msk.bf16.gmra.mxu3 %vm618_vm1, %v2083_v27 }
 0x4d3   :  { %v1617_v26 = vpop.f32.mrf.mxu2 }
 0x4d4   :  { %v1618_v1 = vadd.f32 %v1617_v26, %v1520_v11  ;;  %v1747_v0 = vpop.f32.mrf.mxu3  ;;  %v1522_v21 = vpop.f32.mrf.mxu1 }
 0x4d6   :  { %v12269_v54 = vadd.f32 %v1747_v0, %v1618_v1 }
 0x4db   :  { %v1619_v25 = vpop.f32.mrf.mxu2 }
 0x4dc   :  { %v1620_v33 = vadd.f32 %v1619_v25, %v1522_v21  ;;  %v1749_v23 = vpop.f32.mrf.mxu3  ;;  %v1858_v50 = vpop.f32.mrf.mxu1  ;;  %v2214_v21 = vld [vmem:[#allocation3 + $0x90] sm:$0xff] }
 0x4dd   :  { %v1898_v37 = vadd.f32 %v1858_v50, %v12081_v52  ;;  %v1753_v52 = vadd.f32 %v12117_v20, %v1585_v56 }
 0x4de   :  { %v12271_v35 = vadd.f32 %v1749_v23, %v1620_v33 }
 0x4df   :  { %8723 = vmatmul.msk.bf16.vlgmr.msrb.gmra.mxu1 %vm618_vm1, %v11857_v30 }
 0x4e0   :  { %8755 = vmatmul.msk.bf16.vlgmr.msra.gmra.mxu2 %vm618_vm1, %v11853_v63 }
 0x4e1   :  { %8787 = vmatmul.msk.bf16.vlgmr.msra.gmra.mxu3 %vm618_vm1, %v11868_v10 }
 0x4e3   :  { %v2004_v34 = vpop.f32.mrf.mxu2 }
 0x4e4   :  { %v2044_v29 = vadd.f32 %v2004_v34, %v1898_v37  ;;  %v2150_v51 = vpop.f32.mrf.mxu3  ;;  %v1860_v46 = vpop.f32.mrf.mxu1 }
 0x4e5   :  { %v1899_v32 = vadd.f32 %v1860_v46, %v1753_v52 }
 0x4e6   :  { %v12282_v16 = vadd.f32 %v2150_v51, %v2044_v29 }
 0x4eb   :  { %v2006_v28 = vpop.f32.mrf.mxu2 }
 0x4ec   :  { %v2045_v30 = vadd.f32 %v2006_v28, %v1899_v32  ;;  %v2152_v22 = vpop.f32.mrf.mxu3  ;;  %v1863_v39 = vpop.f32.mrf.mxu1 }
 0x4ed   :  { %v1900_v10 = vadd.f32 %v1863_v39, %v12131_v15 }
 0x4ee   :  { %v12285_v63 = vadd.f32 %v2152_v22, %v2045_v30 }
 0x4ef   :  { %8724 = vmatmul.msk.bf16.gmra.mxu1 %vm618_vm1, %v11963_v14 }
 0x4f0   :  { %8756 = vmatmul.msk.bf16.gmra.mxu2 %vm618_vm1, %v11959_v40 }
 0x4f1   :  { %8788 = vmatmul.msk.bf16.gmra.mxu3 %vm618_vm1, %v11967_v3 }
 0x4f3   :  { %v2009_v43 = vpop.f32.mrf.mxu2 }
 0x4f4   :  { %v2046_v20 = vadd.f32 %v2009_v43, %v1900_v10  ;;  %v2155_v5 = vpop.f32.mrf.mxu3  ;;  %v1865_v36 = vpop.f32.mrf.mxu1 }
 0x4f5   :  { %v1901_v41 = vadd.f32 %v1865_v36, %v12133_v60 }
 0x4f6   :  { %v12294_v57 = vadd.f32 %v2155_v5, %v2046_v20 }
 0x4fb   :  { %v2011_v18 = vpop.f32.mrf.mxu2 }
 0x4fc   :  { %v2047_v11 = vadd.f32 %v2011_v18, %v1901_v41  ;;  %v2157_v15 = vpop.f32.mrf.mxu3  ;;  %v1868_v8 = vpop.f32.mrf.mxu1 }
 0x4fd   :  { %v1902_v14 = vadd.f32 %v1868_v8, %v12147_v4  ;;  %v2360_v4 = vld [vmem:[#allocation3 + $0x91] sm:$0xff] }
 0x4fe   :  { %v12297_v7 = vadd.f32 %v2157_v15, %v2047_v11  ;;  %v2372_v37 = vpack.c.bf16 %v2360_v4, %v12151_v12 }
 0x4ff   :  { %8725 = vmatmul.msk.bf16.gmra.mxu1 %vm618_vm1, %v11987_v24  ;;  %v2506_v24 = vld [vmem:[#allocation3 + $0x92] sm:$0xff] }
 0x500   :  { %8757 = vmatmul.msk.bf16.gmra.mxu2 %vm618_vm1, %v11983_v13  ;;  %v2518_v34 = vpack.c.bf16 %v2506_v24, %v12153_v58  ;;  %v2514_v24 = vld [vmem:[#allocation3 + $0x132] sm:$0xff] }
 0x501   :  { %8789 = vmatmul.msk.bf16.gmra.mxu3 %vm618_vm1, %v11991_v45  ;;  %v2226_v45 = vpack.c.bf16 %v2214_v21, %v12149_v55 }
 0x503   :  { %v2014_v40 = vpop.f32.mrf.mxu2 }
 0x504   :  { %v2048_v3 = vadd.f32 %v2014_v40, %v1902_v14  ;;  %v2160_v60 = vpop.f32.mrf.mxu3  ;;  %v1870_v27 = vpop.f32.mrf.mxu1  ;;  %v15767_v14 = vld [vmem:[#allocation24_spill] sm:$0xff]  ;;  %v15768_v40 = vld [vmem:[#allocation5_spill] sm:$0xff] }
 0x505   :  { %v1903_v1 = vadd.f32 %v1870_v27, %v12155_v53 }
 0x506   :  { %v12306_v26 = vadd.f32 %v2160_v60, %v2048_v3  ;;  %v15769_v3 = vld [vmem:[#allocation6_spill] sm:$0xff] }
 0x50b   :  { %v2016_v0 = vpop.f32.mrf.mxu2 }
 0x50c   :  { %v2049_v25 = vadd.f32 %v2016_v0, %v1903_v1  ;;  %v2162_v33 = vpop.f32.mrf.mxu3  ;;  %v1873_v23 = vpop.f32.mrf.mxu1 }
 0x50d   :  { %v1904_v13 = vadd.f32 %v1873_v23, %v12166_v17 }
 0x50e   :  { %v12309_v50 = vadd.f32 %v2162_v33, %v2049_v25  ;;  %v2222_v25 = vld [vmem:[#allocation3 + $0x130] sm:$0xff] }
 0x50f   :  { %8726 = vmatmul.msk.bf16.gmra.mxu1 %vm618_vm1, %v2226_v45  ;;  %v2230_v45 = vpack.c.bf16 %v2222_v25, %v12252_v44 }
 0x510   :  { %8758 = vmatmul.msk.bf16.gmra.mxu2 %vm618_vm1, %v2372_v37 }
 0x511   :  { %8790 = vmatmul.msk.bf16.gmra.mxu3 %vm618_vm1, %v2518_v34  ;;  %v2522_v34 = vpack.c.bf16 %v2514_v24, %v12256_v2 }
 0x513   :  { %v2019_v53 = vpop.f32.mrf.mxu2 }
 0x514   :  { %v2050_v56 = vadd.f32 %v2019_v53, %v1904_v13  ;;  %v2165_v29 = vpop.f32.mrf.mxu3  ;;  %v1875_v51 = vpop.f32.mrf.mxu1 }
 0x515   :  { %v1905_v17 = vadd.f32 %v1875_v51, %v12168_v38 }
 0x516   :  { %v12318_v46 = vadd.f32 %v2165_v29, %v2050_v56 }
 0x51b   :  { %v2021_v52 = vpop.f32.mrf.mxu2 }
 0x51c   :  { %v2051_v55 = vadd.f32 %v2021_v52, %v1905_v17  ;;  %v2167_v32 = vpop.f32.mrf.mxu3  ;;  %v1878_v12 = vpop.f32.mrf.mxu1 }
 0x51d   :  { %v1906_v58 = vadd.f32 %v1878_v12, %v12182_v6 }
 0x51e   :  { %v12321_v28 = vadd.f32 %v2167_v32, %v2051_v55 }
 0x51f   :  { %8727 = vmatmul.msk.bf16.gmra.mxu1 %vm618_vm1, %v12011_v48 }
 0x520   :  { %8759 = vmatmul.msk.bf16.gmra.mxu2 %vm618_vm1, %v12007_v47  ;;  %v15765_v47 = vld [vmem:[#allocation19_spill] sm:$0xff] }
 0x521   :  { %8791 = vmatmul.msk.bf16.gmra.mxu3 %vm618_vm1, %v12015_v31  ;;  %v15766_v31 = vld [vmem:[#allocation20_spill] sm:$0xff] }
 0x523   :  { %v2024_v30 = vpop.f32.mrf.mxu2 }
 0x524   :  { %v2052_v22 = vadd.f32 %v2024_v30, %v1906_v58  ;;  %v2170_v38 = vpop.f32.mrf.mxu3  ;;  %v12330_v39 = vpop.f32.mrf.mxu1  ;;  %v12387_v30 = vld [vmem:[%s15499_s6] ss:$0 sm:$0xff] }
 0x526   :  { %v12332_v10 = vadd.f32 %v2170_v38, %v2052_v22 }
 0x52b   :  { %v12334_v43 = vpop.f32.mrf.mxu2 }
 0x52c   :  { %v12336_v20 = vpop.f32.mrf.mxu3  ;;  %v1883_v6 = vpop.f32.mrf.mxu1 }
 0x52d   :  { %v1908_v48 = vadd.f32 %v1883_v6, %v12207_v49 }
 0x52f   :  { %8728 = vmatmul.msk.bf16.gmra.mxu1 %vm618_vm1, %v12062_v62 }
 0x530   :  { %8760 = vmatmul.msk.bf16.gmra.mxu2 %vm618_vm1, %v15765_v47 }
 0x531   :  { %8792 = vmatmul.msk.bf16.gmra.mxu3 %vm618_vm1, %v15766_v31 }
 0x533   :  { %v2029_v5 = vpop.f32.mrf.mxu2 }
 0x534   :  { %v2054_v36 = vadd.f32 %v2029_v5, %v1908_v48  ;;  %v2175_v41 = vpop.f32.mrf.mxu3  ;;  %v12345_v18 = vpop.f32.mrf.mxu1 }
 0x536   :  { %v12347_v11 = vadd.f32 %v2175_v41, %v2054_v36 }
 0x53b   :  { %v12349_v15 = vpop.f32.mrf.mxu2 }
 0x53c   :  { %v12351_v8 = vpop.f32.mrf.mxu3  ;;  %v1888_v49 = vpop.f32.mrf.mxu1 }
 0x53d   :  { %v1910_v62 = vadd.f32 %v1888_v49, %v12250_v9  ;;  %v2368_v9 = vld [vmem:[#allocation3 + $0x131] sm:$0xff] }
 0x53e   :  { %v2376_v37 = vpack.c.bf16 %v2368_v9, %v12254_v61 }
 0x53f   :  { %8729 = vmatmul.msk.bf16.gmra.mxu1 %vm618_vm1, %v15767_v14 }
 0x540   :  { %8761 = vmatmul.msk.bf16.gmra.mxu2 %vm618_vm1, %v15768_v40 }
 0x541   :  { %8793 = vmatmul.msk.bf16.gmra.mxu3 %vm618_vm1, %v15769_v3 }
 0x543   :  { %v2034_v60 = vpop.f32.mrf.mxu2 }
 0x544   :  { %v2056_v27 = vadd.f32 %v2034_v60, %v1910_v62  ;;  %v2180_v1 = vpop.f32.mrf.mxu3  ;;  %v12360_v0 = vpop.f32.mrf.mxu1 }
 0x546   :  { %v12362_v21 = vadd.f32 %v2180_v1, %v2056_v27 }
 0x54b   :  { %v12364_v4 = vpop.f32.mrf.mxu2 }
 0x54c   :  { %v12366_v33 = vpop.f32.mrf.mxu3  ;;  %v1893_v23 = vpop.f32.mrf.mxu1 }
 0x54d   :  { %v1912_v13 = vadd.f32 %v1893_v23, %v12269_v54 }
 0x54f   :  { %8730 = vmatmul.msk.bf16.gmra.mxu1 %vm618_vm1, %v2230_v45 }
 0x550   :  { %8762 = vmatmul.msk.bf16.gmra.mxu2 %vm618_vm1, %v2376_v37 }
 0x551   :  { %8794 = vmatmul.msk.bf16.gmra.mxu3 %vm618_vm1, %v2522_v34 }
 0x553   :  { %v2039_v53 = vpop.f32.mrf.mxu2 }
 0x554   :  { %v2058_v56 = vadd.f32 %v2039_v53, %v1912_v13  ;;  %v2185_v29 = vpop.f32.mrf.mxu3  ;;  %v12375_v51 = vpop.f32.mrf.mxu1 }
 0x556   :  { %v12377_v17 = vadd.f32 %v2185_v29, %v2058_v56 }
 0x55b   :  { %v12379_v54 = vpop.f32.mrf.mxu2 }
 0x55c   :  { %v12381_v44 = vpop.f32.mrf.mxu3  ;;  %v2297_v61 = vpop.f32.mrf.mxu1 }
 0x55d   :  { %v2337_v2 = vadd.f32 %v2297_v61, %v12282_v16 }
 0x563   :  { %v2443_v52 = vpop.f32.mrf.mxu2 }
 0x564   :  { %v2483_v55 = vadd.f32 %v2443_v52, %v2337_v2  ;;  %v2589_v32 = vpop.f32.mrf.mxu3  ;;  %v2299_v12 = vpop.f32.mrf.mxu1 }
 0x565   :  { %v2338_v22 = vadd.f32 %v2299_v12, %v12285_v63 }
 0x566   :  { %v2629_v58 = vadd.f32 %v2589_v32, %v2483_v55 }
 0x568   :  { %v12391_v6 = vadd.f32 %v12387_v30, %v2629_v58 }
 0x56a   :  { %v2664_v36 = vmax.f32 %v12391_v6, 0.0 }
 0x56b   :  { %v2445_v38 = vpop.f32.mrf.mxu2 }
 0x56c   :  { %v2484_v48 = vadd.f32 %v2445_v38, %v2338_v22  ;;  %v2591_v47 = vpop.f32.mrf.mxu3  ;;  %v2302_v31 = vpop.f32.mrf.mxu1  ;;  %v2682_v63 = vsel %vm618_vm1, %v2664_v36, 0.0 }
 0x56d   :  { %v2339_v5 = vadd.f32 %v2302_v31, %v12294_v57 }
 0x56e   :  { %v2630_v16 = vadd.f32 %v2591_v47, %v2484_v48 }
 0x570   :  { %v12396_v41 = vadd.f32 %v12387_v30, %v2630_v16 }
 0x572   :  { %v2665_v49 = vmax.f32 %v12396_v41, 0.0 }
 0x573   :  { %v2448_v62 = vpop.f32.mrf.mxu2 }
 0x574   :  { %v2683_v14 = vsel %vm618_vm1, %v2665_v49, 0.0  ;;  %v2485_v40 = vadd.f32 %v2448_v62, %v2339_v5  ;;  %v2594_v3 = vpop.f32.mrf.mxu3  ;;  %v2304_v57 = vpop.f32.mrf.mxu1 }
 0x575   :  { %v2684_v60 = vadd.f32 %v2683_v14, %v2682_v63  ;;  %v2340_v9 = vadd.f32 %v2304_v57, %v12297_v7 }
 0x576   :  { %v2631_v27 = vadd.f32 %v2594_v3, %v2485_v40 }
 0x578   :  { %v12406_v1 = vadd.f32 %v12387_v30, %v2631_v27 }
 0x57a   :  { %v2666_v25 = vmax.f32 %v12406_v1, 0.0 }
 0x57b   :  { %v2450_v24 = vpop.f32.mrf.mxu2 }
 0x57c   :  { %v2685_v23 = vsel %vm618_vm1, %v2666_v25, 0.0  ;;  %v2486_v13 = vadd.f32 %v2450_v24, %v2340_v9  ;;  %v2596_v45 = vpop.f32.mrf.mxu3  ;;  %v2307_v34 = vpop.f32.mrf.mxu1 }
 0x57d   :  { %v2686_v37 = vadd.f32 %v2685_v23, %v2684_v60  ;;  %v2341_v56 = vadd.f32 %v2307_v34, %v12306_v26 }
 0x57e   :  { %v2632_v53 = vadd.f32 %v2596_v45, %v2486_v13 }
 0x580   :  { %v12415_v29 = vadd.f32 %v12387_v30, %v2632_v53 }
 0x582   :  { %v2667_v61 = vmax.f32 %v12415_v29, 0.0 }
 0x583   :  { %v2453_v2 = vpop.f32.mrf.mxu2 }
 0x584   :  { %v2687_v7 = vsel %vm618_vm1, %v2667_v61, 0.0  ;;  %v2487_v52 = vadd.f32 %v2453_v2, %v2341_v56  ;;  %v2599_v55 = vpop.f32.mrf.mxu3  ;;  %v2309_v12 = vpop.f32.mrf.mxu1 }
 0x585   :  { %v2688_v32 = vadd.f32 %v2687_v7, %v2686_v37  ;;  %v2342_v38 = vadd.f32 %v2309_v12, %v12309_v50 }
 0x586   :  { %v2633_v58 = vadd.f32 %v2599_v55, %v2487_v52 }
 0x588   :  { %v12422_v22 = vadd.f32 %v12387_v30, %v2633_v58 }
 0x58a   :  { %v2668_v26 = vmax.f32 %v12422_v22, 0.0 }
 0x58b   :  { %v2455_v48 = vpop.f32.mrf.mxu2 }
 0x58c   :  { %v2689_v47 = vsel %vm618_vm1, %v2668_v26, 0.0  ;;  %v2488_v31 = vadd.f32 %v2455_v48, %v2342_v38  ;;  %v2601_v16 = vpop.f32.mrf.mxu3  ;;  %v2312_v62 = vpop.f32.mrf.mxu1 }
 0x58d   :  { %v2690_v5 = vadd.f32 %v2689_v47, %v2688_v32  ;;  %v2343_v3 = vadd.f32 %v2312_v62, %v12318_v46  ;;  %v1907_v32 = vadd.f32 %v12330_v39, %v12184_v42 }
 0x58e   :  { %v2634_v63 = vadd.f32 %v2601_v16, %v2488_v31 }
 0x58f   :  { %v2053_v38 = vadd.f32 %v12334_v43, %v1907_v32 }
 0x590   :  { %v12430_v14 = vadd.f32 %v12387_v30, %v2634_v63 }
 0x591   :  { %v2199_v63 = vadd.f32 %v12336_v20, %v2053_v38  ;;  %v1909_v20 = vadd.f32 %v12345_v18, %v12227_v19 }
 0x592   :  { %v2669_v40 = vmax.f32 %v12430_v14, 0.0 }
 0x593   :  { %v2458_v60 = vpop.f32.mrf.mxu2 }
 0x594   :  { %v2691_v50 = vsel %vm618_vm1, %v2669_v40, 0.0  ;;  %v2489_v57 = vadd.f32 %v2458_v60, %v2343_v3  ;;  %v2604_v27 = vpop.f32.mrf.mxu3  ;;  %v2314_v24 = vpop.f32.mrf.mxu1 }
 0x595   :  { %v2692_v9 = vadd.f32 %v2691_v50, %v2690_v5  ;;  %v2344_v37 = vadd.f32 %v2314_v24, %v12321_v28 }
 0x596   :  { %v2635_v23 = vadd.f32 %v2604_v27, %v2489_v57 }
 0x598   :  { %v12438_v13 = vadd.f32 %v12387_v30, %v2635_v23 }
 0x59a   :  { %v2670_v45 = vmax.f32 %v12438_v13, 0.0 }
 0x59b   :  { %v2460_v34 = vpop.f32.mrf.mxu2 }
 0x59c   :  { %v2693_v46 = vsel %vm618_vm1, %v2670_v45, 0.0  ;;  %v2490_v53 = vadd.f32 %v2460_v34, %v2344_v37  ;;  %v2606_v56 = vpop.f32.mrf.mxu3  ;;  %v2317_v7 = vpop.f32.mrf.mxu1 }
 0x59d   :  { %v2694_v2 = vadd.f32 %v2693_v46, %v2692_v9  ;;  %v2345_v28 = vadd.f32 %v2317_v7, %v12332_v10  ;;  %v2055_v46 = vadd.f32 %v12349_v15, %v1909_v20 }
 0x59e   :  { %v2636_v52 = vadd.f32 %v2606_v56, %v2490_v53 }
 0x5a0   :  { %v12446_v55 = vadd.f32 %v12387_v30, %v2636_v52 }
 0x5a2   :  { %v2671_v12 = vmax.f32 %v12446_v55, 0.0 }
 0x5a3   :  { %v2463_v58 = vpop.f32.mrf.mxu2 }
 0x5a4   :  { %v2695_v48 = vsel %vm618_vm1, %v2671_v12, 0.0  ;;  %v2491_v47 = vadd.f32 %v2463_v58, %v2345_v28  ;;  %v2609_v31 = vpop.f32.mrf.mxu3  ;;  %v2319_v5 = vpop.f32.mrf.mxu1  ;;  %v2201_v28 = vadd.f32 %v12351_v8, %v2055_v46  ;;  %v1911_v8 = vadd.f32 %v12360_v0, %v12258_v59 }
 0x5a5   :  { %v2696_v16 = vadd.f32 %v2695_v48, %v2694_v2  ;;  %v2346_v10 = vadd.f32 %v2319_v5, %v2199_v63 }
 0x5a6   :  { %v2637_v62 = vadd.f32 %v2609_v31, %v2491_v47 }
 0x5a8   :  { %v12458_v42 = vadd.f32 %v12387_v30, %v2637_v62 }
 0x5aa   :  { %v2672_v39 = vmax.f32 %v12458_v42, 0.0 }
 0x5ab   :  { %v2465_v3 = vpop.f32.mrf.mxu2 }
 0x5ac   :  { %v2697_v43 = vsel %vm618_vm1, %v2672_v39, 0.0  ;;  %v2492_v60 = vadd.f32 %v2465_v3, %v2346_v10  ;;  %v2611_v50 = vpop.f32.mrf.mxu3  ;;  %v2322_v27 = vpop.f32.mrf.mxu1  ;;  %v2057_v3 = vadd.f32 %v12364_v4, %v1911_v8 }
 0x5ad   :  { %v2698_v57 = vadd.f32 %v2697_v43, %v2696_v16  ;;  %v2347_v37 = vadd.f32 %v2322_v27, %v12347_v11 }
 0x5ae   :  { %v2638_v9 = vadd.f32 %v2611_v50, %v2492_v60  ;;  %v2203_v20 = vadd.f32 %v12366_v33, %v2057_v3 }
 0x5b0   :  { %v12465_v24 = vadd.f32 %v12387_v30, %v2638_v9 }
 0x5b2   :  { %v2673_v23 = vmax.f32 %v12465_v24, 0.0 }
 0x5b3   :  { %v2468_v34 = vpop.f32.mrf.mxu2 }
 0x5b4   :  { %v2699_v53 = vsel %vm618_vm1, %v2673_v23, 0.0  ;;  %v2493_v56 = vadd.f32 %v2468_v34, %v2347_v37  ;;  %v2614_v2 = vpop.f32.mrf.mxu3  ;;  %v2324_v52 = vpop.f32.mrf.mxu1 }
 0x5b5   :  { %v2700_v7 = vadd.f32 %v2699_v53, %v2698_v57  ;;  %v2348_v11 = vadd.f32 %v2324_v52, %v2201_v28  ;;  %v1913_v52 = vadd.f32 %v12375_v51, %v12271_v35 }
 0x5b6   :  { %v2639_v32 = vadd.f32 %v2614_v2, %v2493_v56 }
 0x5b8   :  { %v12477_v19 = vadd.f32 %v12387_v30, %v2639_v32 }
 0x5ba   :  { %v2674_v18 = vmax.f32 %v12477_v19, 0.0 }
 0x5bb   :  { %v2470_v58 = vpop.f32.mrf.mxu2 }
 0x5bc   :  { %v2701_v15 = vsel %vm618_vm1, %v2674_v18, 0.0  ;;  %v2494_v38 = vadd.f32 %v2470_v58, %v2348_v11  ;;  %v2616_v48 = vpop.f32.mrf.mxu3  ;;  %v2327_v31 = vpop.f32.mrf.mxu1  ;;  %v2059_v11 = vadd.f32 %v12379_v54, %v1913_v52 }
 0x5bd   :  { %v2702_v47 = vadd.f32 %v2701_v15, %v2700_v7  ;;  %v2349_v63 = vadd.f32 %v2327_v31, %v12362_v21 }
 0x5be   :  { %v2640_v16 = vadd.f32 %v2616_v48, %v2494_v38 }
 0x5c0   :  { %v12484_v5 = vadd.f32 %v12387_v30, %v2640_v16  ;;  %v2205_v16 = vadd.f32 %v12381_v44, %v2059_v11 }
 0x5c2   :  { %v2675_v62 = vmax.f32 %v12484_v5, 0.0 }
 0x5c3   :  { %v2473_v10 = vpop.f32.mrf.mxu2 }
 0x5c4   :  { %v2703_v43 = vsel %vm618_vm1, %v2675_v62, 0.0  ;;  %v2495_v60 = vadd.f32 %v2473_v10, %v2349_v63  ;;  %v2619_v50 = vpop.f32.mrf.mxu3  ;;  %v2329_v27 = vpop.f32.mrf.mxu1 }
 0x5c5   :  { %v2704_v57 = vadd.f32 %v2703_v43, %v2702_v47  ;;  %v2350_v37 = vadd.f32 %v2329_v27, %v2203_v20 }
 0x5c6   :  { %v2641_v9 = vadd.f32 %v2619_v50, %v2495_v60 }
 0x5c8   :  { %v2660_v59 = vadd.f32 %v12387_v30, %v2641_v9 }
 0x5ca   :  { %v2676_v0 = vmax.f32 %v2660_v59, 0.0 }
 0x5cb   :  { %v2475_v34 = vpop.f32.mrf.mxu2 }
 0x5cc   :  { %v2705_v21 = vsel %vm618_vm1, %v2676_v0, 0.0  ;;  %v2496_v46 = vadd.f32 %v2475_v34, %v2350_v37  ;;  %v2621_v4 = vpop.f32.mrf.mxu3  ;;  %v2332_v56 = vpop.f32.mrf.mxu1 }
 0x5cd   :  { %v2706_v53 = vadd.f32 %v2705_v21, %v2704_v57  ;;  %v2351_v33 = vadd.f32 %v2332_v56, %v12377_v17 }
 0x5ce   :  { %v2642_v2 = vadd.f32 %v2621_v4, %v2496_v46 }
 0x5d0   :  { %v2661_v7 = vadd.f32 %v12387_v30, %v2642_v2 }
 0x5d2   :  { %v2677_v32 = vmax.f32 %v2661_v7, 0.0 }
 0x5d3   :  { %v2478_v28 = vpop.f32.mrf.mxu2 }
 0x5d4   :  { %v2707_v58 = vsel %vm618_vm1, %v2677_v32, 0.0  ;;  %v2497_v15 = vadd.f32 %v2478_v28, %v2351_v33  ;;  %v2624_v38 = vpop.f32.mrf.mxu3  ;;  %v2334_v31 = vpop.f32.mrf.mxu1 }
 0x5d5   :  { %v2708_v48 = vadd.f32 %v2707_v58, %v2706_v53  ;;  %v2352_v10 = vadd.f32 %v2334_v31, %v2205_v16 }
 0x5d6   :  { %v2643_v47 = vadd.f32 %v2624_v38, %v2497_v15 }
 0x5d8   :  { %v2662_v8 = vadd.f32 %v12387_v30, %v2643_v47 }
 0x5da   :  { %v2678_v63 = vmax.f32 %v2662_v8, 0.0 }
 0x5db   :  { %v2480_v35 = vpop.f32.mrf.mxu2 }
 0x5dc   :  { %v2709_v51 = vsel %vm618_vm1, %v2678_v63, 0.0  ;;  %v2498_v17 = vadd.f32 %v2480_v35, %v2352_v10  ;;  %v2626_v43 = vpop.f32.mrf.mxu3 }
 0x5dd   :  { %v2710_v3 = vadd.f32 %v2709_v51, %v2708_v48 }
 0x5de   :  { %v2644_v54 = vadd.f32 %v2626_v43, %v2498_v17 }
 0x5e0   :  { %v2663_v60 = vadd.f32 %v12387_v30, %v2644_v54 }
 0x5e2   :  { %v2679_v50 = vmax.f32 %v2663_v60, 0.0 }
 0x5e4   :  { %v2711_v57 = vsel %vm618_vm1, %v2679_v50, 0.0 }
 0x5e5   :  { %v2712_v27 = vadd.f32 %v2711_v57, %v2710_v3 }
 0x5e7   :  { %v2713_v9 = vrot.slane %v2712_v27, 4 }
 0x5e9   :  { %v2714_v20 = vadd.f32 %v2713_v9, %v2712_v27 }
 0x5eb   :  { %v2715_v44 = vrot.slane %v2714_v20, 2 }
 0x5ed   :  { %v2716_v59 = vadd.f32 %v2715_v44, %v2714_v20 }
 0x5ef   :  { %v2717_v37 = vrot.slane %v2716_v59, 1 }
 0x5f1   :  { %v2718_v34 = vadd.f32 %v2717_v37, %v2716_v59 }
 0x5f3   :  { %v2719_v21 = vmul.f32 0.0078125, %v2718_v34 }
 0x5f5   :  { %v12510_v46 = vsub.f32 %v2664_v36, %v2719_v21  ;;  %v12514_v4 = vsub.f32 %v2665_v49, %v2719_v21  ;;  %v12518_v30 = vsub.f32 %v2666_v25, %v2719_v21  ;;  %v12522_v53 = vsub.f32 %v2667_v61, %v2719_v21 }
 0x5f6   :  { %v12526_v56 = vsub.f32 %v2668_v26, %v2719_v21  ;;  %v12530_v6 = vsub.f32 %v2669_v40, %v2719_v21  ;;  %v12534_v36 = vsub.f32 %v2670_v45, %v2719_v21  ;;  %v12538_v41 = vsub.f32 %v2671_v12, %v2719_v21 }
 0x5f7   :  { %v12542_v49 = vsub.f32 %v2672_v39, %v2719_v21  ;;  %v12546_v1 = vsub.f32 %v2673_v23, %v2719_v21  ;;  %v12550_v25 = vsub.f32 %v2674_v18, %v2719_v21  ;;  %v12554_v29 = vsub.f32 %v2675_v62, %v2719_v21 }
 0x5f8   :  { %v12556_v61 = vsub.f32 %v2676_v0, %v2719_v21  ;;  %v12558_v22 = vsub.f32 %v2677_v32, %v2719_v21  ;;  %v12560_v26 = vsub.f32 %v2678_v63, %v2719_v21  ;;  %v12562_v14 = vsub.f32 %v2679_v50, %v2719_v21 }
 0x5f9   :  { %v2736_v40 = vmul.f32 %v12510_v46, %v12510_v46  ;;  %v2737_v13 = vmul.f32 %v12514_v4, %v12514_v4  ;;  %v2738_v45 = vmul.f32 %v12518_v30, %v12518_v30  ;;  %v2739_v55 = vmul.f32 %v12522_v53, %v12522_v53 }
 0x5fa   :  { %v2740_v24 = vmul.f32 %v12526_v56, %v12526_v56  ;;  %v2741_v18 = vmul.f32 %v12530_v6, %v12530_v6  ;;  %v2742_v0 = vmul.f32 %v12534_v36, %v12534_v36  ;;  %v2743_v52 = vmul.f32 %v12538_v41, %v12538_v41 }
 0x5fb   :  { %v2752_v12 = vsel %vm618_vm1, %v2736_v40, 0.0  ;;  %v2753_v42 = vsel %vm618_vm1, %v2737_v13, 0.0  ;;  %v2755_v23 = vsel %vm618_vm1, %v2738_v45, 0.0  ;;  %v2757_v5 = vsel %vm618_vm1, %v2739_v55, 0.0 }
 0x5fc   :  { %v2754_v39 = vadd.f32 %v2753_v42, %v2752_v12  ;;  %v2759_v2 = vsel %vm618_vm1, %v2740_v24, 0.0  ;;  %v2761_v32 = vsel %vm618_vm1, %v2741_v18, 0.0  ;;  %v2744_v28 = vmul.f32 %v12542_v49, %v12542_v49 }
 0x5fd   :  { %v2763_v11 = vsel %vm618_vm1, %v2742_v0, 0.0  ;;  %v2745_v15 = vmul.f32 %v12546_v1, %v12546_v1  ;;  %v2765_v38 = vsel %vm618_vm1, %v2743_v52, 0.0  ;;  %v2746_v47 = vmul.f32 %v12550_v25, %v12550_v25 }
 0x5fe   :  { %v2756_v19 = vadd.f32 %v2755_v23, %v2754_v39  ;;  %v2767_v31 = vsel %vm618_vm1, %v2744_v28, 0.0  ;;  %v2747_v8 = vmul.f32 %v12554_v29, %v12554_v29  ;;  %v2748_v35 = vmul.f32 %v12556_v61, %v12556_v61 }
 0x5ff   :  { %v2769_v63 = vsel %vm618_vm1, %v2745_v15, 0.0  ;;  %v2771_v51 = vsel %vm618_vm1, %v2746_v47, 0.0  ;;  %v2749_v3 = vmul.f32 %v12558_v22, %v12558_v22  ;;  %v2750_v60 = vmul.f32 %v12560_v26, %v12560_v26 }
 0x600   :  { %v2758_v62 = vadd.f32 %v2757_v5, %v2756_v19  ;;  %v2773_v43 = vsel %vm618_vm1, %v2747_v8, 0.0  ;;  %v2775_v50 = vsel %vm618_vm1, %v2748_v35, 0.0  ;;  %v2751_v27 = vmul.f32 %v12562_v14, %v12562_v14 }
 0x601   :  { %v2777_v9 = vsel %vm618_vm1, %v2749_v3, 0.0  ;;  %v2779_v44 = vsel %vm618_vm1, %v2750_v60, 0.0 }
 0x602   :  { %v2760_v7 = vadd.f32 %v2759_v2, %v2758_v62  ;;  %v2781_v37 = vsel %vm618_vm1, %v2751_v27, 0.0  ;;  %v2680_v62 = vld [vmem:[%s15501_s7] sm:$0x1] }
 0x604   :  { %v2762_v33 = vadd.f32 %v2761_v32, %v2760_v7  ;;  %v12618_v32 = vld [vmem:[%s15500_s8] ss:$0 sm:$0xff] }
 0x606   :  { %v2764_v58 = vadd.f32 %v2763_v11, %v2762_v33 }
 0x608   :  { %v2766_v48 = vadd.f32 %v2765_v38, %v2764_v58 }
 0x60a   :  { %v2768_v16 = vadd.f32 %v2767_v31, %v2766_v48 }
 0x60c   :  { %v2770_v10 = vadd.f32 %v2769_v63, %v2768_v16 }
 0x60e   :  { %v2772_v17 = vadd.f32 %v2771_v51, %v2770_v10 }
 0x610   :  { %v2774_v54 = vadd.f32 %v2773_v43, %v2772_v17 }
 0x612   :  { %v2776_v57 = vadd.f32 %v2775_v50, %v2774_v54 }
 0x614   :  { %v2778_v20 = vadd.f32 %v2777_v9, %v2776_v57 }
 0x616   :  { %v2780_v59 = vadd.f32 %v2779_v44, %v2778_v20 }
 0x618   :  { %v2782_v34 = vadd.f32 %v2781_v37, %v2780_v59 }
 0x61a   :  { %v2783_v21 = vrot.slane %v2782_v34, 4 }
 0x61c   :  { %v2784_v40 = vadd.f32 %v2783_v21, %v2782_v34 }
 0x61e   :  { %v2785_v13 = vrot.slane %v2784_v40, 2 }
 0x620   :  { %v2786_v45 = vadd.f32 %v2785_v13, %v2784_v40 }
 0x622   :  { %v2787_v55 = vrot.slane %v2786_v45, 1 }
 0x624   :  { %v2788_v12 = vadd.f32 %v2787_v55, %v2786_v45 }
 0x626   :  { %v2789_v42 = vmul.f32 0.0078125, %v2788_v12 }
 0x628   :  { %v2790_v39 = vadd.f32 1e-05, %v2789_v42 }
 0x62a   :  { %9603 = vrsqrt.f32 %v2790_v39  ;;  %vm2797_vm7 = vweird.f32 %v2790_v39 }
 0x630   :  { %v9604_v24 = vpop.eup %9603 }
 0x631   :  { %v2792_v23 = vmul.f32 %v9604_v24, %v2790_v39  ;;  %vm2798_vm6 = vweird.f32 %v9604_v24 }
 0x632   :  { %vm2799_vm8 = vmor %vm2797_vm7, %vm2798_vm6 }
 0x633   :  { %v2793_v19 = vmul.f32 %v9604_v24, %v2792_v23 }
 0x635   :  { %v2794_v18 = vmul.f32 0.5, %v2793_v19 }
 0x637   :  { %v2795_v5 = vsub.f32 1.5, %v2794_v18 }
 0x639   :  { %v2796_v0 = vmul.f32 %v9604_v24, %v2795_v5 }
 0x63b   :  { %v2800_v2 = vsel %vm2799_vm8, %v9604_v24, %v2796_v0 }
 0x63c   :  { %v2801_v7 = vmul.f32 %v2800_v2, %v2680_v62 }
 0x63e   :  { %v2803_v52 = vperm.slane %v2801_v7, 0 }
 0x640   :  { %v2820_v33 = vmul.f32 %v2803_v52, %v12562_v14  ;;  %v2811_v28 = vmul.f32 %v2803_v52, %v12534_v36  ;;  %v2812_v11 = vmul.f32 %v2803_v52, %v12538_v41  ;;  %v2819_v58 = vmul.f32 %v2803_v52, %v12560_v26 }
 0x641   :  { %v2809_v15 = vmul.f32 %v2803_v52, %v12526_v56  ;;  %v2810_v38 = vmul.f32 %v2803_v52, %v12530_v6  ;;  %v2817_v48 = vmul.f32 %v2803_v52, %v12556_v61  ;;  %v2818_v47 = vmul.f32 %v2803_v52, %v12558_v22 }
 0x642   :  { %v2839_v31 = vadd.f32 %v12618_v32, %v2820_v33  ;;  %v2830_v16 = vadd.f32 %v12618_v32, %v2811_v28  ;;  %v2831_v14 = vadd.f32 %v12618_v32, %v2812_v11  ;;  %v2838_v36 = vadd.f32 %v12618_v32, %v2819_v58 }
 0x643   :  { %v2828_v41 = vadd.f32 %v12618_v32, %v2809_v15  ;;  %v2829_v26 = vadd.f32 %v12618_v32, %v2810_v38  ;;  %v2836_v56 = vadd.f32 %v12618_v32, %v2817_v48  ;;  %v2837_v6 = vadd.f32 %v12618_v32, %v2818_v47 }
 0x644   :  { %v2954_v8 = vpack.c.bf16 %v2830_v16, %v2830_v16  ;;  %v2955_v61 = vpack.c.bf16 %v2831_v14, %v2831_v14  ;;  %v2962_v63 = vpack.c.bf16 %v2838_v36, %v2838_v36  ;;  %v2963_v22 = vpack.c.bf16 %v2839_v31, %v2839_v31  ;;  %v9521_v16 = vld [vmem:[%s15502_s11] sm:$0xff]  ;;  %v9522_v14 = vld [vmem:[%s15502_s11 + $0x8] sm:$0xff] }
 0x645   :  { %v2952_v10 = vpack.c.bf16 %v2828_v41, %v2828_v41  ;;  %v2953_v35 = vpack.c.bf16 %v2829_v26, %v2829_v26  ;;  %v2960_v51 = vpack.c.bf16 %v2836_v56, %v2836_v56  ;;  %v2961_v17 = vpack.c.bf16 %v2837_v6, %v2837_v6  ;;  %v9538_v36 = vld [vmem:[%s15502_s11 + $0x8] sm:$0xff]  ;;  %v9523_v41 = vld [vmem:[%s15502_s11 + $0x10] sm:$0xff]  ;;  %v9560_v56 = vld [vmem:[%s15503_s9 + $0x38] sm:$0xff] }
 0x646   :  { %v3090_v3 = vunpack.c.l.b16 %v2954_v8  ;;  %v3091_v43 = vunpack.c.l.b16 %v2955_v61  ;;  %v3396_v54 = vunpack.c.l.b16 %v2962_v63  ;;  %v3397_v60 = vunpack.c.l.b16 %v2963_v22  ;;  %v9539_v26 = vld [vmem:[%s15502_s11 + $0x10] sm:$0xff]  ;;  %3910 = vmatpush.bf16.msrb.mxu0 %v9560_v56  ;;  %9591 = vmatpush.bf16.msrb.mxu3 %v9560_v56  ;;  %v9524_v6 = vld [vmem:[%s15502_s11 + $0x18] sm:$0xff]  ;;  %v9525_v61 = vld [vmem:[%s15502_s11 + $0x20] sm:$0xff] }
 0x647   :  { %v3088_v50 = vunpack.c.l.b16 %v2952_v10  ;;  %v3089_v57 = vunpack.c.l.b16 %v2953_v35  ;;  %v3394_v27 = vunpack.c.l.b16 %v2960_v51  ;;  %v3395_v9 = vunpack.c.l.b16 %v2961_v17  ;;  %v9540_v8 = vld [vmem:[%s15502_s11 + $0x18] sm:$0xff]  ;;  %v9541_v63 = vld [vmem:[%s15502_s11 + $0x20] sm:$0xff]  ;;  %v9526_v22 = vld [vmem:[%s15502_s11 + $0x28] sm:$0xff] }
 0x648   :  { %v3095_v20 = vpack.c.b16 %v3091_v43, %v3090_v3  ;;  %v3401_v44 = vpack.c.b16 %v3397_v60, %v3396_v54  ;;  %v2807_v59 = vmul.f32 %v2803_v52, %v12518_v30  ;;  %v2808_v37 = vmul.f32 %v2803_v52, %v12522_v53  ;;  %v9542_v10 = vld [vmem:[%s15502_s11 + $0x28] sm:$0xff]  ;;  %v9559_v35 = vld [vmem:[%s15503_s9 + $0x30] sm:$0xff]  ;;  %v9557_v43 = vld [vmem:[%s15503_s9 + $0x20] sm:$0xff] }
 0x649   :  { %v3094_v34 = vpack.c.b16 %v3089_v57, %v3088_v50  ;;  %v3400_v21 = vpack.c.b16 %v3395_v9, %v3394_v27  ;;  %v2815_v40 = vmul.f32 %v2803_v52, %v12550_v25  ;;  %v2816_v13 = vmul.f32 %v2803_v52, %v12554_v29  ;;  %v9558_v51 = vld [vmem:[%s15503_s9 + $0x28] sm:$0xff]  ;;  %v9527_v17 = vld [vmem:[%s15502_s11 + $0x30] sm:$0xff]  ;;  %v9528_v57 = vld [vmem:[%s15502_s11 + $0x38] sm:$0xff] }
 0x64a   :  { %3152 = vmatpush.bf16.msra.mxu1 %v3095_v20  ;;  %3458 = vmatpush.bf16.msrb.mxu2 %v3401_v44  ;;  %v2826_v45 = vadd.f32 %v12618_v32, %v2807_v59  ;;  %v2827_v55 = vadd.f32 %v12618_v32, %v2808_v37  ;;  %v2805_v12 = vmul.f32 %v2803_v52, %v12510_v46  ;;  %v9543_v3 = vld [vmem:[%s15502_s11 + $0x30] sm:$0xff]  ;;  %v3681_v54 = vld [vmem:[#allocation4 + $0x1] sm:$0xff]  ;;  %v9544_v27 = vld [vmem:[%s15502_s11 + $0x38] sm:$0xff] }
 0x64b   :  { %v2834_v42 = vadd.f32 %v12618_v32, %v2815_v40  ;;  %v2835_v30 = vadd.f32 %v12618_v32, %v2816_v13  ;;  %v2806_v53 = vmul.f32 %v2803_v52, %v12514_v4  ;;  %v2813_v39 = vmul.f32 %v2803_v52, %v12542_v49  ;;  %3911 = vmatpush.bf16.msrb.mxu0 %v9559_v35  ;;  %v3682_v60 = vld [vmem:[#allocation4 + $0x9] sm:$0xff]  ;;  %v9529_v9 = vld [vmem:[%s15502_s11 + $0x40] sm:$0xff] }
 0x64c   :  { %v2950_v24 = vpack.c.bf16 %v2826_v45, %v2826_v45  ;;  %v2951_v25 = vpack.c.bf16 %v2827_v55, %v2827_v55  ;;  %v2824_v29 = vadd.f32 %v12618_v32, %v2805_v12  ;;  %v2814_v23 = vmul.f32 %v2803_v52, %v12546_v1  ;;  %9592 = vmatpush.bf16.msrb.mxu3 %v9559_v35  ;;  %v9545_v44 = vld [vmem:[%s15502_s11 + $0x40] sm:$0xff]  ;;  %v9546_v13 = vld [vmem:[%s15502_s11 + $0x48] sm:$0xff] }
 0x64d   :  { %v2958_v19 = vpack.c.bf16 %v2834_v42, %v2834_v42  ;;  %v2959_v18 = vpack.c.bf16 %v2835_v30, %v2835_v30  ;;  %v2825_v5 = vadd.f32 %v12618_v32, %v2806_v53  ;;  %v2832_v46 = vadd.f32 %v12618_v32, %v2813_v39  ;;  %v9531_v39 = vld [vmem:[%s15502_s11 + $0x50] sm:$0xff]  ;;  %v9562_v35 = vld [vmem:[%s15503_s9 + $0x48] sm:$0xff] }
 0x64e   :  { %3153 = vmatpush.bf16.msra.mxu1 %v3094_v34  ;;  %3459 = vmatpush.bf16.msrb.mxu2 %v3400_v21  ;;  %v3086_v62 = vunpack.c.l.b16 %v2950_v24  ;;  %v3087_v0 = vunpack.c.l.b16 %v2951_v25  ;;  %v2948_v2 = vpack.c.bf16 %v2824_v29, %v2824_v29  ;;  %v2833_v4 = vadd.f32 %v12618_v32, %v2814_v23  ;;  %v9537_v32 = vld [vmem:[%s15502_s11] sm:$0xff]  ;;  %v9530_v21 = vld [vmem:[%s15502_s11 + $0x48] sm:$0xff]  ;;  %v9547_v25 = vld [vmem:[%s15502_s11 + $0x50] sm:$0xff] }
 0x64f   :  { %v3392_v49 = vunpack.c.l.b16 %v2958_v19  ;;  %v3393_v7 = vunpack.c.l.b16 %v2959_v18  ;;  %v2949_v33 = vpack.c.bf16 %v2825_v5, %v2825_v5  ;;  %v2956_v28 = vpack.c.bf16 %v2832_v46, %v2832_v46  ;;  %3912 = vmatpush.bf16.msrb.mxu0 %v9558_v51 }
 0x650   :  { %v3093_v11 = vpack.c.b16 %v3087_v0, %v3086_v62  ;;  %v3084_v58 = vunpack.c.l.b16 %v2948_v2  ;;  %v2957_v1 = vpack.c.bf16 %v2833_v4, %v2833_v4  ;;  %9593 = vmatpush.bf16.msrb.mxu3 %v9558_v51  ;;  %v3745_v50 = vpack.c.bf16 %v3682_v60, %v3681_v54  ;;  %v9532_v62 = vld [vmem:[%s15502_s11 + $0x58] sm:$0xff]  ;;  %v9566_v51 = vld [vmem:[%s15503_s9 + $0x68] sm:$0xff]  ;;  %v9551_v54 = vld [vmem:[%s15502_s11 + $0x70] sm:$0xff] }
 0x651   :  { %v3399_v52 = vpack.c.b16 %v3393_v7, %v3392_v49  ;;  %v3085_v15 = vunpack.c.l.b16 %v2949_v33  ;;  %v3390_v38 = vunpack.c.l.b16 %v2956_v28  ;;  %v9548_v2 = vld [vmem:[%s15502_s11 + $0x58] sm:$0xff] }
 0x652   :  { %3154 = vmatpush.bf16.msra.mxu1 %v3093_v11  ;;  %v3391_v48 = vunpack.c.l.b16 %v2957_v1 }
 0x653   :  { %3460 = vmatpush.bf16.msrb.mxu2 %v3399_v52  ;;  %v3092_v47 = vpack.c.b16 %v3085_v15, %v3084_v58  ;;  %3913 = vmatpush.bf16.msrb.mxu0 %v9557_v43  ;;  %v9533_v58 = vld [vmem:[%s15502_s11 + $0x60] sm:$0xff] }
 0x654   :  { %v3398_v31 = vpack.c.b16 %v3391_v48, %v3390_v38  ;;  %9594 = vmatpush.bf16.msrb.mxu3 %v9557_v43  ;;  %v9549_v52 = vld [vmem:[%s15502_s11 + $0x60] sm:$0xff] }
 0x656   :  { %3155 = vmatpush.bf16.msra.mxu1 %v3092_v47  ;;  %8979 = vmatmul.msk.bf16.vlgmr.msrb.gmra.mxu0 %vm618_vm1, %v3745_v50 }
 0x657   :  { %3461 = vmatpush.bf16.msrb.mxu2 %v3398_v31 }
 0x659   :  { %8859 = vmatmul.msk.bf16.vlgmr.msra.gmra.mxu1 %vm618_vm1, %v9521_v16 }
 0x65a   :  { %8939 = vmatmul.msk.bf16.vlgmr.msrb.gmra.mxu2 %vm618_vm1, %v9537_v32  ;;  %v9534_v32 = vld [vmem:[%s15502_s11 + $0x68] sm:$0xff] }
 0x669   :  { %8860 = vmatmul.msk.bf16.gmra.mxu1 %vm618_vm1, %v9522_v14 }
 0x66a   :  { %8940 = vmatmul.msk.bf16.gmra.mxu2 %vm618_vm1, %v9538_v36  ;;  %v9550_v36 = vld [vmem:[%s15502_s11 + $0x68] sm:$0xff] }
 0x679   :  { %8861 = vmatmul.msk.bf16.gmra.mxu1 %vm618_vm1, %v9523_v41 }
 0x67a   :  { %8941 = vmatmul.msk.bf16.gmra.mxu2 %vm618_vm1, %v9539_v26 }
 0x689   :  { %8862 = vmatmul.msk.bf16.gmra.mxu1 %vm618_vm1, %v9524_v6  ;;  %v9564_v6 = vld [vmem:[%s15503_s9 + $0x58] sm:$0xff] }
 0x68a   :  { %8942 = vmatmul.msk.bf16.gmra.mxu2 %vm618_vm1, %v9540_v8  ;;  %v9568_v8 = vld [vmem:[%s15503_s9 + $0x78] sm:$0xff]  ;;  %4593 = vmatpush.bf16.msrb.mxu1 %v9564_v6 }
 0x68b   :  { %5051 = vmatpush.bf16.msra.mxu2 %v9568_v8 }
 0x699   :  { %8863 = vmatmul.msk.bf16.gmra.mxu1 %vm618_vm1, %v9525_v61 }
 0x69a   :  { %8943 = vmatmul.msk.bf16.gmra.mxu2 %vm618_vm1, %v9541_v63 }
 0x6a9   :  { %8864 = vmatmul.msk.bf16.gmra.mxu1 %vm618_vm1, %v9526_v22  ;;  %v9563_v22 = vld [vmem:[%s15503_s9 + $0x50] sm:$0xff] }
 0x6aa   :  { %8944 = vmatmul.msk.bf16.gmra.mxu2 %vm618_vm1, %v9542_v10  ;;  %v9567_v10 = vld [vmem:[%s15503_s9 + $0x70] sm:$0xff]  ;;  %4594 = vmatpush.bf16.msrb.mxu1 %v9563_v22 }
 0x6ab   :  { %5052 = vmatpush.bf16.msra.mxu2 %v9567_v10 }
 0x6ae   :  { %4595 = vmatpush.bf16.msrb.mxu1 %v9562_v35 }
 0x6af   :  { %5053 = vmatpush.bf16.msra.mxu2 %v9566_v51 }
 0x6b9   :  { %8865 = vmatmul.msk.bf16.gmra.mxu1 %vm618_vm1, %v9527_v17 }
 0x6ba   :  { %8945 = vmatmul.msk.bf16.gmra.mxu2 %vm618_vm1, %v9543_v3  ;;  %v9535_v3 = vld [vmem:[%s15502_s11 + $0x70] sm:$0xff] }
 0x6c9   :  { %8866 = vmatmul.msk.bf16.gmra.mxu1 %vm618_vm1, %v9528_v57 }
 0x6ca   :  { %8946 = vmatmul.msk.bf16.gmra.mxu2 %vm618_vm1, %v9544_v27  ;;  %v9561_v27 = vld [vmem:[%s15503_s9 + $0x40] sm:$0xff] }
 0x6cb   :  { %4596 = vmatpush.bf16.msrb.mxu1 %v9561_v27 }
 0x6d6   :  { %v3157_v20 = vpop.f32.mrf.mxu1 }
 0x6d7   :  { %3238 = vst.msk [vmem:[#allocation4 + $0x19] sm:$0xff] %vm618_vm1, %v3157_v20 }
 0x6d9   :  { %8867 = vmatmul.msk.bf16.gmra.mxu1 %vm618_vm1, %v9529_v9  ;;  %v9565_v9 = vld [vmem:[%s15503_s9 + $0x60] sm:$0xff] }
 0x6da   :  { %8947 = vmatmul.msk.bf16.gmra.mxu2 %vm618_vm1, %v9545_v44 }
 0x6db   :  { %5054 = vmatpush.bf16.msra.mxu2 %v9565_v9 }
 0x6dd   :  { %v3463_v59 = vpop.f32.mrf.mxu2 }
 0x6de   :  { %3544 = vst.msk [vmem:[#allocation4 + $0x1c9] sm:$0xff] %vm618_vm1, %v3463_v59  ;;  %v3159_v37 = vpop.f32.mrf.mxu1  ;;  %v3683_v45 = vld [vmem:[#allocation4 + $0x19] sm:$0xff] }
 0x6df   :  { %3239 = vst.msk [vmem:[#allocation4 + $0x21] sm:$0xff] %vm618_vm1, %v3159_v37  ;;  %v9536_v37 = vld [vmem:[%s15502_s11 + $0x78] sm:$0xff] }
 0x6e5   :  { %v3465_v34 = vpop.f32.mrf.mxu2 }
 0x6e6   :  { %3545 = vst.msk [vmem:[#allocation4 + $0x1d1] sm:$0xff] %vm618_vm1, %v3465_v34  ;;  %v3162_v40 = vpop.f32.mrf.mxu1  ;;  %v3684_v55 = vld [vmem:[#allocation4 + $0x21] sm:$0xff] }
 0x6e7   :  { %3240 = vst.msk [vmem:[#allocation4 + $0x31] sm:$0xff] %vm618_vm1, %v3162_v40  ;;  %v3746_v12 = vpack.c.bf16 %v3684_v55, %v3683_v45 }
 0x6e9   :  { %8868 = vmatmul.msk.bf16.gmra.mxu1 %vm618_vm1, %v9530_v21  ;;  %8980 = vmatmul.msk.bf16.gmra.mxu0 %vm618_vm1, %v3746_v12  ;;  %v9552_v21 = vld [vmem:[%s15502_s11 + $0x78] sm:$0xff] }
 0x6ea   :  { %8948 = vmatmul.msk.bf16.gmra.mxu2 %vm618_vm1, %v9546_v13 }
 0x6ed   :  { %v3468_v42 = vpop.f32.mrf.mxu2 }
 0x6ee   :  { %3546 = vst.msk [vmem:[#allocation4 + $0x1e1] sm:$0xff] %vm618_vm1, %v3468_v42  ;;  %v3164_v30 = vpop.f32.mrf.mxu1  ;;  %v3685_v29 = vld [vmem:[#allocation4 + $0x31] sm:$0xff]  ;;  %v12855_v42 = vpop.f32.mrf.mxu0 }
 0x6ef   :  { %3241 = vst.msk [vmem:[#allocation4 + $0x39] sm:$0xff] %vm618_vm1, %v3164_v30  ;;  %v4364_v30 = vld [vmem:[#allocation4 + $0x2] sm:$0xff] }
 0x6f5   :  { %v3470_v53 = vpop.f32.mrf.mxu2 }
 0x6f6   :  { %3547 = vst.msk [vmem:[#allocation4 + $0x1e9] sm:$0xff] %vm618_vm1, %v3470_v53  ;;  %v3167_v24 = vpop.f32.mrf.mxu1  ;;  %v3686_v23 = vld [vmem:[#allocation4 + $0x39] sm:$0xff]  ;;  %v4365_v53 = vld [vmem:[#allocation4 + $0xa] sm:$0xff] }
 0x6f7   :  { %3242 = vst.msk [vmem:[#allocation4 + $0x49] sm:$0xff] %vm618_vm1, %v3167_v24  ;;  %v3747_v19 = vpack.c.bf16 %v3686_v23, %v3685_v29  ;;  %v4428_v24 = vpack.c.bf16 %v4365_v53, %v4364_v30 }
 0x6f9   :  { %8869 = vmatmul.msk.bf16.gmra.mxu1 %vm618_vm1, %v9531_v39  ;;  %8981 = vmatmul.msk.bf16.gmra.mxu0 %vm618_vm1, %v3747_v19 }
 0x6fa   :  { %8949 = vmatmul.msk.bf16.gmra.mxu2 %vm618_vm1, %v9547_v25  ;;  %v4823_v25 = vld [vmem:[#allocation4 + $0x20] sm:$0xff] }
 0x6fd   :  { %v3473_v18 = vpop.f32.mrf.mxu2 }
 0x6fe   :  { %3548 = vst.msk [vmem:[#allocation4 + $0x1f9] sm:$0xff] %vm618_vm1, %v3473_v18  ;;  %v3169_v5 = vpop.f32.mrf.mxu1  ;;  %v3687_v4 = vld [vmem:[#allocation4 + $0x49] sm:$0xff] }
 0x6ff   :  { %3243 = vst.msk [vmem:[#allocation4 + $0x51] sm:$0xff] %vm618_vm1, %v3169_v5  ;;  %v4822_v5 = vld [vmem:[#allocation4 + $0x18] sm:$0xff]  ;;  %v4826_v22 = vld [vmem:[#allocation4 + $0x48] sm:$0xff] }
 0x705   :  { %v3475_v46 = vpop.f32.mrf.mxu2 }
 0x706   :  { %3549 = vst.msk [vmem:[#allocation4 + $0x201] sm:$0xff] %vm618_vm1, %v3475_v46  ;;  %v3172_v0 = vpop.f32.mrf.mxu1  ;;  %v3688_v49 = vld [vmem:[#allocation4 + $0x51] sm:$0xff]  ;;  %v12859_v46 = vpack.c.bf16 %v4823_v25, %v4822_v5 }
 0x707   :  { %3244 = vst.msk [vmem:[#allocation4 + $0x61] sm:$0xff] %vm618_vm1, %v3172_v0  ;;  %v3748_v7 = vpack.c.bf16 %v3688_v49, %v3687_v4  ;;  %v4366_v4 = vld [vmem:[#allocation4 + $0x1a] sm:$0xff]  ;;  %v4367_v49 = vld [vmem:[#allocation4 + $0x22] sm:$0xff] }
 0x709   :  { %8870 = vmatmul.msk.bf16.gmra.mxu1 %vm618_vm1, %v9532_v62  ;;  %8982 = vmatmul.msk.bf16.gmra.mxu0 %vm618_vm1, %v3748_v7  ;;  %v12865_v62 = vpop.f32.mrf.mxu0 }
 0x70a   :  { %8950 = vmatmul.msk.bf16.gmra.mxu2 %vm618_vm1, %v9548_v2 }
 0x70d   :  { %v3478_v33 = vpop.f32.mrf.mxu2 }
 0x70e   :  { %3550 = vst.msk [vmem:[#allocation4 + $0x211] sm:$0xff] %vm618_vm1, %v3478_v33  ;;  %v3174_v28 = vpop.f32.mrf.mxu1  ;;  %v3689_v15 = vld [vmem:[#allocation4 + $0x61] sm:$0xff]  ;;  %v4825_v33 = vld [vmem:[#allocation4 + $0x38] sm:$0xff] }
 0x70f   :  { %3245 = vst.msk [vmem:[#allocation4 + $0x69] sm:$0xff] %vm618_vm1, %v3174_v28 }
 0x715   :  { %v3480_v11 = vpop.f32.mrf.mxu2 }
 0x716   :  { %3551 = vst.msk [vmem:[#allocation4 + $0x219] sm:$0xff] %vm618_vm1, %v3480_v11  ;;  %v3177_v1 = vpop.f32.mrf.mxu1  ;;  %v3690_v38 = vld [vmem:[#allocation4 + $0x69] sm:$0xff] }
 0x717   :  { %3246 = vst.msk [vmem:[#allocation4 + $0x79] sm:$0xff] %vm618_vm1, %v3177_v1  ;;  %v3749_v48 = vpack.c.bf16 %v3690_v38, %v3689_v15  ;;  %v4429_v15 = vpack.c.bf16 %v4367_v49, %v4366_v4  ;;  %v4824_v38 = vld [vmem:[#allocation4 + $0x30] sm:$0xff] }
 0x718   :  { %v4373_v30 = vld [vmem:[#allocation4 + $0x6a] sm:$0xff] }
 0x719   :  { %8871 = vmatmul.msk.bf16.gmra.mxu1 %vm618_vm1, %v9533_v58  ;;  %8983 = vmatmul.msk.bf16.gmra.mxu0 %vm618_vm1, %v3749_v48  ;;  %v12873_v48 = vpack.c.bf16 %v4825_v33, %v4824_v38 }
 0x71a   :  { %8951 = vmatmul.msk.bf16.gmra.mxu2 %vm618_vm1, %v9549_v52 }
 0x71d   :  { %v3483_v47 = vpop.f32.mrf.mxu2 }
 0x71e   :  { %3552 = vst.msk [vmem:[#allocation4 + $0x229] sm:$0xff] %vm618_vm1, %v3483_v47  ;;  %v3179_v31 = vpop.f32.mrf.mxu1  ;;  %v3691_v41 = vld [vmem:[#allocation4 + $0x79] sm:$0xff] }
 0x71f   :  { %3247 = vst.msk [vmem:[#allocation4 + $0x81] sm:$0xff] %vm618_vm1, %v3179_v31  ;;  %v4830_v5 = vld [vmem:[#allocation4 + $0x78] sm:$0xff] }
 0x725   :  { %v3485_v16 = vpop.f32.mrf.mxu2 }
 0x726   :  { %3553 = vst.msk [vmem:[#allocation4 + $0x231] sm:$0xff] %vm618_vm1, %v3485_v16  ;;  %v3182_v14 = vpop.f32.mrf.mxu1  ;;  %v3692_v26 = vld [vmem:[#allocation4 + $0x81] sm:$0xff] }
 0x727   :  { %3248 = vst.msk [vmem:[#allocation4 + $0x91] sm:$0xff] %vm618_vm1, %v3182_v14  ;;  %v3750_v56 = vpack.c.bf16 %v3692_v26, %v3691_v41  ;;  %v4369_v14 = vld [vmem:[#allocation4 + $0x3a] sm:$0xff]  ;;  %v4827_v41 = vld [vmem:[#allocation4 + $0x50] sm:$0xff] }
 0x728   :  { %v12887_v10 = vpack.c.bf16 %v4827_v41, %v4826_v22  ;;  %v4374_v33 = vld [vmem:[#allocation4 + $0x7a] sm:$0xff] }
 0x729   :  { %8872 = vmatmul.msk.bf16.gmra.mxu1 %vm618_vm1, %v9534_v32  ;;  %8984 = vmatmul.msk.bf16.gmra.mxu0 %vm618_vm1, %v3750_v56  ;;  %v4368_v32 = vld [vmem:[#allocation4 + $0x32] sm:$0xff] }
 0x72a   :  { %8952 = vmatmul.msk.bf16.gmra.mxu2 %vm618_vm1, %v9550_v36 }
 0x72d   :  { %v3488_v61 = vpop.f32.mrf.mxu2 }
 0x72e   :  { %3554 = vst.msk [vmem:[#allocation4 + $0x241] sm:$0xff] %vm618_vm1, %v3488_v61  ;;  %v3184_v63 = vpop.f32.mrf.mxu1  ;;  %v3693_v60 = vld [vmem:[#allocation4 + $0x91] sm:$0xff] }
 0x72f   :  { %3249 = vst.msk [vmem:[#allocation4 + $0x99] sm:$0xff] %vm618_vm1, %v3184_v63  ;;  %v4430_v63 = vpack.c.bf16 %v4369_v14, %v4368_v32  ;;  %v4832_v14 = vld [vmem:[#allocation4 + $0x90] sm:$0xff] }
 0x735   :  { %v3490_v17 = vpop.f32.mrf.mxu2 }
 0x736   :  { %3555 = vst.msk [vmem:[#allocation4 + $0x249] sm:$0xff] %vm618_vm1, %v3490_v17  ;;  %v3187_v43 = vpop.f32.mrf.mxu1  ;;  %v3694_v50 = vld [vmem:[#allocation4 + $0x99] sm:$0xff] }
 0x737   :  { %3250 = vst.msk [vmem:[#allocation4 + $0xa9] sm:$0xff] %vm618_vm1, %v3187_v43  ;;  %v3751_v57 = vpack.c.bf16 %v3694_v50, %v3693_v60  ;;  %v4371_v43 = vld [vmem:[#allocation4 + $0x52] sm:$0xff]  ;;  %v4829_v60 = vld [vmem:[#allocation4 + $0x68] sm:$0xff] }
 0x739   :  { %8873 = vmatmul.msk.bf16.gmra.mxu1 %vm618_vm1, %v9535_v3  ;;  %8985 = vmatmul.msk.bf16.gmra.mxu0 %vm618_vm1, %v3751_v57  ;;  %v4370_v3 = vld [vmem:[#allocation4 + $0x4a] sm:$0xff] }
 0x73a   :  { %8953 = vmatmul.msk.bf16.gmra.mxu2 %vm618_vm1, %v9551_v54 }
 0x73d   :  { %v3493_v20 = vpop.f32.mrf.mxu2 }
 0x73e   :  { %3556 = vst.msk [vmem:[#allocation4 + $0x259] sm:$0xff] %vm618_vm1, %v3493_v20  ;;  %v3189_v44 = vpop.f32.mrf.mxu1  ;;  %v3695_v40 = vld [vmem:[#allocation4 + $0xa9] sm:$0xff] }
 0x73f   :  { %3251 = vst.msk [vmem:[#allocation4 + $0xb1] sm:$0xff] %vm618_vm1, %v3189_v44  ;;  %v4431_v44 = vpack.c.bf16 %v4371_v43, %v4370_v3 }
 0x745   :  { %v3495_v59 = vpop.f32.mrf.mxu2 }
 0x746   :  { %3557 = vst.msk [vmem:[#allocation4 + $0x261] sm:$0xff] %vm618_vm1, %v3495_v59  ;;  %v3192_v34 = vpop.f32.mrf.mxu1  ;;  %v3696_v13 = vld [vmem:[#allocation4 + $0xb1] sm:$0xff]  ;;  %v4828_v59 = vld [vmem:[#allocation4 + $0x60] sm:$0xff] }
 0x747   :  { %3252 = vst.msk [vmem:[#allocation4 + $0xc1] sm:$0xff] %vm618_vm1, %v3192_v34  ;;  %v3752_v45 = vpack.c.bf16 %v3696_v13, %v3695_v40  ;;  %v9556_v34 = vld [vmem:[%s15503_s9 + $0x18] sm:$0xff]  ;;  %v4835_v3 = vld [vmem:[#allocation4 + $0xb0] sm:$0xff] }
 0x748   :  { %4199 = vmatpush.bf16.msra.mxu0 %v9556_v34 }
 0x749   :  { %8874 = vmatmul.msk.bf16.gmra.mxu1 %vm618_vm1, %v9536_v37  ;;  %8986 = vmatmul.msk.bf16.gmra.mxu0 %vm618_vm1, %v3752_v45  ;;  %v12901_v37 = vpack.c.bf16 %v4829_v60, %v4828_v59  ;;  %v9555_v45 = vld [vmem:[%s15503_s9 + $0x10] sm:$0xff] }
 0x74a   :  { %8954 = vmatmul.msk.bf16.gmra.mxu2 %vm618_vm1, %v9552_v21 }
 0x74c   :  { %4200 = vmatpush.bf16.msra.mxu0 %v9555_v45  ;;  %v4378_v45 = vld [vmem:[#allocation4 + $0xaa] sm:$0xff] }
 0x74d   :  { %v3498_v55 = vpop.f32.mrf.mxu2 }
 0x74e   :  { %3558 = vst.msk [vmem:[#allocation4 + $0x271] sm:$0xff] %vm618_vm1, %v3498_v55  ;;  %v3194_v12 = vpop.f32.mrf.mxu1  ;;  %v3697_v23 = vld [vmem:[#allocation4 + $0xc1] sm:$0xff] }
 0x74f   :  { %3253 = vst.msk [vmem:[#allocation4 + $0xc9] sm:$0xff] %vm618_vm1, %v3194_v12  ;;  %v9554_v55 = vld [vmem:[%s15503_s9 + $0x8] sm:$0xff] }
 0x750   :  { %v4372_v12 = vld [vmem:[#allocation4 + $0x62] sm:$0xff]  ;;  %4201 = vmatpush.bf16.msra.mxu0 %v9554_v55  ;;  %v4379_v55 = vld [vmem:[#allocation4 + $0xb2] sm:$0xff] }
 0x755   :  { %v3500_v39 = vpop.f32.mrf.mxu2 }
 0x756   :  { %3559 = vst.msk [vmem:[#allocation4 + $0x279] sm:$0xff] %vm618_vm1, %v3500_v39  ;;  %v3197_v29 = vpop.f32.mrf.mxu1  ;;  %v3698_v19 = vld [vmem:[#allocation4 + $0xc9] sm:$0xff]  ;;  %v4831_v39 = vld [vmem:[#allocation4 + $0x80] sm:$0xff] }
 0x757   :  { %3254 = vst.msk [vmem:[#allocation4 + $0xd9] sm:$0xff] %vm618_vm1, %v3197_v29  ;;  %v3753_v18 = vpack.c.bf16 %v3698_v19, %v3697_v23 }
 0x759   :  { %8987 = vmatmul.msk.bf16.gmra.mxu0 %vm618_vm1, %v3753_v18  ;;  %9083 = vmatmul.msk.bf16.vlgmr.msrb.gmra.mxu1 %vm618_vm1, %v4428_v24  ;;  %v4432_v18 = vpack.c.bf16 %v4373_v30, %v4372_v12  ;;  %v4837_v12 = vld [vmem:[#allocation4 + $0xc8] sm:$0xff] }
 0x75a   :  { %9139 = vmatmul.msk.bf16.vlgmr.msra.gmra.mxu2 %vm618_vm1, %v12859_v46 }
 0x75d   :  { %v3503_v0 = vpop.f32.mrf.mxu2 }
 0x75e   :  { %3560 = vst.msk [vmem:[#allocation4 + $0x289] sm:$0xff] %vm618_vm1, %v3503_v0  ;;  %v3199_v2 = vpop.f32.mrf.mxu1  ;;  %v3699_v58 = vld [vmem:[#allocation4 + $0xd9] sm:$0xff] }
 0x75f   :  { %3255 = vst.msk [vmem:[#allocation4 + $0xe1] sm:$0xff] %vm618_vm1, %v3199_v2  ;;  %v9553_v0 = vld [vmem:[%s15503_s9] sm:$0xff]  ;;  %v12927_v2 = vpack.c.bf16 %v4831_v39, %v4830_v5 }
 0x760   :  { %4202 = vmatpush.bf16.msra.mxu0 %v9553_v0 }
 0x765   :  { %v3505_v7 = vpop.f32.mrf.mxu2 }
 0x766   :  { %3561 = vst.msk [vmem:[#allocation4 + $0x291] sm:$0xff] %vm618_vm1, %v3505_v7  ;;  %v3202_v28 = vpop.f32.mrf.mxu1  ;;  %v12870_v11 = vpop.f32.mrf.mxu0  ;;  %v3700_v1 = vld [vmem:[#allocation4 + $0xe1] sm:$0xff] }
 0x767   :  { %3256 = vst.msk [vmem:[#allocation4 + $0xf1] sm:$0xff] %vm618_vm1, %v3202_v28  ;;  %v3754_v52 = vpack.c.bf16 %v3700_v1, %v3699_v58  ;;  %v4375_v28 = vld [vmem:[#allocation4 + $0x82] sm:$0xff]  ;;  %v4833_v1 = vld [vmem:[#allocation4 + $0x98] sm:$0xff] }
 0x768   :  { %v4433_v32 = vpack.c.bf16 %v4375_v28, %v4374_v33  ;;  %v3714_v33 = vld [vmem:[#allocation4 + $0x1b9] sm:$0xff] }
 0x769   :  { %8988 = vmatmul.msk.bf16.gmra.mxu0 %vm618_vm1, %v3754_v52  ;;  %9084 = vmatmul.msk.bf16.gmra.mxu1 %vm618_vm1, %v4429_v15 }
 0x76a   :  { %9140 = vmatmul.msk.bf16.gmra.mxu2 %vm618_vm1, %v12873_v48 }
 0x76d   :  { %v3508_v47 = vpop.f32.mrf.mxu2 }
 0x76e   :  { %3562 = vst.msk [vmem:[#allocation4 + $0x2a1] sm:$0xff] %vm618_vm1, %v3508_v47  ;;  %v3204_v31 = vpop.f32.mrf.mxu1  ;;  %v12880_v16 = vpop.f32.mrf.mxu0  ;;  %v3701_v6 = vld [vmem:[#allocation4 + $0xf1] sm:$0xff] }
 0x76f   :  { %3257 = vst.msk [vmem:[#allocation4 + $0xf9] sm:$0xff] %vm618_vm1, %v3204_v31 }
 0x775   :  { %v3510_v36 = vpop.f32.mrf.mxu2 }
 0x776   :  { %3563 = vst.msk [vmem:[#allocation4 + $0x2a9] sm:$0xff] %vm618_vm1, %v3510_v36  ;;  %v3207_v26 = vpop.f32.mrf.mxu1  ;;  %v12884_v56 = vpop.f32.mrf.mxu0  ;;  %v3702_v8 = vld [vmem:[#allocation4 + $0xf9] sm:$0xff]  ;;  %v12941_v36 = vpack.c.bf16 %v4833_v1, %v4832_v14  ;;  %v4380_v1 = vld [vmem:[#allocation4 + $0xc2] sm:$0xff] }
 0x777   :  { %3258 = vst.msk [vmem:[#allocation4 + $0x109] sm:$0xff] %vm618_vm1, %v3207_v26  ;;  %v3755_v61 = vpack.c.bf16 %v3702_v8, %v3701_v6  ;;  %v3577_v8 = vld [vmem:[#allocation4] sm:$0xff] }
 0x779   :  { %8989 = vmatmul.msk.bf16.gmra.mxu0 %vm618_vm1, %v3755_v61  ;;  %9085 = vmatmul.msk.bf16.gmra.mxu1 %vm618_vm1, %v4430_v63  ;;  %v3578_v61 = vld [vmem:[#allocation4 + $0x8] sm:$0xff] }
 0x77a   :  { %9141 = vmatmul.msk.bf16.gmra.mxu2 %vm618_vm1, %v12887_v10  ;;  %v3641_v22 = vpack.c.bf16 %v3578_v61, %v3577_v8  ;;  %v3715_v61 = vld [vmem:[#allocation4 + $0x1c9] sm:$0xff] }
 0x77d   :  { %v3513_v35 = vpop.f32.mrf.mxu2 }
 0x77e   :  { %3564 = vst.msk [vmem:[#allocation4 + $0x2b9] sm:$0xff] %vm618_vm1, %v3513_v35  ;;  %v3209_v51 = vpop.f32.mrf.mxu1  ;;  %v12894_v17 = vpop.f32.mrf.mxu0  ;;  %v3703_v27 = vld [vmem:[#allocation4 + $0x109] sm:$0xff]  ;;  %v4376_v35 = vld [vmem:[#allocation4 + $0x92] sm:$0xff] }
 0x77f   :  { %3259 = vst.msk [vmem:[#allocation4 + $0x111] sm:$0xff] %vm618_vm1, %v3209_v51  ;;  %v4377_v51 = vld [vmem:[#allocation4 + $0x9a] sm:$0xff] }
 0x785   :  { %v3515_v54 = vpop.f32.mrf.mxu2 }
 0x786   :  { %3565 = vst.msk [vmem:[#allocation4 + $0x2c1] sm:$0xff] %vm618_vm1, %v3515_v54  ;;  %v3212_v50 = vpop.f32.mrf.mxu1  ;;  %v12898_v57 = vpop.f32.mrf.mxu0  ;;  %v3704_v9 = vld [vmem:[#allocation4 + $0x111] sm:$0xff] }
 0x787   :  { %3260 = vst.msk [vmem:[#allocation4 + $0x121] sm:$0xff] %vm618_vm1, %v3212_v50  ;;  %v3756_v20 = vpack.c.bf16 %v3704_v9, %v3703_v27  ;;  %v4834_v9 = vld [vmem:[#allocation4 + $0xa8] sm:$0xff] }
 0x789   :  { %8990 = vmatmul.msk.bf16.gmra.mxu0 %vm618_vm1, %v3756_v20  ;;  %9086 = vmatmul.msk.bf16.gmra.mxu1 %vm618_vm1, %v4431_v44  ;;  %v4434_v20 = vpack.c.bf16 %v4377_v51, %v4376_v35  ;;  %v12955_v44 = vpack.c.bf16 %v4835_v3, %v4834_v9  ;;  %v4382_v35 = vld [vmem:[#allocation4 + $0xda] sm:$0xff]  ;;  %v4383_v51 = vld [vmem:[#allocation4 + $0xe2] sm:$0xff] }
 0x78a   :  { %9142 = vmatmul.msk.bf16.gmra.mxu2 %vm618_vm1, %v12901_v37  ;;  %v4841_v3 = vld [vmem:[#allocation4 + $0xf8] sm:$0xff] }
 0x78d   :  { %v3518_v21 = vpop.f32.mrf.mxu2 }
 0x78e   :  { %3566 = vst.msk [vmem:[#allocation4 + $0x2d1] sm:$0xff] %vm618_vm1, %v3518_v21  ;;  %v3214_v40 = vpop.f32.mrf.mxu1  ;;  %v12911_v13 = vpop.f32.mrf.mxu0  ;;  %v3705_v29 = vld [vmem:[#allocation4 + $0x121] sm:$0xff] }
 0x78f   :  { %3261 = vst.msk [vmem:[#allocation4 + $0x129] sm:$0xff] %vm618_vm1, %v3214_v40 }
 0x795   :  { %v3520_v53 = vpop.f32.mrf.mxu2 }
 0x796   :  { %3567 = vst.msk [vmem:[#allocation4 + $0x2d9] sm:$0xff] %vm618_vm1, %v3520_v53  ;;  %v3217_v24 = vpop.f32.mrf.mxu1  ;;  %v12921_v25 = vpop.f32.mrf.mxu0  ;;  %v3706_v23 = vld [vmem:[#allocation4 + $0x129] sm:$0xff] }
 0x797   :  { %3262 = vst.msk [vmem:[#allocation4 + $0x139] sm:$0xff] %vm618_vm1, %v3217_v24  ;;  %v3757_v19 = vpack.c.bf16 %v3706_v23, %v3705_v29  ;;  %v4836_v23 = vld [vmem:[#allocation4 + $0xc0] sm:$0xff] }
 0x799   :  { %8991 = vmatmul.msk.bf16.gmra.mxu0 %vm618_vm1, %v3757_v19  ;;  %9087 = vmatmul.msk.bf16.gmra.mxu1 %vm618_vm1, %v4432_v18  ;;  %v4435_v19 = vpack.c.bf16 %v4379_v55, %v4378_v45  ;;  %v12970_v18 = vpack.c.bf16 %v4837_v12, %v4836_v23  ;;  %v3718_v45 = vld [vmem:[#allocation4 + $0x1e9] sm:$0xff]  ;;  %v4384_v12 = vld [vmem:[#allocation4 + $0xf2] sm:$0xff] }
 0x79a   :  { %9143 = vmatmul.msk.bf16.gmra.mxu2 %vm618_vm1, %v12927_v2  ;;  %v4842_v23 = vld [vmem:[#allocation4 + $0x108] sm:$0xff] }
 0x79d   :  { %v3523_v4 = vpop.f32.mrf.mxu2 }
 0x79e   :  { %3568 = vst.msk [vmem:[#allocation4 + $0x2e9] sm:$0xff] %vm618_vm1, %v3523_v4  ;;  %v3219_v49 = vpop.f32.mrf.mxu1  ;;  %v12934_v7 = vpop.f32.mrf.mxu0  ;;  %v3707_v38 = vld [vmem:[#allocation4 + $0x139] sm:$0xff] }
 0x79f   :  { %3263 = vst.msk [vmem:[#allocation4 + $0x141] sm:$0xff] %vm618_vm1, %v3219_v49  ;;  %v3713_v49 = vld [vmem:[#allocation4 + $0x1b1] sm:$0xff] }
 0x7a5   :  { %v3525_v58 = vpop.f32.mrf.mxu2 }
 0x7a6   :  { %3569 = vst.msk [vmem:[#allocation4 + $0x2f1] sm:$0xff] %vm618_vm1, %v3525_v58  ;;  %v3222_v52 = vpop.f32.mrf.mxu1  ;;  %v12938_v15 = vpop.f32.mrf.mxu0  ;;  %v3708_v47 = vld [vmem:[#allocation4 + $0x141] sm:$0xff]  ;;  %v3761_v58 = vpack.c.bf16 %v3714_v33, %v3713_v49 }
 0x7a7   :  { %15770 = vst [vmem:[#allocation7_spill] sm:$0xff] %v12938_v15  ;;  %v3758_v31 = vpack.c.bf16 %v3708_v47, %v3707_v38 }
 0x7a8   :  { %3264 = vst.msk [vmem:[#allocation4 + $0x151] sm:$0xff] %vm618_vm1, %v3222_v52  ;;  %v4381_v52 = vld [vmem:[#allocation4 + $0xca] sm:$0xff] }
 0x7a9   :  { %8992 = vmatmul.msk.bf16.gmra.mxu0 %vm618_vm1, %v3758_v31  ;;  %9088 = vmatmul.msk.bf16.gmra.mxu1 %vm618_vm1, %v4433_v32  ;;  %v4838_v31 = vld [vmem:[#allocation4 + $0xd8] sm:$0xff]  ;;  %v4436_v32 = vpack.c.bf16 %v4381_v52, %v4380_v1  ;;  %v4386_v52 = vld [vmem:[#allocation4 + $0x10a] sm:$0xff] }
 0x7aa   :  { %9144 = vmatmul.msk.bf16.gmra.mxu2 %vm618_vm1, %v12941_v36 }
 0x7ad   :  { %v3528_v41 = vpop.f32.mrf.mxu2 }
 0x7ae   :  { %3570 = vst.msk [vmem:[#allocation4 + $0x301] sm:$0xff] %vm618_vm1, %v3528_v41  ;;  %v3224_v26 = vpop.f32.mrf.mxu1  ;;  %v12948_v6 = vpop.f32.mrf.mxu0 }
 0x7af   :  { %15771 = vst [vmem:[#allocation8_spill] sm:$0xff] %v12948_v6  ;;  %v3709_v60 = vld [vmem:[#allocation4 + $0x151] sm:$0xff] }
 0x7b0   :  { %3265 = vst.msk [vmem:[#allocation4 + $0x159] sm:$0xff] %vm618_vm1, %v3224_v26 }
 0x7b5   :  { %v3530_v63 = vpop.f32.mrf.mxu2 }
 0x7b6   :  { %3571 = vst.msk [vmem:[#allocation4 + $0x309] sm:$0xff] %vm618_vm1, %v3530_v63  ;;  %v3227_v43 = vpop.f32.mrf.mxu1  ;;  %v12952_v54 = vpop.f32.mrf.mxu0  ;;  %v3716_v63 = vld [vmem:[#allocation4 + $0x1d1] sm:$0xff] }
 0x7b7   :  { %15772 = vst [vmem:[#allocation9_spill] sm:$0xff] %v12952_v54  ;;  %v3710_v50 = vld [vmem:[#allocation4 + $0x159] sm:$0xff] }
 0x7b8   :  { %3266 = vst.msk [vmem:[#allocation4 + $0x169] sm:$0xff] %vm618_vm1, %v3227_v43  ;;  %v3759_v27 = vpack.c.bf16 %v3710_v50, %v3709_v60  ;;  %v3762_v60 = vpack.c.bf16 %v3716_v63, %v3715_v61  ;;  %v4840_v50 = vld [vmem:[#allocation4 + $0xf0] sm:$0xff]  ;;  %v4844_v63 = vld [vmem:[#allocation4 + $0x120] sm:$0xff] }
 0x7b9   :  { %9027 = vmatmul.msk.bf16.vlgmr.msra.gmra.mxu0 %vm618_vm1, %v3641_v22  ;;  %9089 = vmatmul.msk.bf16.gmra.mxu1 %vm618_vm1, %v4434_v20  ;;  %v13007_v9 = vpack.c.bf16 %v4841_v3, %v4840_v50  ;;  %v9572_v3 = vld [vmem:[%s15503_s9 + $0x98] sm:$0xff] }
 0x7ba   :  { %8993 = vmatmul.msk.bf16.vlgmr.msrb.gmra.mxu3 %vm618_vm1, %v3759_v27  ;;  %9145 = vmatmul.msk.bf16.gmra.mxu2 %vm618_vm1, %v12955_v44  ;;  %v4437_v27 = vpack.c.bf16 %v4383_v51, %v4382_v35 }
 0x7bb   :  { %5509 = vmatpush.bf16.msra.mxu3 %v9572_v3 }
 0x7bd   :  { %v3533_v59 = vpop.f32.mrf.mxu2 }
 0x7be   :  { %3572 = vst.msk [vmem:[#allocation4 + $0x319] sm:$0xff] %vm618_vm1, %v3533_v59  ;;  %v3229_v34 = vpop.f32.mrf.mxu1  ;;  %v12963_v21 = vpop.f32.mrf.mxu0 }
 0x7bf   :  { %15773 = vst [vmem:[#allocation10_spill] sm:$0xff] %v12963_v21  ;;  %v3711_v39 = vld [vmem:[#allocation4 + $0x169] sm:$0xff] }
 0x7c0   :  { %3267 = vst.msk [vmem:[#allocation4 + $0x171] sm:$0xff] %vm618_vm1, %v3229_v34 }
 0x7c5   :  { %v3535_v40 = vpop.f32.mrf.mxu2 }
 0x7c6   :  { %3573 = vst.msk [vmem:[#allocation4 + $0x321] sm:$0xff] %vm618_vm1, %v3535_v40  ;;  %v3232_v30 = vpop.f32.mrf.mxu1  ;;  %v12967_v53 = vpop.f32.mrf.mxu0  ;;  %v3717_v40 = vld [vmem:[#allocation4 + $0x1e1] sm:$0xff] }
 0x7c7   :  { %15774 = vst [vmem:[#allocation11_spill] sm:$0xff] %v12967_v53  ;;  %v3712_v24 = vld [vmem:[#allocation4 + $0x171] sm:$0xff] }
 0x7c8   :  { %3268 = vst.msk [vmem:[#allocation4 + $0x181] sm:$0xff] %vm618_vm1, %v3232_v30  ;;  %v3760_v29 = vpack.c.bf16 %v3712_v24, %v3711_v39  ;;  %v4385_v30 = vld [vmem:[#allocation4 + $0xfa] sm:$0xff]  ;;  %v4843_v39 = vld [vmem:[#allocation4 + $0x110] sm:$0xff] }
 0x7c9   :  { %9028 = vmatmul.msk.bf16.gmra.mxu0 %vm618_vm1, %v12859_v46  ;;  %9090 = vmatmul.msk.bf16.gmra.mxu1 %vm618_vm1, %v4435_v19  ;;  %v4839_v46 = vld [vmem:[#allocation4 + $0xe0] sm:$0xff]  ;;  %v4438_v19 = vpack.c.bf16 %v4385_v30, %v4384_v12  ;;  %v4389_v30 = vld [vmem:[#allocation4 + $0x12a] sm:$0xff] }
 0x7ca   :  { %8994 = vmatmul.msk.bf16.gmra.mxu3 %vm618_vm1, %v3760_v29  ;;  %9146 = vmatmul.msk.bf16.gmra.mxu2 %vm618_vm1, %v12970_v18  ;;  %v12987_v14 = vpack.c.bf16 %v4839_v46, %v4838_v31  ;;  %v3763_v29 = vpack.c.bf16 %v3718_v45, %v3717_v40  ;;  %v4387_v46 = vld [vmem:[#allocation4 + $0x112] sm:$0xff]  ;;  %v4845_v31 = vld [vmem:[#allocation4 + $0x128] sm:$0xff] }
 0x7cb   :  { %v4439_v35 = vpack.c.bf16 %v4387_v46, %v4386_v52  ;;  %v13047_v51 = vpack.c.bf16 %v4845_v31, %v4844_v63  ;;  %v3721_v40 = vld [vmem:[#allocation4 + $0x211] sm:$0xff]  ;;  %v3722_v45 = vld [vmem:[#allocation4 + $0x219] sm:$0xff]  ;;  %v3723_v63 = vld [vmem:[#allocation4 + $0x229] sm:$0xff] }
 0x7cd   :  { %v3538_v5 = vpop.f32.mrf.mxu2 }
 0x7ce   :  { %3574 = vst.msk [vmem:[#allocation4 + $0x331] sm:$0xff] %vm618_vm1, %v3538_v5  ;;  %v3234_v0 = vpop.f32.mrf.mxu1  ;;  %v12979_v4 = vpop.f32.mrf.mxu0  ;;  %v13027_v5 = vpack.c.bf16 %v4843_v39, %v4842_v23  ;;  %v4847_v39 = vld [vmem:[#allocation4 + $0x140] sm:$0xff] }
 0x7cf   :  { %15775 = vst [vmem:[#allocation12_spill] sm:$0xff] %v12979_v4 }
 0x7d0   :  { %3269 = vst.msk [vmem:[#allocation4 + $0x189] sm:$0xff] %vm618_vm1, %v3234_v0 }
 0x7d5   :  { %v3540_v28 = vpop.f32.mrf.mxu2 }
 0x7d6   :  { %3575 = vst.msk [vmem:[#allocation4 + $0x339] sm:$0xff] %vm618_vm1, %v3540_v28  ;;  %v12983_v38 = vpop.f32.mrf.mxu0  ;;  %v12985_v47 = vpop.f32.mrf.mxu1  ;;  %v3719_v28 = vld [vmem:[#allocation4 + $0x1f9] sm:$0xff] }
 0x7d7   :  { %15776 = vst [vmem:[#allocation25_spill] sm:$0xff] %v12983_v38 }
 0x7d9   :  { %9029 = vmatmul.msk.bf16.gmra.mxu0 %vm618_vm1, %v12873_v48  ;;  %9091 = vmatmul.msk.bf16.gmra.mxu1 %vm618_vm1, %v4436_v32 }
 0x7da   :  { %8995 = vmatmul.msk.bf16.gmra.mxu3 %vm618_vm1, %v3761_v58  ;;  %9147 = vmatmul.msk.bf16.gmra.mxu2 %vm618_vm1, %v12987_v14  ;;  %v3720_v58 = vld [vmem:[#allocation4 + $0x201] sm:$0xff] }
 0x7db   :  { %v3764_v61 = vpack.c.bf16 %v3720_v58, %v3719_v28  ;;  %v4846_v28 = vld [vmem:[#allocation4 + $0x138] sm:$0xff] }
 0x7dc   :  { %v13070_v52 = vpack.c.bf16 %v4847_v39, %v4846_v28 }
 0x7dd   :  { %v12995_v41 = vpop.f32.mrf.mxu2 }
 0x7de   :  { %v12997_v26 = vpop.f32.mrf.mxu0  ;;  %v12999_v8 = vpop.f32.mrf.mxu1 }
 0x7df   :  { %15777 = vst [vmem:[#allocation26_spill] sm:$0xff] %v12997_v26 }
 0x7e5   :  { %v13001_v22 = vpop.f32.mrf.mxu2 }
 0x7e6   :  { %v13003_v43 = vpop.f32.mrf.mxu0  ;;  %v13005_v48 = vpop.f32.mrf.mxu1 }
 0x7e7   :  { %15778 = vst [vmem:[#allocation13_spill] sm:$0xff] %v13003_v43 }
 0x7e9   :  { %9030 = vmatmul.msk.bf16.gmra.mxu0 %vm618_vm1, %v12887_v10  ;;  %9092 = vmatmul.msk.bf16.gmra.mxu1 %vm618_vm1, %v4437_v27 }
 0x7ea   :  { %8996 = vmatmul.msk.bf16.gmra.mxu3 %vm618_vm1, %v3762_v60  ;;  %9148 = vmatmul.msk.bf16.gmra.mxu2 %vm618_vm1, %v13007_v9 }
 0x7ed   :  { %v13015_v20 = vpop.f32.mrf.mxu2 }
 0x7ee   :  { %v13017_v59 = vpop.f32.mrf.mxu0  ;;  %v13019_v34 = vpop.f32.mrf.mxu1 }
 0x7ef   :  { %15779 = vst [vmem:[#allocation14_spill] sm:$0xff] %v13017_v59 }
 0x7f5   :  { %v13021_v55 = vpop.f32.mrf.mxu2 }
 0x7f6   :  { %v13023_v24 = vpop.f32.mrf.mxu0  ;;  %v13025_v10 = vpop.f32.mrf.mxu1 }
 0x7f7   :  { %15780 = vst [vmem:[#allocation15_spill] sm:$0xff] %v13023_v24 }
 0x7f9   :  { %9031 = vmatmul.msk.bf16.gmra.mxu0 %vm618_vm1, %v12901_v37  ;;  %9093 = vmatmul.msk.bf16.gmra.mxu1 %vm618_vm1, %v4438_v19  ;;  %v3765_v19 = vpack.c.bf16 %v3722_v45, %v3721_v40  ;;  %v4390_v40 = vld [vmem:[#allocation4 + $0x13a] sm:$0xff]  ;;  %v4391_v45 = vld [vmem:[#allocation4 + $0x142] sm:$0xff] }
 0x7fa   :  { %8997 = vmatmul.msk.bf16.gmra.mxu3 %vm618_vm1, %v3763_v29  ;;  %9149 = vmatmul.msk.bf16.gmra.mxu2 %vm618_vm1, %v13027_v5  ;;  %v4441_v28 = vpack.c.bf16 %v4391_v45, %v4390_v40  ;;  %v4392_v45 = vld [vmem:[#allocation4 + $0x152] sm:$0xff] }
 0x7fd   :  { %v13035_v0 = vpop.f32.mrf.mxu2 }
 0x7fe   :  { %v13037_v49 = vpop.f32.mrf.mxu0  ;;  %v13039_v33 = vpop.f32.mrf.mxu1 }
 0x7ff   :  { %15781 = vst [vmem:[#allocation16_spill] sm:$0xff] %v13037_v49 }
 0x805   :  { %v13041_v1 = vpop.f32.mrf.mxu2 }
 0x806   :  { %v13043_v32 = vpop.f32.mrf.mxu0  ;;  %v13045_v37 = vpop.f32.mrf.mxu1 }
 0x807   :  { %15782 = vst [vmem:[#allocation17_spill] sm:$0xff] %v13043_v32 }
 0x809   :  { %9032 = vmatmul.msk.bf16.gmra.mxu0 %vm618_vm1, %v12927_v2  ;;  %9094 = vmatmul.msk.bf16.gmra.mxu1 %vm618_vm1, %v4439_v35  ;;  %v4388_v2 = vld [vmem:[#allocation4 + $0x122] sm:$0xff]  ;;  %v3724_v35 = vld [vmem:[#allocation4 + $0x231] sm:$0xff] }
 0x80a   :  { %8998 = vmatmul.msk.bf16.gmra.mxu3 %vm618_vm1, %v3764_v61  ;;  %9150 = vmatmul.msk.bf16.gmra.mxu2 %vm618_vm1, %v13047_v51  ;;  %v4440_v58 = vpack.c.bf16 %v4389_v30, %v4388_v2  ;;  %v4849_v2 = vld [vmem:[#allocation4 + $0x158] sm:$0xff]  ;;  %v3766_v39 = vpack.c.bf16 %v3724_v35, %v3723_v63  ;;  %v3725_v63 = vld [vmem:[#allocation4 + $0x241] sm:$0xff]  ;;  %v3726_v35 = vld [vmem:[#allocation4 + $0x249] sm:$0xff] }
 0x80d   :  { %v13058_v60 = vpop.f32.mrf.mxu2 }
 0x80e   :  { %v13060_v50 = vpop.f32.mrf.mxu0  ;;  %v13062_v27 = vpop.f32.mrf.mxu1 }
 0x80f   :  { %15783 = vst [vmem:[#allocation21_spill] sm:$0xff] %v13060_v50  ;;  %v4850_v50 = vld [vmem:[#allocation4 + $0x168] sm:$0xff] }
 0x815   :  { %v13064_v12 = vpop.f32.mrf.mxu2 }
 0x816   :  { %v13066_v29 = vpop.f32.mrf.mxu0  ;;  %v13068_v23 = vpop.f32.mrf.mxu1 }
 0x817   :  { %15784 = vst [vmem:[#allocation22_spill] sm:$0xff] %v13066_v29 }
 0x819   :  { %9033 = vmatmul.msk.bf16.gmra.mxu0 %vm618_vm1, %v12941_v36  ;;  %9095 = vmatmul.msk.bf16.gmra.mxu1 %vm618_vm1, %v4440_v58 }
 0x81a   :  { %8999 = vmatmul.msk.bf16.gmra.mxu3 %vm618_vm1, %v3765_v19  ;;  %9151 = vmatmul.msk.bf16.gmra.mxu2 %vm618_vm1, %v13070_v52  ;;  %v4848_v19 = vld [vmem:[#allocation4 + $0x150] sm:$0xff] }
 0x81b   :  { %v13090_v58 = vpack.c.bf16 %v4849_v2, %v4848_v19  ;;  %v4393_v2 = vld [vmem:[#allocation4 + $0x15a] sm:$0xff] }
 0x81c   :  { %v4442_v32 = vpack.c.bf16 %v4393_v2, %v4392_v45  ;;  %v3727_v2 = vld [vmem:[#allocation4 + $0x259] sm:$0xff] }
 0x81d   :  { %v13078_v46 = vpop.f32.mrf.mxu2 }
 0x81e   :  { %15785 = vst [vmem:[#allocation23_spill] sm:$0xff] %v13078_v46  ;;  %v13080_v31 = vpop.f32.mrf.mxu0  ;;  %v13082_v61 = vpop.f32.mrf.mxu1 }
 0x81f   :  { %15786 = vst [vmem:[#allocation18_spill] sm:$0xff] %v13080_v31 }
 0x820   :  { %15787 = vst [vmem:[#allocation27_spill] sm:$0xff] %v13082_v61 }
 0x825   :  { %v13084_v3 = vpop.f32.mrf.mxu2 }
 0x826   :  { %15788 = vst [vmem:[#allocation19_spill] sm:$0xff] %v13084_v3  ;;  %v13086_v30 = vpop.f32.mrf.mxu0  ;;  %v13088_v36 = vpop.f32.mrf.mxu1 }
 0x827   :  { %15789 = vst [vmem:[#allocation20_spill] sm:$0xff] %v13086_v30 }
 0x828   :  { %15790 = vst [vmem:[#allocation24_spill] sm:$0xff] %v13088_v36 }
 0x829   :  { %9034 = vmatmul.msk.bf16.gmra.mxu0 %vm618_vm1, %v12955_v44  ;;  %9096 = vmatmul.msk.bf16.gmra.mxu1 %vm618_vm1, %v4441_v28  ;;  %v3767_v28 = vpack.c.bf16 %v3726_v35, %v3725_v63  ;;  %v4853_v35 = vld [vmem:[#allocation4 + $0x188] sm:$0xff] }
 0x82a   :  { %9000 = vmatmul.msk.bf16.gmra.mxu3 %vm618_vm1, %v3766_v39  ;;  %9152 = vmatmul.msk.bf16.gmra.mxu2 %vm618_vm1, %v13090_v58  ;;  %v4851_v39 = vld [vmem:[#allocation4 + $0x170] sm:$0xff] }
 0x82b   :  { %v13110_v49 = vpack.c.bf16 %v4851_v39, %v4850_v50  ;;  %v4852_v50 = vld [vmem:[#allocation4 + $0x180] sm:$0xff] }
 0x82c   :  { %v3728_v39 = vld [vmem:[#allocation4 + $0x261] sm:$0xff]  ;;  %v4901_v26 = vpack.c.bf16 %v4853_v35, %v4852_v50  ;;  %v9571_v35 = vld [vmem:[%s15503_s9 + $0x90] sm:$0xff] }
 0x82d   :  { %v13098_v31 = vpop.f32.mrf.mxu2  ;;  %v3768_v38 = vpack.c.bf16 %v3728_v39, %v3727_v2  ;;  %v4397_v2 = vld [vmem:[#allocation4 + $0x1ba] sm:$0xff]  ;;  %5510 = vmatpush.bf16.msra.mxu3 %v9571_v35 }
 0x82e   :  { %15791 = vst [vmem:[#allocation5_spill] sm:$0xff] %v13098_v31  ;;  %v13100_v30 = vpop.f32.mrf.mxu0  ;;  %v13102_v29 = vpop.f32.mrf.mxu1  ;;  %v3730_v39 = vld [vmem:[#allocation4 + $0x279] sm:$0xff] }
 0x82f   :  { %15792 = vst [vmem:[#allocation6_spill] sm:$0xff] %v13100_v30 }
 0x830   :  { %15793 = vst [vmem:[#allocation28_spill] sm:$0xff] %v13102_v29 }
 0x835   :  { %v13104_v40 = vpop.f32.mrf.mxu2 }
 0x836   :  { %15794 = vst [vmem:[#allocation29_spill] sm:$0xff] %v13104_v40  ;;  %v13106_v19 = vpop.f32.mrf.mxu0  ;;  %v13108_v44 = vpop.f32.mrf.mxu1 }
 0x837   :  { %15795 = vst [vmem:[#allocation30_spill] sm:$0xff] %v13108_v44 }
 0x839   :  { %9035 = vmatmul.msk.bf16.gmra.mxu0 %vm618_vm1, %v12970_v18  ;;  %9097 = vmatmul.msk.bf16.gmra.mxu1 %vm618_vm1, %v4442_v32  ;;  %v4394_v32 = vld [vmem:[#allocation4 + $0x16a] sm:$0xff] }
 0x83a   :  { %9001 = vmatmul.msk.bf16.gmra.mxu3 %vm618_vm1, %v3767_v28  ;;  %9153 = vmatmul.msk.bf16.gmra.mxu2 %vm618_vm1, %v13110_v49  ;;  %v4395_v28 = vld [vmem:[#allocation4 + $0x172] sm:$0xff] }
 0x83b   :  { %v4443_v4 = vpack.c.bf16 %v4395_v28, %v4394_v32  ;;  %v4854_v32 = vld [vmem:[#allocation4 + $0x1c8] sm:$0xff]  ;;  %v4855_v28 = vld [vmem:[#allocation4 + $0x1d0] sm:$0xff] }
 0x83d   :  { %v13118_v30 = vpop.f32.mrf.mxu3  ;;  %v13120_v24 = vpop.f32.mrf.mxu2 }
 0x83e   :  { %15796 = vst [vmem:[#allocation31_spill] sm:$0xff] %v13118_v30  ;;  %v13122_v59 = vpop.f32.mrf.mxu0  ;;  %v13124_v63 = vpop.f32.mrf.mxu1 }
 0x83f   :  { %15797 = vst [vmem:[#allocation32_spill] sm:$0xff] %v13120_v24 }
 0x840   :  { %15798 = vst [vmem:[#allocation33_spill] sm:$0xff] %v13124_v63  ;;  %v13158_v63 = vpack.c.bf16 %v4855_v28, %v4854_v32  ;;  %v4398_v32 = vld [vmem:[#allocation4 + $0x1ca] sm:$0xff] }
 0x845   :  { %v13126_v45 = vpop.f32.mrf.mxu3  ;;  %v13128_v18 = vpop.f32.mrf.mxu2 }
 0x846   :  { %15799 = vst [vmem:[#allocation34_spill] sm:$0xff] %v13126_v45  ;;  %v13130_v43 = vpop.f32.mrf.mxu0  ;;  %v13132_v30 = vpop.f32.mrf.mxu1 }
 0x847   :  { %15800 = vst [vmem:[#allocation35_spill] sm:$0xff] %v13128_v18 }
 0x848   :  { %15801 = vst [vmem:[#allocation36_spill] sm:$0xff] %v13132_v30 }
 0x849   :  { %9036 = vmatmul.msk.bf16.gmra.mxu0 %vm618_vm1, %v12987_v14  ;;  %9098 = vmatmul.msk.bf16.gmra.mxu1 %vm618_vm1, %v4443_v4  ;;  %v3729_v4 = vld [vmem:[#allocation4 + $0x271] sm:$0xff] }
 0x84a   :  { %9002 = vmatmul.msk.bf16.gmra.mxu3 %vm618_vm1, %v3768_v38  ;;  %9154 = vmatmul.msk.bf16.gmra.mxu2 %vm618_vm1, %v4901_v26  ;;  %v4396_v38 = vld [vmem:[#allocation4 + $0x1b2] sm:$0xff] }
 0x84d   :  { %v13139_v45 = vpop.f32.mrf.mxu3  ;;  %v13141_v18 = vpop.f32.mrf.mxu2 }
 0x84e   :  { %15802 = vst [vmem:[#allocation37_spill] sm:$0xff] %v13139_v45  ;;  %v13143_v53 = vpop.f32.mrf.mxu0  ;;  %v13145_v50 = vpop.f32.mrf.mxu1 }
 0x84f   :  { %15803 = vst [vmem:[#allocation38_spill] sm:$0xff] %v13141_v18  ;;  %v4444_v18 = vpack.c.bf16 %v4397_v2, %v4396_v38 }
 0x850   :  { %15804 = vst [vmem:[#allocation39_spill] sm:$0xff] %v13145_v50  ;;  %v3769_v50 = vpack.c.bf16 %v3730_v39, %v3729_v4  ;;  %v3731_v39 = vld [vmem:[#allocation4 + $0x289] sm:$0xff] }
 0x855   :  { %v13150_v14 = vpop.f32.mrf.mxu3  ;;  %v13152_v26 = vpop.f32.mrf.mxu2 }
 0x856   :  { %15805 = vst [vmem:[#allocation40_spill] sm:$0xff] %v13150_v14  ;;  %v13154_v45 = vpop.f32.mrf.mxu0  ;;  %v13156_v30 = vpop.f32.mrf.mxu1 }
 0x857   :  { %15806 = vst [vmem:[#allocation41_spill] sm:$0xff] %v13152_v26 }
 0x858   :  { %15807 = vst [vmem:[#allocation42_spill] sm:$0xff] %v13156_v30  ;;  %v4857_v30 = vld [vmem:[#allocation4 + $0x1e8] sm:$0xff] }
 0x859   :  { %9037 = vmatmul.msk.bf16.gmra.mxu0 %vm618_vm1, %v13007_v9  ;;  %9099 = vmatmul.msk.bf16.gmra.mxu1 %vm618_vm1, %v4444_v18  ;;  %v4399_v9 = vld [vmem:[#allocation4 + $0x1d2] sm:$0xff]  ;;  %v4856_v18 = vld [vmem:[#allocation4 + $0x1e0] sm:$0xff] }
 0x85a   :  { %9003 = vmatmul.msk.bf16.gmra.mxu3 %vm618_vm1, %v3769_v50  ;;  %9155 = vmatmul.msk.bf16.gmra.mxu2 %vm618_vm1, %v13158_v63  ;;  %v3732_v50 = vld [vmem:[#allocation4 + $0x291] sm:$0xff]  ;;  %v13182_v21 = vpack.c.bf16 %v4857_v30, %v4856_v18  ;;  %v4859_v18 = vld [vmem:[#allocation4 + $0x200] sm:$0xff] }
 0x85d   :  { %v13166_v35 = vpop.f32.mrf.mxu3  ;;  %v13168_v14 = vpop.f32.mrf.mxu2 }
 0x85e   :  { %15808 = vst [vmem:[#allocation43_spill] sm:$0xff] %v13166_v35  ;;  %v13170_v38 = vpop.f32.mrf.mxu0  ;;  %v13172_v2 = vpop.f32.mrf.mxu1  ;;  %v3770_v35 = vpack.c.bf16 %v3732_v50, %v3731_v39  ;;  %v3733_v50 = vld [vmem:[#allocation4 + $0x2a1] sm:$0xff] }
 0x85f   :  { %15809 = vst [vmem:[#allocation44_spill] sm:$0xff] %v13168_v14  ;;  %v4445_v14 = vpack.c.bf16 %v4399_v9, %v4398_v32  ;;  %v4400_v32 = vld [vmem:[#allocation4 + $0x1e2] sm:$0xff] }
 0x860   :  { %15810 = vst [vmem:[#allocation45_spill] sm:$0xff] %v13172_v2 }
 0x865   :  { %v13174_v4 = vpop.f32.mrf.mxu3  ;;  %v13176_v28 = vpop.f32.mrf.mxu2 }
 0x866   :  { %15811 = vst [vmem:[#allocation46_spill] sm:$0xff] %v13174_v4  ;;  %v13178_v26 = vpop.f32.mrf.mxu0  ;;  %v13180_v24 = vpop.f32.mrf.mxu1 }
 0x867   :  { %15812 = vst [vmem:[#allocation47_spill] sm:$0xff] %v13176_v28 }
 0x868   :  { %15813 = vst [vmem:[#allocation48_spill] sm:$0xff] %v13180_v24 }
 0x869   :  { %9038 = vmatmul.msk.bf16.gmra.mxu0 %vm618_vm1, %v13027_v5  ;;  %9100 = vmatmul.msk.bf16.gmra.mxu1 %vm618_vm1, %v4445_v14  ;;  %v4401_v5 = vld [vmem:[#allocation4 + $0x1ea] sm:$0xff]  ;;  %v4858_v14 = vld [vmem:[#allocation4 + $0x1f8] sm:$0xff] }
 0x86a   :  { %9004 = vmatmul.msk.bf16.gmra.mxu3 %vm618_vm1, %v3770_v35  ;;  %9156 = vmatmul.msk.bf16.gmra.mxu2 %vm618_vm1, %v13182_v21  ;;  %v3734_v35 = vld [vmem:[#allocation4 + $0x2a9] sm:$0xff]  ;;  %v13206_v40 = vpack.c.bf16 %v4859_v18, %v4858_v14  ;;  %v4861_v18 = vld [vmem:[#allocation4 + $0x218] sm:$0xff] }
 0x86d   :  { %v13190_v4 = vpop.f32.mrf.mxu3  ;;  %v13192_v28 = vpop.f32.mrf.mxu2 }
 0x86e   :  { %15814 = vst [vmem:[#allocation49_spill] sm:$0xff] %v13190_v4  ;;  %v13194_v2 = vpop.f32.mrf.mxu0  ;;  %v13196_v39 = vpop.f32.mrf.mxu1  ;;  %v3771_v4 = vpack.c.bf16 %v3734_v35, %v3733_v50 }
 0x86f   :  { %15815 = vst [vmem:[#allocation50_spill] sm:$0xff] %v13192_v28  ;;  %v4446_v28 = vpack.c.bf16 %v4401_v5, %v4400_v32  ;;  %v3735_v32 = vld [vmem:[#allocation4 + $0x2b9] sm:$0xff] }
 0x870   :  { %15816 = vst [vmem:[#allocation51_spill] sm:$0xff] %v13196_v39  ;;  %v4402_v5 = vld [vmem:[#allocation4 + $0x1fa] sm:$0xff] }
 0x875   :  { %v13198_v30 = vpop.f32.mrf.mxu3  ;;  %v13200_v9 = vpop.f32.mrf.mxu2 }
 0x876   :  { %15817 = vst [vmem:[#allocation52_spill] sm:$0xff] %v13198_v30  ;;  %v13202_v24 = vpop.f32.mrf.mxu0  ;;  %v13204_v44 = vpop.f32.mrf.mxu1 }
 0x877   :  { %15818 = vst [vmem:[#allocation53_spill] sm:$0xff] %v13200_v9 }
 0x878   :  { %15819 = vst [vmem:[#allocation54_spill] sm:$0xff] %v13204_v44 }
 0x879   :  { %9039 = vmatmul.msk.bf16.gmra.mxu0 %vm618_vm1, %v13047_v51  ;;  %9101 = vmatmul.msk.bf16.gmra.mxu1 %vm618_vm1, %v4446_v28  ;;  %v4403_v51 = vld [vmem:[#allocation4 + $0x202] sm:$0xff]  ;;  %v4860_v28 = vld [vmem:[#allocation4 + $0x210] sm:$0xff] }
 0x87a   :  { %9005 = vmatmul.msk.bf16.gmra.mxu3 %vm618_vm1, %v3771_v4  ;;  %9157 = vmatmul.msk.bf16.gmra.mxu2 %vm618_vm1, %v13206_v40  ;;  %v3736_v4 = vld [vmem:[#allocation4 + $0x2c1] sm:$0xff]  ;;  %v13230_v29 = vpack.c.bf16 %v4861_v18, %v4860_v28  ;;  %v4863_v18 = vld [vmem:[#allocation4 + $0x230] sm:$0xff] }
 0x87d   :  { %v13214_v30 = vpop.f32.mrf.mxu3  ;;  %v13216_v9 = vpop.f32.mrf.mxu2 }
 0x87e   :  { %15820 = vst [vmem:[#allocation55_spill] sm:$0xff] %v13214_v30  ;;  %v13218_v39 = vpop.f32.mrf.mxu0  ;;  %v13220_v50 = vpop.f32.mrf.mxu1  ;;  %v3772_v30 = vpack.c.bf16 %v3736_v4, %v3735_v32 }
 0x87f   :  { %15821 = vst [vmem:[#allocation56_spill] sm:$0xff] %v13216_v9  ;;  %v4447_v9 = vpack.c.bf16 %v4403_v51, %v4402_v5  ;;  %v3737_v5 = vld [vmem:[#allocation4 + $0x2d1] sm:$0xff] }
 0x880   :  { %15822 = vst [vmem:[#allocation57_spill] sm:$0xff] %v13220_v50  ;;  %v4404_v51 = vld [vmem:[#allocation4 + $0x212] sm:$0xff] }
 0x885   :  { %v13222_v35 = vpop.f32.mrf.mxu3  ;;  %v13224_v14 = vpop.f32.mrf.mxu2 }
 0x886   :  { %15823 = vst [vmem:[#allocation58_spill] sm:$0xff] %v13222_v35  ;;  %v13226_v44 = vpop.f32.mrf.mxu0  ;;  %v13228_v54 = vpop.f32.mrf.mxu1 }
 0x887   :  { %15824 = vst [vmem:[#allocation59_spill] sm:$0xff] %v13224_v14 }
 0x888   :  { %15825 = vst [vmem:[#allocation60_spill] sm:$0xff] %v13226_v44 }
 0x889   :  { %15826 = vst [vmem:[#allocation61_spill] sm:$0xff] %v13228_v54  ;;  %9040 = vmatmul.msk.bf16.gmra.mxu0 %vm618_vm1, %v13070_v52  ;;  %9102 = vmatmul.msk.bf16.gmra.mxu1 %vm618_vm1, %v4447_v9  ;;  %v4405_v52 = vld [vmem:[#allocation4 + $0x21a] sm:$0xff]  ;;  %v4862_v9 = vld [vmem:[#allocation4 + $0x228] sm:$0xff] }
 0x88a   :  { %9006 = vmatmul.msk.bf16.gmra.mxu3 %vm618_vm1, %v3772_v30  ;;  %9158 = vmatmul.msk.bf16.gmra.mxu2 %vm618_vm1, %v13230_v29  ;;  %v3738_v30 = vld [vmem:[#allocation4 + $0x2d9] sm:$0xff]  ;;  %v13254_v6 = vpack.c.bf16 %v4863_v18, %v4862_v9 }
 0x88b   :  { %v4407_v18 = vld [vmem:[#allocation4 + $0x232] sm:$0xff] }
 0x88d   :  { %v13238_v35 = vpop.f32.mrf.mxu3  ;;  %v13240_v14 = vpop.f32.mrf.mxu2 }
 0x88e   :  { %15827 = vst [vmem:[#allocation62_spill] sm:$0xff] %v13238_v35  ;;  %v13242_v50 = vpop.f32.mrf.mxu0  ;;  %v13244_v32 = vpop.f32.mrf.mxu1  ;;  %v3773_v35 = vpack.c.bf16 %v3738_v30, %v3737_v5 }
 0x88f   :  { %15828 = vst [vmem:[#allocation63_spill] sm:$0xff] %v13240_v14  ;;  %v4448_v14 = vpack.c.bf16 %v4405_v52, %v4404_v51  ;;  %v4406_v52 = vld [vmem:[#allocation4 + $0x22a] sm:$0xff] }
 0x890   :  { %15829 = vst [vmem:[#allocation64_spill] sm:$0xff] %v13242_v50 }
 0x891   :  { %15830 = vst [vmem:[#allocation65_spill] sm:$0xff] %v13244_v32  ;;  %v4865_v32 = vld [vmem:[#allocation4 + $0x248] sm:$0xff] }
 0x895   :  { %v13246_v4 = vpop.f32.mrf.mxu3  ;;  %v13248_v28 = vpop.f32.mrf.mxu2 }
 0x896   :  { %15831 = vst [vmem:[#allocation66_spill] sm:$0xff] %v13246_v4  ;;  %v13250_v54 = vpop.f32.mrf.mxu0  ;;  %v13252_v31 = vpop.f32.mrf.mxu1  ;;  %v9570_v4 = vld [vmem:[%s15503_s9 + $0x88] sm:$0xff] }
 0x897   :  { %15832 = vst [vmem:[#allocation67_spill] sm:$0xff] %v13248_v28  ;;  %5511 = vmatpush.bf16.msra.mxu3 %v9570_v4 }
 0x898   :  { %15833 = vst [vmem:[#allocation68_spill] sm:$0xff] %v13250_v54 }
 0x899   :  { %15834 = vst [vmem:[#allocation69_spill] sm:$0xff] %v13252_v31  ;;  %9041 = vmatmul.msk.bf16.gmra.mxu0 %vm618_vm1, %v13090_v58  ;;  %9103 = vmatmul.msk.bf16.gmra.mxu1 %vm618_vm1, %v4448_v14  ;;  %v3739_v58 = vld [vmem:[#allocation4 + $0x2e9] sm:$0xff]  ;;  %v3740_v14 = vld [vmem:[#allocation4 + $0x2f1] sm:$0xff]  ;;  %v4864_v31 = vld [vmem:[#allocation4 + $0x240] sm:$0xff] }
 0x89a   :  { %9007 = vmatmul.msk.bf16.gmra.mxu3 %vm618_vm1, %v3773_v35  ;;  %9159 = vmatmul.msk.bf16.gmra.mxu2 %vm618_vm1, %v13254_v6  ;;  %v3774_v4 = vpack.c.bf16 %v3740_v14, %v3739_v58  ;;  %v13281_v50 = vpack.c.bf16 %v4865_v32, %v4864_v31  ;;  %v3609_v31 = vld [vmem:[#allocation4 + $0x1b0] sm:$0xff]  ;;  %v3610_v32 = vld [vmem:[#allocation4 + $0x1b8] sm:$0xff] }
 0x89d   :  { %v13265_v28 = vpop.f32.mrf.mxu3  ;;  %v13267_v5 = vpop.f32.mrf.mxu2 }
 0x89e   :  { %15835 = vst [vmem:[#allocation70_spill] sm:$0xff] %v13265_v28  ;;  %v13269_v30 = vpop.f32.mrf.mxu0  ;;  %v13271_v35 = vpop.f32.mrf.mxu1 }
 0x89f   :  { %15836 = vst [vmem:[#allocation71_spill] sm:$0xff] %v13267_v5  ;;  %v4449_v5 = vpack.c.bf16 %v4407_v18, %v4406_v52  ;;  %v3741_v52 = vld [vmem:[#allocation4 + $0x301] sm:$0xff]  ;;  %v3742_v18 = vld [vmem:[#allocation4 + $0x309] sm:$0xff] }
 0x8a0   :  { %15837 = vst [vmem:[#allocation72_spill] sm:$0xff] %v13269_v30  ;;  %v4867_v30 = vld [vmem:[#allocation4 + $0x260] sm:$0xff] }
 0x8a1   :  { %15838 = vst [vmem:[#allocation73_spill] sm:$0xff] %v13271_v35 }
 0x8a5   :  { %v13273_v51 = vpop.f32.mrf.mxu3  ;;  %v13275_v9 = vpop.f32.mrf.mxu2 }
 0x8a6   :  { %15839 = vst [vmem:[#allocation74_spill] sm:$0xff] %v13273_v51  ;;  %v13277_v54 = vpop.f32.mrf.mxu0  ;;  %v13279_v28 = vpop.f32.mrf.mxu1 }
 0x8a7   :  { %15840 = vst [vmem:[#allocation75_spill] sm:$0xff] %v13275_v9 }
 0x8a8   :  { %15841 = vst [vmem:[#allocation76_spill] sm:$0xff] %v13277_v54  ;;  %v4866_v54 = vld [vmem:[#allocation4 + $0x258] sm:$0xff] }
 0x8a9   :  { %15842 = vst [vmem:[#allocation77_spill] sm:$0xff] %v13279_v28  ;;  %9042 = vmatmul.msk.bf16.gmra.mxu0 %vm618_vm1, %v13110_v49  ;;  %9104 = vmatmul.msk.bf16.gmra.mxu1 %vm618_vm1, %v4449_v5  ;;  %v4408_v49 = vld [vmem:[#allocation4 + $0x242] sm:$0xff]  ;;  %v3657_v5 = vpack.c.bf16 %v3610_v32, %v3609_v31  ;;  %v4409_v28 = vld [vmem:[#allocation4 + $0x24a] sm:$0xff] }
 0x8aa   :  { %9008 = vmatmul.msk.bf16.gmra.mxu3 %vm618_vm1, %v3774_v4  ;;  %9160 = vmatmul.msk.bf16.gmra.mxu2 %vm618_vm1, %v13281_v50  ;;  %v4450_v36 = vpack.c.bf16 %v4409_v28, %v4408_v49 }
 0x8ad   :  { %v13289_v51 = vpop.f32.mrf.mxu3  ;;  %v13291_v9 = vpop.f32.mrf.mxu2 }
 0x8ae   :  { %15843 = vst [vmem:[#allocation78_spill] sm:$0xff] %v13289_v51  ;;  %v13293_v35 = vpop.f32.mrf.mxu0  ;;  %v13295_v58 = vpop.f32.mrf.mxu1 }
 0x8af   :  { %15844 = vst [vmem:[#allocation79_spill] sm:$0xff] %v13291_v9 }
 0x8b0   :  { %15845 = vst [vmem:[#allocation80_spill] sm:$0xff] %v13293_v35  ;;  %v3775_v35 = vpack.c.bf16 %v3742_v18, %v3741_v52  ;;  %v3744_v52 = vld [vmem:[#allocation4 + $0x321] sm:$0xff] }
 0x8b1   :  { %15846 = vst [vmem:[#allocation81_spill] sm:$0xff] %v13295_v58  ;;  %v13305_v58 = vpack.c.bf16 %v4867_v30, %v4866_v54  ;;  %v4410_v18 = vld [vmem:[#allocation4 + $0x25a] sm:$0xff] }
 0x8b5   :  { %v13297_v14 = vpop.f32.mrf.mxu3  ;;  %v13299_v4 = vpop.f32.mrf.mxu2 }
 0x8b6   :  { %15847 = vst [vmem:[#allocation82_spill] sm:$0xff] %v13297_v14  ;;  %v13301_v51 = vpop.f32.mrf.mxu0  ;;  %v13303_v9 = vpop.f32.mrf.mxu1  ;;  %v9569_v14 = vld [vmem:[%s15503_s9 + $0x80] sm:$0xff] }
 0x8b7   :  { %15848 = vst [vmem:[#allocation83_spill] sm:$0xff] %v13299_v4  ;;  %5512 = vmatpush.bf16.msra.mxu3 %v9569_v14 }
 0x8b8   :  { %15849 = vst [vmem:[#allocation84_spill] sm:$0xff] %v13301_v51 }
 0x8b9   :  { %15850 = vst [vmem:[#allocation85_spill] sm:$0xff] %v13303_v9  ;;  %9043 = vmatmul.msk.bf16.gmra.mxu0 %vm618_vm1, %v3657_v5  ;;  %9105 = vmatmul.msk.bf16.gmra.mxu1 %vm618_vm1, %v4450_v36  ;;  %v4411_v36 = vld [vmem:[#allocation4 + $0x262] sm:$0xff]  ;;  %v4868_v5 = vld [vmem:[#allocation4 + $0x270] sm:$0xff]  ;;  %v4869_v9 = vld [vmem:[#allocation4 + $0x278] sm:$0xff] }
 0x8ba   :  { %9009 = vmatmul.msk.bf16.gmra.mxu3 %vm618_vm1, %v3775_v35  ;;  %9161 = vmatmul.msk.bf16.gmra.mxu2 %vm618_vm1, %v13305_v58  ;;  %v3743_v35 = vld [vmem:[#allocation4 + $0x319] sm:$0xff]  ;;  %v13331_v51 = vpack.c.bf16 %v4869_v9, %v4868_v5 }
 0x8bd   :  { %v13315_v31 = vpop.f32.mrf.mxu3  ;;  %v13317_v32 = vpop.f32.mrf.mxu2 }
 0x8be   :  { %15851 = vst [vmem:[#allocation86_spill] sm:$0xff] %v13315_v31  ;;  %v13319_v54 = vpop.f32.mrf.mxu0  ;;  %v13321_v28 = vpop.f32.mrf.mxu1  ;;  %v3776_v31 = vpack.c.bf16 %v3744_v52, %v3743_v35  ;;  %v4412_v52 = vld [vmem:[#allocation4 + $0x272] sm:$0xff] }
 0x8bf   :  { %15852 = vst [vmem:[#allocation87_spill] sm:$0xff] %v13317_v32  ;;  %v4451_v32 = vpack.c.bf16 %v4411_v36, %v4410_v18  ;;  %v4870_v36 = vld [vmem:[#allocation4 + $0x288] sm:$0xff] }
 0x8c0   :  { %15853 = vst [vmem:[#allocation88_spill] sm:$0xff] %v13319_v54 }
 0x8c1   :  { %15854 = vst [vmem:[#allocation89_spill] sm:$0xff] %v13321_v28 }
 0x8c5   :  { %v13323_v30 = vpop.f32.mrf.mxu3  ;;  %v13325_v49 = vpop.f32.mrf.mxu2 }
 0x8c6   :  { %15855 = vst [vmem:[#allocation90_spill] sm:$0xff] %v13323_v30  ;;  %v13327_v4 = vpop.f32.mrf.mxu0  ;;  %v13329_v14 = vpop.f32.mrf.mxu1 }
 0x8c7   :  { %15856 = vst [vmem:[#allocation91_spill] sm:$0xff] %v13325_v49 }
 0x8c8   :  { %15857 = vst [vmem:[#allocation92_spill] sm:$0xff] %v13327_v4 }
 0x8c9   :  { %15858 = vst [vmem:[#allocation93_spill] sm:$0xff] %v13329_v14  ;;  %9044 = vmatmul.msk.bf16.gmra.mxu0 %vm618_vm1, %v13158_v63  ;;  %9106 = vmatmul.msk.bf16.gmra.mxu1 %vm618_vm1, %v4451_v32  ;;  %v4413_v63 = vld [vmem:[#allocation4 + $0x27a] sm:$0xff]  ;;  %v4871_v32 = vld [vmem:[#allocation4 + $0x290] sm:$0xff] }
 0x8ca   :  { %9010 = vmatmul.msk.bf16.gmra.mxu3 %vm618_vm1, %v3776_v31  ;;  %9162 = vmatmul.msk.bf16.gmra.mxu2 %vm618_vm1, %v13331_v51  ;;  %v5281_v31 = vld [vmem:[#allocation4 + $0x21] sm:$0xff]  ;;  %v5280_v14 = vld [vmem:[#allocation4 + $0x19] sm:$0xff]  ;;  %v13355_v54 = vpack.c.bf16 %v4871_v32, %v4870_v36 }
 0x8cb   :  { %v4872_v36 = vld [vmem:[#allocation4 + $0x2a0] sm:$0xff] }
 0x8cd   :  { %v13339_v30 = vpop.f32.mrf.mxu3  ;;  %v13341_v49 = vpop.f32.mrf.mxu2 }
 0x8ce   :  { %15859 = vst [vmem:[#allocation94_spill] sm:$0xff] %v13339_v30  ;;  %v13343_v28 = vpop.f32.mrf.mxu0  ;;  %v13345_v35 = vpop.f32.mrf.mxu1  ;;  %v5344_v30 = vpack.c.bf16 %v5281_v31, %v5280_v14  ;;  %v4414_v31 = vld [vmem:[#allocation4 + $0x28a] sm:$0xff] }
 0x8cf   :  { %15860 = vst [vmem:[#allocation95_spill] sm:$0xff] %v13341_v49  ;;  %v4452_v49 = vpack.c.bf16 %v4413_v63, %v4412_v52  ;;  %v5283_v63 = vld [vmem:[#allocation4 + $0x39] sm:$0xff] }
 0x8d0   :  { %15861 = vst [vmem:[#allocation96_spill] sm:$0xff] %v13343_v28 }
 0x8d1   :  { %15862 = vst [vmem:[#allocation97_spill] sm:$0xff] %v13345_v35 }
 0x8d5   :  { %v13347_v9 = vpop.f32.mrf.mxu3  ;;  %v13349_v18 = vpop.f32.mrf.mxu2 }
 0x8d6   :  { %15863 = vst [vmem:[#allocation98_spill] sm:$0xff] %v13347_v9  ;;  %v13351_v5 = vpop.f32.mrf.mxu0  ;;  %v13353_v4 = vpop.f32.mrf.mxu1 }
 0x8d7   :  { %15864 = vst [vmem:[#allocation99_spill] sm:$0xff] %v13349_v18 }
 0x8d8   :  { %15865 = vst [vmem:[#allocation100_spill] sm:$0xff] %v13351_v5 }
 0x8d9   :  { %15866 = vst [vmem:[#allocation101_spill] sm:$0xff] %v13353_v4  ;;  %9045 = vmatmul.msk.bf16.gmra.mxu0 %vm618_vm1, %v13182_v21  ;;  %9107 = vmatmul.msk.bf16.gmra.mxu1 %vm618_vm1, %v4452_v49  ;;  %v4873_v49 = vld [vmem:[#allocation4 + $0x2a8] sm:$0xff]  ;;  %v5282_v4 = vld [vmem:[#allocation4 + $0x31] sm:$0xff] }
 0x8da   :  { %9195 = vmatmul.msk.bf16.vlgmr.msra.gmra.mxu3 %vm618_vm1, %v5344_v30  ;;  %9163 = vmatmul.msk.bf16.gmra.mxu2 %vm618_vm1, %v13355_v54  ;;  %v4415_v30 = vld [vmem:[#allocation4 + $0x292] sm:$0xff] }
 0x8dd   :  { %v13363_v9 = vpop.f32.mrf.mxu3  ;;  %v13365_v18 = vpop.f32.mrf.mxu2 }
 0x8de   :  { %15867 = vst [vmem:[#allocation102_spill] sm:$0xff] %v13363_v9  ;;  %v13367_v35 = vpop.f32.mrf.mxu0  ;;  %v13369_v14 = vpop.f32.mrf.mxu1  ;;  %v13379_v9 = vpack.c.bf16 %v5283_v63, %v5282_v4 }
 0x8df   :  { %15868 = vst [vmem:[#allocation103_spill] sm:$0xff] %v13365_v18  ;;  %v4453_v18 = vpack.c.bf16 %v4415_v30, %v4414_v31  ;;  %v4416_v30 = vld [vmem:[#allocation4 + $0x2a2] sm:$0xff] }
 0x8e0   :  { %15869 = vst [vmem:[#allocation104_spill] sm:$0xff] %v13367_v35  ;;  %v13381_v35 = vpack.c.bf16 %v4873_v49, %v4872_v36  ;;  %v4417_v49 = vld [vmem:[#allocation4 + $0x2aa] sm:$0xff] }
 0x8e1   :  { %15870 = vst [vmem:[#allocation105_spill] sm:$0xff] %v13369_v14 }
 0x8e5   :  { %v13371_v52 = vpop.f32.mrf.mxu3  ;;  %v13373_v21 = vpop.f32.mrf.mxu2 }
 0x8e6   :  { %15871 = vst [vmem:[#allocation106_spill] sm:$0xff] %v13371_v52  ;;  %v13375_v32 = vpop.f32.mrf.mxu0  ;;  %v13377_v5 = vpop.f32.mrf.mxu1 }
 0x8e7   :  { %15872 = vst [vmem:[#allocation107_spill] sm:$0xff] %v13373_v21 }
 0x8e8   :  { %15873 = vst [vmem:[#allocation108_spill] sm:$0xff] %v13375_v32  ;;  %v5284_v32 = vld [vmem:[#allocation4 + $0x49] sm:$0xff] }
 0x8e9   :  { %15874 = vst [vmem:[#allocation109_spill] sm:$0xff] %v13377_v5  ;;  %9046 = vmatmul.msk.bf16.gmra.mxu0 %vm618_vm1, %v13206_v40  ;;  %9108 = vmatmul.msk.bf16.gmra.mxu1 %vm618_vm1, %v4453_v18  ;;  %v5285_v40 = vld [vmem:[#allocation4 + $0x51] sm:$0xff]  ;;  %v4875_v18 = vld [vmem:[#allocation4 + $0x2c0] sm:$0xff] }
 0x8ea   :  { %9196 = vmatmul.msk.bf16.gmra.mxu3 %vm618_vm1, %v13379_v9  ;;  %9164 = vmatmul.msk.bf16.gmra.mxu2 %vm618_vm1, %v13381_v35  ;;  %v4874_v5 = vld [vmem:[#allocation4 + $0x2b8] sm:$0xff] }
 0x8ed   :  { %v13390_v52 = vpop.f32.mrf.mxu3  ;;  %v13392_v21 = vpop.f32.mrf.mxu2 }
 0x8ee   :  { %15875 = vst [vmem:[#allocation110_spill] sm:$0xff] %v13390_v52  ;;  %v13394_v4 = vpop.f32.mrf.mxu0  ;;  %v13396_v31 = vpop.f32.mrf.mxu1  ;;  %v13406_v52 = vpack.c.bf16 %v5285_v40, %v5284_v32  ;;  %v4418_v40 = vld [vmem:[#allocation4 + $0x2ba] sm:$0xff] }
 0x8ef   :  { %15876 = vst [vmem:[#allocation111_spill] sm:$0xff] %v13392_v21  ;;  %v4454_v21 = vpack.c.bf16 %v4417_v49, %v4416_v30 }
 0x8f0   :  { %15877 = vst [vmem:[#allocation112_spill] sm:$0xff] %v13394_v4  ;;  %v13408_v4 = vpack.c.bf16 %v4875_v18, %v4874_v5  ;;  %v4419_v18 = vld [vmem:[#allocation4 + $0x2c2] sm:$0xff] }
 0x8f1   :  { %15878 = vst [vmem:[#allocation113_spill] sm:$0xff] %v13396_v31 }
 0x8f5   :  { %v13398_v63 = vpop.f32.mrf.mxu3  ;;  %v13400_v36 = vpop.f32.mrf.mxu2 }
 0x8f6   :  { %15879 = vst [vmem:[#allocation114_spill] sm:$0xff] %v13398_v63  ;;  %v13402_v14 = vpop.f32.mrf.mxu0  ;;  %v13404_v28 = vpop.f32.mrf.mxu1 }
 0x8f7   :  { %15880 = vst [vmem:[#allocation115_spill] sm:$0xff] %v13400_v36 }
 0x8f8   :  { %15881 = vst [vmem:[#allocation116_spill] sm:$0xff] %v13402_v14  ;;  %v5286_v14 = vld [vmem:[#allocation4 + $0x61] sm:$0xff] }
 0x8f9   :  { %15882 = vst [vmem:[#allocation117_spill] sm:$0xff] %v13404_v28  ;;  %9047 = vmatmul.msk.bf16.gmra.mxu0 %vm618_vm1, %v13230_v29  ;;  %9109 = vmatmul.msk.bf16.gmra.mxu1 %vm618_vm1, %v4454_v21  ;;  %v5287_v29 = vld [vmem:[#allocation4 + $0x69] sm:$0xff]  ;;  %v4877_v21 = vld [vmem:[#allocation4 + $0x2d8] sm:$0xff] }
 0x8fa   :  { %9197 = vmatmul.msk.bf16.gmra.mxu3 %vm618_vm1, %v13406_v52  ;;  %9165 = vmatmul.msk.bf16.gmra.mxu2 %vm618_vm1, %v13408_v4  ;;  %v4876_v28 = vld [vmem:[#allocation4 + $0x2d0] sm:$0xff] }
 0x8fd   :  { %v13417_v63 = vpop.f32.mrf.mxu3  ;;  %v13419_v36 = vpop.f32.mrf.mxu2 }
 0x8fe   :  { %15883 = vst [vmem:[#allocation118_spill] sm:$0xff] %v13417_v63  ;;  %v13421_v32 = vpop.f32.mrf.mxu0  ;;  %v13423_v30 = vpop.f32.mrf.mxu1  ;;  %v13433_v63 = vpack.c.bf16 %v5287_v29, %v5286_v14  ;;  %v4420_v29 = vld [vmem:[#allocation4 + $0x2d2] sm:$0xff] }
 0x8ff   :  { %15884 = vst [vmem:[#allocation119_spill] sm:$0xff] %v13419_v36  ;;  %v4455_v36 = vpack.c.bf16 %v4419_v18, %v4418_v40 }
 0x900   :  { %15885 = vst [vmem:[#allocation120_spill] sm:$0xff] %v13421_v32  ;;  %v13435_v32 = vpack.c.bf16 %v4877_v21, %v4876_v28  ;;  %v4421_v21 = vld [vmem:[#allocation4 + $0x2da] sm:$0xff] }
 0x901   :  { %15886 = vst [vmem:[#allocation121_spill] sm:$0xff] %v13423_v30 }
 0x905   :  { %v13425_v5 = vpop.f32.mrf.mxu3  ;;  %v13427_v49 = vpop.f32.mrf.mxu2 }
 0x906   :  { %15887 = vst [vmem:[#allocation122_spill] sm:$0xff] %v13425_v5  ;;  %v13429_v31 = vpop.f32.mrf.mxu0  ;;  %v13431_v3 = vpop.f32.mrf.mxu1 }
 0x907   :  { %15888 = vst [vmem:[#allocation123_spill] sm:$0xff] %v13427_v49 }
 0x908   :  { %15889 = vst [vmem:[#allocation124_spill] sm:$0xff] %v13429_v31  ;;  %v5288_v31 = vld [vmem:[#allocation4 + $0x79] sm:$0xff] }
 0x909   :  { %15890 = vst [vmem:[#allocation125_spill] sm:$0xff] %v13431_v3  ;;  %9048 = vmatmul.msk.bf16.gmra.mxu0 %vm618_vm1, %v13254_v6  ;;  %9110 = vmatmul.msk.bf16.gmra.mxu1 %vm618_vm1, %v4455_v36  ;;  %v5289_v6 = vld [vmem:[#allocation4 + $0x81] sm:$0xff]  ;;  %v4879_v36 = vld [vmem:[#allocation4 + $0x2f0] sm:$0xff] }
 0x90a   :  { %9198 = vmatmul.msk.bf16.gmra.mxu3 %vm618_vm1, %v13433_v63  ;;  %9166 = vmatmul.msk.bf16.gmra.mxu2 %vm618_vm1, %v13435_v32  ;;  %v4878_v3 = vld [vmem:[#allocation4 + $0x2e8] sm:$0xff] }
 0x90d   :  { %v13444_v5 = vpop.f32.mrf.mxu3  ;;  %v13446_v49 = vpop.f32.mrf.mxu2 }
 0x90e   :  { %15891 = vst [vmem:[#allocation126_spill] sm:$0xff] %v13444_v5  ;;  %v13448_v14 = vpop.f32.mrf.mxu0  ;;  %v13450_v40 = vpop.f32.mrf.mxu1  ;;  %v13460_v5 = vpack.c.bf16 %v5289_v6, %v5288_v31  ;;  %v4422_v6 = vld [vmem:[#allocation4 + $0x2ea] sm:$0xff] }
 0x90f   :  { %15892 = vst [vmem:[#allocation127_spill] sm:$0xff] %v13446_v49  ;;  %v4456_v49 = vpack.c.bf16 %v4421_v21, %v4420_v29 }
 0x910   :  { %15893 = vst [vmem:[#allocation128_spill] sm:$0xff] %v13448_v14  ;;  %v13462_v14 = vpack.c.bf16 %v4879_v36, %v4878_v3  ;;  %v4423_v36 = vld [vmem:[#allocation4 + $0x2f2] sm:$0xff] }
 0x911   :  { %15894 = vst [vmem:[#allocation129_spill] sm:$0xff] %v13450_v40 }
 0x915   :  { %v13452_v28 = vpop.f32.mrf.mxu3  ;;  %v13454_v18 = vpop.f32.mrf.mxu2 }
 0x916   :  { %15895 = vst [vmem:[#allocation130_spill] sm:$0xff] %v13452_v28  ;;  %v13456_v30 = vpop.f32.mrf.mxu0  ;;  %v13458_v44 = vpop.f32.mrf.mxu1 }
 0x917   :  { %15896 = vst [vmem:[#allocation131_spill] sm:$0xff] %v13454_v18 }
 0x918   :  { %15897 = vst [vmem:[#allocation132_spill] sm:$0xff] %v13456_v30  ;;  %v5290_v30 = vld [vmem:[#allocation4 + $0x91] sm:$0xff] }
 0x919   :  { %15898 = vst [vmem:[#allocation133_spill] sm:$0xff] %v13458_v44  ;;  %9049 = vmatmul.msk.bf16.gmra.mxu0 %vm618_vm1, %v13281_v50  ;;  %9111 = vmatmul.msk.bf16.gmra.mxu1 %vm618_vm1, %v4456_v49  ;;  %v5291_v50 = vld [vmem:[#allocation4 + $0x99] sm:$0xff]  ;;  %v4881_v49 = vld [vmem:[#allocation4 + $0x308] sm:$0xff] }
 0x91a   :  { %9199 = vmatmul.msk.bf16.gmra.mxu3 %vm618_vm1, %v13460_v5  ;;  %9167 = vmatmul.msk.bf16.gmra.mxu2 %vm618_vm1, %v13462_v14  ;;  %v4880_v44 = vld [vmem:[#allocation4 + $0x300] sm:$0xff] }
 0x91d   :  { %v13471_v28 = vpop.f32.mrf.mxu3  ;;  %v13473_v18 = vpop.f32.mrf.mxu2 }
 0x91e   :  { %15899 = vst [vmem:[#allocation134_spill] sm:$0xff] %v13471_v28  ;;  %v13475_v31 = vpop.f32.mrf.mxu0  ;;  %v13477_v29 = vpop.f32.mrf.mxu1  ;;  %v13487_v28 = vpack.c.bf16 %v5291_v50, %v5290_v30  ;;  %v9588_v30 = vld [vmem:[%s15503_s9 + $0x118] sm:$0xff] }
 0x91f   :  { %15900 = vst [vmem:[#allocation135_spill] sm:$0xff] %v13473_v18  ;;  %v4457_v18 = vpack.c.bf16 %v4423_v36, %v4422_v6  ;;  %7342 = vmatpush.bf16.msrb.mxu3 %v9588_v30 }
 0x920   :  { %15901 = vst [vmem:[#allocation136_spill] sm:$0xff] %v13475_v31  ;;  %v13489_v31 = vpack.c.bf16 %v4881_v49, %v4880_v44  ;;  %v9576_v44 = vld [vmem:[%s15503_s9 + $0xb8] sm:$0xff]  ;;  %v9583_v49 = vld [vmem:[%s15503_s9 + $0xf0] sm:$0xff] }
 0x921   :  { %15902 = vst [vmem:[#allocation137_spill] sm:$0xff] %v13477_v29  ;;  %5967 = vmatpush.bf16.msrb.mxu0 %v9576_v44  ;;  %v9578_v44 = vld [vmem:[%s15503_s9 + $0xc8] sm:$0xff]  ;;  %v4883_v29 = vld [vmem:[#allocation4 + $0x320] sm:$0xff] }
 0x925   :  { %v13479_v3 = vpop.f32.mrf.mxu3  ;;  %v13481_v21 = vpop.f32.mrf.mxu2 }
 0x926   :  { %15903 = vst [vmem:[#allocation138_spill] sm:$0xff] %v13479_v3  ;;  %v13483_v40 = vpop.f32.mrf.mxu0  ;;  %v13485_v15 = vpop.f32.mrf.mxu1  ;;  %v9584_v3 = vld [vmem:[%s15503_s9 + $0xf8] sm:$0xff] }
 0x927   :  { %15904 = vst [vmem:[#allocation139_spill] sm:$0xff] %v13481_v21  ;;  %6884 = vmatpush.bf16.msrb.mxu2 %v9584_v3  ;;  %v9579_v3 = vld [vmem:[%s15503_s9 + $0xd0] sm:$0xff]  ;;  %v4882_v21 = vld [vmem:[#allocation4 + $0x318] sm:$0xff] }
 0x928   :  { %15905 = vst [vmem:[#allocation140_spill] sm:$0xff] %v13483_v40  ;;  %v13540_v46 = vpack.c.bf16 %v4883_v29, %v4882_v21 }
 0x929   :  { %15906 = vst [vmem:[#allocation141_spill] sm:$0xff] %v13485_v15  ;;  %9050 = vmatmul.msk.bf16.gmra.mxu0 %vm618_vm1, %v13305_v58  ;;  %9112 = vmatmul.msk.bf16.gmra.mxu1 %vm618_vm1, %v4457_v18  ;;  %v9580_v58 = vld [vmem:[%s15503_s9 + $0xd8] sm:$0xff]  ;;  %v4425_v15 = vld [vmem:[#allocation4 + $0x30a] sm:$0xff] }
 0x92a   :  { %9200 = vmatmul.msk.bf16.gmra.mxu3 %vm618_vm1, %v13487_v28  ;;  %9168 = vmatmul.msk.bf16.gmra.mxu2 %vm618_vm1, %v13489_v31 }
 0x92b   :  { %6426 = vmatpush.bf16.msra.mxu1 %v9580_v58  ;;  %6885 = vmatpush.bf16.msrb.mxu2 %v9583_v49  ;;  %v9582_v58 = vld [vmem:[%s15503_s9 + $0xe8] sm:$0xff] }
 0x92d   :  { %v13510_v6 = vpop.f32.mrf.mxu3  ;;  %v13512_v18 = vpop.f32.mrf.mxu2 }
 0x92e   :  { %15907 = vst [vmem:[#allocation142_spill] sm:$0xff] %v13510_v6  ;;  %v13514_v50 = vpop.f32.mrf.mxu0  ;;  %v13516_v36 = vpop.f32.mrf.mxu1  ;;  %v4424_v6 = vld [vmem:[#allocation4 + $0x302] sm:$0xff] }
 0x92f   :  { %15908 = vst [vmem:[#allocation143_spill] sm:$0xff] %v13512_v18  ;;  %6427 = vmatpush.bf16.msra.mxu1 %v9579_v3  ;;  %v5292_v3 = vld [vmem:[#allocation4 + $0xa9] sm:$0xff]  ;;  %6886 = vmatpush.bf16.msrb.mxu2 %v9582_v58  ;;  %v4458_v61 = vpack.c.bf16 %v4425_v15, %v4424_v6 }
 0x930   :  { %15909 = vst [vmem:[#allocation144_spill] sm:$0xff] %v13514_v50  ;;  %v4884_v6 = vld [vmem:[#allocation4 + $0x330] sm:$0xff] }
 0x931   :  { %15910 = vst [vmem:[#allocation145_spill] sm:$0xff] %v13516_v36  ;;  %v5293_v36 = vld [vmem:[#allocation4 + $0xb1] sm:$0xff] }
 0x932   :  { %v13538_v40 = vpack.c.bf16 %v5293_v36, %v5292_v3  ;;  %v9581_v36 = vld [vmem:[%s15503_s9 + $0xe0] sm:$0xff]  ;;  %v5295_v3 = vld [vmem:[#allocation4 + $0xc9] sm:$0xff] }
 0x933   :  { %6428 = vmatpush.bf16.msra.mxu1 %v9578_v44  ;;  %6887 = vmatpush.bf16.msrb.mxu2 %v9581_v36  ;;  %v4885_v44 = vld [vmem:[#allocation4 + $0x338] sm:$0xff]  ;;  %v5294_v36 = vld [vmem:[#allocation4 + $0xc1] sm:$0xff] }
 0x935   :  { %v13530_v30 = vpop.f32.mrf.mxu3  ;;  %v13532_v18 = vpop.f32.mrf.mxu2 }
 0x936   :  { %15911 = vst [vmem:[#allocation146_spill] sm:$0xff] %v13530_v30  ;;  %v13534_v50 = vpop.f32.mrf.mxu0  ;;  %v13536_v49 = vpop.f32.mrf.mxu1  ;;  %v9577_v30 = vld [vmem:[%s15503_s9 + $0xc0] sm:$0xff] }
 0x937   :  { %15912 = vst [vmem:[#allocation147_spill] sm:$0xff] %v13532_v18  ;;  %6429 = vmatpush.bf16.msra.mxu1 %v9577_v30  ;;  %v4427_v18 = vld [vmem:[#allocation4 + $0x322] sm:$0xff]  ;;  %v4917_v30 = vpack.c.bf16 %v4885_v44, %v4884_v6 }
 0x938   :  { %15913 = vst [vmem:[#allocation148_spill] sm:$0xff] %v13534_v50 }
 0x939   :  { %15914 = vst [vmem:[#allocation149_spill] sm:$0xff] %v13536_v49  ;;  %9051 = vmatmul.msk.bf16.gmra.mxu0 %vm618_vm1, %v13331_v51  ;;  %9113 = vmatmul.msk.bf16.gmra.mxu1 %vm618_vm1, %v4458_v61  ;;  %v4426_v61 = vld [vmem:[#allocation4 + $0x31a] sm:$0xff] }
 0x93a   :  { %9201 = vmatmul.msk.bf16.gmra.mxu3 %vm618_vm1, %v13538_v40  ;;  %9169 = vmatmul.msk.bf16.gmra.mxu2 %vm618_vm1, %v13540_v46 }
 0x93d   :  { %v13555_v15 = vpop.f32.mrf.mxu3  ;;  %v13557_v51 = vpop.f32.mrf.mxu2 }
 0x93e   :  { %15915 = vst [vmem:[#allocation150_spill] sm:$0xff] %v13555_v15  ;;  %v13559_v29 = vpop.f32.mrf.mxu0  ;;  %v13561_v21 = vpop.f32.mrf.mxu1 }
 0x93f   :  { %15916 = vst [vmem:[#allocation151_spill] sm:$0xff] %v13557_v51  ;;  %v13571_v51 = vpack.c.bf16 %v5295_v3, %v5294_v36  ;;  %v6198_v36 = vld [vmem:[#allocation4 + $0x38] sm:$0xff] }
 0x940   :  { %15917 = vst [vmem:[#allocation152_spill] sm:$0xff] %v13559_v29  ;;  %v4459_v29 = vpack.c.bf16 %v4427_v18, %v4426_v61  ;;  %v4205_v18 = vadd.f32 %v13106_v19, %v12855_v42  ;;  %v4207_v42 = vadd.f32 %v13122_v59, %v12865_v62  ;;  %v5299_v62 = vld [vmem:[#allocation4 + $0xf9] sm:$0xff] }
 0x941   :  { %15918 = vst [vmem:[#allocation153_spill] sm:$0xff] %v13561_v21  ;;  %v6197_v21 = vld [vmem:[#allocation4 + $0x30] sm:$0xff] }
 0x945   :  { %v13563_v58 = vpop.f32.mrf.mxu3  ;;  %v13565_v49 = vpop.f32.mrf.mxu2 }
 0x946   :  { %15919 = vst [vmem:[#allocation154_spill] sm:$0xff] %v13563_v58  ;;  %v13567_v50 = vpop.f32.mrf.mxu0  ;;  %v13569_v15 = vpop.f32.mrf.mxu1 }
 0x947   :  { %15920 = vst [vmem:[#allocation155_spill] sm:$0xff] %v13565_v49 }
 0x948   :  { %15921 = vst [vmem:[#allocation156_spill] sm:$0xff] %v13569_v15 }
 0x949   :  { %9052 = vmatmul.msk.bf16.gmra.mxu0 %vm618_vm1, %v13355_v54  ;;  %9114 = vmatmul.msk.bf16.gmra.mxu1 %vm618_vm1, %v4459_v29  ;;  %v5297_v54 = vld [vmem:[#allocation4 + $0xe1] sm:$0xff] }
 0x94a   :  { %9202 = vmatmul.msk.bf16.gmra.mxu3 %vm618_vm1, %v13571_v51  ;;  %9170 = vmatmul.msk.bf16.gmra.mxu2 %vm618_vm1, %v4917_v30  ;;  %v5296_v30 = vld [vmem:[#allocation4 + $0xd9] sm:$0xff] }
 0x94d   :  { %v13579_v58 = vpop.f32.mrf.mxu3  ;;  %v13581_v49 = vpop.f32.mrf.mxu2 }
 0x94e   :  { %15922 = vst [vmem:[#allocation157_spill] sm:$0xff] %v13579_v58  ;;  %v13583_v6 = vpop.f32.mrf.mxu0  ;;  %v13585_v44 = vpop.f32.mrf.mxu1  ;;  %v4758_v58 = vadd.f32 %v12985_v47, %v4205_v18 }
 0x94f   :  { %15923 = vst [vmem:[#allocation158_spill] sm:$0xff] %v13581_v49  ;;  %v13598_v49 = vpack.c.bf16 %v5297_v54, %v5296_v30 }
 0x950   :  { %15924 = vst [vmem:[#allocation159_spill] sm:$0xff] %v13585_v44  ;;  %v6261_v44 = vpack.c.bf16 %v6198_v36, %v6197_v21  ;;  %v5216_v47 = vadd.f32 %v12995_v41, %v4758_v58  ;;  %v6200_v58 = vld [vmem:[#allocation4 + $0x50] sm:$0xff] }
 0x955   :  { %v13589_v3 = vpop.f32.mrf.mxu3  ;;  %v13591_v61 = vpop.f32.mrf.mxu2 }
 0x956   :  { %15925 = vst [vmem:[#allocation160_spill] sm:$0xff] %v13589_v3  ;;  %v13593_v29 = vpop.f32.mrf.mxu0  ;;  %v13596_v15 = vpop.f32.mrf.mxu1 }
 0x959   :  { %9053 = vmatmul.msk.bf16.gmra.mxu0 %vm618_vm1, %v13381_v35  ;;  %9307 = vmatmul.msk.bf16.vlgmr.msra.gmra.mxu1 %vm618_vm1, %v6261_v44  ;;  %v4759_v35 = vadd.f32 %v12999_v8, %v4207_v42  ;;  %v4210_v44 = vadd.f32 %v13130_v43, %v12870_v11 }
 0x95a   :  { %9203 = vmatmul.msk.bf16.gmra.mxu3 %vm618_vm1, %v13598_v49  ;;  %9363 = vmatmul.msk.bf16.vlgmr.msrb.gmra.mxu2 %vm618_vm1, %v13379_v9 }
 0x95b   :  { %v5217_v9 = vadd.f32 %v13001_v22, %v4759_v35  ;;  %v4760_v3 = vadd.f32 %v13005_v48, %v4210_v44  ;;  %v4212_v22 = vadd.f32 %v13143_v53, %v12880_v16  ;;  %v5301_v16 = vld [vmem:[#allocation4 + $0x111] sm:$0xff] }
 0x95d   :  { %v5514_v19 = vpop.f32.mrf.mxu3  ;;  %v13610_v18 = vpop.f32.mrf.mxu2  ;;  %v5218_v43 = vadd.f32 %v13015_v20, %v4760_v3  ;;  %v6202_v3 = vld [vmem:[#allocation4 + $0x68] sm:$0xff] }
 0x95e   :  { %15926 = vst [vmem:[#allocation161_spill] sm:$0xff] %v13610_v18  ;;  %v13612_v21 = vadd.f32 %v5514_v19, %v5216_v47  ;;  %v13614_v54 = vpop.f32.mrf.mxu0  ;;  %v13617_v36 = vpop.f32.mrf.mxu1  ;;  %v5298_v19 = vld [vmem:[#allocation4 + $0xf1] sm:$0xff] }
 0x95f   :  { %15927 = vst [vmem:[#allocation162_spill] sm:$0xff] %v13617_v36  ;;  %v13631_v42 = vpack.c.bf16 %v5299_v62, %v5298_v19  ;;  %v6199_v36 = vld [vmem:[#allocation4 + $0x48] sm:$0xff] }
 0x960   :  { %v6262_v11 = vpack.c.bf16 %v6200_v58, %v6199_v36  ;;  %v5300_v19 = vld [vmem:[#allocation4 + $0x109] sm:$0xff] }
 0x965   :  { %v5516_v30 = vpop.f32.mrf.mxu3  ;;  %v13622_v59 = vpop.f32.mrf.mxu2 }
 0x966   :  { %15928 = vst [vmem:[#allocation163_spill] sm:$0xff] %v13622_v59  ;;  %v13624_v41 = vadd.f32 %v5516_v30, %v5217_v9  ;;  %v13626_v47 = vpop.f32.mrf.mxu0  ;;  %v13629_v8 = vpop.f32.mrf.mxu1  ;;  %v4215_v30 = vadd.f32 %v13154_v45, %v12884_v56 }
 0x967   :  { %15929 = vst [vmem:[#allocation164_spill] sm:$0xff] %v13629_v8  ;;  %v5746_v8 = vld [vmem:[#allocation4 + $0x7a] sm:$0xff] }
 0x969   :  { %9054 = vmatmul.msk.bf16.gmra.mxu0 %vm618_vm1, %v13408_v4  ;;  %9308 = vmatmul.msk.bf16.gmra.mxu1 %vm618_vm1, %v6262_v11  ;;  %v4761_v4 = vadd.f32 %v13019_v34, %v4212_v22  ;;  %v4762_v11 = vadd.f32 %v13025_v10, %v4215_v30  ;;  %v13664_v22 = vpack.c.bf16 %v5301_v16, %v5300_v19 }
 0x96a   :  { %9204 = vmatmul.msk.bf16.gmra.mxu3 %vm618_vm1, %v13631_v42  ;;  %9364 = vmatmul.msk.bf16.gmra.mxu2 %vm618_vm1, %v13406_v52 }
 0x96b   :  { %v5219_v52 = vadd.f32 %v13021_v55, %v4761_v4  ;;  %v4217_v55 = vadd.f32 %v13170_v38, %v12894_v17  ;;  %v5220_v10 = vadd.f32 %v13035_v0, %v4762_v11  ;;  %v5303_v17 = vld [vmem:[#allocation4 + $0x129] sm:$0xff]  ;;  %v5302_v11 = vld [vmem:[#allocation4 + $0x121] sm:$0xff] }
 0x96d   :  { %v5519_v48 = vpop.f32.mrf.mxu3  ;;  %v13643_v35 = vpop.f32.mrf.mxu2 }
 0x96e   :  { %15930 = vst [vmem:[#allocation165_spill] sm:$0xff] %v13643_v35  ;;  %v13645_v36 = vadd.f32 %v5519_v48, %v5218_v43  ;;  %v13647_v44 = vpop.f32.mrf.mxu0  ;;  %v13650_v9 = vpop.f32.mrf.mxu1  ;;  %v6201_v43 = vld [vmem:[#allocation4 + $0x60] sm:$0xff] }
 0x96f   :  { %15931 = vst [vmem:[#allocation166_spill] sm:$0xff] %v13650_v9  ;;  %v6263_v56 = vpack.c.bf16 %v6202_v3, %v6201_v43  ;;  %v6204_v3 = vld [vmem:[#allocation4 + $0x80] sm:$0xff] }
 0x975   :  { %v5521_v62 = vpop.f32.mrf.mxu3  ;;  %v13655_v53 = vpop.f32.mrf.mxu2 }
 0x976   :  { %15932 = vst [vmem:[#allocation167_spill] sm:$0xff] %v13655_v53  ;;  %v13657_v20 = vadd.f32 %v5521_v62, %v5219_v52  ;;  %v13659_v58 = vpop.f32.mrf.mxu0  ;;  %v13662_v34 = vpop.f32.mrf.mxu1  ;;  %v4220_v62 = vadd.f32 %v13178_v26, %v12898_v57  ;;  %v5742_v53 = vld [vmem:[#allocation4 + $0x4a] sm:$0xff] }
 0x977   :  { %15933 = vst [vmem:[#allocation168_spill] sm:$0xff] %v13662_v34 }
 0x978   :  { %v4764_v43 = vadd.f32 %v13045_v37, %v4220_v62 }
 0x979   :  { %9055 = vmatmul.msk.bf16.gmra.mxu0 %vm618_vm1, %v13435_v32  ;;  %9309 = vmatmul.msk.bf16.gmra.mxu1 %vm618_vm1, %v6263_v56  ;;  %v4763_v32 = vadd.f32 %v13039_v33, %v4217_v55  ;;  %v13697_v56 = vpack.c.bf16 %v5303_v17, %v5302_v11  ;;  %v6203_v55 = vld [vmem:[#allocation4 + $0x78] sm:$0xff] }
 0x97a   :  { %9205 = vmatmul.msk.bf16.gmra.mxu3 %vm618_vm1, %v13664_v22  ;;  %9365 = vmatmul.msk.bf16.gmra.mxu2 %vm618_vm1, %v13433_v63  ;;  %v6264_v57 = vpack.c.bf16 %v6204_v3, %v6203_v55  ;;  %v5222_v37 = vadd.f32 %v13058_v60, %v4764_v43  ;;  %v6206_v3 = vld [vmem:[#allocation4 + $0x98] sm:$0xff] }
 0x97b   :  { %v5221_v63 = vadd.f32 %v13041_v1, %v4763_v32  ;;  %v4222_v1 = vadd.f32 %v13194_v2, %v12911_v13  ;;  %v4225_v13 = vadd.f32 %v13202_v24, %v12921_v25  ;;  %v9574_v2 = vld [vmem:[%s15503_s9 + $0xa8] sm:$0xff]  ;;  %v5304_v43 = vld [vmem:[#allocation4 + $0x139] sm:$0xff] }
 0x97d   :  { %v5524_v45 = vpop.f32.mrf.mxu3  ;;  %v13676_v48 = vpop.f32.mrf.mxu2  ;;  %v4766_v55 = vadd.f32 %v13068_v23, %v4225_v13  ;;  %v4227_v23 = vadd.f32 %v13218_v39, %v12934_v7  ;;  %v5307_v39 = vld [vmem:[#allocation4 + $0x159] sm:$0xff] }
 0x97e   :  { %15934 = vst [vmem:[#allocation169_spill] sm:$0xff] %v13676_v48  ;;  %v13678_v4 = vadd.f32 %v5524_v45, %v5220_v10  ;;  %v13680_v30 = vpop.f32.mrf.mxu0  ;;  %v13683_v52 = vpop.f32.mrf.mxu1 }
 0x97f   :  { %15935 = vst [vmem:[#allocation170_spill] sm:$0xff] %v13683_v52 }
 0x985   :  { %v5526_v16 = vpop.f32.mrf.mxu3  ;;  %v13688_v38 = vpop.f32.mrf.mxu2 }
 0x986   :  { %15936 = vst [vmem:[#allocation171_spill] sm:$0xff] %v13688_v38  ;;  %v13690_v0 = vadd.f32 %v5526_v16, %v5221_v63  ;;  %v13692_v19 = vpop.f32.mrf.mxu0  ;;  %v13695_v33 = vpop.f32.mrf.mxu1  ;;  %v5305_v16 = vld [vmem:[#allocation4 + $0x141] sm:$0xff]  ;;  %v5740_v38 = vld [vmem:[#allocation4 + $0x32] sm:$0xff] }
 0x987   :  { %15937 = vst [vmem:[#allocation172_spill] sm:$0xff] %v13695_v33  ;;  %v13736_v24 = vpack.c.bf16 %v5305_v16, %v5304_v43  ;;  %v15946_v16 = vld [vmem:[#allocation7_spill] sm:$0xff] }
 0x988   :  { %v15948_v43 = vld [vmem:[#allocation19_spill] sm:$0xff] }
 0x989   :  { %9056 = vmatmul.msk.bf16.gmra.mxu0 %vm618_vm1, %v13462_v14  ;;  %9310 = vmatmul.msk.bf16.gmra.mxu1 %vm618_vm1, %v6264_v57  ;;  %v4765_v14 = vadd.f32 %v13062_v27, %v4222_v1  ;;  %v9573_v1 = vld [vmem:[%s15503_s9 + $0xa0] sm:$0xff] }
 0x98a   :  { %9206 = vmatmul.msk.bf16.gmra.mxu3 %vm618_vm1, %v13697_v56  ;;  %9366 = vmatmul.msk.bf16.gmra.mxu2 %vm618_vm1, %v13460_v5  ;;  %v9575_v5 = vld [vmem:[%s15503_s9 + $0xb0] sm:$0xff] }
 0x98b   :  { %v5223_v60 = vadd.f32 %v13064_v12, %v4765_v14  ;;  %5968 = vmatpush.bf16.msrb.mxu0 %v9575_v5  ;;  %v6205_v12 = vld [vmem:[#allocation4 + $0x90] sm:$0xff] }
 0x98c   :  { %v6265_v57 = vpack.c.bf16 %v6206_v3, %v6205_v12  ;;  %v15947_v3 = vld [vmem:[#allocation60_spill] sm:$0xff] }
 0x98d   :  { %v5529_v26 = vpop.f32.mrf.mxu3  ;;  %v13709_v10 = vpop.f32.mrf.mxu2 }
 0x98e   :  { %15938 = vst [vmem:[#allocation173_spill] sm:$0xff] %v13709_v10  ;;  %v13711_v45 = vadd.f32 %v5529_v26, %v5222_v37  ;;  %v13713_v32 = vpop.f32.mrf.mxu0  ;;  %v13716_v62 = vpop.f32.mrf.mxu1  ;;  %v15942_v37 = vld [vmem:[#allocation23_spill] sm:$0xff] }
 0x98f   :  { %15939 = vst [vmem:[#allocation174_spill] sm:$0xff] %v13716_v62  ;;  %5969 = vmatpush.bf16.msrb.mxu0 %v9574_v2  ;;  %v5224_v26 = vadd.f32 %v15942_v37, %v4766_v55  ;;  %v5308_v62 = vld [vmem:[#allocation4 + $0x169] sm:$0xff] }
 0x993   :  { %5970 = vmatpush.bf16.msrb.mxu0 %v9573_v1  ;;  %v6208_v1 = vld [vmem:[#allocation4 + $0xb0] sm:$0xff] }
 0x995   :  { %v5531_v63 = vpop.f32.mrf.mxu3  ;;  %v13727_v17 = vpop.f32.mrf.mxu2 }
 0x996   :  { %15940 = vst [vmem:[#allocation175_spill] sm:$0xff] %v13727_v17  ;;  %v13729_v27 = vadd.f32 %v5531_v63, %v5223_v60  ;;  %v13731_v11 = vpop.f32.mrf.mxu0  ;;  %v13734_v25 = vpop.f32.mrf.mxu1  ;;  %v15944_v60 = vld [vmem:[#allocation27_spill] sm:$0xff] }
 0x997   :  { %15941 = vst [vmem:[#allocation176_spill] sm:$0xff] %v13734_v25  ;;  %v4767_v2 = vadd.f32 %v15944_v60, %v4227_v23  ;;  %v15960_v25 = vld [vmem:[#allocation29_spill] sm:$0xff] }
 0x999   :  { %9057 = vmatmul.msk.bf16.gmra.mxu0 %vm618_vm1, %v13489_v31  ;;  %9311 = vmatmul.msk.bf16.gmra.mxu1 %vm618_vm1, %v6265_v57  ;;  %v5225_v12 = vadd.f32 %v15948_v43, %v4767_v2  ;;  %v9587_v2 = vld [vmem:[%s15503_s9 + $0x110] sm:$0xff] }
 0x99a   :  { %9207 = vmatmul.msk.bf16.gmra.mxu3 %vm618_vm1, %v13736_v24  ;;  %9367 = vmatmul.msk.bf16.gmra.mxu2 %vm618_vm1, %v13487_v28  ;;  %v4230_v28 = vadd.f32 %v15947_v3, %v15946_v16  ;;  %v15952_v3 = vld [vmem:[#allocation8_spill] sm:$0xff] }
 0x99b   :  { %7343 = vmatpush.bf16.msrb.mxu3 %v9587_v2 }
 0x99d   :  { %v5534_v14 = vpop.f32.mrf.mxu3  ;;  %v13751_v31 = vpop.f32.mrf.mxu2 }
 0x99e   :  { %15943 = vst [vmem:[#allocation23_spill] sm:$0xff] %v13751_v31  ;;  %v13753_v5 = vadd.f32 %v5534_v14, %v5224_v26  ;;  %v13755_v13 = vpop.f32.mrf.mxu0  ;;  %v13758_v63 = vpop.f32.mrf.mxu1  ;;  %v5306_v26 = vld [vmem:[#allocation4 + $0x151] sm:$0xff] }
 0x99f   :  { %15945 = vst [vmem:[#allocation27_spill] sm:$0xff] %v13758_v63  ;;  %v15950_v14 = vld [vmem:[#allocation24_spill] sm:$0xff]  ;;  %v13772_v60 = vpack.c.bf16 %v5307_v39, %v5306_v26  ;;  %v6207_v63 = vld [vmem:[#allocation4 + $0xa8] sm:$0xff] }
 0x9a0   :  { %v4768_v31 = vadd.f32 %v15950_v14, %v4230_v28  ;;  %v6266_v16 = vpack.c.bf16 %v6208_v1, %v6207_v63  ;;  %v15953_v28 = vld [vmem:[#allocation64_spill] sm:$0xff] }
 0x9a1   :  { %v4232_v43 = vadd.f32 %v15953_v28, %v15952_v3  ;;  %v15956_v26 = vld [vmem:[#allocation28_spill] sm:$0xff] }
 0x9a2   :  { %v5309_v28 = vld [vmem:[#allocation4 + $0x171] sm:$0xff] }
 0x9a3   :  { %v4769_v14 = vadd.f32 %v15956_v26, %v4232_v43  ;;  %v15962_v43 = vld [vmem:[#allocation30_spill] sm:$0xff]  ;;  %v13808_v10 = vpack.c.bf16 %v5309_v28, %v5308_v62 }
 0x9a5   :  { %v5536_v7 = vpop.f32.mrf.mxu3  ;;  %v13763_v55 = vpop.f32.mrf.mxu2  ;;  %v5227_v17 = vadd.f32 %v15960_v25, %v4769_v14  ;;  %v6209_v25 = vld [vmem:[#allocation4 + $0xc0] sm:$0xff] }
 0x9a6   :  { %15949 = vst [vmem:[#allocation7_spill] sm:$0xff] %v13763_v55  ;;  %v13765_v57 = vadd.f32 %v5536_v7, %v5225_v12  ;;  %v13767_v37 = vpop.f32.mrf.mxu0  ;;  %v13770_v23 = vpop.f32.mrf.mxu1  ;;  %v15954_v12 = vld [vmem:[#allocation5_spill] sm:$0xff] }
 0x9a7   :  { %15951 = vst [vmem:[#allocation60_spill] sm:$0xff] %v13770_v23  ;;  %v5226_v63 = vadd.f32 %v15954_v12, %v4768_v31  ;;  %v15959_v23 = vld [vmem:[#allocation68_spill] sm:$0xff]  ;;  %v5739_v12 = vld [vmem:[#allocation4 + $0x22] sm:$0xff] }
 0x9a8   :  { %v5738_v31 = vld [vmem:[#allocation4 + $0x1a] sm:$0xff] }
 0x9a9   :  { %9058 = vmatmul.msk.bf16.gmra.mxu0 %vm618_vm1, %v13540_v46  ;;  %9312 = vmatmul.msk.bf16.gmra.mxu1 %vm618_vm1, %v6266_v16  ;;  %v15958_v16 = vld [vmem:[#allocation9_spill] sm:$0xff] }
 0x9aa   :  { %9208 = vmatmul.msk.bf16.gmra.mxu3 %vm618_vm1, %v13772_v60  ;;  %9368 = vmatmul.msk.bf16.gmra.mxu2 %vm618_vm1, %v13538_v40  ;;  %v4235_v55 = vadd.f32 %v15959_v23, %v15958_v16  ;;  %v5802_v23 = vpack.c.bf16 %v5739_v12, %v5738_v31  ;;  %v15965_v16 = vld [vmem:[#allocation72_spill] sm:$0xff] }
 0x9ac   :  { %v4770_v26 = vadd.f32 %v15962_v43, %v4235_v55 }
 0x9ad   :  { %v5539_v7 = vpop.f32.mrf.mxu3  ;;  %v13787_v46 = vpop.f32.mrf.mxu2 }
 0x9ae   :  { %15955 = vst [vmem:[#allocation19_spill] sm:$0xff] %v13787_v46  ;;  %v13789_v39 = vadd.f32 %v5539_v7, %v5226_v63  ;;  %v13791_v1 = vpop.f32.mrf.mxu0  ;;  %v13794_v40 = vpop.f32.mrf.mxu1  ;;  %v6210_v63 = vld [vmem:[#allocation4 + $0xc8] sm:$0xff] }
 0x9af   :  { %15957 = vst [vmem:[#allocation24_spill] sm:$0xff] %v13794_v40  ;;  %v6267_v14 = vpack.c.bf16 %v6210_v63, %v6209_v25  ;;  %v15969_v63 = vld [vmem:[#allocation33_spill] sm:$0xff] }
 0x9b5   :  { %v5541_v3 = vpop.f32.mrf.mxu3  ;;  %v13799_v2 = vpop.f32.mrf.mxu2 }
 0x9b6   :  { %15961 = vst [vmem:[#allocation8_spill] sm:$0xff] %v13799_v2  ;;  %v13801_v46 = vadd.f32 %v5541_v3, %v5227_v17  ;;  %v13803_v7 = vpop.f32.mrf.mxu0  ;;  %v13806_v40 = vpop.f32.mrf.mxu1  ;;  %v15964_v17 = vld [vmem:[#allocation10_spill] sm:$0xff]  ;;  %v15966_v3 = vld [vmem:[#allocation32_spill] sm:$0xff] }
 0x9b7   :  { %15963 = vst [vmem:[#allocation64_spill] sm:$0xff] %v13806_v40  ;;  %v4237_v55 = vadd.f32 %v15965_v16, %v15964_v17  ;;  %v5228_v43 = vadd.f32 %v15966_v3, %v4770_v26  ;;  %v15972_v40 = vld [vmem:[#allocation76_spill] sm:$0xff]  ;;  %v5310_v16 = vld [vmem:[#allocation4 + $0x181] sm:$0xff]  ;;  %v5311_v26 = vld [vmem:[#allocation4 + $0x189] sm:$0xff] }
 0x9b8   :  { %v5741_v3 = vld [vmem:[#allocation4 + $0x3a] sm:$0xff]  ;;  %v13840_v48 = vpack.c.bf16 %v5311_v26, %v5310_v16 }
 0x9b9   :  { %9251 = vmatmul.msk.bf16.vlgmr.msrb.gmra.mxu0 %vm618_vm1, %v5802_v23  ;;  %9313 = vmatmul.msk.bf16.gmra.mxu1 %vm618_vm1, %v6267_v14  ;;  %v4771_v25 = vadd.f32 %v15969_v63, %v4237_v55  ;;  %v15971_v14 = vld [vmem:[#allocation11_spill] sm:$0xff]  ;;  %v15976_v55 = vld [vmem:[#allocation36_spill] sm:$0xff] }
 0x9ba   :  { %9209 = vmatmul.msk.bf16.gmra.mxu3 %vm618_vm1, %v13808_v10  ;;  %9369 = vmatmul.msk.bf16.gmra.mxu2 %vm618_vm1, %v13571_v51  ;;  %v4240_v2 = vadd.f32 %v15972_v40, %v15971_v14  ;;  %v15973_v51 = vld [vmem:[#allocation35_spill] sm:$0xff]  ;;  %v5803_v40 = vpack.c.bf16 %v5741_v3, %v5740_v38 }
 0x9bb   :  { %v5229_v33 = vadd.f32 %v15973_v51, %v4771_v25  ;;  %v6211_v25 = vld [vmem:[#allocation4 + $0xd8] sm:$0xff] }
 0x9bc   :  { %v4772_v63 = vadd.f32 %v15976_v55, %v4240_v2  ;;  %v15979_v51 = vld [vmem:[#allocation80_spill] sm:$0xff] }
 0x9bd   :  { %v5544_v62 = vpop.f32.mrf.mxu3  ;;  %v13819_v28 = vpop.f32.mrf.mxu2 }
 0x9be   :  { %15967 = vst [vmem:[#allocation5_spill] sm:$0xff] %v13819_v28  ;;  %v13821_v31 = vadd.f32 %v5544_v62, %v5228_v43  ;;  %v13823_v12 = vpop.f32.mrf.mxu0  ;;  %v13826_v23 = vpop.f32.mrf.mxu1  ;;  %v6212_v62 = vld [vmem:[#allocation4 + $0xe0] sm:$0xff] }
 0x9bf   :  { %15968 = vst [vmem:[#allocation28_spill] sm:$0xff] %v13823_v12  ;;  %v6268_v14 = vpack.c.bf16 %v6212_v62, %v6211_v25  ;;  %v15983_v62 = vld [vmem:[#allocation39_spill] sm:$0xff]  ;;  %v5325_v12 = vld [vmem:[#allocation4 + $0x261] sm:$0xff] }
 0x9c0   :  { %15970 = vst [vmem:[#allocation9_spill] sm:$0xff] %v13826_v23 }
 0x9c5   :  { %v5546_v17 = vpop.f32.mrf.mxu3  ;;  %v13831_v52 = vpop.f32.mrf.mxu2 }
 0x9c6   :  { %15974 = vst [vmem:[#allocation68_spill] sm:$0xff] %v13831_v52  ;;  %v13833_v43 = vadd.f32 %v5546_v17, %v5229_v33  ;;  %v13835_v28 = vpop.f32.mrf.mxu0  ;;  %v13838_v23 = vpop.f32.mrf.mxu1  ;;  %v15978_v33 = vld [vmem:[#allocation12_spill] sm:$0xff]  ;;  %v15980_v17 = vld [vmem:[#allocation38_spill] sm:$0xff] }
 0x9c7   :  { %15975 = vst [vmem:[#allocation29_spill] sm:$0xff] %v13835_v28  ;;  %v4242_v2 = vadd.f32 %v15979_v51, %v15978_v33  ;;  %v5230_v55 = vadd.f32 %v15980_v17, %v4772_v63  ;;  %v5312_v51 = vld [vmem:[#allocation4 + $0x1c9] sm:$0xff]  ;;  %v5313_v63 = vld [vmem:[#allocation4 + $0x1d1] sm:$0xff] }
 0x9c8   :  { %15977 = vst [vmem:[#allocation30_spill] sm:$0xff] %v13838_v23  ;;  %v15986_v23 = vld [vmem:[#allocation84_spill] sm:$0xff]  ;;  %v5360_v35 = vpack.c.bf16 %v5313_v63, %v5312_v51 }
 0x9c9   :  { %9252 = vmatmul.msk.bf16.gmra.mxu0 %vm618_vm1, %v5803_v40  ;;  %9314 = vmatmul.msk.bf16.gmra.mxu1 %vm618_vm1, %v6268_v14  ;;  %v4773_v25 = vadd.f32 %v15983_v62, %v4242_v2  ;;  %v15985_v14 = vld [vmem:[#allocation25_spill] sm:$0xff]  ;;  %v5743_v17 = vld [vmem:[#allocation4 + $0x52] sm:$0xff]  ;;  %v15990_v2 = vld [vmem:[#allocation42_spill] sm:$0xff] }
 0x9ca   :  { %9210 = vmatmul.msk.bf16.gmra.mxu3 %vm618_vm1, %v13840_v48  ;;  %9370 = vmatmul.msk.bf16.gmra.mxu2 %vm618_vm1, %v13598_v49  ;;  %v4245_v52 = vadd.f32 %v15986_v23, %v15985_v14  ;;  %v15987_v49 = vld [vmem:[#allocation41_spill] sm:$0xff]  ;;  %v5804_v23 = vpack.c.bf16 %v5743_v17, %v5742_v53  ;;  %v6213_v14 = vld [vmem:[#allocation4 + $0xf0] sm:$0xff] }
 0x9cb   :  { %v5231_v34 = vadd.f32 %v15987_v49, %v4773_v25  ;;  %v15993_v49 = vld [vmem:[#allocation88_spill] sm:$0xff] }
 0x9cc   :  { %v4774_v62 = vadd.f32 %v15990_v2, %v4245_v52  ;;  %v5748_v28 = vld [vmem:[#allocation4 + $0x92] sm:$0xff] }
 0x9cd   :  { %v5549_v16 = vpop.f32.mrf.mxu3  ;;  %v13851_v26 = vpop.f32.mrf.mxu2 }
 0x9ce   :  { %15981 = vst [vmem:[#allocation10_spill] sm:$0xff] %v13851_v26  ;;  %v13853_v38 = vadd.f32 %v5549_v16, %v5230_v55  ;;  %v13855_v3 = vpop.f32.mrf.mxu0  ;;  %v13858_v40 = vpop.f32.mrf.mxu1  ;;  %v6214_v16 = vld [vmem:[#allocation4 + $0xf8] sm:$0xff] }
 0x9cf   :  { %15982 = vst [vmem:[#allocation72_spill] sm:$0xff] %v13855_v3  ;;  %v6269_v25 = vpack.c.bf16 %v6214_v16, %v6213_v14  ;;  %v15999_v16 = vld [vmem:[#allocation13_spill] sm:$0xff] }
 0x9d0   :  { %15984 = vst [vmem:[#allocation32_spill] sm:$0xff] %v13858_v40 }
 0x9d5   :  { %v5551_v33 = vpop.f32.mrf.mxu3  ;;  %v13863_v9 = vpop.f32.mrf.mxu2 }
 0x9d6   :  { %15988 = vst [vmem:[#allocation33_spill] sm:$0xff] %v13863_v9  ;;  %v13865_v55 = vadd.f32 %v5551_v33, %v5231_v34  ;;  %v13867_v26 = vpop.f32.mrf.mxu0  ;;  %v13870_v40 = vpop.f32.mrf.mxu1  ;;  %v15992_v34 = vld [vmem:[#allocation26_spill] sm:$0xff]  ;;  %v15994_v9 = vld [vmem:[#allocation44_spill] sm:$0xff] }
 0x9d7   :  { %15989 = vst [vmem:[#allocation11_spill] sm:$0xff] %v13867_v26  ;;  %v4247_v33 = vadd.f32 %v15993_v49, %v15992_v34  ;;  %v5232_v52 = vadd.f32 %v15994_v9, %v4774_v62  ;;  %v5744_v26 = vld [vmem:[#allocation4 + $0x62] sm:$0xff]  ;;  %v5745_v62 = vld [vmem:[#allocation4 + $0x6a] sm:$0xff] }
 0x9d8   :  { %15991 = vst [vmem:[#allocation76_spill] sm:$0xff] %v13870_v40  ;;  %v5314_v49 = vld [vmem:[#allocation4 + $0x1e1] sm:$0xff]  ;;  %v5315_v9 = vld [vmem:[#allocation4 + $0x1e9] sm:$0xff] }
 0x9d9   :  { %9253 = vmatmul.msk.bf16.gmra.mxu0 %vm618_vm1, %v5804_v23  ;;  %9315 = vmatmul.msk.bf16.gmra.mxu1 %vm618_vm1, %v6269_v25  ;;  %v16000_v23 = vld [vmem:[#allocation92_spill] sm:$0xff]  ;;  %v13901_v3 = vpack.c.bf16 %v5315_v9, %v5314_v49 }
 0x9da   :  { %9211 = vmatmul.msk.bf16.gmra.mxu3 %vm618_vm1, %v5360_v35  ;;  %9371 = vmatmul.msk.bf16.gmra.mxu2 %vm618_vm1, %v13631_v42  ;;  %v15997_v35 = vld [vmem:[#allocation45_spill] sm:$0xff]  ;;  %v4250_v14 = vadd.f32 %v16000_v23, %v15999_v16  ;;  %v16001_v42 = vld [vmem:[#allocation47_spill] sm:$0xff]  ;;  %v5805_v16 = vpack.c.bf16 %v5745_v62, %v5744_v26 }
 0x9db   :  { %v4775_v63 = vadd.f32 %v15997_v35, %v4247_v33  ;;  %v16004_v33 = vld [vmem:[#allocation48_spill] sm:$0xff]  ;;  %v16011_v62 = vld [vmem:[#allocation51_spill] sm:$0xff] }
 0x9dc   :  { %v4776_v35 = vadd.f32 %v16004_v33, %v4250_v14 }
 0x9dd   :  { %v5554_v2 = vpop.f32.mrf.mxu3  ;;  %v13882_v53 = vpop.f32.mrf.mxu2  ;;  %v5233_v25 = vadd.f32 %v16001_v42, %v4775_v63  ;;  %v6215_v63 = vld [vmem:[#allocation4 + $0x108] sm:$0xff] }
 0x9de   :  { %v13880_v40 = vadd.f32 %v5554_v2, %v5232_v52  ;;  %15995 = vst [vmem:[#allocation35_spill] sm:$0xff] %v13882_v53  ;;  %v13884_v51 = vpop.f32.mrf.mxu0  ;;  %v13887_v17 = vpop.f32.mrf.mxu1  ;;  %v6216_v53 = vld [vmem:[#allocation4 + $0x110] sm:$0xff]  ;;  %v16006_v42 = vld [vmem:[#allocation14_spill] sm:$0xff] }
 0x9df   :  { %15996 = vst [vmem:[#allocation36_spill] sm:$0xff] %v13884_v51  ;;  %v6270_v23 = vpack.c.bf16 %v6216_v53, %v6215_v63 }
 0x9e0   :  { %15998 = vst [vmem:[#allocation12_spill] sm:$0xff] %v13887_v17 }
 0x9e5   :  { %v5556_v34 = vpop.f32.mrf.mxu3  ;;  %v13894_v2 = vpop.f32.mrf.mxu2 }
 0x9e6   :  { %v13892_v52 = vadd.f32 %v5556_v34, %v5233_v25  ;;  %16002 = vst [vmem:[#allocation80_spill] sm:$0xff] %v13894_v2  ;;  %v13896_v51 = vpop.f32.mrf.mxu0  ;;  %v13899_v17 = vpop.f32.mrf.mxu1  ;;  %v16007_v25 = vld [vmem:[#allocation96_spill] sm:$0xff]  ;;  %v16008_v34 = vld [vmem:[#allocation50_spill] sm:$0xff] }
 0x9e7   :  { %16003 = vst [vmem:[#allocation38_spill] sm:$0xff] %v13896_v51  ;;  %v4252_v14 = vadd.f32 %v16007_v25, %v16006_v42  ;;  %v5234_v33 = vadd.f32 %v16008_v34, %v4776_v35  ;;  %v5316_v25 = vld [vmem:[#allocation4 + $0x1f9] sm:$0xff]  ;;  %v5317_v35 = vld [vmem:[#allocation4 + $0x201] sm:$0xff] }
 0x9e8   :  { %16005 = vst [vmem:[#allocation39_spill] sm:$0xff] %v13899_v17  ;;  %v16014_v17 = vld [vmem:[#allocation100_spill] sm:$0xff]  ;;  %v5747_v34 = vld [vmem:[#allocation4 + $0x82] sm:$0xff]  ;;  %v13933_v59 = vpack.c.bf16 %v5317_v35, %v5316_v25 }
 0x9e9   :  { %9254 = vmatmul.msk.bf16.gmra.mxu0 %vm618_vm1, %v5805_v16  ;;  %9316 = vmatmul.msk.bf16.gmra.mxu1 %vm618_vm1, %v6270_v23  ;;  %v4777_v63 = vadd.f32 %v16011_v62, %v4252_v14  ;;  %v16013_v23 = vld [vmem:[#allocation15_spill] sm:$0xff]  ;;  %v16018_v14 = vld [vmem:[#allocation54_spill] sm:$0xff] }
 0x9ea   :  { %9212 = vmatmul.msk.bf16.gmra.mxu3 %vm618_vm1, %v13901_v3  ;;  %9372 = vmatmul.msk.bf16.gmra.mxu2 %vm618_vm1, %v13664_v22  ;;  %v4255_v2 = vadd.f32 %v16014_v17, %v16013_v23  ;;  %v16015_v22 = vld [vmem:[#allocation53_spill] sm:$0xff]  ;;  %v5806_v17 = vpack.c.bf16 %v5747_v34, %v5746_v8 }
 0x9eb   :  { %v5235_v51 = vadd.f32 %v16015_v22, %v4777_v63  ;;  %v6217_v63 = vld [vmem:[#allocation4 + $0x120] sm:$0xff]  ;;  %v16021_v22 = vld [vmem:[#allocation104_spill] sm:$0xff] }
 0x9ec   :  { %v4778_v62 = vadd.f32 %v16018_v14, %v4255_v2  ;;  %v16025_v34 = vld [vmem:[#allocation57_spill] sm:$0xff] }
 0x9ed   :  { %v5559_v49 = vpop.f32.mrf.mxu3  ;;  %v13914_v26 = vpop.f32.mrf.mxu2 }
 0x9ee   :  { %v13912_v9 = vadd.f32 %v5559_v49, %v5234_v33  ;;  %16009 = vst [vmem:[#allocation25_spill] sm:$0xff] %v13914_v26  ;;  %v13916_v53 = vpop.f32.mrf.mxu0  ;;  %v13919_v16 = vpop.f32.mrf.mxu1  ;;  %v6218_v26 = vld [vmem:[#allocation4 + $0x128] sm:$0xff] }
 0x9ef   :  { %16010 = vst [vmem:[#allocation84_spill] sm:$0xff] %v13916_v53  ;;  %v6271_v23 = vpack.c.bf16 %v6218_v26, %v6217_v63 }
 0x9f0   :  { %16012 = vst [vmem:[#allocation41_spill] sm:$0xff] %v13919_v16 }
 0x9f5   :  { %v5561_v42 = vpop.f32.mrf.mxu3  ;;  %v13926_v49 = vpop.f32.mrf.mxu2 }
 0x9f6   :  { %v13924_v33 = vadd.f32 %v5561_v42, %v5235_v51  ;;  %16016 = vst [vmem:[#allocation42_spill] sm:$0xff] %v13926_v49  ;;  %v13928_v53 = vpop.f32.mrf.mxu0  ;;  %v13931_v16 = vpop.f32.mrf.mxu1  ;;  %v16020_v51 = vld [vmem:[#allocation16_spill] sm:$0xff] }
 0x9f7   :  { %16017 = vst [vmem:[#allocation26_spill] sm:$0xff] %v13928_v53  ;;  %v4257_v2 = vadd.f32 %v16021_v22, %v16020_v51  ;;  %v16022_v42 = vld [vmem:[#allocation56_spill] sm:$0xff] }
 0x9f8   :  { %16019 = vst [vmem:[#allocation88_spill] sm:$0xff] %v13931_v16  ;;  %v5236_v14 = vadd.f32 %v16022_v42, %v4778_v62  ;;  %v16028_v16 = vld [vmem:[#allocation108_spill] sm:$0xff] }
 0x9f9   :  { %9255 = vmatmul.msk.bf16.gmra.mxu0 %vm618_vm1, %v5806_v17  ;;  %9317 = vmatmul.msk.bf16.gmra.mxu1 %vm618_vm1, %v6271_v23  ;;  %v4779_v63 = vadd.f32 %v16025_v34, %v4257_v2  ;;  %v16027_v23 = vld [vmem:[#allocation17_spill] sm:$0xff]  ;;  %v5318_v22 = vld [vmem:[#allocation4 + $0x211] sm:$0xff] }
 0x9fa   :  { %9213 = vmatmul.msk.bf16.gmra.mxu3 %vm618_vm1, %v13933_v59  ;;  %9373 = vmatmul.msk.bf16.gmra.mxu2 %vm618_vm1, %v13697_v56  ;;  %v4260_v49 = vadd.f32 %v16028_v16, %v16027_v23  ;;  %v16029_v56 = vld [vmem:[#allocation59_spill] sm:$0xff]  ;;  %v5319_v62 = vld [vmem:[#allocation4 + $0x219] sm:$0xff] }
 0x9fb   :  { %v5237_v53 = vadd.f32 %v16029_v56, %v4779_v63  ;;  %v5749_v42 = vld [vmem:[#allocation4 + $0x9a] sm:$0xff]  ;;  %v13965_v18 = vpack.c.bf16 %v5319_v62, %v5318_v22 }
 0x9fc   :  { %v16033_v2 = vld [vmem:[#allocation61_spill] sm:$0xff]  ;;  %v5807_v16 = vpack.c.bf16 %v5749_v42, %v5748_v28  ;;  %v6219_v63 = vld [vmem:[#allocation4 + $0x138] sm:$0xff] }
 0x9fd   :  { %v5564_v25 = vpop.f32.mrf.mxu3  ;;  %v13946_v8 = vpop.f32.mrf.mxu2  ;;  %v4780_v34 = vadd.f32 %v16033_v2, %v4260_v49  ;;  %v16036_v56 = vld [vmem:[#allocation112_spill] sm:$0xff]  ;;  %v16041_v42 = vld [vmem:[#allocation65_spill] sm:$0xff] }
 0x9fe   :  { %v13944_v35 = vadd.f32 %v5564_v25, %v5236_v14  ;;  %16023 = vst [vmem:[#allocation44_spill] sm:$0xff] %v13946_v8  ;;  %v13948_v26 = vpop.f32.mrf.mxu0  ;;  %v13951_v17 = vpop.f32.mrf.mxu1  ;;  %v6220_v8 = vld [vmem:[#allocation4 + $0x140] sm:$0xff] }
 0x9ff   :  { %16024 = vst [vmem:[#allocation45_spill] sm:$0xff] %v13948_v26  ;;  %v6272_v23 = vpack.c.bf16 %v6220_v8, %v6219_v63 }
 0xa00   :  { %16026 = vst [vmem:[#allocation13_spill] sm:$0xff] %v13951_v17 }
 0xa05   :  { %v5566_v51 = vpop.f32.mrf.mxu3  ;;  %v13958_v25 = vpop.f32.mrf.mxu2 }
 0xa06   :  { %v13956_v14 = vadd.f32 %v5566_v51, %v5237_v53  ;;  %16031 = vst [vmem:[#allocation47_spill] sm:$0xff] %v13958_v25  ;;  %v13960_v26 = vpop.f32.mrf.mxu0  ;;  %v13963_v17 = vpop.f32.mrf.mxu1  ;;  %v16035_v53 = vld [vmem:[#allocation21_spill] sm:$0xff]  ;;  %v16037_v51 = vld [vmem:[#allocation63_spill] sm:$0xff] }
 0xa07   :  { %16032 = vst [vmem:[#allocation48_spill] sm:$0xff] %v13960_v26  ;;  %v4262_v49 = vadd.f32 %v16036_v56, %v16035_v53  ;;  %v5238_v2 = vadd.f32 %v16037_v51, %v4780_v34  ;;  %v5320_v56 = vld [vmem:[#allocation4 + $0x229] sm:$0xff]  ;;  %v5321_v34 = vld [vmem:[#allocation4 + $0x231] sm:$0xff] }
 0xa08   :  { %16030 = vst [vmem:[#allocation92_spill] sm:$0xff] %v13956_v14  ;;  %v5750_v14 = vld [vmem:[#allocation4 + $0xaa] sm:$0xff]  ;;  %v5751_v51 = vld [vmem:[#allocation4 + $0xb2] sm:$0xff] }
 0xa09   :  { %16034 = vst [vmem:[#allocation14_spill] sm:$0xff] %v13963_v17  ;;  %9256 = vmatmul.msk.bf16.gmra.mxu0 %vm618_vm1, %v5807_v16  ;;  %9318 = vmatmul.msk.bf16.gmra.mxu1 %vm618_vm1, %v6272_v23  ;;  %v4781_v63 = vadd.f32 %v16041_v42, %v4262_v49  ;;  %v16043_v23 = vld [vmem:[#allocation22_spill] sm:$0xff]  ;;  %v16044_v17 = vld [vmem:[#allocation116_spill] sm:$0xff]  ;;  %v16049_v49 = vld [vmem:[#allocation69_spill] sm:$0xff] }
 0xa0a   :  { %9214 = vmatmul.msk.bf16.gmra.mxu3 %vm618_vm1, %v13965_v18  ;;  %9374 = vmatmul.msk.bf16.gmra.mxu2 %vm618_vm1, %v13736_v24  ;;  %v4265_v25 = vadd.f32 %v16044_v17, %v16043_v23  ;;  %v16045_v24 = vld [vmem:[#allocation67_spill] sm:$0xff]  ;;  %v5808_v17 = vpack.c.bf16 %v5751_v51, %v5750_v14  ;;  %v16057_v51 = vld [vmem:[#allocation73_spill] sm:$0xff] }
 0xa0b   :  { %v5239_v26 = vadd.f32 %v16045_v24, %v4781_v63  ;;  %v6221_v63 = vld [vmem:[#allocation4 + $0x150] sm:$0xff]  ;;  %v16052_v24 = vld [vmem:[#allocation120_spill] sm:$0xff] }
 0xa0c   :  { %v4782_v42 = vadd.f32 %v16049_v49, %v4265_v25 }
 0xa0d   :  { %v5569_v22 = vpop.f32.mrf.mxu3  ;;  %v13978_v28 = vpop.f32.mrf.mxu2 }
 0xa0e   :  { %v13976_v62 = vadd.f32 %v5569_v22, %v5238_v2  ;;  %16039 = vst [vmem:[#allocation50_spill] sm:$0xff] %v13978_v28  ;;  %v13980_v8 = vpop.f32.mrf.mxu0  ;;  %v13983_v16 = vpop.f32.mrf.mxu1  ;;  %v6222_v28 = vld [vmem:[#allocation4 + $0x158] sm:$0xff] }
 0xa0f   :  { %16040 = vst [vmem:[#allocation51_spill] sm:$0xff] %v13980_v8  ;;  %v6273_v23 = vpack.c.bf16 %v6222_v28, %v6221_v63 }
 0xa10   :  { %16038 = vst [vmem:[#allocation96_spill] sm:$0xff] %v13976_v62  ;;  %v13997_v62 = vpack.c.bf16 %v5321_v34, %v5320_v56 }
 0xa11   :  { %16042 = vst [vmem:[#allocation15_spill] sm:$0xff] %v13983_v16 }
 0xa15   :  { %v5571_v53 = vpop.f32.mrf.mxu3  ;;  %v13990_v22 = vpop.f32.mrf.mxu2 }
 0xa16   :  { %v13988_v2 = vadd.f32 %v5571_v53, %v5239_v26  ;;  %16047 = vst [vmem:[#allocation53_spill] sm:$0xff] %v13990_v22  ;;  %v13992_v8 = vpop.f32.mrf.mxu0  ;;  %v13995_v16 = vpop.f32.mrf.mxu1  ;;  %v16051_v26 = vld [vmem:[#allocation18_spill] sm:$0xff]  ;;  %v16053_v53 = vld [vmem:[#allocation71_spill] sm:$0xff] }
 0xa17   :  { %16048 = vst [vmem:[#allocation54_spill] sm:$0xff] %v13992_v8  ;;  %v4267_v25 = vadd.f32 %v16052_v24, %v16051_v26  ;;  %v5240_v49 = vadd.f32 %v16053_v53, %v4782_v42  ;;  %v5322_v24 = vld [vmem:[#allocation4 + $0x241] sm:$0xff]  ;;  %v5323_v42 = vld [vmem:[#allocation4 + $0x249] sm:$0xff] }
 0xa18   :  { %16046 = vst [vmem:[#allocation100_spill] sm:$0xff] %v13988_v2  ;;  %v5752_v2 = vld [vmem:[#allocation4 + $0xc2] sm:$0xff]  ;;  %v5753_v53 = vld [vmem:[#allocation4 + $0xca] sm:$0xff] }
 0xa19   :  { %16050 = vst [vmem:[#allocation16_spill] sm:$0xff] %v13995_v16  ;;  %9257 = vmatmul.msk.bf16.gmra.mxu0 %vm618_vm1, %v5808_v17  ;;  %9319 = vmatmul.msk.bf16.gmra.mxu1 %vm618_vm1, %v6273_v23  ;;  %v4783_v63 = vadd.f32 %v16057_v51, %v4267_v25  ;;  %v16059_v23 = vld [vmem:[#allocation20_spill] sm:$0xff]  ;;  %v16065_v25 = vld [vmem:[#allocation77_spill] sm:$0xff] }
 0xa1a   :  { %9215 = vmatmul.msk.bf16.gmra.mxu3 %vm618_vm1, %v13997_v62  ;;  %9375 = vmatmul.msk.bf16.gmra.mxu2 %vm618_vm1, %v13772_v60  ;;  %v16060_v16 = vld [vmem:[#allocation124_spill] sm:$0xff]  ;;  %v16061_v60 = vld [vmem:[#allocation75_spill] sm:$0xff] }
 0xa1b   :  { %v4270_v22 = vadd.f32 %v16060_v16, %v16059_v23  ;;  %v5241_v8 = vadd.f32 %v16061_v60, %v4783_v63  ;;  %v6223_v16 = vld [vmem:[#allocation4 + $0x168] sm:$0xff]  ;;  %v16067_v63 = vld [vmem:[#allocation128_spill] sm:$0xff] }
 0xa1d   :  { %v5574_v56 = vpop.f32.mrf.mxu3  ;;  %v14010_v14 = vpop.f32.mrf.mxu2  ;;  %v4784_v51 = vadd.f32 %v16065_v25, %v4270_v22  ;;  %v16066_v22 = vld [vmem:[#allocation6_spill] sm:$0xff] }
 0xa1e   :  { %v14008_v34 = vadd.f32 %v5574_v56, %v5240_v49  ;;  %16055 = vst [vmem:[#allocation56_spill] sm:$0xff] %v14010_v14  ;;  %v14012_v28 = vpop.f32.mrf.mxu0  ;;  %v14015_v17 = vpop.f32.mrf.mxu1  ;;  %v6224_v14 = vld [vmem:[#allocation4 + $0x170] sm:$0xff]  ;;  %v4272_v60 = vadd.f32 %v16067_v63, %v16066_v22  ;;  %v5754_v22 = vld [vmem:[#allocation4 + $0xda] sm:$0xff] }
 0xa1f   :  { %16056 = vst [vmem:[#allocation57_spill] sm:$0xff] %v14012_v28  ;;  %v6274_v23 = vpack.c.bf16 %v6224_v14, %v6223_v16  ;;  %v16069_v14 = vld [vmem:[#allocation79_spill] sm:$0xff] }
 0xa20   :  { %16054 = vst [vmem:[#allocation104_spill] sm:$0xff] %v14008_v34  ;;  %v5809_v34 = vpack.c.bf16 %v5753_v53, %v5752_v2  ;;  %v16074_v16 = vld [vmem:[#allocation31_spill] sm:$0xff] }
 0xa21   :  { %16058 = vst [vmem:[#allocation17_spill] sm:$0xff] %v14015_v17  ;;  %v14027_v17 = vpack.c.bf16 %v5323_v42, %v5322_v24 }
 0xa25   :  { %v5576_v26 = vpop.f32.mrf.mxu3  ;;  %v14022_v56 = vpop.f32.mrf.mxu2 }
 0xa26   :  { %v14020_v49 = vadd.f32 %v5576_v26, %v5241_v8  ;;  %16063 = vst [vmem:[#allocation59_spill] sm:$0xff] %v14022_v56  ;;  %v14024_v28 = vpop.f32.mrf.mxu0  ;;  %v9586_v8 = vld [vmem:[%s15503_s9 + $0x108] sm:$0xff]  ;;  %v14040_v2 = vpop.f32.mrf.mxu1  ;;  %v5242_v26 = vadd.f32 %v16069_v14, %v4784_v51 }
 0xa27   :  { %16064 = vst [vmem:[#allocation61_spill] sm:$0xff] %v14024_v28  ;;  %7344 = vmatpush.bf16.msrb.mxu3 %v9586_v8  ;;  %v16076_v28 = vld [vmem:[#allocation83_spill] sm:$0xff]  ;;  %v5755_v51 = vld [vmem:[#allocation4 + $0xe2] sm:$0xff] }
 0xa28   :  { %16062 = vst [vmem:[#allocation108_spill] sm:$0xff] %v14020_v49 }
 0xa29   :  { %9258 = vmatmul.msk.bf16.gmra.mxu0 %vm618_vm1, %v5809_v34  ;;  %9320 = vmatmul.msk.bf16.gmra.mxu1 %vm618_vm1, %v6274_v23  ;;  %16068 = vst [vmem:[#allocation21_spill] sm:$0xff] %v14040_v2  ;;  %v16075_v23 = vld [vmem:[#allocation132_spill] sm:$0xff] }
 0xa2a   :  { %9216 = vmatmul.msk.bf16.gmra.mxu3 %vm618_vm1, %v14027_v17  ;;  %9376 = vmatmul.msk.bf16.gmra.mxu2 %vm618_vm1, %v13808_v10  ;;  %v16073_v10 = vld [vmem:[#allocation81_spill] sm:$0xff]  ;;  %v4275_v56 = vadd.f32 %v16075_v23, %v16074_v16 }
 0xa2b   :  { %v4785_v25 = vadd.f32 %v16073_v10, %v4272_v60  ;;  %v5324_v2 = vld [vmem:[#allocation4 + $0x259] sm:$0xff] }
 0xa2c   :  { %v16080_v60 = vld [vmem:[#allocation85_spill] sm:$0xff] }
 0xa2d   :  { %v5579_v24 = vpop.f32.mrf.mxu3  ;;  %v14045_v34 = vpop.f32.mrf.mxu2  ;;  %v5243_v49 = vadd.f32 %v16076_v28, %v4785_v25  ;;  %v4786_v10 = vadd.f32 %v16080_v60, %v4275_v56  ;;  %v14063_v28 = vpack.c.bf16 %v5325_v12, %v5324_v2  ;;  %v5810_v25 = vpack.c.bf16 %v5755_v51, %v5754_v22  ;;  %v16084_v60 = vld [vmem:[#allocation87_spill] sm:$0xff]  ;;  %v16086_v22 = vld [vmem:[#allocation89_spill] sm:$0xff] }
 0xa2e   :  { %v14043_v42 = vadd.f32 %v5579_v24, %v5242_v26  ;;  %16071 = vst [vmem:[#allocation63_spill] sm:$0xff] %v14045_v34  ;;  %v14047_v53 = vpop.f32.mrf.mxu0  ;;  %v14053_v14 = vpop.f32.mrf.mxu1  ;;  %v6225_v26 = vld [vmem:[#allocation4 + $0x180] sm:$0xff]  ;;  %v6226_v24 = vld [vmem:[#allocation4 + $0x188] sm:$0xff] }
 0xa2f   :  { %16072 = vst [vmem:[#allocation65_spill] sm:$0xff] %v14047_v53  ;;  %v6275_v23 = vpack.c.bf16 %v6226_v24, %v6225_v26 }
 0xa30   :  { %16070 = vst [vmem:[#allocation112_spill] sm:$0xff] %v14043_v42 }
 0xa31   :  { %16077 = vst [vmem:[#allocation22_spill] sm:$0xff] %v14053_v14  ;;  %v16091_v14 = vld [vmem:[#allocation140_spill] sm:$0xff] }
 0xa35   :  { %v5581_v63 = vpop.f32.mrf.mxu3  ;;  %v14057_v34 = vpop.f32.mrf.mxu2 }
 0xa36   :  { %v14055_v8 = vadd.f32 %v5581_v63, %v5243_v49  ;;  %16079 = vst [vmem:[#allocation67_spill] sm:$0xff] %v14057_v34  ;;  %v5972_v53 = vpop.f32.mrf.mxu0  ;;  %v16082_v49 = vld [vmem:[#allocation34_spill] sm:$0xff]  ;;  %v16083_v63 = vld [vmem:[#allocation136_spill] sm:$0xff]  ;;  %v14077_v26 = vpop.f32.mrf.mxu1  ;;  %v16090_v34 = vld [vmem:[#allocation37_spill] sm:$0xff] }
 0xa37   :  { %v14061_v16 = vadd.f32 %v5972_v53, %v13612_v21  ;;  %v4277_v56 = vadd.f32 %v16083_v63, %v16082_v49  ;;  %v5244_v21 = vadd.f32 %v16084_v60, %v4786_v10  ;;  %16087 = vst [vmem:[#allocation120_spill] sm:$0xff] %v14077_v26  ;;  %v4280_v49 = vadd.f32 %v16091_v14, %v16090_v34  ;;  %v16092_v63 = vld [vmem:[#allocation91_spill] sm:$0xff]  ;;  %v6228_v60 = vld [vmem:[#allocation4 + $0x1a0] sm:$0xff] }
 0xa38   :  { %16078 = vst [vmem:[#allocation116_spill] sm:$0xff] %v14055_v8 }
 0xa39   :  { %16081 = vst [vmem:[#allocation69_spill] sm:$0xff] %v14061_v16  ;;  %9259 = vmatmul.msk.bf16.gmra.mxu0 %vm618_vm1, %v5810_v25  ;;  %9321 = vmatmul.msk.bf16.gmra.mxu1 %vm618_vm1, %v6275_v23  ;;  %v4787_v51 = vadd.f32 %v16086_v22, %v4277_v56  ;;  %v5756_v23 = vld [vmem:[#allocation4 + $0xf2] sm:$0xff]  ;;  %v5757_v22 = vld [vmem:[#allocation4 + $0xfa] sm:$0xff] }
 0xa3a   :  { %9217 = vmatmul.msk.bf16.gmra.mxu3 %vm618_vm1, %v14063_v28  ;;  %9377 = vmatmul.msk.bf16.gmra.mxu2 %vm618_vm1, %v13840_v48  ;;  %v6227_v48 = vld [vmem:[#allocation4 + $0x198] sm:$0xff]  ;;  %v5811_v14 = vpack.c.bf16 %v5757_v22, %v5756_v23 }
 0xa3b   :  { %v5245_v10 = vadd.f32 %v16092_v63, %v4787_v51  ;;  %v5327_v56 = vld [vmem:[#allocation4 + $0x279] sm:$0xff] }
 0xa3c   :  { %v16102_v22 = vld [vmem:[#allocation148_spill] sm:$0xff] }
 0xa3d   :  { %v5584_v53 = vpop.f32.mrf.mxu3  ;;  %v14082_v25 = vpop.f32.mrf.mxu2 }
 0xa3e   :  { %v14074_v12 = vadd.f32 %v5584_v53, %v5244_v21  ;;  %v5974_v2 = vpop.f32.mrf.mxu0  ;;  %16089 = vst [vmem:[#allocation73_spill] sm:$0xff] %v14082_v25  ;;  %v6685_v21 = vld [vmem:[#allocation4 + $0x199] sm:$0xff]  ;;  %v6686_v53 = vld [vmem:[#allocation4 + $0x1a1] sm:$0xff]  ;;  %v14095_v51 = vpop.f32.mrf.mxu1 }
 0xa3f   :  { %v14080_v24 = vadd.f32 %v5974_v2, %v13624_v41  ;;  %v6276_v2 = vpack.c.bf16 %v6228_v60, %v6227_v48  ;;  %v16093_v25 = vld [vmem:[#allocation93_spill] sm:$0xff]  ;;  %16094 = vst [vmem:[#allocation20_spill] sm:$0xff] %v14095_v51  ;;  %v16097_v48 = vld [vmem:[#allocation144_spill] sm:$0xff] }
 0xa40   :  { %16085 = vst [vmem:[#allocation18_spill] sm:$0xff] %v14074_v12  ;;  %v5326_v12 = vld [vmem:[#allocation4 + $0x271] sm:$0xff]  ;;  %v4788_v8 = vadd.f32 %v16093_v25, %v4280_v49  ;;  %v16099_v60 = vld [vmem:[#allocation97_spill] sm:$0xff] }
 0xa41   :  { %16088 = vst [vmem:[#allocation71_spill] sm:$0xff] %v14080_v24  ;;  %v6734_v24 = vpack.c.bf16 %v6686_v53, %v6685_v21  ;;  %v14093_v34 = vpack.c.bf16 %v5327_v56, %v5326_v12  ;;  %v16096_v25 = vld [vmem:[#allocation40_spill] sm:$0xff]  ;;  %v16098_v49 = vld [vmem:[#allocation95_spill] sm:$0xff] }
 0xa42   :  { %v5246_v12 = vadd.f32 %v16098_v49, %v4788_v8  ;;  %v16101_v56 = vld [vmem:[#allocation43_spill] sm:$0xff] }
 0xa43   :  { %v5329_v49 = vld [vmem:[#allocation4 + $0x291] sm:$0xff] }
 0xa45   :  { %v5586_v16 = vpop.f32.mrf.mxu3 }
 0xa46   :  { %v14087_v26 = vadd.f32 %v5586_v16, %v5245_v10  ;;  %v5977_v41 = vpop.f32.mrf.mxu0  ;;  %v14100_v16 = vpop.f32.mrf.mxu2 }
 0xa47   :  { %v14091_v42 = vadd.f32 %v5977_v41, %v13645_v36  ;;  %16095 = vst [vmem:[#allocation124_spill] sm:$0xff] %v14100_v16  ;;  %v4282_v36 = vadd.f32 %v16097_v48, %v16096_v25  ;;  %v4285_v41 = vadd.f32 %v16102_v22, %v16101_v56  ;;  %v5758_v16 = vld [vmem:[#allocation4 + $0x10a] sm:$0xff] }
 0xa48   :  { %v5328_v48 = vld [vmem:[#allocation4 + $0x289] sm:$0xff] }
 0xa49   :  { %9260 = vmatmul.msk.bf16.gmra.mxu0 %vm618_vm1, %v5811_v14  ;;  %9322 = vmatmul.msk.bf16.gmra.mxu1 %vm618_vm1, %v6276_v2  ;;  %v4789_v21 = vadd.f32 %v16099_v60, %v4282_v36  ;;  %v14115_v2 = vpop.f32.mrf.mxu1  ;;  %v6229_v36 = vld [vmem:[#allocation4 + $0x1e0] sm:$0xff]  ;;  %v6230_v60 = vld [vmem:[#allocation4 + $0x1e8] sm:$0xff]  ;;  %v14126_v22 = vpack.c.bf16 %v5329_v49, %v5328_v48 }
 0xa4a   :  { %9218 = vmatmul.msk.bf16.gmra.mxu3 %vm618_vm1, %v14093_v34  ;;  %9378 = vmatmul.msk.bf16.gmra.mxu2 %vm618_vm1, %v6734_v24  ;;  %16103 = vst [vmem:[#allocation77_spill] sm:$0xff] %v14115_v2  ;;  %v16104_v24 = vld [vmem:[#allocation99_spill] sm:$0xff] }
 0xa4b   :  { %v5247_v14 = vadd.f32 %v16104_v24, %v4789_v21  ;;  %v6277_v24 = vpack.c.bf16 %v6230_v60, %v6229_v36  ;;  %v16113_v36 = vld [vmem:[#allocation105_spill] sm:$0xff]  ;;  %v5331_v2 = vld [vmem:[#allocation4 + $0x2a9] sm:$0xff] }
 0xa4d   :  { %v5589_v63 = vpop.f32.mrf.mxu3 }
 0xa4e   :  { %v14107_v23 = vadd.f32 %v5589_v63, %v5246_v12  ;;  %v5979_v10 = vpop.f32.mrf.mxu0  ;;  %v14118_v25 = vpop.f32.mrf.mxu2  ;;  %v5759_v12 = vld [vmem:[#allocation4 + $0x112] sm:$0xff] }
 0xa4f   :  { %v14111_v53 = vadd.f32 %v5979_v10, %v13657_v20  ;;  %16105 = vst [vmem:[#allocation6_spill] sm:$0xff] %v14118_v25  ;;  %v16106_v10 = vld [vmem:[#allocation101_spill] sm:$0xff]  ;;  %v5812_v21 = vpack.c.bf16 %v5759_v12, %v5758_v16  ;;  %v16115_v25 = vld [vmem:[#allocation107_spill] sm:$0xff] }
 0xa50   :  { %v4790_v51 = vadd.f32 %v16106_v10, %v4285_v41  ;;  %v16110_v10 = vld [vmem:[#allocation103_spill] sm:$0xff] }
 0xa51   :  { %16100 = vst [vmem:[#allocation75_spill] sm:$0xff] %v14111_v53  ;;  %v14137_v48 = vpop.f32.mrf.mxu1  ;;  %v16116_v53 = vld [vmem:[#allocation109_spill] sm:$0xff] }
 0xa52   :  { %16111 = vst [vmem:[#allocation79_spill] sm:$0xff] %v14137_v48  ;;  %v5761_v48 = vld [vmem:[#allocation4 + $0x12a] sm:$0xff] }
 0xa55   :  { %v5591_v8 = vpop.f32.mrf.mxu3 }
 0xa56   :  { %v14120_v63 = vadd.f32 %v5591_v8, %v5247_v14  ;;  %v5982_v20 = vpop.f32.mrf.mxu0  ;;  %v16108_v14 = vld [vmem:[#allocation46_spill] sm:$0xff]  ;;  %v16109_v8 = vld [vmem:[#allocation152_spill] sm:$0xff]  ;;  %v14141_v49 = vpop.f32.mrf.mxu2 }
 0xa57   :  { %v14124_v56 = vadd.f32 %v5982_v20, %v13678_v4  ;;  %v4287_v41 = vadd.f32 %v16109_v8, %v16108_v14  ;;  %v5248_v4 = vadd.f32 %v16110_v10, %v4790_v51  ;;  %16112 = vst [vmem:[#allocation81_spill] sm:$0xff] %v14141_v49  ;;  %v5760_v8 = vld [vmem:[#allocation4 + $0x122] sm:$0xff] }
 0xa58   :  { %v5330_v10 = vld [vmem:[#allocation4 + $0x2a1] sm:$0xff] }
 0xa59   :  { %16107 = vst [vmem:[#allocation128_spill] sm:$0xff] %v14124_v56  ;;  %9261 = vmatmul.msk.bf16.gmra.mxu0 %vm618_vm1, %v5812_v21  ;;  %9323 = vmatmul.msk.bf16.gmra.mxu1 %vm618_vm1, %v6277_v24  ;;  %v4791_v60 = vadd.f32 %v16113_v36, %v4287_v41  ;;  %v16114_v24 = vld [vmem:[#allocation49_spill] sm:$0xff]  ;;  %v14153_v36 = vpop.f32.mrf.mxu1 }
 0xa5a   :  { %9219 = vmatmul.msk.bf16.gmra.mxu3 %vm618_vm1, %v14126_v22  ;;  %9379 = vmatmul.msk.bf16.gmra.mxu2 %vm618_vm1, %v13901_v3  ;;  %v4290_v3 = vadd.f32 %v13567_v50, %v16114_v24  ;;  %v6232_v49 = vld [vmem:[#allocation4 + $0x200] sm:$0xff]  ;;  %v14158_v50 = vpack.c.bf16 %v5331_v2, %v5330_v10 }
 0xa5b   :  { %v5249_v14 = vadd.f32 %v16115_v25, %v4791_v60  ;;  %v5813_v25 = vpack.c.bf16 %v5761_v48, %v5760_v8 }
 0xa5c   :  { %v4792_v41 = vadd.f32 %v16116_v53, %v4290_v3  ;;  %v16118_v53 = vld [vmem:[#allocation52_spill] sm:$0xff] }
 0xa5d   :  { %v5594_v20 = vpop.f32.mrf.mxu3 }
 0xa5e   :  { %v14139_v16 = vadd.f32 %v5594_v20, %v5248_v4  ;;  %v5984_v12 = vpop.f32.mrf.mxu0  ;;  %v6231_v20 = vld [vmem:[#allocation4 + $0x1f8] sm:$0xff] }
 0xa5f   :  { %v14145_v21 = vadd.f32 %v5984_v12, %v13690_v0  ;;  %v14160_v12 = vpop.f32.mrf.mxu2  ;;  %v6278_v60 = vpack.c.bf16 %v6232_v49, %v6231_v20  ;;  %v16120_v49 = vld [vmem:[#allocation113_spill] sm:$0xff]  ;;  %v16123_v20 = vld [vmem:[#allocation55_spill] sm:$0xff] }
 0xa60   :  { %16117 = vst [vmem:[#allocation31_spill] sm:$0xff] %v14160_v12 }
 0xa65   :  { %v5596_v51 = vpop.f32.mrf.mxu3 }
 0xa66   :  { %v14150_v4 = vadd.f32 %v5596_v51, %v5249_v14  ;;  %v5987_v56 = vpop.f32.mrf.mxu0  ;;  %v14177_v51 = vpop.f32.mrf.mxu1 }
 0xa67   :  { %v14156_v0 = vadd.f32 %v5987_v56, %v13711_v45  ;;  %v4292_v45 = vadd.f32 %v13583_v6, %v16118_v53  ;;  %v16119_v56 = vld [vmem:[#allocation111_spill] sm:$0xff]  ;;  %16121 = vst [vmem:[#allocation132_spill] sm:$0xff] %v14177_v51  ;;  %v14179_v10 = vpop.f32.mrf.mxu2  ;;  %v5332_v53 = vld [vmem:[#allocation4 + $0x2b9] sm:$0xff] }
 0xa68   :  { %v5250_v2 = vadd.f32 %v16119_v56, %v4792_v41  ;;  %16122 = vst [vmem:[#allocation83_spill] sm:$0xff] %v14179_v10  ;;  %v5333_v56 = vld [vmem:[#allocation4 + $0x2c1] sm:$0xff] }
 0xa69   :  { %9262 = vmatmul.msk.bf16.gmra.mxu0 %vm618_vm1, %v5813_v25  ;;  %9324 = vmatmul.msk.bf16.gmra.mxu1 %vm618_vm1, %v6278_v60  ;;  %v4793_v14 = vadd.f32 %v16120_v49, %v4292_v45  ;;  %v16124_v25 = vld [vmem:[#allocation115_spill] sm:$0xff]  ;;  %v5762_v60 = vld [vmem:[#allocation4 + $0x13a] sm:$0xff]  ;;  %v14190_v10 = vpack.c.bf16 %v5333_v56, %v5332_v53 }
 0xa6a   :  { %9220 = vmatmul.msk.bf16.gmra.mxu3 %vm618_vm1, %v14158_v50  ;;  %9380 = vmatmul.msk.bf16.gmra.mxu2 %vm618_vm1, %v13933_v59  ;;  %v4295_v59 = vadd.f32 %v13593_v29, %v16123_v20  ;;  %v6233_v45 = vld [vmem:[#allocation4 + $0x210] sm:$0xff]  ;;  %v6234_v49 = vld [vmem:[#allocation4 + $0x218] sm:$0xff] }
 0xa6b   :  { %v5251_v6 = vadd.f32 %v16124_v25, %v4793_v14  ;;  %v6279_v20 = vpack.c.bf16 %v6234_v49, %v6233_v45  ;;  %v16126_v14 = vld [vmem:[#allocation58_spill] sm:$0xff] }
 0xa6d   :  { %v5599_v24 = vpop.f32.mrf.mxu3 }
 0xa6e   :  { %v14171_v48 = vadd.f32 %v5599_v24, %v5250_v2  ;;  %v5989_v3 = vpop.f32.mrf.mxu0  ;;  %v5763_v2 = vld [vmem:[#allocation4 + $0x142] sm:$0xff]  ;;  %v14200_v25 = vpop.f32.mrf.mxu1 }
 0xa6f   :  { %v14175_v8 = vadd.f32 %v5989_v3, %v13729_v27  ;;  %v16125_v3 = vld [vmem:[#allocation117_spill] sm:$0xff]  ;;  %v5814_v29 = vpack.c.bf16 %v5763_v2, %v5762_v60  ;;  %16127 = vst [vmem:[#allocation85_spill] sm:$0xff] %v14200_v25  ;;  %v6236_v25 = vld [vmem:[#allocation4 + $0x230] sm:$0xff] }
 0xa70   :  { %v4794_v12 = vadd.f32 %v16125_v3, %v4295_v59  ;;  %v4297_v59 = vadd.f32 %v13614_v54, %v16126_v14  ;;  %v16130_v2 = vld [vmem:[#allocation121_spill] sm:$0xff]  ;;  %v16132_v3 = vld [vmem:[#allocation123_spill] sm:$0xff] }
 0xa71   :  { %v5334_v14 = vld [vmem:[#allocation4 + $0x2d1] sm:$0xff] }
 0xa72   :  { %v4795_v45 = vadd.f32 %v16130_v2, %v4297_v59 }
 0xa74   :  { %v5253_v54 = vadd.f32 %v16132_v3, %v4795_v45 }
 0xa75   :  { %v5601_v41 = vpop.f32.mrf.mxu3 }
 0xa76   :  { %v14184_v24 = vadd.f32 %v5601_v41, %v5251_v6  ;;  %v5992_v27 = vpop.f32.mrf.mxu0  ;;  %v14203_v41 = vpop.f32.mrf.mxu2 }
 0xa77   :  { %v14188_v51 = vadd.f32 %v5992_v27, %v13753_v5  ;;  %v16128_v5 = vld [vmem:[#allocation119_spill] sm:$0xff]  ;;  %16129 = vst [vmem:[#allocation34_spill] sm:$0xff] %v14203_v41  ;;  %v16131_v27 = vld [vmem:[#allocation62_spill] sm:$0xff]  ;;  %v14214_v41 = vpop.f32.mrf.mxu1 }
 0xa78   :  { %v5252_v6 = vadd.f32 %v16128_v5, %v4794_v12  ;;  %v5335_v12 = vld [vmem:[#allocation4 + $0x2d9] sm:$0xff]  ;;  %16133 = vst [vmem:[#allocation136_spill] sm:$0xff] %v14214_v41 }
 0xa79   :  { %9263 = vmatmul.msk.bf16.gmra.mxu0 %vm618_vm1, %v5814_v29  ;;  %9325 = vmatmul.msk.bf16.gmra.mxu1 %vm618_vm1, %v6279_v20  ;;  %v5764_v29 = vld [vmem:[#allocation4 + $0x152] sm:$0xff]  ;;  %v5765_v5 = vld [vmem:[#allocation4 + $0x15a] sm:$0xff]  ;;  %v14224_v45 = vpack.c.bf16 %v5335_v12, %v5334_v14 }
 0xa7a   :  { %9221 = vmatmul.msk.bf16.gmra.mxu3 %vm618_vm1, %v14190_v10  ;;  %9381 = vmatmul.msk.bf16.gmra.mxu2 %vm618_vm1, %v13965_v18  ;;  %v4300_v18 = vadd.f32 %v13626_v47, %v16131_v27  ;;  %v5815_v27 = vpack.c.bf16 %v5765_v5, %v5764_v29  ;;  %v16143_v41 = vld [vmem:[#allocation133_spill] sm:$0xff] }
 0xa7d   :  { %v5604_v60 = vpop.f32.mrf.mxu3 }
 0xa7e   :  { %v14205_v53 = vadd.f32 %v5604_v60, %v5252_v6  ;;  %v5994_v56 = vpop.f32.mrf.mxu0  ;;  %v6235_v60 = vld [vmem:[#allocation4 + $0x228] sm:$0xff]  ;;  %v14218_v59 = vpop.f32.mrf.mxu2 }
 0xa7f   :  { %v14209_v49 = vadd.f32 %v5994_v56, %v13765_v57  ;;  %16134 = vst [vmem:[#allocation87_spill] sm:$0xff] %v14218_v59  ;;  %v16135_v56 = vld [vmem:[#allocation125_spill] sm:$0xff]  ;;  %v6280_v3 = vpack.c.bf16 %v6236_v25, %v6235_v60  ;;  %v14238_v5 = vpop.f32.mrf.mxu1 }
 0xa80   :  { %v4796_v2 = vadd.f32 %v16135_v56, %v4300_v18  ;;  %v16138_v25 = vld [vmem:[#allocation129_spill] sm:$0xff]  ;;  %16139 = vst [vmem:[#allocation89_spill] sm:$0xff] %v14238_v5 }
 0xa85   :  { %v5606_v20 = vpop.f32.mrf.mxu3 }
 0xa86   :  { %v14216_v6 = vadd.f32 %v5606_v20, %v5253_v54  ;;  %v5997_v57 = vpop.f32.mrf.mxu0  ;;  %v16136_v54 = vld [vmem:[#allocation66_spill] sm:$0xff]  ;;  %v16137_v20 = vld [vmem:[#allocation127_spill] sm:$0xff]  ;;  %v14243_v56 = vpop.f32.mrf.mxu2 }
 0xa87   :  { %v14222_v47 = vadd.f32 %v5997_v57, %v13789_v39  ;;  %v4302_v18 = vadd.f32 %v13647_v44, %v16136_v54  ;;  %v5254_v39 = vadd.f32 %v16137_v20, %v4796_v2  ;;  %16140 = vst [vmem:[#allocation37_spill] sm:$0xff] %v14243_v56  ;;  %v5766_v54 = vld [vmem:[#allocation4 + $0x16a] sm:$0xff] }
 0xa88   :  { %v5336_v20 = vld [vmem:[#allocation4 + $0x2e9] sm:$0xff] }
 0xa89   :  { %9264 = vmatmul.msk.bf16.gmra.mxu0 %vm618_vm1, %v5815_v27  ;;  %9326 = vmatmul.msk.bf16.gmra.mxu1 %vm618_vm1, %v6280_v3  ;;  %v4797_v12 = vadd.f32 %v16138_v25, %v4302_v18  ;;  %v16141_v27 = vld [vmem:[#allocation70_spill] sm:$0xff]  ;;  %v16142_v3 = vld [vmem:[#allocation131_spill] sm:$0xff]  ;;  %v6237_v18 = vld [vmem:[#allocation4 + $0x240] sm:$0xff] }
 0xa8a   :  { %9222 = vmatmul.msk.bf16.gmra.mxu3 %vm618_vm1, %v14224_v45  ;;  %9382 = vmatmul.msk.bf16.gmra.mxu2 %vm618_vm1, %v13997_v62  ;;  %v4305_v62 = vadd.f32 %v13659_v58, %v16141_v27  ;;  %v6238_v25 = vld [vmem:[#allocation4 + $0x248] sm:$0xff] }
 0xa8b   :  { %v5255_v44 = vadd.f32 %v16142_v3, %v4797_v12  ;;  %v6281_v27 = vpack.c.bf16 %v6238_v25, %v6237_v18  ;;  %v14256_v12 = vpop.f32.mrf.mxu1  ;;  %v16149_v18 = vld [vmem:[#allocation78_spill] sm:$0xff] }
 0xa8c   :  { %v4310_v25 = vadd.f32 %v13692_v19, %v16149_v18 }
 0xa8d   :  { %v5609_v57 = vpop.f32.mrf.mxu3 }
 0xa8e   :  { %v14235_v14 = vadd.f32 %v5609_v57, %v5254_v39  ;;  %v5999_v29 = vpop.f32.mrf.mxu0  ;;  %v5337_v39 = vld [vmem:[#allocation4 + $0x2f1] sm:$0xff]  ;;  %v14261_v3 = vpop.f32.mrf.mxu2 }
 0xa8f   :  { %v14241_v60 = vadd.f32 %v5999_v29, %v13801_v46  ;;  %v5767_v57 = vld [vmem:[#allocation4 + $0x172] sm:$0xff]  ;;  %v4798_v46 = vadd.f32 %v16143_v41, %v4305_v62  ;;  %v14254_v56 = vpack.c.bf16 %v5337_v39, %v5336_v20  ;;  %16144 = vst [vmem:[#allocation140_spill] sm:$0xff] %v14261_v3  ;;  %v16148_v20 = vld [vmem:[#allocation137_spill] sm:$0xff] }
 0xa90   :  { %v5816_v58 = vpack.c.bf16 %v5767_v57, %v5766_v54  ;;  %v5338_v3 = vld [vmem:[#allocation4 + $0x301] sm:$0xff] }
 0xa95   :  { %v5611_v2 = vpop.f32.mrf.mxu3 }
 0xa96   :  { %v14248_v59 = vadd.f32 %v5611_v2, %v5255_v44  ;;  %v6002_v5 = vpop.f32.mrf.mxu0 }
 0xa97   :  { %v14252_v29 = vadd.f32 %v6002_v5, %v13821_v31  ;;  %v16145_v31 = vld [vmem:[#allocation74_spill] sm:$0xff]  ;;  %v16146_v5 = vld [vmem:[#allocation135_spill] sm:$0xff] }
 0xa98   :  { %v4307_v41 = vadd.f32 %v13680_v30, %v16145_v31  ;;  %v5256_v62 = vadd.f32 %v16146_v5, %v4798_v46  ;;  %v14280_v30 = vpop.f32.mrf.mxu2  ;;  %v5339_v31 = vld [vmem:[#allocation4 + $0x309] sm:$0xff] }
 0xa99   :  { %9265 = vmatmul.msk.bf16.gmra.mxu0 %vm618_vm1, %v5816_v58  ;;  %9327 = vmatmul.msk.bf16.gmra.mxu1 %vm618_vm1, %v6281_v27  ;;  %v14277_v58 = vpop.f32.mrf.mxu1  ;;  %16151 = vst [vmem:[#allocation93_spill] sm:$0xff] %v14280_v30  ;;  %v5768_v5 = vld [vmem:[#allocation4 + $0x182] sm:$0xff]  ;;  %v14288_v18 = vpack.c.bf16 %v5339_v31, %v5338_v3 }
 0xa9a   :  { %9223 = vmatmul.msk.bf16.gmra.mxu3 %vm618_vm1, %v14254_v56  ;;  %9383 = vmatmul.msk.bf16.gmra.mxu2 %vm618_vm1, %v14027_v17  ;;  %v4799_v39 = vadd.f32 %v16148_v20, %v4307_v41  ;;  %v16150_v17 = vld [vmem:[#allocation139_spill] sm:$0xff]  ;;  %v6239_v41 = vld [vmem:[#allocation4 + $0x258] sm:$0xff]  ;;  %v6240_v20 = vld [vmem:[#allocation4 + $0x260] sm:$0xff] }
 0xa9b   :  { %v16163_v30 = vld [vmem:[#allocation149_spill] sm:$0xff] }
 0xa9c   :  { %v5257_v27 = vadd.f32 %v16150_v17, %v4799_v39  ;;  %v6282_v17 = vpack.c.bf16 %v6240_v20, %v6239_v41 }
 0xa9d   :  { %v5614_v44 = vpop.f32.mrf.mxu3 }
 0xa9e   :  { %v14269_v54 = vadd.f32 %v5614_v44, %v5256_v62  ;;  %v6004_v2 = vpop.f32.mrf.mxu0  ;;  %v5769_v62 = vld [vmem:[#allocation4 + $0x18a] sm:$0xff] }
 0xa9f   :  { %v14273_v57 = vadd.f32 %v6004_v2, %v13833_v43  ;;  %v16153_v2 = vld [vmem:[#allocation141_spill] sm:$0xff]  ;;  %v5817_v39 = vpack.c.bf16 %v5769_v62, %v5768_v5 }
 0xaa0   :  { %16147 = vst [vmem:[#allocation91_spill] sm:$0xff] %v14269_v54  ;;  %v4800_v54 = vadd.f32 %v16153_v2, %v4310_v25  ;;  %v9585_v25 = vld [vmem:[%s15503_s9 + $0x100] sm:$0xff]  ;;  %v14306_v41 = vpop.f32.mrf.mxu2 }
 0xaa1   :  { %7345 = vmatpush.bf16.msrb.mxu3 %v9585_v25  ;;  %v14302_v5 = vpop.f32.mrf.mxu1  ;;  %16158 = vst [vmem:[#allocation97_spill] sm:$0xff] %v14306_v41  ;;  %v5340_v25 = vld [vmem:[#allocation4 + $0x319] sm:$0xff] }
 0xaa2   :  { %16156 = vst [vmem:[#allocation144_spill] sm:$0xff] %v14302_v5  ;;  %v5771_v5 = vld [vmem:[#allocation4 + $0x1d2] sm:$0xff] }
 0xaa5   :  { %v5616_v46 = vpop.f32.mrf.mxu3 }
 0xaa6   :  { %v14282_v44 = vadd.f32 %v5616_v46, %v5257_v27  ;;  %v6007_v43 = vpop.f32.mrf.mxu0  ;;  %v16155_v27 = vld [vmem:[#allocation143_spill] sm:$0xff] }
 0xaa7   :  { %v14286_v19 = vadd.f32 %v6007_v43, %v13853_v38  ;;  %v16154_v38 = vld [vmem:[#allocation82_spill] sm:$0xff]  ;;  %v5258_v46 = vadd.f32 %v16155_v27, %v4800_v54  ;;  %v16159_v43 = vld [vmem:[#allocation145_spill] sm:$0xff] }
 0xaa8   :  { %16152 = vst [vmem:[#allocation40_spill] sm:$0xff] %v14282_v44  ;;  %v4312_v3 = vadd.f32 %v13713_v32, %v16154_v38  ;;  %v16161_v32 = vld [vmem:[#allocation147_spill] sm:$0xff]  ;;  %v5341_v44 = vld [vmem:[#allocation4 + $0x321] sm:$0xff] }
 0xaa9   :  { %9266 = vmatmul.msk.bf16.gmra.mxu0 %vm618_vm1, %v5817_v39  ;;  %9328 = vmatmul.msk.bf16.gmra.mxu1 %vm618_vm1, %v6282_v17  ;;  %v16160_v39 = vld [vmem:[#allocation86_spill] sm:$0xff] }
 0xaaa   :  { %9224 = vmatmul.msk.bf16.gmra.mxu3 %vm618_vm1, %v14288_v18  ;;  %9384 = vmatmul.msk.bf16.gmra.mxu2 %vm618_vm1, %v14063_v28  ;;  %v4801_v28 = vadd.f32 %v16159_v43, %v4312_v3  ;;  %v4315_v17 = vadd.f32 %v13731_v11, %v16160_v39  ;;  %v5770_v54 = vld [vmem:[#allocation4 + $0x1ca] sm:$0xff]  ;;  %v14318_v43 = vpop.f32.mrf.mxu1  ;;  %v14323_v11 = vpack.c.bf16 %v5341_v44, %v5340_v25 }
 0xaac   :  { %v5259_v38 = vadd.f32 %v16161_v32, %v4801_v28  ;;  %v4802_v3 = vadd.f32 %v16163_v30, %v4315_v17  ;;  %v14325_v28 = vpop.f32.mrf.mxu2  ;;  %v16164_v30 = vld [vmem:[#allocation90_spill] sm:$0xff] }
 0xaad   :  { %v5619_v31 = vpop.f32.mrf.mxu3 }
 0xaae   :  { %v14304_v62 = vadd.f32 %v5619_v31, %v5258_v46  ;;  %v6009_v20 = vpop.f32.mrf.mxu0  ;;  %v6241_v31 = vld [vmem:[#allocation4 + $0x270] sm:$0xff] }
 0xaaf   :  { %v14310_v2 = vadd.f32 %v6009_v20, %v13865_v55  ;;  %v5818_v20 = vpack.c.bf16 %v5771_v5, %v5770_v54 }
 0xab0   :  { %16157 = vst [vmem:[#allocation95_spill] sm:$0xff] %v14304_v62  ;;  %v6242_v62 = vld [vmem:[#allocation4 + $0x278] sm:$0xff] }
 0xab1   :  { %v6283_v39 = vpack.c.bf16 %v6242_v62, %v6241_v31  ;;  %v16167_v62 = vld [vmem:[#allocation153_spill] sm:$0xff]  ;;  %v16169_v31 = vld [vmem:[#allocation94_spill] sm:$0xff] }
 0xab4   :  { %v14344_v25 = vpop.f32.mrf.mxu2 }
 0xab5   :  { %v5621_v27 = vpop.f32.mrf.mxu3  ;;  %16168 = vst [vmem:[#allocation99_spill] sm:$0xff] %v14344_v25 }
 0xab6   :  { %v14315_v46 = vadd.f32 %v5621_v27, %v5259_v38  ;;  %v6012_v41 = vpop.f32.mrf.mxu0  ;;  %v14342_v27 = vpop.f32.mrf.mxu1 }
 0xab7   :  { %v14321_v55 = vadd.f32 %v6012_v41, %v13880_v40  ;;  %v4317_v40 = vadd.f32 %v13755_v13, %v16164_v30  ;;  %v16165_v41 = vld [vmem:[#allocation151_spill] sm:$0xff] }
 0xab8   :  { %16162 = vst [vmem:[#allocation43_spill] sm:$0xff] %v14315_v46  ;;  %v5260_v44 = vadd.f32 %v16165_v41, %v4802_v3  ;;  %v5342_v30 = vld [vmem:[#allocation4 + $0x331] sm:$0xff]  ;;  %v5343_v41 = vld [vmem:[#allocation4 + $0x339] sm:$0xff] }
 0xab9   :  { %9267 = vmatmul.msk.bf16.gmra.mxu0 %vm618_vm1, %v5818_v20  ;;  %9329 = vmatmul.msk.bf16.gmra.mxu1 %vm618_vm1, %v6283_v39  ;;  %v4803_v38 = vadd.f32 %v16167_v62, %v4317_v40  ;;  %v16170_v20 = vld [vmem:[#allocation155_spill] sm:$0xff]  ;;  %v5772_v39 = vld [vmem:[#allocation4 + $0x1e2] sm:$0xff]  ;;  %v14355_v25 = vpack.c.bf16 %v5343_v41, %v5342_v30 }
 0xaba   :  { %9225 = vmatmul.msk.bf16.gmra.mxu3 %vm618_vm1, %v14323_v11  ;;  %9385 = vmatmul.msk.bf16.gmra.mxu2 %vm618_vm1, %v14093_v34  ;;  %v4320_v34 = vadd.f32 %v13767_v37, %v16169_v31  ;;  %v6243_v40 = vld [vmem:[#allocation4 + $0x288] sm:$0xff]  ;;  %v6244_v62 = vld [vmem:[#allocation4 + $0x290] sm:$0xff] }
 0xabb   :  { %v5261_v13 = vadd.f32 %v16170_v20, %v4803_v38  ;;  %v6284_v31 = vpack.c.bf16 %v6244_v62, %v6243_v40  ;;  %v16173_v38 = vld [vmem:[#allocation98_spill] sm:$0xff] }
 0xabd   :  { %v5624_v17 = vpop.f32.mrf.mxu3 }
 0xabe   :  { %v14336_v5 = vadd.f32 %v5624_v17, %v5260_v44  ;;  %v6014_v32 = vpop.f32.mrf.mxu0  ;;  %v5773_v44 = vld [vmem:[#allocation4 + $0x1ea] sm:$0xff]  ;;  %v14365_v20 = vpop.f32.mrf.mxu1 }
 0xabf   :  { %v14340_v54 = vadd.f32 %v6014_v32, %v13892_v52  ;;  %v16172_v32 = vld [vmem:[#allocation156_spill] sm:$0xff]  ;;  %v5819_v37 = vpack.c.bf16 %v5773_v44, %v5772_v39  ;;  %16174 = vst [vmem:[#allocation46_spill] sm:$0xff] %v14365_v20  ;;  %v16178_v44 = vld [vmem:[#allocation159_spill] sm:$0xff] }
 0xac0   :  { %16166 = vst [vmem:[#allocation148_spill] sm:$0xff] %v14336_v5  ;;  %v4804_v5 = vadd.f32 %v16172_v32, %v4320_v34  ;;  %v4322_v34 = vadd.f32 %v13791_v1, %v16173_v38  ;;  %v7113_v32 = vld [vmem:[#allocation4 + $0x32] sm:$0xff]  ;;  %v7114_v38 = vld [vmem:[#allocation4 + $0x3a] sm:$0xff] }
 0xac2   :  { %v4805_v40 = vadd.f32 %v16178_v44, %v4322_v34  ;;  %v7177_v44 = vpack.c.bf16 %v7114_v38, %v7113_v32  ;;  %v16187_v32 = vld [vmem:[#allocation162_spill] sm:$0xff]  ;;  %v16189_v38 = vld [vmem:[#allocation92_spill] sm:$0xff] }
 0xac4   :  { %v5263_v1 = vadd.f32 %v13591_v61, %v4805_v40 }
 0xac5   :  { %v5626_v3 = vpop.f32.mrf.mxu3 }
 0xac6   :  { %v14349_v17 = vadd.f32 %v5626_v3, %v5261_v13  ;;  %v6017_v52 = vpop.f32.mrf.mxu0  ;;  %v14368_v3 = vpop.f32.mrf.mxu2 }
 0xac7   :  { %v14353_v46 = vadd.f32 %v6017_v52, %v13912_v9  ;;  %v16175_v9 = vld [vmem:[#allocation158_spill] sm:$0xff]  ;;  %16176 = vst [vmem:[#allocation152_spill] sm:$0xff] %v14368_v3  ;;  %v16225_v3 = vld [vmem:[#allocation172_spill] sm:$0xff] }
 0xac8   :  { %16171 = vst [vmem:[#allocation101_spill] sm:$0xff] %v14349_v17  ;;  %v5262_v13 = vadd.f32 %v16175_v9, %v4804_v5  ;;  %v16179_v52 = vld [vmem:[#allocation102_spill] sm:$0xff]  ;;  %v14379_v9 = vpop.f32.mrf.mxu1 }
 0xac9   :  { %9268 = vmatmul.msk.bf16.gmra.mxu0 %vm618_vm1, %v5819_v37  ;;  %9330 = vmatmul.msk.bf16.gmra.mxu1 %vm618_vm1, %v6284_v31  ;;  %v5774_v31 = vld [vmem:[#allocation4 + $0x1fa] sm:$0xff]  ;;  %v5775_v5 = vld [vmem:[#allocation4 + $0x202] sm:$0xff]  ;;  %16180 = vst [vmem:[#allocation105_spill] sm:$0xff] %v14379_v9 }
 0xaca   :  { %9226 = vmatmul.msk.bf16.gmra.mxu3 %vm618_vm1, %v14355_v25  ;;  %9386 = vmatmul.msk.bf16.gmra.mxu2 %vm618_vm1, %v14126_v22  ;;  %v4325_v22 = vadd.f32 %v13803_v7, %v16179_v52  ;;  %v5820_v61 = vpack.c.bf16 %v5775_v5, %v5774_v31  ;;  %v16183_v52 = vld [vmem:[#allocation106_spill] sm:$0xff] }
 0xacd   :  { %v5629_v39 = vpop.f32.mrf.mxu3 }
 0xace   :  { %v14370_v30 = vadd.f32 %v5629_v39, %v5262_v13  ;;  %v6019_v41 = vpop.f32.mrf.mxu0  ;;  %v6245_v39 = vld [vmem:[#allocation4 + $0x2a0] sm:$0xff]  ;;  %v14383_v34 = vpop.f32.mrf.mxu2 }
 0xacf   :  { %v14374_v62 = vadd.f32 %v6019_v41, %v13924_v33  ;;  %16182 = vst [vmem:[#allocation107_spill] sm:$0xff] %v14383_v34  ;;  %v4806_v41 = vadd.f32 %v13596_v15, %v4325_v22 }
 0xad0   :  { %16177 = vst [vmem:[#allocation103_spill] sm:$0xff] %v14370_v30  ;;  %v6246_v30 = vld [vmem:[#allocation4 + $0x2a8] sm:$0xff]  ;;  %v14400_v5 = vpop.f32.mrf.mxu1 }
 0xad1   :  { %v6285_v40 = vpack.c.bf16 %v6246_v30, %v6245_v39  ;;  %16188 = vst [vmem:[#allocation52_spill] sm:$0xff] %v14400_v5  ;;  %v16195_v5 = vld [vmem:[#allocation164_spill] sm:$0xff] }
 0xad5   :  { %v5631_v37 = vpop.f32.mrf.mxu3 }
 0xad6   :  { %v14381_v13 = vadd.f32 %v5631_v37, %v5263_v1  ;;  %v6022_v33 = vpop.f32.mrf.mxu0  ;;  %v16184_v1 = vld [vmem:[#allocation28_spill] sm:$0xff] }
 0xad7   :  { %v14387_v7 = vadd.f32 %v6022_v33, %v13944_v35  ;;  %v4327_v37 = vadd.f32 %v16184_v1, %v16183_v52  ;;  %v14405_v33 = vpop.f32.mrf.mxu2  ;;  %v7115_v1 = vld [vmem:[#allocation4 + $0x4a] sm:$0xff] }
 0xad8   :  { %16181 = vst [vmem:[#allocation49_spill] sm:$0xff] %v14381_v13  ;;  %v16185_v13 = vld [vmem:[#allocation161_spill] sm:$0xff] }
 0xad9   :  { %9269 = vmatmul.msk.bf16.gmra.mxu0 %vm618_vm1, %v5820_v61  ;;  %9331 = vmatmul.msk.bf16.gmra.mxu1 %vm618_vm1, %v6285_v40  ;;  %v5264_v15 = vadd.f32 %v16185_v13, %v4806_v41  ;;  %v4807_v30 = vadd.f32 %v16187_v32, %v4327_v37  ;;  %16190 = vst [vmem:[#allocation111_spill] sm:$0xff] %v14405_v33  ;;  %v16191_v61 = vld [vmem:[#allocation110_spill] sm:$0xff]  ;;  %v16193_v40 = vld [vmem:[#allocation163_spill] sm:$0xff]  ;;  %v6247_v37 = vld [vmem:[#allocation4 + $0x2b8] sm:$0xff] }
 0xada   :  { %9419 = vmatmul.msk.bf16.vlgmr.msrb.gmra.mxu3 %vm618_vm1, %v7177_v44  ;;  %9387 = vmatmul.msk.bf16.gmra.mxu2 %vm618_vm1, %v14158_v50  ;;  %v16192_v50 = vld [vmem:[#allocation29_spill] sm:$0xff]  ;;  %v5776_v41 = vld [vmem:[#allocation4 + $0x212] sm:$0xff] }
 0xadb   :  { %v4330_v44 = vadd.f32 %v16192_v50, %v16191_v61  ;;  %v5265_v52 = vadd.f32 %v16193_v40, %v4807_v30  ;;  %v6248_v32 = vld [vmem:[#allocation4 + $0x2c0] sm:$0xff]  ;;  %v14416_v50 = vpop.f32.mrf.mxu1 }
 0xadc   :  { %v6286_v61 = vpack.c.bf16 %v6248_v32, %v6247_v37  ;;  %16197 = vst [vmem:[#allocation55_spill] sm:$0xff] %v14416_v50  ;;  %v16201_v40 = vld [vmem:[#allocation165_spill] sm:$0xff]  ;;  %v16205_v37 = vld [vmem:[#allocation118_spill] sm:$0xff]  ;;  %v16206_v32 = vld [vmem:[#allocation11_spill] sm:$0xff] }
 0xadd   :  { %v5634_v22 = vpop.f32.mrf.mxu3  ;;  %v16212_v50 = vld [vmem:[#allocation104_spill] sm:$0xff] }
 0xade   :  { %v14397_v35 = vadd.f32 %v5634_v22, %v5264_v15  ;;  %v6024_v31 = vpop.f32.mrf.mxu0  ;;  %v5777_v15 = vld [vmem:[#allocation4 + $0x21a] sm:$0xff]  ;;  %v7116_v22 = vld [vmem:[#allocation4 + $0x52] sm:$0xff] }
 0xadf   :  { %v14403_v39 = vadd.f32 %v6024_v31, %v16189_v38  ;;  %v4808_v31 = vadd.f32 %v16195_v5, %v4330_v44  ;;  %v16196_v38 = vld [vmem:[#allocation96_spill] sm:$0xff]  ;;  %v5821_v33 = vpack.c.bf16 %v5777_v15, %v5776_v41  ;;  %v7178_v9 = vpack.c.bf16 %v7116_v22, %v7115_v1  ;;  %v14420_v30 = vpop.f32.mrf.mxu2  ;;  %v16199_v5 = vld [vmem:[#allocation114_spill] sm:$0xff] }
 0xae0   :  { %16186 = vst [vmem:[#allocation109_spill] sm:$0xff] %v14397_v35  ;;  %v16200_v44 = vld [vmem:[#allocation72_spill] sm:$0xff]  ;;  %v16203_v15 = vld [vmem:[#allocation166_spill] sm:$0xff] }
 0xae1   :  { %16198 = vst [vmem:[#allocation115_spill] sm:$0xff] %v14420_v30  ;;  %v16204_v22 = vld [vmem:[#allocation100_spill] sm:$0xff]  ;;  %v7117_v30 = vld [vmem:[#allocation4 + $0x62] sm:$0xff] }
 0xae5   :  { %v5636_v13 = vpop.f32.mrf.mxu3 }
 0xae6   :  { %v14410_v35 = vadd.f32 %v5636_v13, %v5265_v52  ;;  %v6027_v17 = vpop.f32.mrf.mxu0  ;;  %v5266_v52 = vadd.f32 %v16201_v40, %v4808_v31  ;;  %v5779_v40 = vld [vmem:[#allocation4 + $0x232] sm:$0xff] }
 0xae7   :  { %v14414_v34 = vadd.f32 %v6027_v17, %v16196_v38  ;;  %v4332_v17 = vadd.f32 %v16200_v44, %v16199_v5  ;;  %v4335_v38 = vadd.f32 %v16206_v32, %v16205_v37  ;;  %v14439_v5 = vpop.f32.mrf.mxu2  ;;  %v5778_v44 = vld [vmem:[#allocation4 + $0x22a] sm:$0xff] }
 0xae8   :  { %16194 = vst [vmem:[#allocation113_spill] sm:$0xff] %v14410_v35  ;;  %v5822_v32 = vpack.c.bf16 %v5779_v40, %v5778_v44 }
 0xae9   :  { %9270 = vmatmul.msk.bf16.gmra.mxu0 %vm618_vm1, %v5821_v33  ;;  %9332 = vmatmul.msk.bf16.gmra.mxu1 %vm618_vm1, %v6286_v61  ;;  %v4809_v33 = vadd.f32 %v16203_v15, %v4332_v17  ;;  %v14436_v61 = vpop.f32.mrf.mxu1  ;;  %16209 = vst [vmem:[#allocation119_spill] sm:$0xff] %v14439_v5  ;;  %v6249_v17 = vld [vmem:[#allocation4 + $0x2d0] sm:$0xff]  ;;  %v6250_v15 = vld [vmem:[#allocation4 + $0x2d8] sm:$0xff] }
 0xaea   :  { %9420 = vmatmul.msk.bf16.gmra.mxu3 %vm618_vm1, %v7178_v9  ;;  %9388 = vmatmul.msk.bf16.gmra.mxu2 %vm618_vm1, %v14190_v10  ;;  %16207 = vst [vmem:[#allocation58_spill] sm:$0xff] %v14436_v61  ;;  %v16208_v10 = vld [vmem:[#allocation167_spill] sm:$0xff] }
 0xaeb   :  { %v5267_v35 = vadd.f32 %v16208_v10, %v4809_v33  ;;  %v6287_v33 = vpack.c.bf16 %v6250_v15, %v6249_v17  ;;  %v16214_v10 = vld [vmem:[#allocation36_spill] sm:$0xff]  ;;  %v5781_v5 = vld [vmem:[#allocation4 + $0x24a] sm:$0xff] }
 0xaec   :  { %v16220_v17 = vld [vmem:[#allocation108_spill] sm:$0xff] }
 0xaed   :  { %v5639_v1 = vpop.f32.mrf.mxu3 }
 0xaee   :  { %v14428_v13 = vadd.f32 %v5639_v1, %v5266_v52  ;;  %v6029_v41 = vpop.f32.mrf.mxu0  ;;  %v7118_v52 = vld [vmem:[#allocation4 + $0x6a] sm:$0xff] }
 0xaef   :  { %v14432_v9 = vadd.f32 %v6029_v41, %v16204_v22  ;;  %v16211_v22 = vld [vmem:[#allocation168_spill] sm:$0xff]  ;;  %v7179_v61 = vpack.c.bf16 %v7118_v52, %v7117_v30  ;;  %v14459_v30 = vpop.f32.mrf.mxu2  ;;  %v16219_v52 = vld [vmem:[#allocation170_spill] sm:$0xff] }
 0xaf0   :  { %16202 = vst [vmem:[#allocation117_spill] sm:$0xff] %v14428_v13  ;;  %v4810_v13 = vadd.f32 %v16211_v22, %v4335_v38 }
 0xaf1   :  { %16218 = vst [vmem:[#allocation125_spill] sm:$0xff] %v14459_v30 }
 0xaf5   :  { %v5641_v31 = vpop.f32.mrf.mxu3 }
 0xaf6   :  { %v14441_v1 = vadd.f32 %v5641_v31, %v5267_v35  ;;  %v6032_v41 = vpop.f32.mrf.mxu0  ;;  %v16213_v35 = vld [vmem:[#allocation122_spill] sm:$0xff] }
 0xaf7   :  { %v14445_v37 = vadd.f32 %v6032_v41, %v16212_v50  ;;  %v4337_v31 = vadd.f32 %v16214_v10, %v16213_v35  ;;  %v14455_v50 = vpop.f32.mrf.mxu1  ;;  %v16221_v41 = vld [vmem:[#allocation126_spill] sm:$0xff]  ;;  %v7119_v10 = vld [vmem:[#allocation4 + $0x7a] sm:$0xff] }
 0xaf8   :  { %16210 = vst [vmem:[#allocation121_spill] sm:$0xff] %v14441_v1  ;;  %v16215_v1 = vld [vmem:[#allocation169_spill] sm:$0xff] }
 0xaf9   :  { %9271 = vmatmul.msk.bf16.gmra.mxu0 %vm618_vm1, %v5822_v32  ;;  %9333 = vmatmul.msk.bf16.gmra.mxu1 %vm618_vm1, %v6287_v33  ;;  %v5268_v38 = vadd.f32 %v16215_v1, %v4810_v13  ;;  %16216 = vst [vmem:[#allocation62_spill] sm:$0xff] %v14455_v50  ;;  %v16223_v33 = vld [vmem:[#allocation171_spill] sm:$0xff]  ;;  %v5780_v1 = vld [vmem:[#allocation4 + $0x242] sm:$0xff] }
 0xafa   :  { %9421 = vmatmul.msk.bf16.gmra.mxu3 %vm618_vm1, %v7179_v61  ;;  %9389 = vmatmul.msk.bf16.gmra.mxu2 %vm618_vm1, %v14224_v45  ;;  %v4811_v61 = vadd.f32 %v16219_v52, %v4337_v31  ;;  %v16222_v45 = vld [vmem:[#allocation38_spill] sm:$0xff] }
 0xafb   :  { %v4340_v32 = vadd.f32 %v16222_v45, %v16221_v41  ;;  %v7120_v50 = vld [vmem:[#allocation4 + $0x82] sm:$0xff]  ;;  %v5823_v41 = vpack.c.bf16 %v5781_v5, %v5780_v1  ;;  %v16234_v1 = vld [vmem:[#allocation116_spill] sm:$0xff] }
 0xafc   :  { %v5269_v35 = vadd.f32 %v16223_v33, %v4811_v61  ;;  %v7180_v45 = vpack.c.bf16 %v7120_v50, %v7119_v10  ;;  %v14476_v61 = vpop.f32.mrf.mxu2  ;;  %v16233_v10 = vld [vmem:[#allocation174_spill] sm:$0xff] }
 0xafd   :  { %v5644_v22 = vpop.f32.mrf.mxu3  ;;  %v4812_v31 = vadd.f32 %v16225_v3, %v4340_v32  ;;  %16228 = vst [vmem:[#allocation129_spill] sm:$0xff] %v14476_v61  ;;  %v16229_v3 = vld [vmem:[#allocation130_spill] sm:$0xff]  ;;  %v16230_v32 = vld [vmem:[#allocation84_spill] sm:$0xff]  ;;  %v16240_v61 = vld [vmem:[#allocation175_spill] sm:$0xff] }
 0xafe   :  { %v14457_v44 = vadd.f32 %v5644_v22, %v5268_v38  ;;  %v6034_v40 = vpop.f32.mrf.mxu0  ;;  %v6251_v22 = vld [vmem:[#allocation4 + $0x2e8] sm:$0xff] }
 0xaff   :  { %v14463_v15 = vadd.f32 %v6034_v40, %v16220_v17  ;;  %v14471_v52 = vpop.f32.mrf.mxu1  ;;  %v16227_v40 = vld [vmem:[#allocation112_spill] sm:$0xff] }
 0xb00   :  { %16217 = vst [vmem:[#allocation123_spill] sm:$0xff] %v14457_v44  ;;  %v6252_v44 = vld [vmem:[#allocation4 + $0x2f0] sm:$0xff] }
 0xb01   :  { %16226 = vst [vmem:[#allocation127_spill] sm:$0xff] %v14471_v52  ;;  %v6288_v33 = vpack.c.bf16 %v6252_v44, %v6251_v22 }
 0xb05   :  { %v5646_v13 = vpop.f32.mrf.mxu3 }
 0xb06   :  { %v14468_v38 = vadd.f32 %v5646_v13, %v5269_v35  ;;  %v6037_v30 = vpop.f32.mrf.mxu0  ;;  %v4342_v35 = vadd.f32 %v16230_v32, %v16229_v3  ;;  %v16231_v13 = vld [vmem:[#allocation173_spill] sm:$0xff]  ;;  %v7121_v32 = vld [vmem:[#allocation4 + $0x92] sm:$0xff] }
 0xb07   :  { %v14474_v17 = vadd.f32 %v6037_v30, %v16227_v40  ;;  %v5270_v30 = vadd.f32 %v16231_v13, %v4812_v31  ;;  %v5782_v13 = vld [vmem:[#allocation4 + $0x25a] sm:$0xff] }
 0xb08   :  { %16224 = vst [vmem:[#allocation66_spill] sm:$0xff] %v14468_v38  ;;  %v4813_v44 = vadd.f32 %v16233_v10, %v4342_v35  ;;  %v6253_v35 = vld [vmem:[#allocation4 + $0x300] sm:$0xff]  ;;  %v6254_v10 = vld [vmem:[#allocation4 + $0x308] sm:$0xff] }
 0xb09   :  { %9272 = vmatmul.msk.bf16.gmra.mxu0 %vm618_vm1, %v5823_v41  ;;  %9334 = vmatmul.msk.bf16.gmra.mxu1 %vm618_vm1, %v6288_v33  ;;  %v14492_v41 = vpop.f32.mrf.mxu1  ;;  %v16238_v33 = vld [vmem:[#allocation134_spill] sm:$0xff] }
 0xb0a   :  { %9422 = vmatmul.msk.bf16.gmra.mxu3 %vm618_vm1, %v7180_v45  ;;  %9390 = vmatmul.msk.bf16.gmra.mxu2 %vm618_vm1, %v14254_v56  ;;  %16236 = vst [vmem:[#allocation133_spill] sm:$0xff] %v14492_v41  ;;  %v14494_v45 = vpop.f32.mrf.mxu2  ;;  %v16239_v56 = vld [vmem:[#allocation26_spill] sm:$0xff]  ;;  %v5271_v3 = vadd.f32 %v16240_v61, %v4813_v44  ;;  %v16245_v44 = vld [vmem:[#allocation45_spill] sm:$0xff] }
 0xb0b   :  { %16237 = vst [vmem:[#allocation74_spill] sm:$0xff] %v14494_v45  ;;  %v4345_v38 = vadd.f32 %v16239_v56, %v16238_v33  ;;  %v16243_v41 = vld [vmem:[#allocation18_spill] sm:$0xff]  ;;  %v6289_v33 = vpack.c.bf16 %v6254_v10, %v6253_v35 }
 0xb0c   :  { %v16244_v61 = vld [vmem:[#allocation138_spill] sm:$0xff] }
 0xb0d   :  { %v5649_v40 = vpop.f32.mrf.mxu3  ;;  %v4347_v56 = vadd.f32 %v16245_v44, %v16244_v61  ;;  %v16249_v35 = vld [vmem:[#allocation142_spill] sm:$0xff]  ;;  %v5784_v44 = vld [vmem:[#allocation4 + $0x272] sm:$0xff] }
 0xb0e   :  { %v14486_v5 = vadd.f32 %v5649_v40, %v5270_v30  ;;  %v6039_v50 = vpop.f32.mrf.mxu0  ;;  %v5783_v30 = vld [vmem:[#allocation4 + $0x262] sm:$0xff]  ;;  %v7122_v40 = vld [vmem:[#allocation4 + $0x9a] sm:$0xff] }
 0xb0f   :  { %v14490_v22 = vadd.f32 %v6039_v50, %v16234_v1  ;;  %v16242_v1 = vld [vmem:[#allocation176_spill] sm:$0xff]  ;;  %v5824_v45 = vpack.c.bf16 %v5783_v30, %v5782_v13  ;;  %v7181_v20 = vpack.c.bf16 %v7122_v40, %v7121_v32  ;;  %v16248_v30 = vld [vmem:[#allocation27_spill] sm:$0xff] }
 0xb10   :  { %16232 = vst [vmem:[#allocation70_spill] sm:$0xff] %v14486_v5  ;;  %v4814_v52 = vadd.f32 %v16242_v1, %v4345_v38  ;;  %v16246_v38 = vld [vmem:[#allocation23_spill] sm:$0xff] }
 0xb11   :  { %16235 = vst [vmem:[#allocation131_spill] sm:$0xff] %v14490_v22 }
 0xb15   :  { %v5651_v31 = vpop.f32.mrf.mxu3 }
 0xb16   :  { %v14499_v5 = vadd.f32 %v5651_v31, %v5271_v3  ;;  %v6042_v50 = vpop.f32.mrf.mxu0  ;;  %v14512_v3 = vpop.f32.mrf.mxu1 }
 0xb17   :  { %v14503_v22 = vadd.f32 %v6042_v50, %v16243_v41  ;;  %v5272_v41 = vadd.f32 %v16246_v38, %v4814_v52  ;;  %v14515_v31 = vpop.f32.mrf.mxu2  ;;  %v16251_v50 = vld [vmem:[#allocation7_spill] sm:$0xff]  ;;  %v5785_v52 = vld [vmem:[#allocation4 + $0x27a] sm:$0xff] }
 0xb18   :  { %16241 = vst [vmem:[#allocation135_spill] sm:$0xff] %v14499_v5  ;;  %v7124_v38 = vld [vmem:[#allocation4 + $0xb2] sm:$0xff] }
 0xb19   :  { %9273 = vmatmul.msk.bf16.gmra.mxu0 %vm618_vm1, %v5824_v45  ;;  %9335 = vmatmul.msk.bf16.gmra.mxu1 %vm618_vm1, %v6289_v33  ;;  %v7123_v33 = vld [vmem:[#allocation4 + $0xaa] sm:$0xff] }
 0xb1a   :  { %9423 = vmatmul.msk.bf16.gmra.mxu3 %vm618_vm1, %v7181_v20  ;;  %9391 = vmatmul.msk.bf16.gmra.mxu2 %vm618_vm1, %v14288_v18  ;;  %v4815_v20 = vadd.f32 %v16248_v30, %v4347_v56  ;;  %v16250_v18 = vld [vmem:[#allocation48_spill] sm:$0xff] }
 0xb1b   :  { %v4350_v10 = vadd.f32 %v16250_v18, %v16249_v35  ;;  %v7182_v18 = vpack.c.bf16 %v7124_v38, %v7123_v33  ;;  %v16260_v33 = vld [vmem:[#allocation24_spill] sm:$0xff] }
 0xb1c   :  { %v5273_v1 = vadd.f32 %v16251_v50, %v4815_v20  ;;  %v5825_v20 = vpack.c.bf16 %v5785_v52, %v5784_v44 }
 0xb1d   :  { %v5654_v32 = vpop.f32.mrf.mxu3 }
 0xb1e   :  { %v14517_v13 = vadd.f32 %v5654_v32, %v5272_v41  ;;  %v6044_v45 = vpop.f32.mrf.mxu0  ;;  %v14526_v5 = vpop.f32.mrf.mxu1  ;;  %v6255_v32 = vld [vmem:[#allocation4 + $0x318] sm:$0xff] }
 0xb1f   :  { %v14521_v40 = vadd.f32 %v6044_v45, %v14087_v26  ;;  %16252 = vst [vmem:[#allocation78_spill] sm:$0xff] %v14526_v5  ;;  %v14530_v56 = vpop.f32.mrf.mxu2  ;;  %v16255_v45 = vld [vmem:[#allocation60_spill] sm:$0xff] }
 0xb20   :  { %16247 = vst [vmem:[#allocation137_spill] sm:$0xff] %v14517_v13  ;;  %v6256_v13 = vld [vmem:[#allocation4 + $0x320] sm:$0xff]  ;;  %v4816_v30 = vadd.f32 %v16255_v45, %v4350_v10 }
 0xb21   :  { %16254 = vst [vmem:[#allocation141_spill] sm:$0xff] %v14530_v56  ;;  %v6290_v50 = vpack.c.bf16 %v6256_v13, %v6255_v32  ;;  %v16258_v56 = vld [vmem:[#allocation19_spill] sm:$0xff] }
 0xb22   :  { %v5274_v10 = vadd.f32 %v16258_v56, %v4816_v30  ;;  %v5786_v30 = vld [vmem:[#allocation4 + $0x28a] sm:$0xff] }
 0xb25   :  { %v5656_v61 = vpop.f32.mrf.mxu3 }
 0xb26   :  { %v14528_v41 = vadd.f32 %v5656_v61, %v5273_v1  ;;  %v6047_v26 = vpop.f32.mrf.mxu0  ;;  %v16256_v1 = vld [vmem:[#allocation146_spill] sm:$0xff]  ;;  %v16257_v61 = vld [vmem:[#allocation51_spill] sm:$0xff]  ;;  %v14550_v38 = vpop.f32.mrf.mxu1 }
 0xb27   :  { %v14534_v35 = vadd.f32 %v6047_v26, %v14107_v23  ;;  %16261 = vst [vmem:[#allocation143_spill] sm:$0xff] %v14550_v38  ;;  %v14552_v32 = vpop.f32.mrf.mxu2  ;;  %v16263_v26 = vld [vmem:[#allocation150_spill] sm:$0xff] }
 0xb28   :  { %16253 = vst [vmem:[#allocation139_spill] sm:$0xff] %v14528_v41  ;;  %v4352_v41 = vadd.f32 %v16257_v61, %v16256_v1  ;;  %v7125_v1 = vld [vmem:[#allocation4 + $0xc2] sm:$0xff]  ;;  %v5787_v61 = vld [vmem:[#allocation4 + $0x292] sm:$0xff] }
 0xb29   :  { %9274 = vmatmul.msk.bf16.gmra.mxu0 %vm618_vm1, %v5825_v20  ;;  %9336 = vmatmul.msk.bf16.gmra.mxu1 %vm618_vm1, %v6290_v50  ;;  %16262 = vst [vmem:[#allocation145_spill] sm:$0xff] %v14552_v32  ;;  %v5826_v32 = vpack.c.bf16 %v5787_v61, %v5786_v30  ;;  %v16274_v61 = vld [vmem:[#allocation9_spill] sm:$0xff] }
 0xb2a   :  { %9424 = vmatmul.msk.bf16.gmra.mxu3 %vm618_vm1, %v7182_v18  ;;  %9392 = vmatmul.msk.bf16.gmra.mxu2 %vm618_vm1, %v14323_v11  ;;  %v4817_v13 = vadd.f32 %v16260_v33, %v4352_v41  ;;  %v16264_v11 = vld [vmem:[#allocation54_spill] sm:$0xff]  ;;  %v16265_v18 = vld [vmem:[#allocation8_spill] sm:$0xff]  ;;  %v6257_v41 = vld [vmem:[#allocation4 + $0x330] sm:$0xff] }
 0xb2b   :  { %v4355_v20 = vadd.f32 %v16264_v11, %v16263_v26  ;;  %v6258_v33 = vld [vmem:[#allocation4 + $0x338] sm:$0xff] }
 0xb2c   :  { %v5275_v50 = vadd.f32 %v16265_v18, %v4817_v13  ;;  %v6291_v26 = vpack.c.bf16 %v6258_v33, %v6257_v41  ;;  %v16271_v18 = vld [vmem:[#allocation57_spill] sm:$0xff] }
 0xb2d   :  { %v5659_v45 = vpop.f32.mrf.mxu3  ;;  %v16275_v41 = vld [vmem:[#allocation157_spill] sm:$0xff] }
 0xb2e   :  { %v14544_v23 = vadd.f32 %v5659_v45, %v5274_v10  ;;  %v6049_v44 = vpop.f32.mrf.mxu0  ;;  %v7126_v10 = vld [vmem:[#allocation4 + $0xca] sm:$0xff]  ;;  %v14565_v13 = vpop.f32.mrf.mxu1  ;;  %v16276_v33 = vld [vmem:[#allocation61_spill] sm:$0xff] }
 0xb2f   :  { %v14548_v52 = vadd.f32 %v6049_v44, %v14120_v63  ;;  %v16267_v44 = vld [vmem:[#allocation64_spill] sm:$0xff]  ;;  %v7183_v5 = vpack.c.bf16 %v7126_v10, %v7125_v1  ;;  %16268 = vst [vmem:[#allocation147_spill] sm:$0xff] %v14565_v13  ;;  %v14567_v11 = vpop.f32.mrf.mxu2 }
 0xb30   :  { %16259 = vst [vmem:[#allocation82_spill] sm:$0xff] %v14544_v23  ;;  %v4818_v23 = vadd.f32 %v16267_v44, %v4355_v20  ;;  %v16270_v20 = vld [vmem:[#allocation154_spill] sm:$0xff]  ;;  %v16277_v44 = vld [vmem:[#allocation68_spill] sm:$0xff] }
 0xb31   :  { %16269 = vst [vmem:[#allocation149_spill] sm:$0xff] %v14567_v11  ;;  %v5788_v11 = vld [vmem:[#allocation4 + $0x2a2] sm:$0xff] }
 0xb35   :  { %v5661_v56 = vpop.f32.mrf.mxu3 }
 0xb36   :  { %v14557_v45 = vadd.f32 %v5661_v56, %v5275_v50  ;;  %v6052_v63 = vpop.f32.mrf.mxu0  ;;  %v16272_v50 = vld [vmem:[#allocation5_spill] sm:$0xff] }
 0xb37   :  { %v14561_v38 = vadd.f32 %v6052_v63, %v14139_v16  ;;  %v4357_v16 = vadd.f32 %v16271_v18, %v16270_v20  ;;  %v5276_v56 = vadd.f32 %v16272_v50, %v4818_v23  ;;  %v4360_v63 = vadd.f32 %v16276_v33, %v16275_v41  ;;  %v5789_v20 = vld [vmem:[#allocation4 + $0x2aa] sm:$0xff]  ;;  %v7128_v18 = vld [vmem:[#allocation4 + $0xe2] sm:$0xff] }
 0xb38   :  { %16266 = vst [vmem:[#allocation86_spill] sm:$0xff] %v14557_v45  ;;  %v16282_v33 = vld [vmem:[#allocation10_spill] sm:$0xff] }
 0xb39   :  { %9275 = vmatmul.msk.bf16.gmra.mxu0 %vm618_vm1, %v5826_v32  ;;  %9337 = vmatmul.msk.bf16.gmra.mxu1 %vm618_vm1, %v6291_v26 }
 0xb3a   :  { %9425 = vmatmul.msk.bf16.gmra.mxu3 %vm618_vm1, %v7183_v5  ;;  %9393 = vmatmul.msk.bf16.gmra.mxu2 %vm618_vm1, %v14355_v25  ;;  %v4819_v5 = vadd.f32 %v16274_v61, %v4357_v16  ;;  %v7127_v25 = vld [vmem:[#allocation4 + $0xda] sm:$0xff] }
 0xb3b   :  { %v16280_v61 = vld [vmem:[#allocation160_spill] sm:$0xff] }
 0xb3c   :  { %v5277_v26 = vadd.f32 %v16277_v44, %v4819_v5  ;;  %v16281_v5 = vld [vmem:[#allocation65_spill] sm:$0xff] }
 0xb3d   :  { %v5664_v1 = vpop.f32.mrf.mxu3  ;;  %v4362_v41 = vadd.f32 %v16281_v5, %v16280_v61  ;;  %v16288_v5 = vld [vmem:[#allocation76_spill] sm:$0xff] }
 0xb3e   :  { %v14575_v30 = vadd.f32 %v5664_v1, %v5276_v56  ;;  %v6054_v32 = vpop.f32.mrf.mxu0  ;;  %v16279_v56 = vld [vmem:[#allocation30_spill] sm:$0xff] }
 0xb3f   :  { %v14579_v10 = vadd.f32 %v6054_v32, %v14150_v4  ;;  %v4820_v1 = vadd.f32 %v16279_v56, %v4360_v63  ;;  %v5827_v4 = vpack.c.bf16 %v5789_v20, %v5788_v11  ;;  %v7184_v32 = vpack.c.bf16 %v7128_v18, %v7127_v25  ;;  %v16285_v11 = vld [vmem:[#allocation33_spill] sm:$0xff]  ;;  %v7129_v20 = vld [vmem:[#allocation4 + $0xf2] sm:$0xff] }
 0xb40   :  { %16273 = vst [vmem:[#allocation90_spill] sm:$0xff] %v14575_v30  ;;  %v5791_v56 = vld [vmem:[#allocation4 + $0x2c2] sm:$0xff] }
 0xb41   :  { %v5278_v44 = vadd.f32 %v16282_v33, %v4820_v1  ;;  %v16287_v1 = vld [vmem:[#allocation69_spill] sm:$0xff] }
 0xb45   :  { %v5666_v45 = vpop.f32.mrf.mxu3 }
 0xb46   :  { %v14584_v23 = vadd.f32 %v5666_v45, %v5277_v26  ;;  %v6057_v50 = vpop.f32.mrf.mxu0 }
 0xb47   :  { %v14588_v16 = vadd.f32 %v6057_v50, %v14171_v48  ;;  %v5790_v50 = vld [vmem:[#allocation4 + $0x2ba] sm:$0xff] }
 0xb48   :  { %16278 = vst [vmem:[#allocation151_spill] sm:$0xff] %v14584_v23  ;;  %v16284_v23 = vld [vmem:[#allocation32_spill] sm:$0xff] }
 0xb49   :  { %9276 = vmatmul.msk.bf16.gmra.mxu0 %vm618_vm1, %v5827_v4  ;;  %v4821_v63 = vadd.f32 %v16284_v23, %v4362_v41  ;;  %v7130_v4 = vld [vmem:[#allocation4 + $0xfa] sm:$0xff]  ;;  %v5828_v23 = vpack.c.bf16 %v5791_v56, %v5790_v50 }
 0xb4a   :  { %9426 = vmatmul.msk.bf16.gmra.mxu3 %vm618_vm1, %v7184_v32  ;;  %v7185_v41 = vpack.c.bf16 %v7130_v4, %v7129_v20  ;;  %v7131_v4 = vld [vmem:[#allocation4 + $0x10a] sm:$0xff] }
 0xb4b   :  { %v5279_v25 = vadd.f32 %v16285_v11, %v4821_v63 }
 0xb4d   :  { %v5669_v30 = vpop.f32.mrf.mxu3 }
 0xb4e   :  { %v14595_v45 = vadd.f32 %v5669_v30, %v5278_v44  ;;  %v6059_v26 = vpop.f32.mrf.mxu0  ;;  %v6591_v30 = vadd.f32 %v16288_v5, %v16287_v1  ;;  %v16292_v1 = vld [vmem:[#allocation12_spill] sm:$0xff] }
 0xb4f   :  { %v14599_v48 = vadd.f32 %v6059_v26, %v14184_v24  ;;  %v16290_v24 = vld [vmem:[#allocation35_spill] sm:$0xff]  ;;  %v14615_v26 = vld [vmem:[%s15504_s10] ss:$0 sm:$0xff]  ;;  %v16294_v5 = vld [vmem:[#allocation80_spill] sm:$0xff] }
 0xb50   :  { %16283 = vst [vmem:[#allocation153_spill] sm:$0xff] %v14595_v45  ;;  %v7049_v44 = vadd.f32 %v16290_v24, %v6591_v30  ;;  %v7132_v24 = vld [vmem:[#allocation4 + $0x112] sm:$0xff] }
 0xb55   :  { %v5671_v18 = vpop.f32.mrf.mxu3 }
 0xb56   :  { %v14602_v32 = vadd.f32 %v5671_v18, %v5279_v25  ;;  %v6062_v61 = vpop.f32.mrf.mxu0  ;;  %v16291_v18 = vld [vmem:[#allocation71_spill] sm:$0xff] }
 0xb57   :  { %v14607_v33 = vadd.f32 %v6062_v61, %v14205_v53  ;;  %v6592_v53 = vadd.f32 %v16292_v1, %v16291_v18  ;;  %v7186_v1 = vpack.c.bf16 %v7132_v24, %v7131_v4 }
 0xb58   :  { %16286 = vst [vmem:[#allocation94_spill] sm:$0xff] %v14602_v32 }
 0xb59   :  { %16289 = vst [vmem:[#allocation155_spill] sm:$0xff] %v14607_v33  ;;  %9277 = vmatmul.msk.bf16.gmra.mxu0 %vm618_vm1, %v5828_v23  ;;  %v7050_v30 = vadd.f32 %v16294_v5, %v6592_v53  ;;  %v5792_v23 = vld [vmem:[#allocation4 + $0x2d2] sm:$0xff] }
 0xb5a   :  { %9427 = vmatmul.msk.bf16.gmra.mxu3 %vm618_vm1, %v7185_v41  ;;  %v5793_v41 = vld [vmem:[#allocation4 + $0x2da] sm:$0xff] }
 0xb5b   :  { %v5829_v18 = vpack.c.bf16 %v5793_v41, %v5792_v23 }
 0xb5d   :  { %v7347_v63 = vpop.f32.mrf.mxu3 }
 0xb5e   :  { %v7507_v11 = vadd.f32 %v7347_v63, %v7049_v44  ;;  %v6064_v25 = vpop.f32.mrf.mxu0 }
 0xb5f   :  { %v14623_v20 = vadd.f32 %v6064_v25, %v14216_v6 }
 0xb60   :  { %v14620_v50 = vadd.f32 %v14615_v26, %v7507_v11  ;;  %v16295_v11 = vld [vmem:[#allocation39_spill] sm:$0xff] }
 0xb61   :  { %16293 = vst [vmem:[#allocation156_spill] sm:$0xff] %v14623_v20  ;;  %v6593_v13 = vadd.f32 %v16295_v11, %v14091_v42  ;;  %v16301_v11 = vld [vmem:[#allocation42_spill] sm:$0xff] }
 0xb62   :  { %v7638_v56 = vand.u32 2147483647, %v14620_v50  ;;  %vm8086_vm10 = vcmp.ge.f32.partialorder %v14620_v50, 0.0 }
 0xb64   :  { %v7702_v61 = vsub.f32 0.0, %v7638_v56 }
 0xb65   :  { %v7349_v44 = vpop.f32.mrf.mxu3 }
 0xb66   :  { %v7766_v63 = vmul.f32 1.442695, %v7702_v61  ;;  %v7508_v32 = vadd.f32 %v7349_v44, %v7050_v30  ;;  %v6067_v45 = vpop.f32.mrf.mxu0  ;;  %v16297_v61 = vld [vmem:[#allocation25_spill] sm:$0xff] }
 0xb67   :  { %v14633_v25 = vadd.f32 %v6067_v45, %v14235_v14  ;;  %v7051_v5 = vadd.f32 %v16297_v61, %v6593_v13  ;;  %v16299_v44 = vld [vmem:[#allocation41_spill] sm:$0xff]  ;;  %v5795_v61 = vld [vmem:[#allocation4 + $0x2f2] sm:$0xff] }
 0xb68   :  { %9605 = vpow2.f32 %v7766_v63  ;;  %v14630_v6 = vadd.f32 %v14615_v26, %v7508_v32  ;;  %v16298_v32 = vld [vmem:[#allocation75_spill] sm:$0xff]  ;;  %v7133_v13 = vld [vmem:[#allocation4 + $0x122] sm:$0xff] }
 0xb69   :  { %16296 = vst [vmem:[#allocation98_spill] sm:$0xff] %v14633_v25  ;;  %9278 = vmatmul.msk.bf16.gmra.mxu0 %vm618_vm1, %v5829_v18  ;;  %v6594_v63 = vadd.f32 %v16299_v44, %v16298_v32 }
 0xb6a   :  { %v7639_v53 = vand.u32 2147483647, %v14630_v6  ;;  %9428 = vmatmul.msk.bf16.gmra.mxu3 %vm618_vm1, %v7186_v1  ;;  %vm8087_vm11 = vcmp.ge.f32.partialorder %v14630_v6, 0.0 }
 0xb6c   :  { %v7703_v56 = vsub.f32 0.0, %v7639_v53  ;;  %v7052_v53 = vadd.f32 %v16301_v11, %v6594_v63 }
 0xb6d   :  { %v7352_v4 = vpop.f32.mrf.mxu3 }
 0xb6e   :  { %v9606_v30 = vpop.eup %9605  ;;  %v7768_v23 = vmul.f32 1.442695, %v7703_v56  ;;  %v7509_v42 = vadd.f32 %v7352_v4, %v7051_v5  ;;  %v6069_v24 = vpop.f32.mrf.mxu0  ;;  %v5794_v56 = vld [vmem:[#allocation4 + $0x2ea] sm:$0xff] }
 0xb6f   :  { %v7894_v41 = vadd.f32 1.0, %v9606_v30  ;;  %v14645_v45 = vadd.f32 %v6069_v24, %v14248_v59  ;;  %v7134_v5 = vld [vmem:[#allocation4 + $0x12a] sm:$0xff]  ;;  %v5830_v20 = vpack.c.bf16 %v5795_v61, %v5794_v56  ;;  %v16302_v59 = vld [vmem:[#allocation128_spill] sm:$0xff] }
 0xb70   :  { %9607 = vpow2.f32 %v7768_v23  ;;  %v14642_v14 = vadd.f32 %v14615_v26, %v7509_v42  ;;  %v7187_v33 = vpack.c.bf16 %v7134_v5, %v7133_v13  ;;  %v16303_v24 = vld [vmem:[#allocation88_spill] sm:$0xff] }
 0xb71   :  { %16300 = vst [vmem:[#allocation158_spill] sm:$0xff] %v14645_v45  ;;  %9609 = vrcp.f32 %v7894_v41  ;;  %v6595_v41 = vadd.f32 %v16303_v24, %v16302_v59  ;;  %v7135_v59 = vld [vmem:[#allocation4 + $0x13a] sm:$0xff] }
 0xb72   :  { %v7640_v18 = vand.u32 2147483647, %v14642_v14  ;;  %vm8088_vm12 = vcmp.ge.f32.partialorder %v14642_v14, 0.0 }
 0xb74   :  { %v7704_v1 = vsub.f32 0.0, %v7640_v18 }
 0xb75   :  { %v7354_v4 = vpop.f32.mrf.mxu3 }
 0xb76   :  { %v9608_v25 = vpop.eup %9607  ;;  %v7770_v32 = vmul.f32 1.442695, %v7704_v1  ;;  %v7510_v23 = vadd.f32 %v7354_v4, %v7052_v53  ;;  %v16304_v53 = vld [vmem:[#allocation44_spill] sm:$0xff] }
 0xb77   :  { %v9610_v44 = vpop.eup %9609  ;;  %v7895_v42 = vadd.f32 1.0, %v9608_v25  ;;  %v7053_v56 = vadd.f32 %v16304_v53, %v6595_v41  ;;  %v7136_v53 = vld [vmem:[#allocation4 + $0x142] sm:$0xff] }
 0xb78   :  { %v8022_v45 = vmul.f32 %v9610_v44, %v9606_v30  ;;  %9611 = vpow2.f32 %v7770_v32  ;;  %v14652_v18 = vadd.f32 %v14615_v26, %v7510_v23 }
 0xb79   :  { %9613 = vrcp.f32 %v7895_v42  ;;  %9279 = vmatmul.msk.bf16.gmra.mxu0 %vm618_vm1, %v5830_v20  ;;  %v16305_v20 = vld [vmem:[#allocation13_spill] sm:$0xff] }
 0xb7a   :  { %v8150_v63 = vsub.f32 1.0, %v8022_v45  ;;  %v7641_v11 = vand.u32 2147483647, %v14652_v18  ;;  %9429 = vmatmul.msk.bf16.gmra.mxu3 %vm618_vm1, %v7187_v33  ;;  %v6596_v33 = vadd.f32 %v16305_v20, %v14145_v21  ;;  %vm8089_vm13 = vcmp.ge.f32.partialorder %v14652_v18, 0.0 }
 0xb7c   :  { %v8214_v13 = vsel %vm8086_vm10, %v8150_v63, %v8022_v45  ;;  %v7705_v1 = vsub.f32 0.0, %v7641_v11  ;;  %v16306_v63 = vld [vmem:[#allocation47_spill] sm:$0xff] }
 0xb7d   :  { %8279 = vst.msk [vmem:[%s15505_s12] sm:$0xff] %vm8278_vm9, %v8214_v13  ;;  %v7357_v30 = vpop.f32.mrf.mxu3  ;;  %v7054_v11 = vadd.f32 %v16306_v63, %v6596_v33  ;;  %v5796_v13 = vld [vmem:[#allocation4 + $0x302] sm:$0xff] }
 0xb7e   :  { %v9612_v61 = vpop.eup %9611  ;;  %v7772_v5 = vmul.f32 1.442695, %v7705_v1  ;;  %v7511_v4 = vadd.f32 %v7357_v30, %v7053_v56  ;;  %v5797_v1 = vld [vmem:[#allocation4 + $0x30a] sm:$0xff] }
 0xb7f   :  { %v9614_v32 = vpop.eup %9613  ;;  %v7896_v23 = vadd.f32 1.0, %v9612_v61  ;;  %v5831_v6 = vpack.c.bf16 %v5797_v1, %v5796_v13 }
 0xb80   :  { %v8023_v44 = vmul.f32 %v9614_v32, %v9608_v25  ;;  %9615 = vpow2.f32 %v7772_v5  ;;  %v14666_v50 = vadd.f32 %v14615_v26, %v7511_v4  ;;  %v7188_v32 = vpack.c.bf16 %v7136_v53, %v7135_v59 }
 0xb81   :  { %9617 = vrcp.f32 %v7896_v23  ;;  %v16307_v23 = vld [vmem:[#allocation14_spill] sm:$0xff] }
 0xb82   :  { %v8151_v45 = vsub.f32 1.0, %v8023_v44  ;;  %v7642_v42 = vand.u32 2147483647, %v14666_v50  ;;  %v6597_v20 = vadd.f32 %v16307_v23, %v14156_v0  ;;  %vm8090_vm14 = vcmp.ge.f32.partialorder %v14666_v50, 0.0  ;;  %v16313_v50 = vld [vmem:[#allocation17_spill] sm:$0xff] }
 0xb84   :  { %v8215_v24 = vsel %vm8087_vm11, %v8151_v45, %v8023_v44  ;;  %v7706_v41 = vsub.f32 0.0, %v7642_v42 }
 0xb85   :  { %8280 = vst.msk [vmem:[%s15505_s12 + $0x8] sm:$0xff] %vm8278_vm9, %v8215_v24  ;;  %v7359_v21 = vpop.f32.mrf.mxu3 }
 0xb86   :  { %v9616_v25 = vpop.eup %9615  ;;  %v7774_v56 = vmul.f32 1.442695, %v7706_v41  ;;  %v7512_v30 = vadd.f32 %v7359_v21, %v7054_v11  ;;  %v16308_v41 = vld [vmem:[#allocation50_spill] sm:$0xff]  ;;  %v16309_v21 = vld [vmem:[#allocation15_spill] sm:$0xff] }
 0xb87   :  { %v9618_v5 = vpop.eup %9617  ;;  %v7897_v4 = vadd.f32 1.0, %v9616_v25  ;;  %v7055_v63 = vadd.f32 %v16308_v41, %v6597_v20  ;;  %v16310_v20 = vld [vmem:[#allocation53_spill] sm:$0xff] }
 0xb88   :  { %v8024_v33 = vmul.f32 %v9618_v5, %v9612_v61  ;;  %9619 = vpow2.f32 %v7774_v56  ;;  %v14678_v44 = vadd.f32 %v14615_v26, %v7512_v30  ;;  %v6598_v56 = vadd.f32 %v16309_v21, %v14175_v8 }
 0xb89   :  { %9621 = vrcp.f32 %v7897_v4  ;;  %9280 = vmatmul.msk.bf16.gmra.mxu0 %vm618_vm1, %v5831_v6  ;;  %v7137_v6 = vld [vmem:[#allocation4 + $0x152] sm:$0xff] }
 0xb8a   :  { %v8152_v45 = vsub.f32 1.0, %v8024_v33  ;;  %v7643_v42 = vand.u32 2147483647, %v14678_v44  ;;  %9430 = vmatmul.msk.bf16.gmra.mxu3 %vm618_vm1, %v7188_v32  ;;  %vm8091_vm15 = vcmp.ge.f32.partialorder %v14678_v44, 0.0 }
 0xb8c   :  { %v8216_v24 = vsel %vm8088_vm12, %v8152_v45, %v8024_v33  ;;  %v7707_v59 = vsub.f32 0.0, %v7643_v42  ;;  %v7056_v33 = vadd.f32 %v16310_v20, %v6598_v56  ;;  %v5798_v45 = vld [vmem:[#allocation4 + $0x31a] sm:$0xff]  ;;  %v5799_v42 = vld [vmem:[#allocation4 + $0x322] sm:$0xff] }
 0xb8d   :  { %8281 = vst.msk [vmem:[%s15505_s12 + $0x10] sm:$0xff] %vm8278_vm9, %v8216_v24  ;;  %v7362_v0 = vpop.f32.mrf.mxu3  ;;  %v7138_v24 = vld [vmem:[#allocation4 + $0x15a] sm:$0xff]  ;;  %v6717_v20 = vld [vmem:[#allocation4 + $0x349] sm:$0xff] }
 0xb8e   :  { %v9620_v61 = vpop.eup %9619  ;;  %v7776_v11 = vmul.f32 1.442695, %v7707_v59  ;;  %v7513_v13 = vadd.f32 %v7362_v0, %v7055_v63  ;;  %v14701_v59 = vpop.f32.mrf.mxu2 }
 0xb8f   :  { %v9622_v1 = vpop.eup %9621  ;;  %v7898_v53 = vadd.f32 1.0, %v9620_v61 }
 0xb90   :  { %v8025_v30 = vmul.f32 %v9622_v1, %v9616_v25  ;;  %9623 = vpow2.f32 %v7776_v11  ;;  %v14692_v14 = vadd.f32 %v14615_v26, %v7513_v13  ;;  %v5832_v11 = vpack.c.bf16 %v5799_v42, %v5798_v45  ;;  %v16311_v1 = vld [vmem:[#allocation16_spill] sm:$0xff] }
 0xb91   :  { %9625 = vrcp.f32 %v7898_v53  ;;  %v7189_v13 = vpack.c.bf16 %v7138_v24, %v7137_v6  ;;  %v6599_v53 = vadd.f32 %v16311_v1, %v14188_v51  ;;  %v16312_v51 = vld [vmem:[#allocation56_spill] sm:$0xff]  ;;  %v6259_v1 = vld [vmem:[#allocation4 + $0x348] sm:$0xff] }
 0xb92   :  { %v8153_v5 = vsub.f32 1.0, %v8025_v30  ;;  %v7644_v4 = vand.u32 2147483647, %v14692_v14  ;;  %vm8092_vm0 = vcmp.ge.f32.partialorder %v14692_v14, 0.0 }
 0xb94   :  { %v8217_v32 = vsel %vm8089_vm13, %v8153_v5, %v8025_v30  ;;  %v7708_v23 = vsub.f32 0.0, %v7644_v4  ;;  %v14711_v4 = vpop.f32.mrf.mxu1 }
 0xb95   :  { %8282 = vst.msk [vmem:[%s15505_s12 + $0x18] sm:$0xff] %vm8278_vm9, %v8217_v32  ;;  %v7364_v8 = vpop.f32.mrf.mxu3 }
 0xb96   :  { %v9624_v25 = vpop.eup %9623  ;;  %v7778_v41 = vmul.f32 1.442695, %v7708_v23  ;;  %v7514_v63 = vadd.f32 %v7364_v8, %v7056_v33  ;;  %v6718_v33 = vld [vmem:[#allocation4 + $0x351] sm:$0xff] }
 0xb97   :  { %v9626_v18 = vpop.eup %9625  ;;  %v7899_v0 = vadd.f32 1.0, %v9624_v25  ;;  %v6750_v8 = vpack.c.bf16 %v6718_v33, %v6717_v20  ;;  %v7140_v20 = vld [vmem:[#allocation4 + $0x172] sm:$0xff] }
 0xb98   :  { %v8026_v21 = vmul.f32 %v9626_v18, %v9620_v61  ;;  %9627 = vpow2.f32 %v7778_v41  ;;  %v14706_v56 = vadd.f32 %v14615_v26, %v7514_v63  ;;  %v7057_v61 = vadd.f32 %v16312_v51, %v6599_v53  ;;  %v6260_v53 = vld [vmem:[#allocation4 + $0x350] sm:$0xff] }
 0xb99   :  { %9629 = vrcp.f32 %v7899_v0  ;;  %9281 = vmatmul.msk.bf16.gmra.mxu0 %vm618_vm1, %v5832_v11  ;;  %v6600_v18 = vadd.f32 %v16313_v50, %v14209_v49  ;;  %v14721_v0 = vpop.f32.mrf.mxu2  ;;  %9394 = vmatmul.msk.bf16.gmra.mxu2 %vm618_vm1, %v6750_v8  ;;  %v16314_v51 = vld [vmem:[#allocation59_spill] sm:$0xff] }
 0xb9a   :  { %v8154_v30 = vsub.f32 1.0, %v8026_v21  ;;  %v7645_v5 = vand.u32 2147483647, %v14706_v56  ;;  %9431 = vmatmul.msk.bf16.gmra.mxu3 %vm618_vm1, %v7189_v13  ;;  %vm8093_vm2 = vcmp.ge.f32.partialorder %v14706_v56, 0.0  ;;  %v16319_v56 = vld [vmem:[#allocation120_spill] sm:$0xff] }
 0xb9c   :  { %v8218_v6 = vsel %vm8090_vm14, %v8154_v30, %v8026_v21  ;;  %v7709_v32 = vsub.f32 0.0, %v7645_v5  ;;  %v7139_v5 = vld [vmem:[#allocation4 + $0x16a] sm:$0xff]  ;;  %v14730_v33 = vpop.f32.mrf.mxu1 }
 0xb9d   :  { %8283 = vst.msk [vmem:[%s15505_s12 + $0x20] sm:$0xff] %vm8278_vm9, %v8218_v6  ;;  %v7367_v23 = vpop.f32.mrf.mxu3  ;;  %v6292_v6 = vpack.c.bf16 %v6260_v53, %v6259_v1 }
 0xb9e   :  { %v9628_v45 = vpop.eup %9627  ;;  %v7780_v42 = vmul.f32 1.442695, %v7709_v32  ;;  %v7515_v24 = vadd.f32 %v7367_v23, %v7057_v61  ;;  %v5800_v61 = vld [vmem:[#allocation4 + $0x332] sm:$0xff]  ;;  %v5801_v23 = vld [vmem:[#allocation4 + $0x33a] sm:$0xff] }
 0xb9f   :  { %v9630_v41 = vpop.eup %9629  ;;  %v7900_v63 = vadd.f32 1.0, %v9628_v45  ;;  %9338 = vmatmul.msk.bf16.gmra.mxu1 %vm618_vm1, %v6292_v6  ;;  %v5833_v50 = vpack.c.bf16 %v5801_v23, %v5800_v61 }
 0xba0   :  { %v8027_v11 = vmul.f32 %v9630_v41, %v9624_v25  ;;  %9631 = vpow2.f32 %v7780_v42  ;;  %v14724_v13 = vadd.f32 %v14615_v26, %v7515_v24  ;;  %v7058_v25 = vadd.f32 %v16314_v51, %v6600_v18 }
 0xba1   :  { %9633 = vrcp.f32 %v7900_v63  ;;  %v7190_v18 = vpack.c.bf16 %v7140_v20, %v7139_v5 }
 0xba2   :  { %v8155_v21 = vsub.f32 1.0, %v8027_v11  ;;  %v7646_v30 = vand.u32 2147483647, %v14724_v13  ;;  %vm8094_vm3 = vcmp.ge.f32.partialorder %v14724_v13, 0.0 }
 0xba4   :  { %v8219_v49 = vsel %vm8091_vm15, %v8155_v21, %v8027_v11  ;;  %v7710_v32 = vsub.f32 0.0, %v7646_v30  ;;  %v16315_v11 = vld [vmem:[#allocation21_spill] sm:$0xff] }
 0xba5   :  { %8284 = vst.msk [vmem:[%s15505_s12 + $0x28] sm:$0xff] %vm8278_vm9, %v8219_v49  ;;  %v7369_v42 = vpop.f32.mrf.mxu3  ;;  %v6601_v1 = vadd.f32 %v16315_v11, %v14222_v47  ;;  %v16318_v11 = vld [vmem:[#allocation67_spill] sm:$0xff] }
 0xba6   :  { %v9632_v44 = vpop.eup %9631  ;;  %v7782_v24 = vmul.f32 1.442695, %v7710_v32  ;;  %v7516_v8 = vadd.f32 %v7369_v42, %v7058_v25  ;;  %v16316_v32 = vld [vmem:[#allocation63_spill] sm:$0xff]  ;;  %v16317_v42 = vld [vmem:[#allocation22_spill] sm:$0xff] }
 0xba7   :  { %v9634_v41 = vpop.eup %9633  ;;  %v7901_v63 = vadd.f32 1.0, %v9632_v44  ;;  %v7059_v51 = vadd.f32 %v16316_v32, %v6601_v1 }
 0xba8   :  { %v8028_v53 = vmul.f32 %v9634_v41, %v9628_v45  ;;  %9635 = vpow2.f32 %v7782_v24  ;;  %v14740_v21 = vadd.f32 %v14615_v26, %v7516_v8  ;;  %v6602_v24 = vadd.f32 %v16317_v42, %v14241_v60 }
 0xba9   :  { %9637 = vrcp.f32 %v7901_v63  ;;  %9282 = vmatmul.msk.bf16.gmra.mxu0 %vm618_vm1, %v5833_v50 }
 0xbaa   :  { %v8156_v30 = vsub.f32 1.0, %v8028_v53  ;;  %v7647_v49 = vand.u32 2147483647, %v14740_v21  ;;  %9432 = vmatmul.msk.bf16.gmra.mxu3 %vm618_vm1, %v7190_v18  ;;  %v7060_v1 = vadd.f32 %v16318_v11, %v6602_v24  ;;  %vm8095_vm4 = vcmp.ge.f32.partialorder %v14740_v21, 0.0  ;;  %v16323_v21 = vld [vmem:[#allocation77_spill] sm:$0xff] }
 0xbac   :  { %v8220_v6 = vsel %vm8092_vm0, %v8156_v30, %v8028_v53  ;;  %v7711_v5 = vsub.f32 0.0, %v7647_v49  ;;  %v7141_v53 = vld [vmem:[#allocation4 + $0x182] sm:$0xff]  ;;  %v7142_v30 = vld [vmem:[#allocation4 + $0x18a] sm:$0xff] }
 0xbad   :  { %8285 = vst.msk [vmem:[%s15505_s12 + $0x30] sm:$0xff] %vm8278_vm9, %v8220_v6  ;;  %v7372_v47 = vpop.f32.mrf.mxu3 }
 0xbae   :  { %v9636_v45 = vpop.eup %9635  ;;  %v7784_v25 = vmul.f32 1.442695, %v7711_v5  ;;  %v7517_v61 = vadd.f32 %v7372_v47, %v7059_v51  ;;  %v7191_v51 = vpack.c.bf16 %v7142_v30, %v7141_v53  ;;  %v6603_v47 = vadd.f32 %v16319_v56, %v14252_v29  ;;  %v16322_v56 = vld [vmem:[#allocation124_spill] sm:$0xff] }
 0xbaf   :  { %v9638_v23 = vpop.eup %9637  ;;  %v7902_v20 = vadd.f32 1.0, %v9636_v45 }
 0xbb0   :  { %v8029_v8 = vmul.f32 %v9638_v23, %v9632_v44  ;;  %9639 = vpow2.f32 %v7784_v25  ;;  %v14754_v14 = vadd.f32 %v14615_v26, %v7517_v61 }
 0xbb1   :  { %9641 = vrcp.f32 %v7902_v20 }
 0xbb2   :  { %v8157_v41 = vsub.f32 1.0, %v8029_v8  ;;  %v7648_v63 = vand.u32 2147483647, %v14754_v14  ;;  %vm8096_vm5 = vcmp.ge.f32.partialorder %v14754_v14, 0.0 }
 0xbb4   :  { %v8221_v50 = vsel %vm8093_vm2, %v8157_v41, %v8029_v8  ;;  %v7712_v18 = vsub.f32 0.0, %v7648_v63  ;;  %v16320_v8 = vld [vmem:[#allocation73_spill] sm:$0xff] }
 0xbb5   :  { %8286 = vst.msk [vmem:[%s15505_s12 + $0x38] sm:$0xff] %vm8278_vm9, %v8221_v50  ;;  %v7374_v60 = vpop.f32.mrf.mxu3  ;;  %v7061_v41 = vadd.f32 %v16320_v8, %v6603_v47  ;;  %v6605_v8 = vadd.f32 %v16323_v21, %v14286_v19 }
 0xbb6   :  { %v9640_v44 = vpop.eup %9639  ;;  %v7786_v49 = vmul.f32 1.442695, %v7712_v18  ;;  %v7518_v6 = vadd.f32 %v7374_v60, %v7060_v1  ;;  %v16321_v1 = vld [vmem:[#allocation20_spill] sm:$0xff] }
 0xbb7   :  { %v9642_v5 = vpop.eup %9641  ;;  %v7903_v32 = vadd.f32 1.0, %v9640_v44  ;;  %v6604_v53 = vadd.f32 %v16321_v1, %v14273_v57  ;;  %v16324_v1 = vld [vmem:[#allocation6_spill] sm:$0xff] }
 0xbb8   :  { %v8030_v25 = vmul.f32 %v9642_v5, %v9636_v45  ;;  %9643 = vpow2.f32 %v7786_v49  ;;  %v14766_v61 = vadd.f32 %v14615_v26, %v7518_v6  ;;  %v7143_v6 = vld [vmem:[#allocation4 + $0x19a] sm:$0xff]  ;;  %v7144_v5 = vld [vmem:[#allocation4 + $0x1a2] sm:$0xff] }
 0xbb9   :  { %9645 = vrcp.f32 %v7903_v32  ;;  %v7062_v47 = vadd.f32 %v16322_v56, %v6604_v53  ;;  %v7063_v53 = vadd.f32 %v16324_v1, %v6605_v8 }
 0xbba   :  { %v8158_v23 = vsub.f32 1.0, %v8030_v25  ;;  %v7649_v20 = vand.u32 2147483647, %v14766_v61  ;;  %9433 = vmatmul.msk.bf16.gmra.mxu3 %vm618_vm1, %v7191_v51  ;;  %vm8097_vm6 = vcmp.ge.f32.partialorder %v14766_v61, 0.0  ;;  %v6607_v61 = vadd.f32 %v14153_v36, %v14321_v55 }
 0xbbc   :  { %v8222_v42 = vsel %vm8094_vm3, %v8158_v23, %v8030_v25  ;;  %v7713_v24 = vsub.f32 0.0, %v7649_v20  ;;  %v7192_v20 = vpack.c.bf16 %v7144_v5, %v7143_v6  ;;  %v16325_v5 = vld [vmem:[#allocation79_spill] sm:$0xff] }
 0xbbd   :  { %8287 = vst.msk [vmem:[%s15505_s12 + $0x40] sm:$0xff] %vm8278_vm9, %v8222_v42  ;;  %v7377_v29 = vpop.f32.mrf.mxu3 }
 0xbbe   :  { %v9644_v45 = vpop.eup %9643  ;;  %v7788_v63 = vmul.f32 1.442695, %v7713_v24  ;;  %v7519_v50 = vadd.f32 %v7377_v29, %v7061_v41 }
 0xbbf   :  { %v9646_v18 = vpop.eup %9645  ;;  %v7904_v11 = vadd.f32 1.0, %v9644_v45 }
 0xbc0   :  { %v8031_v30 = vmul.f32 %v9646_v18, %v9640_v44  ;;  %9647 = vpow2.f32 %v7788_v63  ;;  %v14779_v13 = vadd.f32 %v14615_v26, %v7519_v50 }
 0xbc1   :  { %9649 = vrcp.f32 %v7904_v11 }
 0xbc2   :  { %v8159_v60 = vsub.f32 1.0, %v8031_v30  ;;  %v7650_v49 = vand.u32 2147483647, %v14779_v13  ;;  %vm8098_vm7 = vcmp.ge.f32.partialorder %v14779_v13, 0.0 }
 0xbc4   :  { %v8223_v32 = vsel %vm8095_vm4, %v8159_v60, %v8031_v30  ;;  %v7714_v51 = vsub.f32 0.0, %v7650_v49 }
 0xbc5   :  { %8288 = vst.msk [vmem:[%s15505_s12 + $0x48] sm:$0xff] %vm8278_vm9, %v8223_v32  ;;  %v7379_v57 = vpop.f32.mrf.mxu3  ;;  %v6606_v32 = vadd.f32 %v16325_v5, %v14310_v2 }
 0xbc6   :  { %v9648_v44 = vpop.eup %9647  ;;  %v7790_v25 = vmul.f32 1.442695, %v7714_v51  ;;  %v7520_v23 = vadd.f32 %v7379_v57, %v7062_v47 }
 0xbc7   :  { %v9650_v42 = vpop.eup %9649  ;;  %v7905_v24 = vadd.f32 1.0, %v9648_v44 }
 0xbc8   :  { %v8032_v41 = vmul.f32 %v9650_v42, %v9644_v45  ;;  %9651 = vpow2.f32 %v7790_v25  ;;  %v14791_v29 = vadd.f32 %v14615_v26, %v7520_v23  ;;  %v16326_v23 = vld [vmem:[#allocation81_spill] sm:$0xff] }
 0xbc9   :  { %9653 = vrcp.f32 %v7905_v24  ;;  %v7145_v42 = vld [vmem:[#allocation4 + $0x1e2] sm:$0xff]  ;;  %v7146_v24 = vld [vmem:[#allocation4 + $0x1ea] sm:$0xff] }
 0xbca   :  { %v8160_v63 = vsub.f32 1.0, %v8032_v41  ;;  %v7651_v50 = vand.u32 2147483647, %v14791_v29  ;;  %9434 = vmatmul.msk.bf16.gmra.mxu3 %vm618_vm1, %v7192_v20  ;;  %v7064_v20 = vadd.f32 %v16326_v23, %v6606_v32  ;;  %vm8099_vm8 = vcmp.ge.f32.partialorder %v14791_v29, 0.0  ;;  %v16330_v29 = vld [vmem:[#allocation85_spill] sm:$0xff] }
 0xbcc   :  { %v8224_v18 = vsel %vm8096_vm5, %v8160_v63, %v8032_v41  ;;  %v7715_v11 = vsub.f32 0.0, %v7651_v50  ;;  %v7193_v50 = vpack.c.bf16 %v7146_v24, %v7145_v42  ;;  %v16329_v42 = vld [vmem:[#allocation83_spill] sm:$0xff] }
 0xbcd   :  { %8289 = vst.msk [vmem:[%s15505_s12 + $0x50] sm:$0xff] %vm8278_vm9, %v8224_v18  ;;  %v7382_v19 = vpop.f32.mrf.mxu3 }
 0xbce   :  { %v9652_v45 = vpop.eup %9651  ;;  %v7792_v30 = vmul.f32 1.442695, %v7715_v11  ;;  %v7521_v60 = vadd.f32 %v7382_v19, %v7063_v53 }
 0xbcf   :  { %v9654_v49 = vpop.eup %9653  ;;  %v7906_v6 = vadd.f32 1.0, %v9652_v45 }
 0xbd0   :  { %v8033_v51 = vmul.f32 %v9654_v49, %v9648_v44  ;;  %9655 = vpow2.f32 %v7792_v30  ;;  %v14804_v14 = vadd.f32 %v14615_v26, %v7521_v60  ;;  %v16327_v60 = vld [vmem:[#allocation31_spill] sm:$0xff] }
 0xbd1   :  { %9657 = vrcp.f32 %v7906_v6  ;;  %v7065_v49 = vadd.f32 %v16327_v60, %v6607_v61 }
 0xbd2   :  { %v8161_v56 = vsub.f32 1.0, %v8033_v51  ;;  %v7652_v47 = vand.u32 2147483647, %v14804_v14  ;;  %vm8100_vm10 = vcmp.ge.f32.partialorder %v14804_v14, 0.0 }
 0xbd4   :  { %v8225_v57 = vsel %vm8097_vm6, %v8161_v56, %v8033_v51  ;;  %v7716_v25 = vsub.f32 0.0, %v7652_v47  ;;  %v16328_v51 = vld [vmem:[#allocation132_spill] sm:$0xff] }
 0xbd5   :  { %8290 = vst.msk [vmem:[%s15505_s12 + $0x58] sm:$0xff] %vm8278_vm9, %v8225_v57  ;;  %v7384_v2 = vpop.f32.mrf.mxu3  ;;  %v6608_v56 = vadd.f32 %v16328_v51, %v14340_v54 }
 0xbd6   :  { %v9656_v44 = vpop.eup %9655  ;;  %v7794_v21 = vmul.f32 1.442695, %v7716_v25  ;;  %v7522_v8 = vadd.f32 %v7384_v2, %v7064_v20  ;;  %v7147_v2 = vld [vmem:[#allocation4 + $0x1fa] sm:$0xff] }
 0xbd7   :  { %v9658_v41 = vpop.eup %9657  ;;  %v7907_v63 = vadd.f32 1.0, %v9656_v44  ;;  %v7066_v24 = vadd.f32 %v16329_v42, %v6608_v56  ;;  %v16332_v56 = vld [vmem:[#allocation136_spill] sm:$0xff] }
 0xbd8   :  { %v8034_v18 = vmul.f32 %v9658_v41, %v9652_v45  ;;  %9659 = vpow2.f32 %v7794_v21  ;;  %v14816_v11 = vadd.f32 %v14615_v26, %v7522_v8  ;;  %v7148_v21 = vld [vmem:[#allocation4 + $0x202] sm:$0xff] }
 0xbd9   :  { %9661 = vrcp.f32 %v7907_v63  ;;  %v7194_v61 = vpack.c.bf16 %v7148_v21, %v7147_v2  ;;  %v7149_v21 = vld [vmem:[#allocation4 + $0x212] sm:$0xff] }
 0xbda   :  { %v8162_v1 = vsub.f32 1.0, %v8034_v18  ;;  %v7653_v53 = vand.u32 2147483647, %v14816_v11  ;;  %9435 = vmatmul.msk.bf16.gmra.mxu3 %vm618_vm1, %v7193_v50  ;;  %vm8101_vm11 = vcmp.ge.f32.partialorder %v14816_v11, 0.0  ;;  %v16334_v11 = vld [vmem:[#allocation89_spill] sm:$0xff] }
 0xbdc   :  { %v8226_v19 = vsel %vm8098_vm7, %v8162_v1, %v8034_v18  ;;  %v7717_v30 = vsub.f32 0.0, %v7653_v53  ;;  %v6609_v18 = vadd.f32 %v16330_v29, %v14353_v46  ;;  %v6611_v29 = vadd.f32 %v16334_v11, %v14387_v7 }
 0xbdd   :  { %8291 = vst.msk [vmem:[%s15505_s12 + $0x60] sm:$0xff] %vm8278_vm9, %v8226_v19  ;;  %v7387_v36 = vpop.f32.mrf.mxu3 }
 0xbde   :  { %v9660_v55 = vpop.eup %9659  ;;  %v7796_v45 = vmul.f32 1.442695, %v7717_v30  ;;  %v7523_v6 = vadd.f32 %v7387_v36, %v7065_v49  ;;  %v16331_v36 = vld [vmem:[#allocation34_spill] sm:$0xff] }
 0xbdf   :  { %v9662_v5 = vpop.eup %9661  ;;  %v7908_v32 = vadd.f32 1.0, %v9660_v55 }
 0xbe0   :  { %v8035_v47 = vmul.f32 %v9662_v5, %v9656_v44  ;;  %9663 = vpow2.f32 %v7796_v45  ;;  %v14829_v13 = vadd.f32 %v14615_v26, %v7523_v6  ;;  %v7067_v45 = vadd.f32 %v16331_v36, %v6609_v18  ;;  %v16335_v36 = vld [vmem:[#allocation37_spill] sm:$0xff] }
 0xbe1   :  { %9665 = vrcp.f32 %v7908_v32 }
 0xbe2   :  { %v8163_v57 = vsub.f32 1.0, %v8035_v47  ;;  %v7654_v25 = vand.u32 2147483647, %v14829_v13  ;;  %vm8102_vm12 = vcmp.ge.f32.partialorder %v14829_v13, 0.0 }
 0xbe4   :  { %v8227_v23 = vsel %vm8099_vm8, %v8163_v57, %v8035_v47  ;;  %v7718_v20 = vsub.f32 0.0, %v7654_v25  ;;  %v6610_v47 = vadd.f32 %v16332_v56, %v14374_v62 }
 0xbe5   :  { %8292 = vst.msk [vmem:[%s15505_s12 + $0x68] sm:$0xff] %vm8278_vm9, %v8227_v23  ;;  %v7389_v54 = vpop.f32.mrf.mxu3 }
 0xbe6   :  { %v9664_v44 = vpop.eup %9663  ;;  %v7798_v8 = vmul.f32 1.442695, %v7718_v20  ;;  %v7524_v41 = vadd.f32 %v7389_v54, %v7066_v24  ;;  %v16333_v24 = vld [vmem:[#allocation87_spill] sm:$0xff]  ;;  %v7150_v54 = vld [vmem:[#allocation4 + $0x21a] sm:$0xff] }
 0xbe7   :  { %v9666_v63 = vpop.eup %9665  ;;  %v7909_v50 = vadd.f32 1.0, %v9664_v44  ;;  %v7068_v2 = vadd.f32 %v16333_v24, %v6610_v47  ;;  %v7151_v24 = vld [vmem:[#allocation4 + $0x22a] sm:$0xff] }
 0xbe8   :  { %v8036_v1 = vmul.f32 %v9666_v63, %v9660_v55  ;;  %9667 = vpow2.f32 %v7798_v8  ;;  %v14841_v53 = vadd.f32 %v14615_v26, %v7524_v41 }
 0xbe9   :  { %9669 = vrcp.f32 %v7909_v50 }
 0xbea   :  { %v8164_v19 = vsub.f32 1.0, %v8036_v1  ;;  %v7655_v30 = vand.u32 2147483647, %v14841_v53  ;;  %9436 = vmatmul.msk.bf16.gmra.mxu3 %vm618_vm1, %v7194_v61  ;;  %v7195_v61 = vpack.c.bf16 %v7150_v54, %v7149_v21  ;;  %vm8103_vm13 = vcmp.ge.f32.partialorder %v14841_v53, 0.0 }
 0xbeb   :  { %v6613_v53 = vadd.f32 %v14277_v58, %v14414_v34 }
 0xbec   :  { %v8228_v60 = vsel %vm8100_vm10, %v8164_v19, %v8036_v1  ;;  %v7719_v49 = vsub.f32 0.0, %v7655_v30 }
 0xbed   :  { %8293 = vst.msk [vmem:[%s15505_s12 + $0x70] sm:$0xff] %vm8278_vm9, %v8228_v60  ;;  %v7392_v46 = vpop.f32.mrf.mxu3 }
 0xbee   :  { %v9668_v55 = vpop.eup %9667  ;;  %v7800_v6 = vmul.f32 1.442695, %v7719_v49  ;;  %v7525_v5 = vadd.f32 %v7392_v46, %v7067_v45  ;;  %v7069_v45 = vadd.f32 %v16335_v36, %v6611_v29 }
 0xbef   :  { %v9670_v32 = vpop.eup %9669  ;;  %v7910_v51 = vadd.f32 1.0, %v9668_v55 }
 0xbf0   :  { %v8037_v57 = vmul.f32 %v9670_v32, %v9664_v44  ;;  %9671 = vpow2.f32 %v7800_v6  ;;  %v14854_v14 = vadd.f32 %v14615_v26, %v7525_v5 }
 0xbf1   :  { %9673 = vrcp.f32 %v7910_v51  ;;  %v6612_v51 = vadd.f32 %v14256_v12, %v14403_v39 }
 0xbf2   :  { %v8165_v25 = vsub.f32 1.0, %v8037_v57  ;;  %v7656_v23 = vand.u32 2147483647, %v14854_v14  ;;  %vm8104_vm14 = vcmp.ge.f32.partialorder %v14854_v14, 0.0 }
 0xbf4   :  { %v8229_v20 = vsel %vm8101_vm11, %v8165_v25, %v8037_v57  ;;  %v7720_v42 = vsub.f32 0.0, %v7656_v23 }
 0xbf5   :  { %8294 = vst.msk [vmem:[%s15505_s12 + $0x78] sm:$0xff] %vm8278_vm9, %v8229_v20  ;;  %v7394_v62 = vpop.f32.mrf.mxu3  ;;  %v16336_v20 = vld [vmem:[#allocation140_spill] sm:$0xff] }
 0xbf6   :  { %v9672_v44 = vpop.eup %9671  ;;  %v7802_v8 = vmul.f32 1.442695, %v7720_v42  ;;  %v7526_v41 = vadd.f32 %v7394_v62, %v7068_v2  ;;  %v7070_v42 = vadd.f32 %v16336_v20, %v6612_v51  ;;  %v7152_v2 = vld [vmem:[#allocation4 + $0x232] sm:$0xff]  ;;  %v16339_v51 = vld [vmem:[#allocation97_spill] sm:$0xff] }
 0xbf7   :  { %v9674_v63 = vpop.eup %9673  ;;  %v7911_v50 = vadd.f32 1.0, %v9672_v44 }
 0xbf8   :  { %v8038_v18 = vmul.f32 %v9674_v63, %v9668_v55  ;;  %9675 = vpow2.f32 %v7802_v8  ;;  %v14866_v1 = vadd.f32 %v14615_v26, %v7526_v41  ;;  %v7196_v8 = vpack.c.bf16 %v7152_v2, %v7151_v24 }
 0xbf9   :  { %9677 = vrcp.f32 %v7911_v50 }
 0xbfa   :  { %v8166_v19 = vsub.f32 1.0, %v8038_v18  ;;  %v7657_v30 = vand.u32 2147483647, %v14866_v1  ;;  %9437 = vmatmul.msk.bf16.gmra.mxu3 %vm618_vm1, %v7195_v61  ;;  %vm8105_vm15 = vcmp.ge.f32.partialorder %v14866_v1, 0.0  ;;  %v6615_v1 = vadd.f32 %v14318_v43, %v14445_v37 }
 0xbfc   :  { %v8230_v60 = vsel %vm8102_vm12, %v8166_v19, %v8038_v18  ;;  %v7721_v49 = vsub.f32 0.0, %v7657_v30  ;;  %v16337_v18 = vld [vmem:[#allocation93_spill] sm:$0xff] }
 0xbfd   :  { %8295 = vst.msk [vmem:[%s15505_s12 + $0x80] sm:$0xff] %vm8278_vm9, %v8230_v60  ;;  %v7397_v7 = vpop.f32.mrf.mxu3  ;;  %v7071_v19 = vadd.f32 %v16337_v18, %v6613_v53 }
 0xbfe   :  { %v9676_v46 = vpop.eup %9675  ;;  %v7804_v55 = vmul.f32 1.442695, %v7721_v49  ;;  %v7527_v6 = vadd.f32 %v7397_v7, %v7069_v45  ;;  %v16338_v45 = vld [vmem:[#allocation144_spill] sm:$0xff] }
 0xbff   :  { %v9678_v5 = vpop.eup %9677  ;;  %v7912_v32 = vadd.f32 1.0, %v9676_v46  ;;  %v6614_v7 = vadd.f32 %v16338_v45, %v14432_v9 }
 0xc00   :  { %v8039_v56 = vmul.f32 %v9678_v5, %v9672_v44  ;;  %9679 = vpow2.f32 %v7804_v55  ;;  %v14879_v13 = vadd.f32 %v14615_v26, %v7527_v6 }
 0xc01   :  { %9681 = vrcp.f32 %v7912_v32 }
 0xc02   :  { %v8167_v47 = vsub.f32 1.0, %v8039_v56  ;;  %v7658_v57 = vand.u32 2147483647, %v14879_v13  ;;  %vm8106_vm0 = vcmp.ge.f32.partialorder %v14879_v13, 0.0 }
 0xc04   :  { %v8231_v25 = vsel %vm8103_vm13, %v8167_v47, %v8039_v56  ;;  %v7722_v23 = vsub.f32 0.0, %v7658_v57  ;;  %v7072_v56 = vadd.f32 %v16339_v51, %v6614_v7  ;;  %v7153_v47 = vld [vmem:[#allocation4 + $0x242] sm:$0xff]  ;;  %v7154_v57 = vld [vmem:[#allocation4 + $0x24a] sm:$0xff] }
 0xc05   :  { %8296 = vst.msk [vmem:[%s15505_s12 + $0x88] sm:$0xff] %vm8278_vm9, %v8231_v25  ;;  %v7399_v12 = vpop.f32.mrf.mxu3  ;;  %v7197_v2 = vpack.c.bf16 %v7154_v57, %v7153_v47  ;;  %v16342_v57 = vld [vmem:[#allocation152_spill] sm:$0xff] }
 0xc06   :  { %v9680_v39 = vpop.eup %9679  ;;  %v7806_v21 = vmul.f32 1.442695, %v7722_v23  ;;  %v7528_v54 = vadd.f32 %v7399_v12, %v7070_v42 }
 0xc07   :  { %v9682_v62 = vpop.eup %9681  ;;  %v7913_v44 = vadd.f32 1.0, %v9680_v39 }
 0xc08   :  { %v8040_v41 = vmul.f32 %v9682_v62, %v9676_v46  ;;  %9683 = vpow2.f32 %v7806_v21  ;;  %v14891_v63 = vadd.f32 %v14615_v26, %v7528_v54 }
 0xc09   :  { %9685 = vrcp.f32 %v7913_v44 }
 0xc0a   :  { %v8168_v50 = vsub.f32 1.0, %v8040_v41  ;;  %v7659_v61 = vand.u32 2147483647, %v14891_v63  ;;  %9438 = vmatmul.msk.bf16.gmra.mxu3 %vm618_vm1, %v7196_v8  ;;  %v7073_v8 = vadd.f32 %v14325_v28, %v6615_v1  ;;  %vm8107_vm2 = vcmp.ge.f32.partialorder %v14891_v63, 0.0  ;;  %v16341_v63 = vld [vmem:[#allocation46_spill] sm:$0xff]  ;;  %v16343_v1 = vld [vmem:[#allocation131_spill] sm:$0xff] }
 0xc0c   :  { %v8232_v11 = vsel %vm8104_vm14, %v8168_v50, %v8040_v41  ;;  %v7723_v29 = vsub.f32 0.0, %v7659_v61 }
 0xc0d   :  { %8297 = vst.msk [vmem:[%s15505_s12 + $0x90] sm:$0xff] %vm8278_vm9, %v8232_v11  ;;  %v7402_v58 = vpop.f32.mrf.mxu3  ;;  %v6616_v11 = vadd.f32 %v14342_v27, %v14463_v15 }
 0xc0e   :  { %v9684_v34 = vpop.eup %9683  ;;  %v7808_v30 = vmul.f32 1.442695, %v7723_v29  ;;  %v7529_v60 = vadd.f32 %v7402_v58, %v7071_v19 }
 0xc0f   :  { %v9686_v49 = vpop.eup %9685  ;;  %v7914_v36 = vadd.f32 1.0, %v9684_v34 }
 0xc10   :  { %v8041_v46 = vmul.f32 %v9686_v49, %v9680_v39  ;;  %9687 = vpow2.f32 %v7808_v30  ;;  %v14904_v14 = vadd.f32 %v14615_v26, %v7529_v60  ;;  %v7155_v60 = vld [vmem:[#allocation4 + $0x25a] sm:$0xff]  ;;  %v7156_v49 = vld [vmem:[#allocation4 + $0x262] sm:$0xff] }
 0xc11   :  { %9689 = vrcp.f32 %v7914_v36 }
 0xc12   :  { %v8169_v55 = vsub.f32 1.0, %v8041_v46  ;;  %v7660_v6 = vand.u32 2147483647, %v14904_v14  ;;  %vm8108_vm3 = vcmp.ge.f32.partialorder %v14904_v14, 0.0 }
 0xc14   :  { %v8233_v5 = vsel %vm8105_vm15, %v8169_v55, %v8041_v46  ;;  %v7724_v32 = vsub.f32 0.0, %v7660_v6  ;;  %v7198_v46 = vpack.c.bf16 %v7156_v49, %v7155_v60  ;;  %v6617_v55 = vadd.f32 %v16341_v63, %v14474_v17 }
 0xc15   :  { %8298 = vst.msk [vmem:[%s15505_s12 + $0x98] sm:$0xff] %vm8278_vm9, %v8233_v5  ;;  %v7404_v9 = vpop.f32.mrf.mxu3  ;;  %v14943_v5 = vld [vmem:[%s15504_s10] ss:$0 sm:$0xff] }
 0xc16   :  { %v9688_v25 = vpop.eup %9687  ;;  %v7810_v23 = vmul.f32 1.442695, %v7724_v32  ;;  %v7530_v20 = vadd.f32 %v7404_v9, %v7072_v56  ;;  %v7075_v9 = vadd.f32 %v16342_v57, %v6617_v55 }
 0xc17   :  { %v9690_v42 = vpop.eup %9689  ;;  %v7915_v24 = vadd.f32 1.0, %v9688_v25 }
 0xc18   :  { %v8042_v12 = vmul.f32 %v9690_v42, %v9684_v34  ;;  %9691 = vpow2.f32 %v7810_v23  ;;  %v14916_v39 = vadd.f32 %v14615_v26, %v7530_v20  ;;  %v16340_v34 = vld [vmem:[#allocation99_spill] sm:$0xff] }
 0xc19   :  { %9693 = vrcp.f32 %v7915_v24  ;;  %v7074_v30 = vadd.f32 %v16340_v34, %v6616_v11 }
 0xc1a   :  { %v8170_v21 = vsub.f32 1.0, %v8042_v12  ;;  %v7661_v54 = vand.u32 2147483647, %v14916_v39  ;;  %9439 = vmatmul.msk.bf16.gmra.mxu3 %vm618_vm1, %v7197_v2  ;;  %vm8109_vm4 = vcmp.ge.f32.partialorder %v14916_v39, 0.0  ;;  %v16346_v39 = vld [vmem:[#allocation52_spill] sm:$0xff] }
 0xc1b   :  { %v6619_v34 = vadd.f32 %v16346_v39, %v14503_v22  ;;  %v16352_v39 = vld [vmem:[#allocation62_spill] sm:$0xff] }
 0xc1c   :  { %v8234_v62 = vsel %vm8106_vm0, %v8170_v21, %v8042_v12  ;;  %v7725_v44 = vsub.f32 0.0, %v7661_v54  ;;  %v16344_v12 = vld [vmem:[#allocation105_spill] sm:$0xff] }
 0xc1d   :  { %8299 = vst.msk [vmem:[%s15505_s12 + $0xa0] sm:$0xff] %vm8278_vm9, %v8234_v62  ;;  %v7407_v43 = vpop.f32.mrf.mxu3  ;;  %v6618_v21 = vadd.f32 %v16344_v12, %v16343_v1 }
 0xc1e   :  { %v9692_v37 = vpop.eup %9691  ;;  %v7812_v53 = vmul.f32 1.442695, %v7725_v44  ;;  %v7531_v41 = vadd.f32 %v7407_v43, %v7073_v8 }
 0xc1f   :  { %v9694_v50 = vpop.eup %9693  ;;  %v7916_v61 = vadd.f32 1.0, %v9692_v37 }
 0xc20   :  { %v8043_v29 = vmul.f32 %v9694_v50, %v9688_v25  ;;  %9695 = vpow2.f32 %v7812_v53  ;;  %v14929_v13 = vadd.f32 %v14615_v26, %v7531_v41  ;;  %v7157_v41 = vld [vmem:[#allocation4 + $0x272] sm:$0xff]  ;;  %v7158_v50 = vld [vmem:[#allocation4 + $0x27a] sm:$0xff] }
 0xc21   :  { %9697 = vrcp.f32 %v7916_v61 }
 0xc22   :  { %v8171_v28 = vsub.f32 1.0, %v8043_v29  ;;  %v7662_v18 = vand.u32 2147483647, %v14929_v13  ;;  %vm8110_vm5 = vcmp.ge.f32.partialorder %v14929_v13, 0.0 }
 0xc24   :  { %v8235_v19 = vsel %vm8107_vm2, %v8171_v28, %v8043_v29  ;;  %v7726_v58 = vsub.f32 0.0, %v7662_v18 }
 0xc25   :  { %8300 = vst.msk [vmem:[%s15505_s12 + $0xa8] sm:$0xff] %vm8278_vm9, %v8235_v19  ;;  %v7409_v27 = vpop.f32.mrf.mxu3 }
 0xc26   :  { %v9696_v15 = vpop.eup %9695  ;;  %v7814_v26 = vmul.f32 1.442695, %v7726_v58  ;;  %v7532_v36 = vadd.f32 %v7409_v27, %v7074_v30  ;;  %v7199_v58 = vpack.c.bf16 %v7158_v50, %v7157_v41 }
 0xc27   :  { %v9698_v45 = vpop.eup %9697  ;;  %v7917_v7 = vadd.f32 1.0, %v9696_v15 }
 0xc28   :  { %v8044_v6 = vmul.f32 %v9698_v45, %v9692_v37  ;;  %9699 = vpow2.f32 %v7814_v26  ;;  %v14946_v32 = vadd.f32 %v14943_v5, %v7532_v36  ;;  %v16345_v37 = vld [vmem:[#allocation107_spill] sm:$0xff] }
 0xc29   :  { %9701 = vrcp.f32 %v7917_v7  ;;  %v7076_v53 = vadd.f32 %v16345_v37, %v6618_v21  ;;  %v16347_v36 = vld [vmem:[#allocation111_spill] sm:$0xff] }
 0xc2a   :  { %v8172_v51 = vsub.f32 1.0, %v8044_v6  ;;  %v7663_v56 = vand.u32 2147483647, %v14946_v32  ;;  %9440 = vmatmul.msk.bf16.gmra.mxu3 %vm618_vm1, %v7198_v46  ;;  %v7077_v45 = vadd.f32 %v16347_v36, %v6619_v34  ;;  %vm8111_vm6 = vcmp.ge.f32.partialorder %v14946_v32, 0.0  ;;  %v16350_v32 = vld [vmem:[#allocation58_spill] sm:$0xff]  ;;  %v16353_v36 = vld [vmem:[#allocation125_spill] sm:$0xff] }
 0xc2b   :  { %v6622_v34 = vadd.f32 %v16352_v39, %v14548_v52 }
 0xc2c   :  { %v8236_v47 = vsel %vm8108_vm3, %v8172_v51, %v8044_v6  ;;  %v7727_v17 = vsub.f32 0.0, %v7663_v56  ;;  %v16348_v51 = vld [vmem:[#allocation55_spill] sm:$0xff] }
 0xc2d   :  { %8301 = vst.msk [vmem:[%s15505_s12 + $0xb0] sm:$0xff] %vm8278_vm9, %v8236_v47  ;;  %v7412_v25 = vpop.f32.mrf.mxu3  ;;  %v6620_v56 = vadd.f32 %v16348_v51, %v14521_v40 }
 0xc2e   :  { %v9700_v23 = vpop.eup %9699  ;;  %v7816_v20 = vmul.f32 1.442695, %v7727_v17  ;;  %v7533_v42 = vadd.f32 %v7412_v25, %v7075_v9 }
 0xc2f   :  { %v9702_v24 = vpop.eup %9701  ;;  %v7918_v2 = vadd.f32 1.0, %v9700_v23 }
 0xc30   :  { %v8045_v54 = vmul.f32 %v9702_v24, %v9696_v15  ;;  %9703 = vpow2.f32 %v7816_v20  ;;  %v14959_v14 = vadd.f32 %v14943_v5, %v7533_v42  ;;  %v7159_v42 = vld [vmem:[#allocation4 + $0x28a] sm:$0xff]  ;;  %v7160_v24 = vld [vmem:[#allocation4 + $0x292] sm:$0xff] }
 0xc31   :  { %9705 = vrcp.f32 %v7918_v2 }
 0xc32   :  { %v8173_v62 = vsub.f32 1.0, %v8045_v54  ;;  %v7664_v44 = vand.u32 2147483647, %v14959_v14  ;;  %vm8112_vm7 = vcmp.ge.f32.partialorder %v14959_v14, 0.0 }
 0xc34   :  { %v8237_v8 = vsel %vm8109_vm4, %v8173_v62, %v8045_v54  ;;  %v7728_v43 = vsub.f32 0.0, %v7664_v44  ;;  %v7200_v62 = vpack.c.bf16 %v7160_v24, %v7159_v42  ;;  %v6621_v44 = vadd.f32 %v16350_v32, %v14534_v35  ;;  %v16355_v42 = vld [vmem:[#allocation129_spill] sm:$0xff] }
 0xc35   :  { %8302 = vst.msk [vmem:[%s15505_s12 + $0xb8] sm:$0xff] %vm8278_vm9, %v8237_v8  ;;  %v7414_v61 = vpop.f32.mrf.mxu3 }
 0xc36   :  { %v9704_v11 = vpop.eup %9703  ;;  %v7818_v29 = vmul.f32 1.442695, %v7728_v43  ;;  %v7534_v28 = vadd.f32 %v7414_v61, %v7076_v53  ;;  %v16351_v61 = vld [vmem:[#allocation119_spill] sm:$0xff] }
 0xc37   :  { %v9706_v18 = vpop.eup %9705  ;;  %v7919_v19 = vadd.f32 1.0, %v9704_v11 }
 0xc38   :  { %v8046_v30 = vmul.f32 %v9706_v18, %v9700_v23  ;;  %9707 = vpow2.f32 %v7818_v29  ;;  %v14971_v60 = vadd.f32 %v14943_v5, %v7534_v28  ;;  %v16349_v23 = vld [vmem:[#allocation115_spill] sm:$0xff] }
 0xc39   :  { %9709 = vrcp.f32 %v7919_v19  ;;  %v7078_v20 = vadd.f32 %v16349_v23, %v6620_v56 }
 0xc3a   :  { %v8174_v49 = vsub.f32 1.0, %v8046_v30  ;;  %v7665_v27 = vand.u32 2147483647, %v14971_v60  ;;  %9441 = vmatmul.msk.bf16.gmra.mxu3 %vm618_vm1, %v7199_v58  ;;  %vm8113_vm8 = vcmp.ge.f32.partialorder %v14971_v60, 0.0  ;;  %v16354_v60 = vld [vmem:[#allocation127_spill] sm:$0xff] }
 0xc3c   :  { %v8238_v15 = vsel %vm8110_vm5, %v8174_v49, %v8046_v30  ;;  %v7729_v26 = vsub.f32 0.0, %v7665_v27 }
 0xc3d   :  { %8303 = vst.msk [vmem:[%s15505_s12 + $0xc0] sm:$0xff] %vm8278_vm9, %v8238_v15  ;;  %v7417_v22 = vpop.f32.mrf.mxu3 }
 0xc3e   :  { %v9708_v7 = vpop.eup %9707  ;;  %v7820_v46 = vmul.f32 1.442695, %v7729_v26  ;;  %v7535_v63 = vadd.f32 %v7417_v22, %v7077_v45  ;;  %v7080_v45 = vadd.f32 %v16353_v36, %v6622_v34  ;;  %v7161_v22 = vld [vmem:[#allocation4 + $0x2a2] sm:$0xff] }
 0xc3f   :  { %v9710_v55 = vpop.eup %9709  ;;  %v7920_v6 = vadd.f32 1.0, %v9708_v7 }
 0xc40   :  { %v8047_v47 = vmul.f32 %v9710_v55, %v9704_v11  ;;  %9711 = vpow2.f32 %v7820_v46  ;;  %v14984_v13 = vadd.f32 %v14943_v5, %v7535_v63  ;;  %v7079_v11 = vadd.f32 %v16351_v61, %v6621_v44 }
 0xc41   :  { %9713 = vrcp.f32 %v7920_v6 }
 0xc42   :  { %v8175_v17 = vsub.f32 1.0, %v8047_v47  ;;  %v7666_v57 = vand.u32 2147483647, %v14984_v13  ;;  %vm8114_vm10 = vcmp.ge.f32.partialorder %v14984_v13, 0.0 }
 0xc44   :  { %v8239_v9 = vsel %vm8111_vm6, %v8175_v17, %v8047_v47  ;;  %v7730_v25 = vsub.f32 0.0, %v7666_v57  ;;  %v6623_v47 = vadd.f32 %v16354_v60, %v14561_v38 }
 0xc45   :  { %8304 = vst.msk [vmem:[%s15505_s12 + $0xc8] sm:$0xff] %vm8278_vm9, %v8239_v9  ;;  %v7419_v40 = vpop.f32.mrf.mxu3 }
 0xc46   :  { %v9712_v2 = vpop.eup %9711  ;;  %v7822_v1 = vmul.f32 1.442695, %v7730_v25  ;;  %v7536_v12 = vadd.f32 %v7419_v40, %v7078_v20  ;;  %v7081_v24 = vadd.f32 %v16355_v42, %v6623_v47  ;;  %v7166_v42 = vld [vmem:[#allocation4 + $0x2da] sm:$0xff] }
 0xc47   :  { %v9714_v21 = vpop.eup %9713  ;;  %v7921_v54 = vadd.f32 1.0, %v9712_v2 }
 0xc48   :  { %v8048_v8 = vmul.f32 %v9714_v21, %v9708_v7  ;;  %9715 = vpow2.f32 %v7822_v1  ;;  %v14996_v43 = vadd.f32 %v14943_v5, %v7536_v12  ;;  %v7162_v7 = vld [vmem:[#allocation4 + $0x2aa] sm:$0xff] }
 0xc49   :  { %9717 = vrcp.f32 %v7921_v54  ;;  %v7201_v56 = vpack.c.bf16 %v7162_v7, %v7161_v22  ;;  %v16356_v54 = vld [vmem:[#allocation133_spill] sm:$0xff] }
 0xc4a   :  { %v8176_v37 = vsub.f32 1.0, %v8048_v8  ;;  %v7667_v53 = vand.u32 2147483647, %v14996_v43  ;;  %9442 = vmatmul.msk.bf16.gmra.mxu3 %vm618_vm1, %v7200_v62  ;;  %v6624_v62 = vadd.f32 %v16356_v54, %v14579_v10  ;;  %vm8115_vm11 = vcmp.ge.f32.partialorder %v14996_v43, 0.0  ;;  %v16360_v54 = vld [vmem:[#allocation155_spill] sm:$0xff] }
 0xc4b   :  { %v6625_v43 = vadd.f32 %v14512_v3, %v14588_v16 }
 0xc4c   :  { %v8240_v41 = vsel %vm8112_vm7, %v8176_v37, %v8048_v8  ;;  %v7731_v50 = vsub.f32 0.0, %v7667_v53  ;;  %v15037_v37 = vpop.f32.mrf.mxu0 }
 0xc4d   :  { %8305 = vst.msk [vmem:[%s15505_s12 + $0xd0] sm:$0xff] %vm8278_vm9, %v8240_v41  ;;  %v7422_v35 = vpop.f32.mrf.mxu3  ;;  %v7083_v3 = vadd.f32 %v14515_v31, %v6625_v43 }
 0xc4e   :  { %v9716_v29 = vpop.eup %9715  ;;  %v7824_v28 = vmul.f32 1.442695, %v7731_v50  ;;  %v7537_v18 = vadd.f32 %v7422_v35, %v7079_v11  ;;  %v16357_v50 = vld [vmem:[#allocation74_spill] sm:$0xff]  ;;  %v7163_v11 = vld [vmem:[#allocation4 + $0x2ba] sm:$0xff] }
 0xc4f   :  { %v9718_v19 = vpop.eup %9717  ;;  %v7922_v58 = vadd.f32 1.0, %v9716_v29  ;;  %v7082_v61 = vadd.f32 %v16357_v50, %v6624_v62  ;;  %v7164_v35 = vld [vmem:[#allocation4 + $0x2c2] sm:$0xff]  ;;  %v16361_v62 = vld [vmem:[#allocation143_spill] sm:$0xff] }
 0xc50   :  { %v8049_v30 = vmul.f32 %v9718_v19, %v9712_v2  ;;  %9719 = vpow2.f32 %v7824_v28  ;;  %v15009_v14 = vadd.f32 %v14943_v5, %v7537_v18  ;;  %v7202_v39 = vpack.c.bf16 %v7164_v35, %v7163_v11  ;;  %v16362_v11 = vld [vmem:[#allocation145_spill] sm:$0xff] }
 0xc51   :  { %9721 = vrcp.f32 %v7922_v58 }
 0xc52   :  { %v8177_v49 = vsub.f32 1.0, %v8049_v30  ;;  %v7668_v27 = vand.u32 2147483647, %v15009_v14  ;;  %vm8116_vm12 = vcmp.ge.f32.partialorder %v15009_v14, 0.0  ;;  %v16358_v14 = vld [vmem:[#allocation78_spill] sm:$0xff] }
 0xc54   :  { %v8241_v15 = vsel %vm8113_vm8, %v8177_v49, %v8049_v30  ;;  %v7732_v26 = vsub.f32 0.0, %v7668_v27  ;;  %v15050_v49 = vpop.f32.mrf.mxu1  ;;  %v15058_v16 = vpop.f32.mrf.mxu0 }
 0xc55   :  { %8306 = vst.msk [vmem:[%s15505_s12 + $0xd8] sm:$0xff] %vm8278_vm9, %v8241_v15  ;;  %v7424_v52 = vpop.f32.mrf.mxu3 }
 0xc56   :  { %v9720_v46 = vpop.eup %9719  ;;  %v7826_v63 = vmul.f32 1.442695, %v7732_v26  ;;  %v7538_v55 = vadd.f32 %v7424_v52, %v7080_v45  ;;  %v15055_v26 = vpop.f32.mrf.mxu2 }
 0xc57   :  { %v9722_v6 = vpop.eup %9721  ;;  %v7923_v51 = vadd.f32 1.0, %v9720_v46 }
 0xc58   :  { %v8050_v17 = vmul.f32 %v9722_v6, %v9716_v29  ;;  %9723 = vpow2.f32 %v7826_v63  ;;  %v15021_v57 = vadd.f32 %v14943_v5, %v7538_v55  ;;  %v6626_v6 = vadd.f32 %v16358_v14, %v14599_v48  ;;  %v7168_v14 = vld [vmem:[#allocation4 + $0x2f2] sm:$0xff] }
 0xc59   :  { %9725 = vrcp.f32 %v7923_v51 }
 0xc5a   :  { %v8178_v9 = vsub.f32 1.0, %v8050_v17  ;;  %v7669_v25 = vand.u32 2147483647, %v15021_v57  ;;  %9443 = vmatmul.msk.bf16.gmra.mxu3 %vm618_vm1, %v7201_v56  ;;  %vm8117_vm13 = vcmp.ge.f32.partialorder %v15021_v57, 0.0 }
 0xc5c   :  { %v8242_v23 = vsel %vm8114_vm10, %v8178_v9, %v8050_v17  ;;  %v7733_v20 = vsub.f32 0.0, %v7669_v25  ;;  %v15070_v47 = vpop.f32.mrf.mxu1  ;;  %v16359_v25 = vld [vmem:[#allocation141_spill] sm:$0xff] }
 0xc5d   :  { %8307 = vst.msk [vmem:[%s15505_s12 + $0xe0] sm:$0xff] %vm8278_vm9, %v8242_v23  ;;  %v7427_v38 = vpop.f32.mrf.mxu3  ;;  %v7084_v23 = vadd.f32 %v16359_v25, %v6626_v6 }
 0xc5e   :  { %v9724_v40 = vpop.eup %9723  ;;  %v7828_v2 = vmul.f32 1.442695, %v7733_v20  ;;  %v7539_v1 = vadd.f32 %v7427_v38, %v7081_v24  ;;  %v7165_v20 = vld [vmem:[#allocation4 + $0x2d2] sm:$0xff]  ;;  %v15078_v38 = vpop.f32.mrf.mxu2 }
 0xc5f   :  { %v9726_v12 = vpop.eup %9725  ;;  %v7924_v21 = vadd.f32 1.0, %v9724_v40 }
 0xc60   :  { %v8051_v32 = vmul.f32 %v9726_v12, %v9720_v46  ;;  %9727 = vpow2.f32 %v7828_v2  ;;  %v15034_v13 = vadd.f32 %v14943_v5, %v7539_v1  ;;  %v15080_v12 = vpop.f32.mrf.mxu0 }
 0xc61   :  { %9729 = vrcp.f32 %v7924_v21  ;;  %v7203_v21 = vpack.c.bf16 %v7166_v42, %v7165_v20 }
 0xc62   :  { %v8179_v44 = vsub.f32 1.0, %v8051_v32  ;;  %v7670_v8 = vand.u32 2147483647, %v15034_v13  ;;  %vm8118_vm14 = vcmp.ge.f32.partialorder %v15034_v13, 0.0  ;;  %v16363_v13 = vld [vmem:[#allocation156_spill] sm:$0xff] }
 0xc64   :  { %v8243_v53 = vsel %vm8115_vm11, %v8179_v44, %v8051_v32  ;;  %v7734_v41 = vsub.f32 0.0, %v7670_v8  ;;  %v6627_v32 = vadd.f32 %v16361_v62, %v16360_v54 }
 0xc65   :  { %8308 = vst.msk [vmem:[%s15505_s12 + $0xe8] sm:$0xff] %vm8278_vm9, %v8243_v53  ;;  %v7429_v10 = vpop.f32.mrf.mxu3 }
 0xc66   :  { %v9728_v29 = vpop.eup %9727  ;;  %v7830_v28 = vmul.f32 1.442695, %v7734_v41  ;;  %v7540_v18 = vadd.f32 %v7429_v10, %v7082_v61  ;;  %v7085_v35 = vadd.f32 %v16362_v11, %v6627_v32  ;;  %v15091_v10 = vpop.f32.mrf.mxu1 }
 0xc67   :  { %v9730_v19 = vpop.eup %9729  ;;  %v7925_v58 = vadd.f32 1.0, %v9728_v29  ;;  %v15097_v43 = vpop.f32.mrf.mxu2 }
 0xc68   :  { %v8052_v34 = vmul.f32 %v9730_v19, %v9724_v40  ;;  %9731 = vpow2.f32 %v7830_v28  ;;  %v15048_v30 = vadd.f32 %v14943_v5, %v7540_v18 }
 0xc69   :  { %9733 = vrcp.f32 %v7925_v58 }
 0xc6a   :  { %v8180_v27 = vsub.f32 1.0, %v8052_v34  ;;  %v7671_v15 = vand.u32 2147483647, %v15048_v30  ;;  %9444 = vmatmul.msk.bf16.gmra.mxu3 %vm618_vm1, %v7202_v39  ;;  %vm8119_vm15 = vcmp.ge.f32.partialorder %v15048_v30, 0.0 }
 0xc6c   :  { %v8244_v36 = vsel %vm8116_vm12, %v8180_v27, %v8052_v34  ;;  %v7735_v45 = vsub.f32 0.0, %v7671_v15  ;;  %v16364_v34 = vld [vmem:[#allocation147_spill] sm:$0xff] }
 0xc6d   :  { %8309 = vst.msk [vmem:[%s15505_s12 + $0xf0] sm:$0xff] %vm8278_vm9, %v8244_v36  ;;  %v7432_v22 = vpop.f32.mrf.mxu3  ;;  %v6628_v27 = vadd.f32 %v16364_v34, %v16363_v13  ;;  %v7169_v13 = vld [vmem:[#allocation4 + $0x302] sm:$0xff]  ;;  %v7170_v34 = vld [vmem:[#allocation4 + $0x30a] sm:$0xff] }
 0xc6e   :  { %v9732_v7 = vpop.eup %9731  ;;  %v7832_v52 = vmul.f32 1.442695, %v7735_v45  ;;  %v7541_v46 = vadd.f32 %v7432_v22, %v7083_v3  ;;  %v15104_v45 = vpop.f32.mrf.mxu0 }
 0xc6f   :  { %v9734_v63 = vpop.eup %9733  ;;  %v7926_v55 = vadd.f32 1.0, %v9732_v7 }
 0xc70   :  { %v8053_v51 = vmul.f32 %v9734_v63, %v9728_v29  ;;  %9735 = vpow2.f32 %v7832_v52  ;;  %v15067_v31 = vadd.f32 %v14943_v5, %v7541_v46  ;;  %v16365_v46 = vld [vmem:[#allocation149_spill] sm:$0xff] }
 0xc71   :  { %9737 = vrcp.f32 %v7926_v55  ;;  %v7086_v63 = vadd.f32 %v16365_v46, %v6628_v27  ;;  %v7167_v55 = vld [vmem:[#allocation4 + $0x2ea] sm:$0xff] }
 0xc72   :  { %v8181_v56 = vsub.f32 1.0, %v8053_v51  ;;  %v7672_v60 = vand.u32 2147483647, %v15067_v31  ;;  %v7204_v30 = vpack.c.bf16 %v7168_v14, %v7167_v55  ;;  %vm8120_vm0 = vcmp.ge.f32.partialorder %v15067_v31, 0.0 }
 0xc74   :  { %v8245_v17 = vsel %vm8117_vm13, %v8181_v56, %v8053_v51  ;;  %v7736_v9 = vsub.f32 0.0, %v7672_v60 }
 0xc75   :  { %8310 = vst.msk [vmem:[%s15505_s12 + $0xf8] sm:$0xff] %vm8278_vm9, %v8245_v17  ;;  %v7434_v48 = vpop.f32.mrf.mxu3 }
 0xc76   :  { %v9736_v24 = vpop.eup %9735  ;;  %v7834_v40 = vmul.f32 1.442695, %v7736_v9  ;;  %v7542_v2 = vadd.f32 %v7434_v48, %v7084_v23  ;;  %v15113_v9 = vpop.f32.mrf.mxu1  ;;  %v16366_v23 = vld [vmem:[#allocation98_spill] sm:$0xff] }
 0xc77   :  { %v9738_v1 = vpop.eup %9737  ;;  %v7927_v57 = vadd.f32 1.0, %v9736_v24  ;;  %v6629_v20 = vadd.f32 %v14711_v4, %v16366_v23 }
 0xc78   :  { %v8054_v44 = vmul.f32 %v9738_v1, %v9732_v7  ;;  %9739 = vpow2.f32 %v7834_v40  ;;  %v15085_v8 = vadd.f32 %v14943_v5, %v7542_v2  ;;  %v15124_v1 = vpop.f32.mrf.mxu0 }
 0xc79   :  { %9741 = vrcp.f32 %v7927_v57  ;;  %v7087_v4 = vadd.f32 %v14701_v59, %v6629_v20 }
 0xc7a   :  { %v8182_v53 = vsub.f32 1.0, %v8054_v44  ;;  %v7673_v41 = vand.u32 2147483647, %v15085_v8  ;;  %9445 = vmatmul.msk.bf16.gmra.mxu3 %vm618_vm1, %v7203_v21  ;;  %vm8121_vm2 = vcmp.ge.f32.partialorder %v15085_v8, 0.0 }
 0xc7c   :  { %v8246_v50 = vsel %vm8118_vm14, %v8182_v53, %v8054_v44  ;;  %v7737_v61 = vsub.f32 0.0, %v7673_v41 }
 0xc7d   :  { %8311 = vst.msk [vmem:[%s15505_s12 + $0x100] sm:$0xff] %vm8278_vm9, %v8246_v50  ;;  %v7437_v29 = vpop.f32.mrf.mxu3  ;;  %v16367_v50 = vld [vmem:[#allocation158_spill] sm:$0xff] }
 0xc7e   :  { %v9740_v28 = vpop.eup %9739  ;;  %v7836_v18 = vmul.f32 1.442695, %v7737_v61  ;;  %v7543_v19 = vadd.f32 %v7437_v29, %v7085_v35  ;;  %v6630_v61 = vadd.f32 %v14730_v33, %v16367_v50  ;;  %v15137_v59 = vpop.f32.mrf.mxu1 }
 0xc7f   :  { %v9742_v58 = vpop.eup %9741  ;;  %v7928_v39 = vadd.f32 1.0, %v9740_v28 }
 0xc80   :  { %v8055_v15 = vmul.f32 %v9742_v58, %v9736_v24  ;;  %9743 = vpow2.f32 %v7836_v18  ;;  %v15102_v36 = vadd.f32 %v14943_v5, %v7543_v19  ;;  %v15120_v24 = vpop.f32.mrf.mxu2  ;;  %v16368_v18 = vld [vmem:[#allocation91_spill] sm:$0xff]  ;;  %v15146_v27 = vpop.f32.mrf.mxu0 }
 0xc81   :  { %9745 = vrcp.f32 %v7928_v39  ;;  %v6172_v19 = vadd.f32 %v15037_v37, %v16368_v18  ;;  %v7088_v39 = vadd.f32 %v14721_v0, %v6630_v61  ;;  %v7205_v37 = vpack.c.bf16 %v7170_v34, %v7169_v13 }
 0xc82   :  { %v8183_v3 = vsub.f32 1.0, %v8055_v15  ;;  %v7674_v22 = vand.u32 2147483647, %v15102_v36  ;;  %vm8122_vm3 = vcmp.ge.f32.partialorder %v15102_v36, 0.0 }
 0xc83   :  { %v6631_v46 = vadd.f32 %v15050_v49, %v6172_v19 }
 0xc84   :  { %v8247_v7 = vsel %vm8119_vm15, %v8183_v3, %v8055_v15  ;;  %v7738_v52 = vsub.f32 0.0, %v7674_v22 }
 0xc85   :  { %8312 = vst.msk [vmem:[%s15505_s12 + $0x108] sm:$0xff] %vm8278_vm9, %v8247_v7  ;;  %v7439_v6 = vpop.f32.mrf.mxu3 }
 0xc86   :  { %v9744_v51 = vpop.eup %9743  ;;  %v7838_v56 = vmul.f32 1.442695, %v7738_v52  ;;  %v7544_v60 = vadd.f32 %v7439_v6, %v7086_v63  ;;  %v15158_v6 = vpop.f32.mrf.mxu1 }
 0xc87   :  { %v9746_v17 = vpop.eup %9745  ;;  %v7929_v25 = vadd.f32 1.0, %v9744_v51 }
 0xc88   :  { %v8056_v42 = vmul.f32 %v9746_v17, %v9740_v28  ;;  %9747 = vpow2.f32 %v7838_v56  ;;  %v15118_v48 = vadd.f32 %v14943_v5, %v7544_v60  ;;  %v15141_v28 = vpop.f32.mrf.mxu2  ;;  %v7089_v17 = vadd.f32 %v15055_v26, %v6631_v46  ;;  %v15170_v36 = vpop.f32.mrf.mxu0 }
 0xc89   :  { %9749 = vrcp.f32 %v7929_v25 }
 0xc8a   :  { %v8184_v40 = vsub.f32 1.0, %v8056_v42  ;;  %v7675_v2 = vand.u32 2147483647, %v15118_v48  ;;  %9446 = vmatmul.msk.bf16.gmra.mxu3 %vm618_vm1, %v7204_v30  ;;  %vm8123_vm4 = vcmp.ge.f32.partialorder %v15118_v48, 0.0 }
 0xc8c   :  { %v8248_v57 = vsel %vm8120_vm0, %v8184_v40, %v8056_v42  ;;  %v7739_v21 = vsub.f32 0.0, %v7675_v2 }
 0xc8d   :  { %8313 = vst.msk [vmem:[%s15505_s12 + $0x110] sm:$0xff] %vm8278_vm9, %v8248_v57  ;;  %v7442_v54 = vpop.f32.mrf.mxu3 }
 0xc8e   :  { %v9748_v62 = vpop.eup %9747  ;;  %v7840_v32 = vmul.f32 1.442695, %v7739_v21  ;;  %v7545_v44 = vadd.f32 %v7442_v54, %v7087_v4  ;;  %v16370_v54 = vld [vmem:[#allocation95_spill] sm:$0xff]  ;;  %v15181_v50 = vpop.f32.mrf.mxu1 }
 0xc8f   :  { %v9750_v53 = vpop.eup %9749  ;;  %v7930_v41 = vadd.f32 1.0, %v9748_v62 }
 0xc90   :  { %v8057_v11 = vmul.f32 %v9750_v53, %v9744_v51  ;;  %9751 = vpow2.f32 %v7840_v32  ;;  %v15135_v31 = vadd.f32 %v14943_v5, %v7545_v44  ;;  %v16369_v51 = vld [vmem:[#allocation40_spill] sm:$0xff]  ;;  %v15168_v23 = vpop.f32.mrf.mxu2 }
 0xc91   :  { %9753 = vrcp.f32 %v7930_v41  ;;  %v6173_v56 = vadd.f32 %v15058_v16, %v16369_v51  ;;  %v7171_v41 = vld [vmem:[#allocation4 + $0x31a] sm:$0xff] }
 0xc92   :  { %v8185_v35 = vsub.f32 1.0, %v8057_v11  ;;  %v7676_v29 = vand.u32 2147483647, %v15135_v31  ;;  %vm8124_vm5 = vcmp.ge.f32.partialorder %v15135_v31, 0.0 }
 0xc93   :  { %v6632_v16 = vadd.f32 %v15070_v47, %v6173_v56  ;;  %v7172_v47 = vld [vmem:[#allocation4 + $0x322] sm:$0xff] }
 0xc94   :  { %v8249_v58 = vsel %vm8121_vm2, %v8185_v35, %v8057_v11  ;;  %v7740_v33 = vsub.f32 0.0, %v7676_v29 }
 0xc95   :  { %8314 = vst.msk [vmem:[%s15505_s12 + $0x118] sm:$0xff] %vm8278_vm9, %v8249_v58  ;;  %v7444_v15 = vpop.f32.mrf.mxu3  ;;  %v7090_v53 = vadd.f32 %v15078_v38, %v6632_v16 }
 0xc96   :  { %v9752_v8 = vpop.eup %9751  ;;  %v7842_v3 = vmul.f32 1.442695, %v7740_v33  ;;  %v7546_v22 = vadd.f32 %v7444_v15, %v7088_v39  ;;  %v15193_v39 = vpop.f32.mrf.mxu0  ;;  %v16371_v15 = vld [vmem:[#allocation43_spill] sm:$0xff] }
 0xc97   :  { %v9754_v7 = vpop.eup %9753  ;;  %v7931_v52 = vadd.f32 1.0, %v9752_v8 }
 0xc98   :  { %v8058_v63 = vmul.f32 %v9754_v7, %v9748_v62  ;;  %9755 = vpow2.f32 %v7842_v3  ;;  %v15154_v0 = vadd.f32 %v14943_v5, %v7546_v22  ;;  %v6174_v62 = vadd.f32 %v15080_v12, %v16370_v54  ;;  %v15187_v19 = vpop.f32.mrf.mxu2 }
 0xc99   :  { %9757 = vrcp.f32 %v7931_v52  ;;  %v7206_v12 = vpack.c.bf16 %v7172_v47, %v7171_v41  ;;  %v16373_v47 = vld [vmem:[#allocation101_spill] sm:$0xff] }
 0xc9a   :  { %v8186_v55 = vsub.f32 1.0, %v8058_v63  ;;  %v7677_v14 = vand.u32 2147483647, %v15154_v0  ;;  %9447 = vmatmul.msk.bf16.gmra.mxu3 %vm618_vm1, %v7205_v37  ;;  %v6633_v38 = vadd.f32 %v15091_v10, %v6174_v62  ;;  %vm8125_vm6 = vcmp.ge.f32.partialorder %v15154_v0, 0.0 }
 0xc9c   :  { %v8250_v60 = vsel %vm8122_vm3, %v8186_v55, %v8058_v63  ;;  %v7741_v49 = vsub.f32 0.0, %v7677_v14  ;;  %v7091_v22 = vadd.f32 %v15097_v43, %v6633_v38  ;;  %v15205_v55 = vpop.f32.mrf.mxu1 }
 0xc9d   :  { %8315 = vst.msk [vmem:[%s15505_s12 + $0x120] sm:$0xff] %vm8278_vm9, %v8250_v60  ;;  %v7447_v25 = vpop.f32.mrf.mxu3 }
 0xc9e   :  { %v9756_v30 = vpop.eup %9755  ;;  %v7844_v20 = vmul.f32 1.442695, %v7741_v49  ;;  %v7547_v42 = vadd.f32 %v7447_v25, %v7089_v17  ;;  %v15214_v49 = vpop.f32.mrf.mxu0  ;;  %v16372_v17 = vld [vmem:[#allocation148_spill] sm:$0xff] }
 0xc9f   :  { %v9758_v40 = vpop.eup %9757  ;;  %v7932_v2 = vadd.f32 1.0, %v9756_v30  ;;  %v6176_v25 = vadd.f32 %v15124_v1, %v16372_v17 }
 0xca0   :  { %v8059_v57 = vmul.f32 %v9758_v40, %v9752_v8  ;;  %9759 = vpow2.f32 %v7844_v20  ;;  %v15174_v26 = vadd.f32 %v14943_v5, %v7547_v42  ;;  %v6175_v8 = vadd.f32 %v15104_v45, %v16371_v15  ;;  %v15211_v43 = vpop.f32.mrf.mxu2  ;;  %v7173_v42 = vld [vmem:[#allocation4 + $0x332] sm:$0xff]  ;;  %v7174_v40 = vld [vmem:[#allocation4 + $0x33a] sm:$0xff] }
 0xca1   :  { %9761 = vrcp.f32 %v7932_v2  ;;  %v7207_v54 = vpack.c.bf16 %v7174_v40, %v7173_v42  ;;  %v6635_v1 = vadd.f32 %v15137_v59, %v6176_v25  ;;  %v6177_v59 = vadd.f32 %v15146_v27, %v16373_v47 }
 0xca2   :  { %v8187_v21 = vsub.f32 1.0, %v8059_v57  ;;  %v7678_v4 = vand.u32 2147483647, %v15174_v26  ;;  %v6634_v14 = vadd.f32 %v15113_v9, %v6175_v8  ;;  %vm8126_vm7 = vcmp.ge.f32.partialorder %v15174_v26, 0.0 }
 0xca4   :  { %v8251_v32 = vsel %vm8123_vm4, %v8187_v21, %v8059_v57  ;;  %v7742_v44 = vsub.f32 0.0, %v7678_v4  ;;  %v7092_v20 = vadd.f32 %v15120_v24, %v6634_v14 }
 0xca5   :  { %8316 = vst.msk [vmem:[%s15505_s12 + $0x128] sm:$0xff] %vm8278_vm9, %v8251_v32  ;;  %v7449_v61 = vpop.f32.mrf.mxu3  ;;  %v15228_v32 = vpop.f32.mrf.mxu1 }
 0xca6   :  { %v9760_v11 = vpop.eup %9759  ;;  %v7846_v35 = vmul.f32 1.442695, %v7742_v44  ;;  %v7548_v48 = vadd.f32 %v7449_v61, %v7090_v53 }
 0xca7   :  { %v9762_v29 = vpop.eup %9761  ;;  %v7933_v18 = vadd.f32 1.0, %v9760_v11 }
 0xca8   :  { %v8060_v58 = vmul.f32 %v9762_v29, %v9756_v30  ;;  %9763 = vpow2.f32 %v7846_v35  ;;  %v15191_v33 = vadd.f32 %v14943_v5, %v7548_v48  ;;  %v15233_v41 = vpop.f32.mrf.mxu2  ;;  %v7093_v35 = vadd.f32 %v15141_v28, %v6635_v1  ;;  %v15238_v48 = vpop.f32.mrf.mxu0 }
 0xca9   :  { %9765 = vrcp.f32 %v7933_v18 }
 0xcaa   :  { %v8188_v13 = vsub.f32 1.0, %v8060_v58  ;;  %v7679_v34 = vand.u32 2147483647, %v15191_v33  ;;  %9448 = vmatmul.msk.bf16.gmra.mxu3 %vm618_vm1, %v7206_v12  ;;  %vm8127_vm8 = vcmp.ge.f32.partialorder %v15191_v33, 0.0 }
 0xcac   :  { %v8252_v3 = vsel %vm8124_vm5, %v8188_v13, %v8060_v58  ;;  %v7743_v10 = vsub.f32 0.0, %v7679_v34  ;;  %v6636_v13 = vadd.f32 %v15158_v6, %v6177_v59  ;;  %v16376_v59 = vld [vmem:[#allocation109_spill] sm:$0xff] }
 0xcad   :  { %8317 = vst.msk [vmem:[%s15505_s12 + $0x130] sm:$0xff] %vm8278_vm9, %v8252_v3  ;;  %v7452_v7 = vpop.f32.mrf.mxu3  ;;  %v15249_v8 = vpop.f32.mrf.mxu1  ;;  %v7175_v3 = vld [vmem:[#allocation4 + $0x34a] sm:$0xff] }
 0xcae   :  { %v9764_v52 = vpop.eup %9763  ;;  %v7848_v37 = vmul.f32 1.442695, %v7743_v10  ;;  %v7549_v46 = vadd.f32 %v7452_v7, %v7091_v22  ;;  %v7176_v10 = vld [vmem:[#allocation4 + $0x352] sm:$0xff] }
 0xcaf   :  { %v9766_v63 = vpop.eup %9765  ;;  %v7934_v31 = vadd.f32 1.0, %v9764_v52  ;;  %v16374_v22 = vld [vmem:[#allocation103_spill] sm:$0xff] }
 0xcb0   :  { %v8061_v45 = vmul.f32 %v9766_v63, %v9760_v11  ;;  %9767 = vpow2.f32 %v7848_v37  ;;  %v15209_v51 = vadd.f32 %v14943_v5, %v7549_v46  ;;  %v6178_v7 = vadd.f32 %v15170_v36, %v16374_v22 }
 0xcb1   :  { %9769 = vrcp.f32 %v7934_v31  ;;  %v7094_v37 = vadd.f32 %v15168_v23, %v6636_v13  ;;  %v15259_v31 = vpop.f32.mrf.mxu2 }
 0xcb2   :  { %v8189_v56 = vsub.f32 1.0, %v8061_v45  ;;  %v7680_v60 = vand.u32 2147483647, %v15209_v51  ;;  %v6637_v17 = vadd.f32 %v15181_v50, %v6178_v7  ;;  %vm8128_vm10 = vcmp.ge.f32.partialorder %v15209_v51, 0.0 }
 0xcb4   :  { %v8253_v30 = vsel %vm8125_vm6, %v8189_v56, %v8061_v45  ;;  %v7744_v9 = vsub.f32 0.0, %v7680_v60  ;;  %v7208_v45 = vpack.c.bf16 %v7176_v10, %v7175_v3  ;;  %v15261_v60 = vpop.f32.mrf.mxu0  ;;  %v7095_v50 = vadd.f32 %v15187_v19, %v6637_v17  ;;  %v16377_v10 = vld [vmem:[#allocation113_spill] sm:$0xff] }
 0xcb5   :  { %8318 = vst.msk [vmem:[%s15505_s12 + $0x138] sm:$0xff] %vm8278_vm9, %v8253_v30  ;;  %v7454_v2 = vpop.f32.mrf.mxu3  ;;  %v6181_v22 = vadd.f32 %v15238_v48, %v16377_v10 }
 0xcb6   :  { %v9768_v16 = vpop.eup %9767  ;;  %v7850_v57 = vmul.f32 1.442695, %v7744_v9  ;;  %v7550_v21 = vadd.f32 %v7454_v2, %v7092_v20  ;;  %v16375_v20 = vld [vmem:[#allocation49_spill] sm:$0xff] }
 0xcb7   :  { %v9770_v4 = vpop.eup %9769  ;;  %v7935_v0 = vadd.f32 1.0, %v9768_v16  ;;  %v6179_v42 = vadd.f32 %v15193_v39, %v16375_v20 }
 0xcb8   :  { %v8062_v62 = vmul.f32 %v9770_v4, %v9764_v52  ;;  %9771 = vpow2.f32 %v7850_v57  ;;  %v15226_v24 = vadd.f32 %v14943_v5, %v7550_v21 }
 0xcb9   :  { %9773 = vrcp.f32 %v7935_v0  ;;  %v15279_v1 = vpop.f32.mrf.mxu2  ;;  %v6638_v39 = vadd.f32 %v15205_v55, %v6179_v42 }
 0xcba   :  { %v8190_v44 = vsub.f32 1.0, %v8062_v62  ;;  %v7681_v53 = vand.u32 2147483647, %v15226_v24  ;;  %9449 = vmatmul.msk.bf16.gmra.mxu3 %vm618_vm1, %v7207_v54 }
 0xcbb   :  { %v7096_v55 = vadd.f32 %v15211_v43, %v6638_v39  ;;  %v16379_v39 = vld [vmem:[#allocation121_spill] sm:$0xff] }
 0xcbc   :  { %v8254_v61 = vsel %vm8126_vm7, %v8190_v44, %v8062_v62  ;;  %v7745_v11 = vsub.f32 0.0, %v7681_v53  ;;  %v15285_v44 = vpop.f32.mrf.mxu0 }
 0xcbd   :  { %8319 = vst.msk [vmem:[%s15505_s12 + $0x140] sm:$0xff] %vm8278_vm9, %v8254_v61  ;;  %v7457_v29 = vpop.f32.mrf.mxu3  ;;  %v6180_v61 = vadd.f32 %v15214_v49, %v16376_v59 }
 0xcbe   :  { %v9772_v18 = vpop.eup %9771  ;;  %v7852_v12 = vmul.f32 1.442695, %v7745_v11  ;;  %v7551_v26 = vadd.f32 %v7457_v29, %v7093_v35 }
 0xcbf   :  { %v9774_v38 = vpop.eup %9773  ;;  %v7936_v58 = vadd.f32 1.0, %v9772_v18  ;;  %v6639_v13 = vadd.f32 %v15228_v32, %v6180_v61 }
 0xcc0   :  { %v8063_v27 = vmul.f32 %v9774_v38, %v9768_v16  ;;  %9775 = vpow2.f32 %v7852_v12  ;;  %v15246_v34 = vadd.f32 %v14943_v5, %v7551_v26  ;;  %v15273_v16 = vpop.f32.mrf.mxu1 }
 0xcc1   :  { %9777 = vrcp.f32 %v7936_v58  ;;  %v15302_v43 = vpop.f32.mrf.mxu2 }
 0xcc2   :  { %v8191_v28 = vsub.f32 1.0, %v8063_v27  ;;  %v7682_v15 = vand.u32 2147483647, %v15246_v34  ;;  %vm8130_vm11 = vcmp.ge.f32.partialorder %v15246_v34, 0.0  ;;  %v6640_v34 = vadd.f32 %v15249_v8, %v6181_v22 }
 0xcc4   :  { %v8255_v52 = vsel %vm8127_vm8, %v8191_v28, %v8063_v27  ;;  %v7746_v6 = vsub.f32 0.0, %v7682_v15  ;;  %v15305_v3 = vpop.f32.mrf.mxu0  ;;  %v7098_v8 = vadd.f32 %v15259_v31, %v6640_v34  ;;  %v15334_v31 = vld [vmem:[%s15504_s10] ss:$0 sm:$0xff] }
 0xcc5   :  { %8320 = vst.msk [vmem:[%s15505_s12 + $0x148] sm:$0xff] %vm8278_vm9, %v8255_v52  ;;  %v7459_v46 = vpop.f32.mrf.mxu3  ;;  %v7097_v52 = vadd.f32 %v15233_v41, %v6639_v13 }
 0xcc6   :  { %v9776_v63 = vpop.eup %9775  ;;  %v7854_v14 = vmul.f32 1.442695, %v7746_v6  ;;  %v7552_v33 = vadd.f32 %v7459_v46, %v7094_v37 }
 0xcc7   :  { %v9778_v56 = vpop.eup %9777  ;;  %v7937_v36 = vadd.f32 1.0, %v9776_v63 }
 0xcc8   :  { %v8064_v25 = vmul.f32 %v9778_v56, %v9772_v18  ;;  %9779 = vpow2.f32 %v7854_v14  ;;  %v15265_v23 = vadd.f32 %v14943_v5, %v7552_v33  ;;  %v15296_v58 = vpop.f32.mrf.mxu1 }
 0xcc9   :  { %9781 = vrcp.f32 %v7937_v36  ;;  %v15321_v17 = vpop.f32.mrf.mxu2 }
 0xcca   :  { %v8192_v30 = vsub.f32 1.0, %v8064_v25  ;;  %v7683_v9 = vand.u32 2147483647, %v15265_v23  ;;  %9450 = vmatmul.msk.bf16.gmra.mxu3 %vm618_vm1, %v7208_v45  ;;  %vm8129_vm1 = vcmp.ge.f32.partialorder %v15226_v24, 0.0  ;;  %vm8131_vm12 = vcmp.ge.f32.partialorder %v15265_v23, 0.0 }
 0xccc   :  { %v8256_v40 = vsel %vm8128_vm10, %v8192_v30, %v8064_v25  ;;  %v7747_v2 = vsub.f32 0.0, %v7683_v9  ;;  %v16378_v25 = vld [vmem:[#allocation117_spill] sm:$0xff]  ;;  %v6104_v42 = vpop.f32.mrf.mxu0 }
 0xccd   :  { %8321 = vst.msk [vmem:[%s15505_s12 + $0x150] sm:$0xff] %vm8278_vm9, %v8256_v40  ;;  %v7462_v57 = vpop.f32.mrf.mxu3  ;;  %v6182_v30 = vadd.f32 %v15261_v60, %v16378_v25 }
 0xcce   :  { %v9780_v21 = vpop.eup %9779  ;;  %v7856_v4 = vmul.f32 1.442695, %v7747_v2  ;;  %v7553_v0 = vadd.f32 %v7462_v57, %v7095_v50 }
 0xccf   :  { %v9782_v54 = vpop.eup %9781  ;;  %v7938_v51 = vadd.f32 1.0, %v9780_v21 }
 0xcd0   :  { %v8065_v62 = vmul.f32 %v9782_v54, %v9776_v63  ;;  %9783 = vpow2.f32 %v7856_v4  ;;  %v15283_v19 = vadd.f32 %v14943_v5, %v7553_v0  ;;  %v6561_v56 = vpop.f32.mrf.mxu1 }
 0xcd1   :  { %9785 = vrcp.f32 %v7938_v51 }
 0xcd2   :  { %v8193_v53 = vsub.f32 1.0, %v8065_v62  ;;  %v7684_v47 = vand.u32 2147483647, %v15283_v19  ;;  %vm8132_vm13 = vcmp.ge.f32.partialorder %v15283_v19, 0.0 }
 0xcd4   :  { %v8257_v11 = vsel %vm8129_vm1, %v8193_v53, %v8065_v62  ;;  %v7748_v35 = vsub.f32 0.0, %v7684_v47 }
 0xcd5   :  { %8322 = vst.msk [vmem:[%s15505_s12 + $0x158] sm:$0xff] %vm8278_vm9, %v8257_v11  ;;  %v7464_v29 = vpop.f32.mrf.mxu3  ;;  %v7021_v11 = vpop.f32.mrf.mxu2 }
 0xcd6   :  { %v9784_v18 = vpop.eup %9783  ;;  %v7858_v12 = vmul.f32 1.442695, %v7748_v35  ;;  %v7554_v26 = vadd.f32 %v7464_v29, %v7096_v55 }
 0xcd7   :  { %v9786_v38 = vpop.eup %9785  ;;  %v7939_v24 = vadd.f32 1.0, %v9784_v18 }
 0xcd8   :  { %v8066_v49 = vmul.f32 %v9786_v38, %v9780_v21  ;;  %9787 = vpow2.f32 %v7858_v12  ;;  %v15300_v27 = vadd.f32 %v14943_v5, %v7554_v26  ;;  %v6641_v21 = vadd.f32 %v15273_v16, %v6182_v30  ;;  %v6563_v51 = vpop.f32.mrf.mxu1 }
 0xcd9   :  { %9789 = vrcp.f32 %v7939_v24  ;;  %v6183_v16 = vadd.f32 %v15285_v44, %v16379_v39  ;;  %v16380_v24 = vld [vmem:[#allocation123_spill] sm:$0xff] }
 0xcda   :  { %v8194_v28 = vsub.f32 1.0, %v8066_v49  ;;  %v7685_v15 = vand.u32 2147483647, %v15300_v27  ;;  %v7099_v47 = vadd.f32 %v15279_v1, %v6641_v21  ;;  %vm8133_vm14 = vcmp.ge.f32.partialorder %v15300_v27, 0.0 }
 0xcdb   :  { %v6642_v12 = vadd.f32 %v15296_v58, %v6183_v16  ;;  %v6184_v13 = vadd.f32 %v15305_v3, %v16380_v24 }
 0xcdc   :  { %v8258_v7 = vsel %vm8130_vm11, %v8194_v28, %v8066_v49  ;;  %v7749_v32 = vsub.f32 0.0, %v7685_v15 }
 0xcdd   :  { %8323 = vst.msk [vmem:[%s15505_s12 + $0x160] sm:$0xff] %vm8278_vm9, %v8258_v7  ;;  %v7467_v6 = vpop.f32.mrf.mxu3  ;;  %v7100_v15 = vadd.f32 %v15302_v43, %v6642_v12  ;;  %v7024_v27 = vpop.f32.mrf.mxu2 }
 0xcde   :  { %v9788_v37 = vpop.eup %9787  ;;  %v7860_v46 = vmul.f32 1.442695, %v7749_v32  ;;  %v7555_v63 = vadd.f32 %v7467_v6, %v7097_v52 }
 0xcdf   :  { %v9790_v14 = vpop.eup %9789  ;;  %v7940_v33 = vadd.f32 1.0, %v9788_v37 }
 0xce0   :  { %v8067_v45 = vmul.f32 %v9790_v14, %v9784_v18  ;;  %9791 = vpow2.f32 %v7860_v46  ;;  %v15317_v48 = vadd.f32 %v14943_v5, %v7555_v63  ;;  %v6107_v18 = vpop.f32.mrf.mxu0  ;;  %v6566_v10 = vpop.f32.mrf.mxu1 }
 0xce1   :  { %9793 = vrcp.f32 %v7940_v33  ;;  %v16381_v33 = vld [vmem:[#allocation66_spill] sm:$0xff] }
 0xce2   :  { %v8195_v41 = vsub.f32 1.0, %v8067_v45  ;;  %v7686_v36 = vand.u32 2147483647, %v15317_v48  ;;  %vm8134_vm15 = vcmp.ge.f32.partialorder %v15317_v48, 0.0  ;;  %v6185_v34 = vadd.f32 %v6104_v42, %v16381_v33 }
 0xce4   :  { %v8259_v9 = vsel %vm8131_vm12, %v8195_v41, %v8067_v45  ;;  %v7750_v20 = vsub.f32 0.0, %v7686_v36 }
 0xce5   :  { %8324 = vst.msk [vmem:[%s15505_s12 + $0x168] sm:$0xff] %vm8278_vm9, %v8259_v9  ;;  %v7469_v5 = vpop.f32.mrf.mxu3 }
 0xce6   :  { %v9792_v40 = vpop.eup %9791  ;;  %v7862_v2 = vmul.f32 1.442695, %v7750_v20  ;;  %v7556_v50 = vadd.f32 %v7469_v5, %v7098_v8 }
 0xce7   :  { %v9794_v23 = vpop.eup %9793  ;;  %v7941_v57 = vadd.f32 1.0, %v9792_v40 }
 0xce8   :  { %v8068_v4 = vmul.f32 %v9794_v23, %v9788_v37  ;;  %9795 = vpow2.f32 %v7862_v2  ;;  %v15337_v60 = vadd.f32 %v15334_v31, %v7556_v50  ;;  %v6643_v37 = vadd.f32 %v6561_v56, %v6184_v13  ;;  %v6109_v43 = vpop.f32.mrf.mxu0  ;;  %v6568_v8 = vpop.f32.mrf.mxu1 }
 0xce9   :  { %9797 = vrcp.f32 %v7941_v57  ;;  %v16382_v57 = vld [vmem:[#allocation70_spill] sm:$0xff] }
 0xcea   :  { %v8196_v0 = vsub.f32 1.0, %v8068_v4  ;;  %v7687_v54 = vand.u32 2147483647, %v15337_v60  ;;  %v7101_v36 = vadd.f32 %v15321_v17, %v6643_v37  ;;  %v7026_v17 = vpop.f32.mrf.mxu2  ;;  %vm8135_vm0 = vcmp.ge.f32.partialorder %v15337_v60, 0.0 }
 0xceb   :  { %v6186_v21 = vadd.f32 %v6107_v18, %v16382_v57  ;;  %v16383_v18 = vld [vmem:[#allocation135_spill] sm:$0xff] }
 0xcec   :  { %v8260_v62 = vsel %vm8132_vm13, %v8196_v0, %v8068_v4  ;;  %v7751_v53 = vsub.f32 0.0, %v7687_v54 }
 0xced   :  { %8325 = vst.msk [vmem:[%s15505_s12 + $0x170] sm:$0xff] %vm8278_vm9, %v8260_v62  ;;  %v7472_v59 = vpop.f32.mrf.mxu3 }
 0xcee   :  { %v9796_v61 = vpop.eup %9795  ;;  %v7864_v35 = vmul.f32 1.442695, %v7751_v53  ;;  %v7557_v55 = vadd.f32 %v7472_v59, %v7099_v47  ;;  %v6645_v59 = vadd.f32 %v6566_v10, %v6186_v21 }
 0xcef   :  { %v9798_v29 = vpop.eup %9797  ;;  %v7942_v19 = vadd.f32 1.0, %v9796_v61 }
 0xcf0   :  { %v8069_v44 = vmul.f32 %v9798_v29, %v9792_v40  ;;  %9799 = vpow2.f32 %v7864_v35  ;;  %v15350_v26 = vadd.f32 %v15334_v31, %v7557_v55  ;;  %v6644_v40 = vadd.f32 %v6563_v51, %v6185_v34  ;;  %v6112_v23 = vpop.f32.mrf.mxu0  ;;  %v6571_v35 = vpop.f32.mrf.mxu1 }
 0xcf1   :  { %9801 = vrcp.f32 %v7942_v19  ;;  %v6187_v19 = vadd.f32 %v6109_v43, %v16383_v18 }
 0xcf2   :  { %v8197_v1 = vsub.f32 1.0, %v8069_v44  ;;  %v7688_v38 = vand.u32 2147483647, %v15350_v26  ;;  %v7102_v54 = vadd.f32 %v7021_v11, %v6644_v40  ;;  %vm8136_vm2 = vcmp.ge.f32.partialorder %v15350_v26, 0.0  ;;  %v7029_v29 = vpop.f32.mrf.mxu2 }
 0xcf4   :  { %v8261_v49 = vsel %vm8133_vm14, %v8197_v1, %v8069_v44  ;;  %v7752_v28 = vsub.f32 0.0, %v7688_v38  ;;  %v7103_v1 = vadd.f32 %v7024_v27, %v6645_v59 }
 0xcf5   :  { %8326 = vst.msk [vmem:[%s15505_s12 + $0x178] sm:$0xff] %vm8278_vm9, %v8261_v49  ;;  %v7474_v58 = vpop.f32.mrf.mxu3 }
 0xcf6   :  { %v9800_v22 = vpop.eup %9799  ;;  %v7866_v7 = vmul.f32 1.442695, %v7752_v28  ;;  %v7558_v32 = vadd.f32 %v7474_v58, %v7100_v15  ;;  %v6646_v58 = vadd.f32 %v6568_v8, %v6187_v19  ;;  %v16385_v8 = vld [vmem:[#allocation139_spill] sm:$0xff] }
 0xcf7   :  { %v9802_v52 = vpop.eup %9801  ;;  %v7943_v6 = vadd.f32 1.0, %v9800_v22 }
 0xcf8   :  { %v8070_v46 = vmul.f32 %v9802_v52, %v9796_v61  ;;  %9803 = vpow2.f32 %v7866_v7  ;;  %v15362_v3 = vadd.f32 %v15334_v31, %v7558_v32  ;;  %v6114_v38 = vpop.f32.mrf.mxu0  ;;  %v6573_v52 = vpop.f32.mrf.mxu1  ;;  %v7104_v43 = vadd.f32 %v7026_v17, %v6646_v58 }
 0xcf9   :  { %9805 = vrcp.f32 %v7943_v6  ;;  %v16384_v6 = vld [vmem:[#allocation137_spill] sm:$0xff] }
 0xcfa   :  { %v8198_v63 = vsub.f32 1.0, %v8070_v46  ;;  %v7689_v14 = vand.u32 2147483647, %v15362_v3  ;;  %vm8137_vm3 = vcmp.ge.f32.partialorder %v15362_v3, 0.0  ;;  %v6188_v27 = vadd.f32 %v6112_v23, %v16384_v6  ;;  %v7031_v33 = vpop.f32.mrf.mxu2 }
 0xcfc   :  { %v8262_v45 = vsel %vm8134_vm15, %v8198_v63, %v8070_v46  ;;  %v7753_v41 = vsub.f32 0.0, %v7689_v14 }
 0xcfd   :  { %8327 = vst.msk [vmem:[%s15505_s12 + $0x180] sm:$0xff] %vm8278_vm9, %v8262_v45  ;;  %v7477_v56 = vpop.f32.mrf.mxu3 }
 0xcfe   :  { %v9804_v25 = vpop.eup %9803  ;;  %v7868_v30 = vmul.f32 1.442695, %v7753_v41  ;;  %v7559_v9 = vadd.f32 %v7477_v56, %v7101_v36 }
 0xcff   :  { %v9806_v20 = vpop.eup %9805  ;;  %v7944_v5 = vadd.f32 1.0, %v9804_v25 }
 0xd00   :  { %v8071_v48 = vmul.f32 %v9806_v20, %v9800_v22  ;;  %9807 = vpow2.f32 %v7868_v30  ;;  %v15373_v42 = vadd.f32 %v15334_v31, %v7559_v9  ;;  %v6117_v36 = vpop.f32.mrf.mxu0 }
 0xd01   :  { %9809 = vrcp.f32 %v7944_v5  ;;  %v6189_v5 = vadd.f32 %v6114_v38, %v16385_v8 }
 0xd02   :  { %v8199_v2 = vsub.f32 1.0, %v8071_v48  ;;  %v7690_v50 = vand.u32 2147483647, %v15373_v42  ;;  %vm8138_vm4 = vcmp.ge.f32.partialorder %v15373_v42, 0.0 }
 0xd04   :  { %v8263_v4 = vsel %vm8135_vm0, %v8199_v2, %v8071_v48  ;;  %v7754_v0 = vsub.f32 0.0, %v7690_v50  ;;  %v6576_v2 = vpop.f32.mrf.mxu1 }
 0xd05   :  { %8328 = vst.msk [vmem:[%s15505_s12 + $0x188] sm:$0xff] %vm8278_vm9, %v8263_v4  ;;  %v7479_v51 = vpop.f32.mrf.mxu3 }
 0xd06   :  { %v9808_v39 = vpop.eup %9807  ;;  %v7870_v16 = vmul.f32 1.442695, %v7754_v0  ;;  %v7560_v62 = vadd.f32 %v7479_v51, %v7102_v54  ;;  %v7034_v54 = vpop.f32.mrf.mxu2  ;;  %v6648_v51 = vadd.f32 %v6573_v52, %v6189_v5 }
 0xd07   :  { %v9810_v53 = vpop.eup %9809  ;;  %v7945_v47 = vadd.f32 1.0, %v9808_v39 }
 0xd08   :  { %v8072_v61 = vmul.f32 %v9810_v53, %v9804_v25  ;;  %9811 = vpow2.f32 %v7870_v16  ;;  %v15383_v60 = vadd.f32 %v15334_v31, %v7560_v62  ;;  %v6647_v25 = vadd.f32 %v6571_v35, %v6188_v27  ;;  %v6119_v16 = vpop.f32.mrf.mxu0 }
 0xd09   :  { %9813 = vrcp.f32 %v7945_v47  ;;  %v16386_v47 = vld [vmem:[#allocation82_spill] sm:$0xff] }
 0xd0a   :  { %v8200_v11 = vsub.f32 1.0, %v8072_v61  ;;  %v7691_v55 = vand.u32 2147483647, %v15383_v60  ;;  %v7105_v17 = vadd.f32 %v7029_v29, %v6647_v25  ;;  %vm8139_vm5 = vcmp.ge.f32.partialorder %v15383_v60, 0.0 }
 0xd0b   :  { %v6190_v59 = vadd.f32 %v6117_v36, %v16386_v47  ;;  %v16388_v36 = vld [vmem:[#allocation90_spill] sm:$0xff] }
 0xd0c   :  { %v8264_v12 = vsel %vm8136_vm2, %v8200_v11, %v8072_v61  ;;  %v7755_v44 = vsub.f32 0.0, %v7691_v55  ;;  %v7106_v11 = vadd.f32 %v7031_v33, %v6648_v51 }
 0xd0d   :  { %8329 = vst.msk [vmem:[%s15505_s12 + $0x190] sm:$0xff] %vm8278_vm9, %v8264_v12  ;;  %v7482_v24 = vpop.f32.mrf.mxu3  ;;  %v6649_v38 = vadd.f32 %v6576_v2, %v6190_v59 }
 0xd0e   :  { %v9812_v13 = vpop.eup %9811  ;;  %v7872_v49 = vmul.f32 1.442695, %v7755_v44  ;;  %v7561_v28 = vadd.f32 %v7482_v24, %v7103_v1  ;;  %v6578_v44 = vpop.f32.mrf.mxu1 }
 0xd0f   :  { %v9814_v15 = vpop.eup %9813  ;;  %v7946_v10 = vadd.f32 1.0, %v9812_v13 }
 0xd10   :  { %v8073_v26 = vmul.f32 %v9814_v15, %v9808_v39  ;;  %9815 = vpow2.f32 %v7872_v49  ;;  %v15393_v22 = vadd.f32 %v15334_v31, %v7561_v28  ;;  %v6122_v15 = vpop.f32.mrf.mxu0 }
 0xd11   :  { %9817 = vrcp.f32 %v7946_v10  ;;  %v16387_v10 = vld [vmem:[#allocation86_spill] sm:$0xff] }
 0xd12   :  { %v8201_v7 = vsub.f32 1.0, %v8073_v26  ;;  %v7692_v32 = vand.u32 2147483647, %v15393_v22  ;;  %vm8140_vm6 = vcmp.ge.f32.partialorder %v15393_v22, 0.0  ;;  %v6191_v58 = vadd.f32 %v6119_v16, %v16387_v10 }
 0xd14   :  { %v8265_v37 = vsel %vm8137_vm3, %v8201_v7, %v8073_v26  ;;  %v7756_v46 = vsub.f32 0.0, %v7692_v32  ;;  %v7107_v32 = vadd.f32 %v7034_v54, %v6649_v38 }
 0xd15   :  { %8330 = vst.msk [vmem:[%s15505_s12 + $0x198] sm:$0xff] %vm8278_vm9, %v8265_v37  ;;  %v7484_v63 = vpop.f32.mrf.mxu3 }
 0xd16   :  { %v9816_v14 = vpop.eup %9815  ;;  %v7874_v34 = vmul.f32 1.442695, %v7756_v46  ;;  %v7562_v45 = vadd.f32 %v7484_v63, %v7104_v43  ;;  %v6650_v63 = vadd.f32 %v6578_v44, %v6191_v58  ;;  %v6581_v33 = vpop.f32.mrf.mxu1 }
 0xd17   :  { %v9818_v41 = vpop.eup %9817  ;;  %v7947_v56 = vadd.f32 1.0, %v9816_v14 }
 0xd18   :  { %v8074_v3 = vmul.f32 %v9818_v41, %v9812_v13  ;;  %9819 = vpow2.f32 %v7874_v34  ;;  %v15403_v30 = vadd.f32 %v15334_v31, %v7562_v45  ;;  %v7036_v13 = vpop.f32.mrf.mxu2 }
 0xd19   :  { %9821 = vrcp.f32 %v7947_v56  ;;  %v6192_v56 = vadd.f32 %v6122_v15, %v16388_v36 }
 0xd1a   :  { %v8202_v9 = vsub.f32 1.0, %v8074_v3  ;;  %v7693_v20 = vand.u32 2147483647, %v15403_v30  ;;  %vm8141_vm7 = vcmp.ge.f32.partialorder %v15403_v30, 0.0 }
 0xd1c   :  { %v8266_v40 = vsel %vm8138_vm4, %v8202_v9, %v8074_v3  ;;  %v7757_v48 = vsub.f32 0.0, %v7693_v20  ;;  %v7108_v9 = vadd.f32 %v7036_v13, %v6650_v63  ;;  %v6124_v20 = vpop.f32.mrf.mxu0  ;;  %v16391_v63 = vld [vmem:[#allocation94_spill] sm:$0xff] }
 0xd1d   :  { %8331 = vst.msk [vmem:[%s15505_s12 + $0x1a0] sm:$0xff] %vm8278_vm9, %v8266_v40  ;;  %v7487_v50 = vpop.f32.mrf.mxu3 }
 0xd1e   :  { %v9820_v23 = vpop.eup %9819  ;;  %v7876_v57 = vmul.f32 1.442695, %v7757_v48  ;;  %v7563_v21 = vadd.f32 %v7487_v50, %v7105_v17  ;;  %v6651_v50 = vadd.f32 %v6581_v33, %v6192_v56 }
 0xd1f   :  { %v9822_v4 = vpop.eup %9821  ;;  %v7948_v0 = vadd.f32 1.0, %v9820_v23 }
 0xd20   :  { %v8075_v42 = vmul.f32 %v9822_v4, %v9816_v14  ;;  %9823 = vpow2.f32 %v7876_v57  ;;  %v15413_v39 = vadd.f32 %v15334_v31, %v7563_v21  ;;  %v7039_v41 = vpop.f32.mrf.mxu2  ;;  %v6583_v4 = vpop.f32.mrf.mxu1 }
 0xd21   :  { %9825 = vrcp.f32 %v7948_v0  ;;  %v16389_v0 = vld [vmem:[#allocation151_spill] sm:$0xff]  ;;  %v7109_v16 = vadd.f32 %v7039_v41, %v6651_v50 }
 0xd22   :  { %v8203_v62 = vsub.f32 1.0, %v8075_v42  ;;  %v7694_v53 = vand.u32 2147483647, %v15413_v39  ;;  %vm8142_vm8 = vcmp.ge.f32.partialorder %v15413_v39, 0.0  ;;  %v6193_v54 = vadd.f32 %v6124_v20, %v16389_v0 }
 0xd24   :  { %v8267_v61 = vsel %vm8139_vm5, %v8203_v62, %v8075_v42  ;;  %v7758_v35 = vsub.f32 0.0, %v7694_v53 }
 0xd25   :  { %8332 = vst.msk [vmem:[%s15505_s12 + $0x1a8] sm:$0xff] %vm8278_vm9, %v8267_v61  ;;  %v7489_v55 = vpop.f32.mrf.mxu3 }
 0xd26   :  { %v9824_v29 = vpop.eup %9823  ;;  %v7878_v18 = vmul.f32 1.442695, %v7758_v35  ;;  %v7564_v19 = vadd.f32 %v7489_v55, %v7106_v11  ;;  %v6127_v11 = vpop.f32.mrf.mxu0 }
 0xd27   :  { %v9826_v12 = vpop.eup %9825  ;;  %v7949_v1 = vadd.f32 1.0, %v9824_v29 }
 0xd28   :  { %v8076_v24 = vmul.f32 %v9826_v12, %v9820_v23  ;;  %9827 = vpow2.f32 %v7878_v18  ;;  %v15423_v60 = vadd.f32 %v15334_v31, %v7564_v19  ;;  %v7041_v35 = vpop.f32.mrf.mxu2  ;;  %v6586_v44 = vpop.f32.mrf.mxu1 }
 0xd29   :  { %9829 = vrcp.f32 %v7949_v1  ;;  %v16390_v1 = vld [vmem:[#allocation153_spill] sm:$0xff] }
 0xd2a   :  { %v8204_v49 = vsub.f32 1.0, %v8076_v24  ;;  %v7695_v28 = vand.u32 2147483647, %v15423_v60  ;;  %vm8143_vm10 = vcmp.ge.f32.partialorder %v15423_v60, 0.0  ;;  %v6194_v38 = vadd.f32 %v6127_v11, %v16390_v1 }
 0xd2c   :  { %v8268_v26 = vsel %vm8140_vm6, %v8204_v49, %v8076_v24  ;;  %v7759_v7 = vsub.f32 0.0, %v7695_v28 }
 0xd2d   :  { %8333 = vst.msk [vmem:[%s15505_s12 + $0x1b0] sm:$0xff] %vm8278_vm9, %v8268_v26  ;;  %v7492_v52 = vpop.f32.mrf.mxu3 }
 0xd2e   :  { %v9828_v6 = vpop.eup %9827  ;;  %v7880_v27 = vmul.f32 1.442695, %v7759_v7  ;;  %v7565_v37 = vadd.f32 %v7492_v52, %v7107_v32  ;;  %v6653_v52 = vadd.f32 %v6586_v44, %v6194_v38 }
 0xd2f   :  { %v9830_v46 = vpop.eup %9829  ;;  %v7950_v43 = vadd.f32 1.0, %v9828_v6 }
 0xd30   :  { %v8077_v14 = vmul.f32 %v9830_v46, %v9824_v29  ;;  %9831 = vpow2.f32 %v7880_v27  ;;  %v15433_v22 = vadd.f32 %v15334_v31, %v7565_v37  ;;  %v6652_v29 = vadd.f32 %v6583_v4, %v6193_v54  ;;  %v7044_v7 = vpop.f32.mrf.mxu2  ;;  %v6129_v27 = vpop.f32.mrf.mxu0 }
 0xd31   :  { %9833 = vrcp.f32 %v7950_v43  ;;  %v7111_v43 = vadd.f32 %v7044_v7, %v6653_v52 }
 0xd32   :  { %v8205_v34 = vsub.f32 1.0, %v8077_v14  ;;  %v7696_v45 = vand.u32 2147483647, %v15433_v22  ;;  %v7110_v49 = vadd.f32 %v7041_v35, %v6652_v29  ;;  %vm8144_vm1 = vcmp.ge.f32.partialorder %v15433_v22, 0.0 }
 0xd34   :  { %v8269_v25 = vsel %vm8141_vm7, %v8205_v34, %v8077_v14  ;;  %v7760_v3 = vsub.f32 0.0, %v7696_v45  ;;  %v6195_v14 = vadd.f32 %v6129_v27, %v16391_v63  ;;  %v6588_v45 = vpop.f32.mrf.mxu1 }
 0xd35   :  { %8334 = vst.msk [vmem:[%s15505_s12 + $0x1b8] sm:$0xff] %vm8278_vm9, %v8269_v25  ;;  %v7494_v8 = vpop.f32.mrf.mxu3 }
 0xd36   :  { %v9832_v5 = vpop.eup %9831  ;;  %v7882_v40 = vmul.f32 1.442695, %v7760_v3  ;;  %v7566_v48 = vadd.f32 %v7494_v8, %v7108_v9  ;;  %v6654_v20 = vadd.f32 %v6588_v45, %v6195_v14 }
 0xd37   :  { %v9834_v17 = vpop.eup %9833  ;;  %v7951_v2 = vadd.f32 1.0, %v9832_v5 }
 0xd38   :  { %v8078_v30 = vmul.f32 %v9834_v17, %v9828_v6  ;;  %9835 = vpow2.f32 %v7882_v40  ;;  %v15443_v23 = vadd.f32 %v15334_v31, %v7566_v48 }
 0xd39   :  { %9837 = vrcp.f32 %v7951_v2 }
 0xd3a   :  { %v8206_v57 = vsub.f32 1.0, %v8078_v30  ;;  %v7697_v21 = vand.u32 2147483647, %v15443_v23  ;;  %vm8145_vm11 = vcmp.ge.f32.partialorder %v15443_v23, 0.0 }
 0xd3c   :  { %v8270_v51 = vsel %vm8142_vm8, %v8206_v57, %v8078_v30  ;;  %v7761_v42 = vsub.f32 0.0, %v7697_v21 }
 0xd3d   :  { %8335 = vst.msk [vmem:[%s15505_s12 + $0x1c0] sm:$0xff] %vm8278_vm9, %v8270_v51  ;;  %v7497_v62 = vpop.f32.mrf.mxu3 }
 0xd3e   :  { %v9836_v53 = vpop.eup %9835  ;;  %v7884_v47 = vmul.f32 1.442695, %v7761_v42  ;;  %v7567_v59 = vadd.f32 %v7497_v62, %v7109_v16 }
 0xd3f   :  { %v9838_v61 = vpop.eup %9837  ;;  %v7952_v55 = vadd.f32 1.0, %v9836_v53 }
 0xd40   :  { %v8079_v39 = vmul.f32 %v9838_v61, %v9832_v5  ;;  %9839 = vpow2.f32 %v7884_v47  ;;  %v15453_v18 = vadd.f32 %v15334_v31, %v7567_v59  ;;  %v7046_v5 = vpop.f32.mrf.mxu2 }
 0xd41   :  { %9841 = vrcp.f32 %v7952_v55  ;;  %v7112_v17 = vadd.f32 %v7046_v5, %v6654_v20 }
 0xd42   :  { %v8207_v19 = vsub.f32 1.0, %v8079_v39  ;;  %v7698_v12 = vand.u32 2147483647, %v15453_v18  ;;  %vm8146_vm12 = vcmp.ge.f32.partialorder %v15453_v18, 0.0 }
 0xd44   :  { %v8271_v24 = vsel %vm8143_vm10, %v8207_v19, %v8079_v39  ;;  %v7762_v13 = vsub.f32 0.0, %v7698_v12 }
 0xd45   :  { %8336 = vst.msk [vmem:[%s15505_s12 + $0x1c8] sm:$0xff] %vm8278_vm9, %v8271_v24  ;;  %v7499_v28 = vpop.f32.mrf.mxu3 }
 0xd46   :  { %v9840_v15 = vpop.eup %9839  ;;  %v7886_v10 = vmul.f32 1.442695, %v7762_v13  ;;  %v7568_v58 = vadd.f32 %v7499_v28, %v7110_v49 }
 0xd47   :  { %v9842_v26 = vpop.eup %9841  ;;  %v7953_v32 = vadd.f32 1.0, %v9840_v15 }
 0xd48   :  { %v8080_v6 = vmul.f32 %v9842_v26, %v9836_v53  ;;  %9843 = vpow2.f32 %v7886_v10  ;;  %v7635_v60 = vadd.f32 %v15334_v31, %v7568_v58 }
 0xd49   :  { %9845 = vrcp.f32 %v7953_v32 }
 0xd4a   :  { %v8208_v37 = vsub.f32 1.0, %v8080_v6  ;;  %v7699_v46 = vand.u32 2147483647, %v7635_v60  ;;  %vm8147_vm13 = vcmp.ge.f32.partialorder %v7635_v60, 0.0 }
 0xd4c   :  { %v8272_v33 = vsel %vm8144_vm1, %v8208_v37, %v8080_v6  ;;  %v7763_v34 = vsub.f32 0.0, %v7699_v46 }
 0xd4d   :  { %8337 = vst.msk [vmem:[%s15505_s12 + $0x1d0] sm:$0xff] %vm8278_vm9, %v8272_v33  ;;  %v7502_v41 = vpop.f32.mrf.mxu3 }
 0xd4e   :  { %v9844_v36 = vpop.eup %9843  ;;  %v7888_v56 = vmul.f32 1.442695, %v7763_v34  ;;  %v7569_v25 = vadd.f32 %v7502_v41, %v7111_v43 }
 0xd4f   :  { %v9846_v3 = vpop.eup %9845  ;;  %v7954_v9 = vadd.f32 1.0, %v9844_v36 }
 0xd50   :  { %v8081_v8 = vmul.f32 %v9846_v3, %v9840_v15  ;;  %9847 = vpow2.f32 %v7888_v56  ;;  %v7636_v22 = vadd.f32 %v15334_v31, %v7569_v25 }
 0xd51   :  { %9849 = vrcp.f32 %v7954_v9 }
 0xd52   :  { %v8209_v40 = vsub.f32 1.0, %v8081_v8  ;;  %v7700_v48 = vand.u32 2147483647, %v7636_v22  ;;  %vm8148_vm14 = vcmp.ge.f32.partialorder %v7636_v22, 0.0 }
 0xd54   :  { %v8273_v2 = vsel %vm8145_vm11, %v8209_v40, %v8081_v8  ;;  %v7764_v50 = vsub.f32 0.0, %v7700_v48 }
 0xd55   :  { %8338 = vst.msk [vmem:[%s15505_s12 + $0x1d8] sm:$0xff] %vm8278_vm9, %v8273_v2  ;;  %v7504_v30 = vpop.f32.mrf.mxu3 }
 0xd56   :  { %v9848_v57 = vpop.eup %9847  ;;  %v7890_v21 = vmul.f32 1.442695, %v7764_v50  ;;  %v7570_v4 = vadd.f32 %v7504_v30, %v7112_v17 }
 0xd57   :  { %v9850_v0 = vpop.eup %9849  ;;  %v7955_v54 = vadd.f32 1.0, %v9848_v57 }
 0xd58   :  { %v8082_v51 = vmul.f32 %v9850_v0, %v9844_v36  ;;  %9851 = vpow2.f32 %v7890_v21  ;;  %v7637_v42 = vadd.f32 %v15334_v31, %v7570_v4 }
 0xd59   :  { %9853 = vrcp.f32 %v7955_v54 }
 0xd5a   :  { %v8210_v23 = vsub.f32 1.0, %v8082_v51  ;;  %v7701_v16 = vand.u32 2147483647, %v7637_v42  ;;  %vm8149_vm15 = vcmp.ge.f32.partialorder %v7637_v42, 0.0 }
 0xd5c   :  { %v8274_v62 = vsel %vm8146_vm12, %v8210_v23, %v8082_v51  ;;  %v7765_v53 = vsub.f32 0.0, %v7701_v16 }
 0xd5d   :  { %8339 = vst.msk [vmem:[%s15505_s12 + $0x1e0] sm:$0xff] %vm8278_vm9, %v8274_v62 }
 0xd5e   :  { %v9852_v47 = vpop.eup %9851  ;;  %v7892_v59 = vmul.f32 1.442695, %v7765_v53 }
 0xd5f   :  { %v9854_v61 = vpop.eup %9853  ;;  %v7956_v35 = vadd.f32 1.0, %v9852_v47 }
 0xd60   :  { %v8083_v11 = vmul.f32 %v9854_v61, %v9848_v57  ;;  %9855 = vpow2.f32 %v7892_v59 }
 0xd61   :  { %9857 = vrcp.f32 %v7956_v35 }
 0xd62   :  { %v8211_v31 = vsub.f32 1.0, %v8083_v11 }
 0xd64   :  { %v8275_v55 = vsel %vm8147_vm13, %v8211_v31, %v8083_v11 }
 0xd65   :  { %8340 = vst.msk [vmem:[%s15505_s12 + $0x1e8] sm:$0xff] %vm8278_vm9, %v8275_v55 }
 0xd66   :  { %v9856_v29 = vpop.eup %9855 }
 0xd67   :  { %v9858_v39 = vpop.eup %9857  ;;  %v7957_v18 = vadd.f32 1.0, %v9856_v29 }
 0xd68   :  { %v8084_v19 = vmul.f32 %v9858_v39, %v9852_v47 }
 0xd69   :  { %9859 = vrcp.f32 %v7957_v18 }
 0xd6a   :  { %v8212_v12 = vsub.f32 1.0, %v8084_v19 }
 0xd6c   :  { %v8276_v44 = vsel %vm8148_vm14, %v8212_v12, %v8084_v19 }
 0xd6d   :  { %8341 = vst.msk [vmem:[%s15505_s12 + $0x1f0] sm:$0xff] %vm8278_vm9, %v8276_v44 }
 0xd6f   :  { %v9860_v1 = vpop.eup %9859 }
 0xd70   :  { %v8085_v38 = vmul.f32 %v9860_v1, %v9856_v29 }
 0xd72   :  { %v8213_v24 = vsub.f32 1.0, %v8085_v38 }
 0xd74   :  { %v8277_v13 = vsel %vm8149_vm15, %v8213_v24, %v8085_v38 }
 0xd75   :  { %8342 = vst.msk [vmem:[%s15505_s12 + $0x1f8] sm:$0xff] %vm8278_vm9, %v8277_v13 }

</bundles_post_ra>
